<compile_context>
chip_gen: v7x
topology: tpu7x:2x2x1
jax: 0.10.0
libtpu: 0.0.40
codegen_flags: <defaults>
</compile_context>

<pallas_src>
import functools

import jax
import jax.numpy as jnp
from jax import lax
from jax.experimental import pallas as pl
from jax.experimental.pallas import tpu as pltpu

EPS = 1e-5  # BatchNorm eps (PyTorch default)


def _round_up(x, m):
    return (x + m - 1) // m * m


# ---------------------------------------------------------------------------
# Pallas kernels
# ---------------------------------------------------------------------------
def _linear_kernel(*refs, act, has_residual):
    """y = act(x @ w + b [+ residual]); w is input-major (K, N)."""
    if has_residual:
        x_ref, w_ref, b_ref, r_ref, o_ref = refs
    else:
        x_ref, w_ref, b_ref, o_ref = refs
    y = jnp.dot(x_ref[...], w_ref[...], preferred_element_type=jnp.float32)
    y = y + b_ref[...]
    if has_residual:
        y = y + r_ref[...]
    if act == "relu":
        y = jnp.maximum(y, 0.0)
    o_ref[...] = y.astype(o_ref.dtype)


def linear(x, w, b=None, *, act="none", residual=None, tile_m=512):
    """act(x @ w + b [+ residual]) via a row-tiled Pallas matmul.

    x: (M, K) f32, w: (K, N) f32 (input-major), b: (N,), residual: (M, N)."""
    M, K = x.shape
    N = w.shape[1]
    if b is None:
        b = jnp.zeros((N,), x.dtype)
    b2 = b.reshape(1, N)

    tm = min(tile_m, _round_up(M, 8))
    Mp = _round_up(M, tm)
    if Mp != M:
        x = jnp.pad(x, ((0, Mp - M), (0, 0)))
        if residual is not None:
            residual = jnp.pad(residual, ((0, Mp - M), (0, 0)))

    has_res = residual is not None
    kernel = functools.partial(_linear_kernel, act=act, has_residual=has_res)

    in_specs = [
        pl.BlockSpec((tm, K), lambda i: (i, 0)),
        pl.BlockSpec((K, N), lambda i: (0, 0)),
        pl.BlockSpec((1, N), lambda i: (0, 0)),
    ]
    args = [x, w, b2]
    if has_res:
        in_specs.append(pl.BlockSpec((tm, N), lambda i: (i, 0)))
        args.append(residual)

    out = pl.pallas_call(
        kernel,
        out_shape=jax.ShapeDtypeStruct((Mp, N), x.dtype),
        grid_spec=pltpu.PrefetchScalarGridSpec(
            num_scalar_prefetch=0,
            grid=(Mp // tm,),
            in_specs=in_specs,
            out_specs=pl.BlockSpec((tm, N), lambda i: (i, 0)),
        ),
        compiler_params=pltpu.CompilerParams(
            dimension_semantics=("parallel",)),
    )(*args)
    return out[:M] if Mp != M else out


def _dw3x3_se_kernel(xp_ref, wdw_ref, bdw_ref, w1_ref, w2_ref, o_ref, *, H, W, C):
    """Depthwise 3x3 conv (stride 1, pad 1, BN folded) + ReLU + squeeze-excite.

    xp_ref : (1, H+2, W+2, C)  spatially pre-padded input
    wdw_ref: (9, C)            depthwise taps (BN scale folded in)
    bdw_ref: (1, C)            folded BN shift
    w1_ref : (C, E), w2_ref: (E, C)   SE 1x1 convs (no bias)
    o_ref  : (1, H, W, C)      SE-gated output
    """
    acc = jnp.zeros((H, W, C), jnp.float32)
    for kh in range(3):
        for kw in range(3):
            tap = xp_ref[0, kh:kh + H, kw:kw + W, :]          # (H, W, C)
            wk = wdw_ref[3 * kh + kw:3 * kh + kw + 1, :]      # (1, C)
            acc = acc + tap * wk
    y = jnp.maximum(acc + bdw_ref[...], 0.0)                   # folded BN + ReLU

    # Squeeze-excite: global average pool -> fc -> relu -> fc -> hardsigmoid.
    pooled = jnp.sum(jnp.sum(y, axis=0), axis=0, keepdims=True) * (1.0 / (H * W))
    p8 = jnp.broadcast_to(pooled, (8, C))     # fill a full sublane tile for the MXU
    h1 = jnp.maximum(
        jnp.dot(p8, w1_ref[...], preferred_element_type=jnp.float32), 0.0)
    g = jnp.dot(h1, w2_ref[...], preferred_element_type=jnp.float32)
    g = jnp.minimum(jnp.maximum(g + 3.0, 0.0), 6.0) * (1.0 / 6.0)   # hardsigmoid
    gate = g[0:1, :]                                                 # (1, C)
    o_ref[0] = (y * gate).astype(o_ref.dtype)


def dwconv3x3_se(x, wdw, bdw, w_se1, w_se2):
    """x: (B, H, W, C) NHWC -> depthwise 3x3 + ReLU + SE gate, fused."""
    B, H, W, C = x.shape
    E = w_se1.shape[1]
    xp = jnp.pad(x, ((0, 0), (1, 1), (1, 1), (0, 0)))
    kernel = functools.partial(_dw3x3_se_kernel, H=H, W=W, C=C)
    return pl.pallas_call(
        kernel,
        out_shape=jax.ShapeDtypeStruct((B, H, W, C), x.dtype),
        grid_spec=pltpu.PrefetchScalarGridSpec(
            num_scalar_prefetch=0,
            grid=(B,),
            in_specs=[
                pl.BlockSpec((1, H + 2, W + 2, C), lambda b: (b, 0, 0, 0)),
                pl.BlockSpec((9, C), lambda b: (0, 0)),
                pl.BlockSpec((1, C), lambda b: (0, 0)),
                pl.BlockSpec((C, E), lambda b: (0, 0)),
                pl.BlockSpec((E, C), lambda b: (0, 0)),
            ],
            out_specs=pl.BlockSpec((1, H, W, C), lambda b: (b, 0, 0, 0)),
        ),
        compiler_params=pltpu.CompilerParams(
            dimension_semantics=("parallel",)),
    )(xp, wdw, bdw.reshape(1, C), w_se1, w_se2)


def _block_tail_kernel(g_ref, x_ref, w2_ref, b2_ref, w3_ref, b3_ref,
                       w4_ref, b4_ref, o_ref):
    """Fused SimpleInvertedResidual tail:
        x1  = x + g @ W2 + b2                 (pw2, BN folded, + residual)
        out = x1 + relu(x1 @ W3 + b3) @ W4 + b4   (FFN pw3/pw4 + residual)
    """
    x1 = x_ref[...] + jnp.dot(g_ref[...], w2_ref[...],
                              preferred_element_type=jnp.float32) + b2_ref[...]
    h = jnp.maximum(
        jnp.dot(x1, w3_ref[...], preferred_element_type=jnp.float32) + b3_ref[...],
        0.0)
    y = x1 + jnp.dot(h, w4_ref[...],
                     preferred_element_type=jnp.float32) + b4_ref[...]
    o_ref[...] = y.astype(o_ref.dtype)


def block_tail(g2d, x2d, p, *, tile_m=512):
    """g2d: (M, Cdw) gated dw output, x2d: (M, C) block input."""
    M, Cdw = g2d.shape
    C = x2d.shape[1]
    F = p["pw3_w"].shape[1]

    tm = min(tile_m, _round_up(M, 8))
    Mp = _round_up(M, tm)
    if Mp != M:
        g2d = jnp.pad(g2d, ((0, Mp - M), (0, 0)))
        x2d = jnp.pad(x2d, ((0, Mp - M), (0, 0)))

    out = pl.pallas_call(
        _block_tail_kernel,
        out_shape=jax.ShapeDtypeStruct((Mp, C), x2d.dtype),
        grid_spec=pltpu.PrefetchScalarGridSpec(
            num_scalar_prefetch=0,
            grid=(Mp // tm,),
            in_specs=[
                pl.BlockSpec((tm, Cdw), lambda i: (i, 0)),
                pl.BlockSpec((tm, C), lambda i: (i, 0)),
                pl.BlockSpec((Cdw, C), lambda i: (0, 0)),
                pl.BlockSpec((1, C), lambda i: (0, 0)),
                pl.BlockSpec((C, F), lambda i: (0, 0)),
                pl.BlockSpec((1, F), lambda i: (0, 0)),
                pl.BlockSpec((F, C), lambda i: (0, 0)),
                pl.BlockSpec((1, C), lambda i: (0, 0)),
            ],
            out_specs=pl.BlockSpec((tm, C), lambda i: (i, 0)),
        ),
        compiler_params=pltpu.CompilerParams(
            dimension_semantics=("parallel",)),
    )(g2d, x2d, p["pw2_w"], p["pw2_b"].reshape(1, C), p["pw3_w"],
      p["pw3_b"].reshape(1, F), p["pw4_w"], p["pw4_b"].reshape(1, C))
    return out[:M] if Mp != M else out


# ---------------------------------------------------------------------------
# Network building blocks (Pallas path) -- wrappers only do layout plumbing.
# ---------------------------------------------------------------------------
def conv3x3(x, w2, b, residual=None):
    """3x3 conv, stride 1, pad 1, via im2col + MXU matmul.

    x: (B, H, W, Cin), w2: (9*Cin, Cout) with (kh, kw, cin) row ordering."""
    B, H, W, Cin = x.shape
    Cout = w2.shape[1]
    xp = jnp.pad(x, ((0, 0), (1, 1), (1, 1), (0, 0)))
    cols = [xp[:, kh:kh + H, kw:kw + W, :] for kh in range(3) for kw in range(3)]
    patches = jnp.concatenate(cols, axis=-1).reshape(B * H * W, 9 * Cin)
    rf = None if residual is None else residual.reshape(B * H * W, Cout)
    y = linear(patches, w2, b, residual=rf)
    return y.reshape(B, H, W, Cout)


def downsample(x, w2, b):
    """2x2 stride-2 conv via space-to-depth + matmul.  w2: (4*Cin, Cout)."""
    B, H, W, C = x.shape
    Cout = w2.shape[1]
    xr = (x.reshape(B, H // 2, 2, W // 2, 2, C)
           .transpose(0, 1, 3, 2, 4, 5)
           .reshape(B * (H // 2) * (W // 2), 4 * C))
    y = linear(xr, w2, b)
    return y.reshape(B, H // 2, W // 2, Cout)


def _pixel_shuffle_nhwc(y, r=2):
    B, H, W, C = y.shape
    co = C // (r * r)
    y = y.reshape(B, H, W, co, r, r)
    y = y.transpose(0, 1, 4, 2, 5, 3)
    return y.reshape(B, H * r, W * r, co)


def upsample(x, w):
    """1x1 conv C -> 2C (no bias) + PixelShuffle(2)."""
    B, H, W, C = x.shape
    y = linear(x.reshape(B * H * W, C), w).reshape(B, H, W, w.shape[1])
    return _pixel_shuffle_nhwc(y, 2)


def block_forward(x, p):
    """SimpleInvertedResidual forward (BN folded), x: (B, H, W, C)."""
    B, H, W, C = x.shape
    M = B * H * W
    xf = x.reshape(M, C)
    h = linear(xf, p["pw1_w"], p["pw1_b"], act="relu")         # pw1 + BN + ReLU
    h = h.reshape(B, H, W, -1)
    g = dwconv3x3_se(h, p["dw_w"], p["dw_b"], p["se_w1"], p["se_w2"])
    y = block_tail(g.reshape(M, -1), xf, p)                    # pw2+res, FFN+res
    return y.reshape(B, H, W, C)


def reformer_forward_pallas(inp_nchw, fp, *, padder_size):
    x = jnp.transpose(inp_nchw, (0, 2, 3, 1)).astype(jnp.float32)   # NHWC
    B, H0, W0, _ = x.shape
    ph = (padder_size - H0 % padder_size) % padder_size
    pw = (padder_size - W0 % padder_size) % padder_size
    img = jnp.pad(x, ((0, 0), (0, ph), (0, pw), (0, 0)))

    h = conv3x3(img, fp["intro_w"], fp["intro_b"])
    encs = []
    for stage, down in zip(fp["encoders"], fp["downs"]):
        for blk in stage:
            h = block_forward(h, blk)
        encs.append(h)
        h = downsample(h, down["w"], down["b"])
    for blk in fp["middle"]:
        h = block_forward(h, blk)
    for up, stage, skip in zip(fp["ups"], fp["decoders"], encs[::-1]):
        h = upsample(h, up["w"]) + skip
        for blk in stage:
            h = block_forward(h, blk)
    out = conv3x3(h, fp["ending_w"], fp["ending_b"], residual=img)  # ending + inp_img
    out = out[:, :H0, :W0, :]
    return jnp.transpose(out, (0, 3, 1, 2))


# ---------------------------------------------------------------------------
# Parameters: raw (conv + BN stats) and host-side folding for the Pallas path.
# ---------------------------------------------------------------------------
class KeyGen:
    def __init__(self, key):
        self.key = key

    def __call__(self):
        self.key, sub = jax.random.split(self.key)
        return sub


def _make_bn(kg, c):
    return {
        "gamma": jax.random.uniform(kg(), (c,), jnp.float32, 0.8, 1.2),
        "beta": jax.random.uniform(kg(), (c,), jnp.float32, -0.1, 0.1),
        "mean": jax.random.uniform(kg(), (c,), jnp.float32, -0.1, 0.1),
        "var": jax.random.uniform(kg(), (c,), jnp.float32, 0.5, 1.5),
    }


def _make_block_params(kg, c):
    dw = 2 * c              # dw_expand = 2
    ffn = 2 * c             # SimpleInvertedResidual's ffn_ratio default = 2
    e = max(dw // 4, 8)     # SeModule expand_size

    def u(shape, fan_in):
        bound = (1.0 / fan_in) ** 0.5
        return jax.random.uniform(kg(), shape, jnp.float32, -bound, bound)

    return {
        "pw1_w": u((c, dw), c), "bn1": _make_bn(kg, dw),
        "dw_w": u((3, 3, dw), 9), "bn_dw": _make_bn(kg, dw),
        "se_w1": u((dw, e), dw), "se_w2": u((e, dw), e),
        "pw2_w": u((dw, c), dw), "bn2": _make_bn(kg, c),
        "pw3_w": u((c, ffn), c), "bn3": _make_bn(kg, ffn),
        "pw4_w": u((ffn, c), ffn), "bn4": _make_bn(kg, c),
    }


def build_params(key, inp_ch, width, enc_blk_nums, dec_blk_nums, middle_blk_num):
    kg = KeyGen(key)

    def u(shape, fan_in):
        bound = (1.0 / fan_in) ** 0.5
        return jax.random.uniform(kg(), shape, jnp.float32, -bound, bound)

    p = {
        "intro": {"w": u((3, 3, inp_ch, width), 9 * inp_ch),
                  "b": u((width,), 9 * inp_ch)},
        "ending": {"w": u((3, 3, width, inp_ch), 9 * width),
                   "b": u((inp_ch,), 9 * width)},
        "encoders": [], "downs": [], "middle": [], "ups": [], "decoders": [],
    }
    chan = width
    for num in enc_blk_nums:
        p["encoders"].append([_make_block_params(kg, chan) for _ in range(num)])
        p["downs"].append({"w": u((2, 2, chan, 2 * chan), 4 * chan),
                           "b": u((2 * chan,), 4 * chan)})
        chan *= 2
    p["middle"] = [_make_block_params(kg, chan) for _ in range(middle_blk_num)]
    for num in dec_blk_nums:
        p["ups"].append({"w": u((chan, 2 * chan), chan)})
        chan //= 2
        p["decoders"].append([_make_block_params(kg, chan) for _ in range(num)])
    return p, kg()


def _fold_pw(w, bn):
    s = bn["gamma"] / jnp.sqrt(bn["var"] + EPS)
    return w * s[None, :], bn["beta"] - bn["mean"] * s


def _fold_dw(w, bn):
    s = bn["gamma"] / jnp.sqrt(bn["var"] + EPS)
    return (w * s[None, None, :]).reshape(9, -1), bn["beta"] - bn["mean"] * s


def _fold_block(p):
    pw1_w, pw1_b = _fold_pw(p["pw1_w"], p["bn1"])
    dw_w, dw_b = _fold_dw(p["dw_w"], p["bn_dw"])
    pw2_w, pw2_b = _fold_pw(p["pw2_w"], p["bn2"])
    pw3_w, pw3_b = _fold_pw(p["pw3_w"], p["bn3"])
    pw4_w, pw4_b = _fold_pw(p["pw4_w"], p["bn4"])
    return {
        "pw1_w": pw1_w, "pw1_b": pw1_b, "dw_w": dw_w, "dw_b": dw_b,
        "se_w1": p["se_w1"], "se_w2": p["se_w2"],
        "pw2_w": pw2_w, "pw2_b": pw2_b,
        "pw3_w": pw3_w, "pw3_b": pw3_b, "pw4_w": pw4_w, "pw4_b": pw4_b,
    }


def prepare_pallas_params(p):
    """Host-side weight prep: BN fold + kernel-ready (input-major) layouts."""
    return {
        "intro_w": p["intro"]["w"].reshape(-1, p["intro"]["w"].shape[-1]),
        "intro_b": p["intro"]["b"],
        "ending_w": p["ending"]["w"].reshape(-1, p["ending"]["w"].shape[-1]),
        "ending_b": p["ending"]["b"],
        "downs": [{"w": d["w"].reshape(-1, d["w"].shape[-1]), "b": d["b"]}
                  for d in p["downs"]],
        "ups": [{"w": u["w"]} for u in p["ups"]],
        "encoders": [[_fold_block(b) for b in st] for st in p["encoders"]],
        "middle": [_fold_block(b) for b in p["middle"]],
        "decoders": [[_fold_block(b) for b in st] for st in p["decoders"]],
    }


# ---------------------------------------------------------------------------
# Pure-JAX reference (mirrors the PyTorch forward, unfolded BN, HIGHEST prec).
# ---------------------------------------------------------------------------
_PREC = lax.Precision.HIGHEST


def _conv_ref(x, w, strides, padding, groups=1):
    return lax.conv_general_dilated(
        x, w, window_strides=strides, padding=padding,
        dimension_numbers=("NHWC", "HWIO", "NHWC"),
        feature_group_count=groups, precision=_PREC)


def _bn_ref(x, bn):
    return (x - bn["mean"]) / jnp.sqrt(bn["var"] + EPS) * bn["gamma"] + bn["beta"]


def _hardsigmoid_ref(x):
    return jnp.clip(x + 3.0, 0.0, 6.0) / 6.0


def _block_ref(x, p):
    h = jax.nn.relu(_bn_ref(
        jnp.einsum("bhwc,cd->bhwd", x, p["pw1_w"], precision=_PREC), p["bn1"]))
    c = h.shape[-1]
    h = jax.nn.relu(_bn_ref(
        _conv_ref(h, p["dw_w"].reshape(3, 3, 1, c), (1, 1), ((1, 1), (1, 1)),
                  groups=c), p["bn_dw"]))
    pool = jnp.mean(h, axis=(1, 2), keepdims=True)
    gate = _hardsigmoid_ref(jnp.einsum(
        "bhwc,cd->bhwd",
        jax.nn.relu(jnp.einsum("bhwc,cd->bhwd", pool, p["se_w1"], precision=_PREC)),
        p["se_w2"], precision=_PREC))
    h = h * gate
    x = x + _bn_ref(jnp.einsum("bhwc,cd->bhwd", h, p["pw2_w"], precision=_PREC),
                    p["bn2"])
    h2 = jax.nn.relu(_bn_ref(
        jnp.einsum("bhwc,cd->bhwd", x, p["pw3_w"], precision=_PREC), p["bn3"]))
    x = x + _bn_ref(jnp.einsum("bhwc,cd->bhwd", h2, p["pw4_w"], precision=_PREC),
                    p["bn4"])
    return x


def _pixel_shuffle_ref(y, r=2):
    # NCHW-style decomposition (mirrors torch.nn.PixelShuffle), applied to NHWC.
    t = jnp.transpose(y, (0, 3, 1, 2))
    n, c, h, w = t.shape
    t = t.reshape(n, c // (r * r), r, r, h, w)
    t = t.transpose(0, 1, 4, 2, 5, 3).reshape(n, c // (r * r), h * r, w * r)
    return jnp.transpose(t, (0, 2, 3, 1))


def reformer_forward_ref(inp_nchw, p, *, padder_size):
    x = jnp.transpose(inp_nchw, (0, 2, 3, 1)).astype(jnp.float32)
    B, H0, W0, _ = x.shape
    ph = (padder_size - H0 % padder_size) % padder_size
    pw = (padder_size - W0 % padder_size) % padder_size
    img = jnp.pad(x, ((0, 0), (0, ph), (0, pw), (0, 0)))

    h = _conv_ref(img, p["intro"]["w"], (1, 1), ((1, 1), (1, 1))) + p["intro"]["b"]
    encs = []
    for stage, down in zip(p["encoders"], p["downs"]):
        for blk in stage:
            h = _block_ref(h, blk)
        encs.append(h)
        h = _conv_ref(h, down["w"], (2, 2), "VALID") + down["b"]
    for blk in p["middle"]:
        h = _block_ref(h, blk)
    for up, stage, skip in zip(p["ups"], p["decoders"], encs[::-1]):
        y = jnp.einsum("bhwc,cd->bhwd", h, up["w"], precision=_PREC)
        h = _pixel_shuffle_ref(y, 2) + skip
        for blk in stage:
            h = _block_ref(h, blk)
    out = (_conv_ref(h, p["ending"]["w"], (1, 1), ((1, 1), (1, 1)))
           + p["ending"]["b"] + img)
    out = out[:, :H0, :W0, :]
    return jnp.transpose(out, (0, 3, 1, 2))


# ---------------------------------------------------------------------------
if __name__ == "__main__":
    # Small Reformer config (reduced depth/width for a fast toy-shape check).
    B, Cin, H, W = 2, 3, 16, 16
    width = 16
    enc_blk_nums = [1, 1]
    dec_blk_nums = [1, 1]
    middle_blk_num = 1
    padder = 2 ** len(enc_blk_nums)

    key = jax.random.PRNGKey(0)
    params, key = build_params(key, Cin, width, enc_blk_nums, dec_blk_nums,
                               middle_blk_num)
    x = jax.random.normal(key, (B, Cin, H, W), dtype=jnp.float32)

    folded = prepare_pallas_params(params)
    fwd = jax.jit(functools.partial(reformer_forward_pallas, padder_size=padder))
    out = jax.block_until_ready(fwd(x, folded))

    ref = reformer_forward_ref(x, params, padder_size=padder)
    assert out.shape == (B, Cin, H, W)
    max_err = float(jnp.max(jnp.abs(out - ref)))
    scale = float(jnp.max(jnp.abs(ref)))
    assert max_err <= 1e-2 * max(scale, 1.0), (
        f"mismatch vs reference: max_err={max_err} (scale={scale})")

    print("KERNEL_OK")
</pallas_src>

<mosaic_0001>
module attributes {stable_mosaic.version = 11 : i64} {
  func.func @_linear_kernel(%arg0: i32, %arg1: memref<512x27xf32, #tpu.memory_space<vmem>>, %arg2: memref<27x16xf32, #tpu.memory_space<vmem>>, %arg3: memref<1x16xf32, #tpu.memory_space<vmem>>, %arg4: memref<512x16xf32, #tpu.memory_space<vmem>>) attributes {dimension_semantics = [#tpu.dimension_semantics<parallel>], iteration_bounds = array<i64: 1>, scalar_prefetch = 0 : i64, scratch_operands = 0 : i64, tpu.core_type = #tpu.core_type<tc>, window_params = [{transform_indices = @transform_0, window_bounds = array<i64: 512, 27>}, {pipeline_mode = #tpu.pipeline_mode<synchronous>, transform_indices = @transform_1, window_bounds = array<i64: 27, 16>}, {pipeline_mode = #tpu.pipeline_mode<synchronous>, transform_indices = @transform_2, window_bounds = array<i64: 1, 16>}, {transform_indices = @transform_3, window_bounds = array<i64: 512, 16>}]} {
    %c0 = arith.constant 0 : index
    %c0_0 = arith.constant 0 : index
    %0 = vector.load %arg1[%c0, %c0_0] : memref<512x27xf32, #tpu.memory_space<vmem>>, vector<512x27xf32>
    %c0_1 = arith.constant 0 : index
    %c0_2 = arith.constant 0 : index
    %1 = vector.load %arg2[%c0_1, %c0_2] : memref<27x16xf32, #tpu.memory_space<vmem>>, vector<27x16xf32>
    %cst = arith.constant dense<0.000000e+00> : vector<512x16xf32>
    %2 = tpu.matmul %0, %1, %cst {dimension_numbers = #tpu.dot_dimension_numbers<[1], [0], [0], [1], [0, 0, 1, 1], [], []>} : vector<512x27xf32>, vector<27x16xf32>, vector<512x16xf32> -> vector<512x16xf32>
    %c0_3 = arith.constant 0 : index
    %c0_4 = arith.constant 0 : index
    %3 = vector.load %arg3[%c0_3, %c0_4] : memref<1x16xf32, #tpu.memory_space<vmem>>, vector<1x16xf32>
    %4 = vector.broadcast %3 : vector<1x16xf32> to vector<512x16xf32>
    %5 = arith.addf %2, %4 : vector<512x16xf32>
    %c0_5 = arith.constant 0 : index
    %c0_6 = arith.constant 0 : index
    %6 = vector.load %arg4[%c0_5, %c0_6] : memref<512x16xf32, #tpu.memory_space<vmem>>, vector<512x16xf32>
    tpu.vector_store %arg4[%c0_5, %c0_6], %5 {strides = array<i32>} : memref<512x16xf32, #tpu.memory_space<vmem>>, vector<512x16xf32>,
    return
  }
  func.func @transform_0(%arg0: i32) -> (i32, i32) {
    %c0_i32 = arith.constant 0 : i32
    %c0_i32_0 = arith.constant 0 : i32
    return %arg0, %c0_i32 : i32, i32
  }
  func.func @transform_1(%arg0: i32) -> (i32, i32) {
    %c0_i32 = arith.constant 0 : i32
    %c0_i32_0 = arith.constant 0 : i32
    %c0_i32_1 = arith.constant 0 : i32
    return %c0_i32, %c0_i32_0 : i32, i32
  }
  func.func @transform_2(%arg0: i32) -> (i32, i32) {
    %c0_i32 = arith.constant 0 : i32
    %c0_i32_0 = arith.constant 0 : i32
    %c0_i32_1 = arith.constant 0 : i32
    return %c0_i32, %c0_i32_0 : i32, i32
  }
  func.func @transform_3(%arg0: i32) -> (i32, i32) {
    %c0_i32 = arith.constant 0 : i32
    %c0_i32_0 = arith.constant 0 : i32
    return %arg0, %c0_i32 : i32, i32
  }
}

module attributes {stable_mosaic.version = 11 : i64} {
  func.func @_linear_kernel(%arg0: i32, %arg1: memref<512x16xf32, #tpu.memory_space<vmem>>, %arg2: memref<16x32xf32, #tpu.memory_space<vmem>>, %arg3: memref<1x32xf32, #tpu.memory_space<vmem>>, %arg4: memref<512x32xf32, #tpu.memory_space<vmem>>) attributes {dimension_semantics = [#tpu.dimension_semantics<parallel>], iteration_bounds = array<i64: 1>, scalar_prefetch = 0 : i64, scratch_operands = 0 : i64, tpu.core_type = #tpu.core_type<tc>, window_params = [{transform_indices = @transform_0, window_bounds = array<i64: 512, 16>}, {pipeline_mode = #tpu.pipeline_mode<synchronous>, transform_indices = @transform_1, window_bounds = array<i64: 16, 32>}, {pipeline_mode = #tpu.pipeline_mode<synchronous>, transform_indices = @transform_2, window_bounds = array<i64: 1, 32>}, {transform_indices = @transform_3, window_bounds = array<i64: 512, 32>}]} {
    %c0 = arith.constant 0 : index
    %c0_0 = arith.constant 0 : index
    %0 = vector.load %arg1[%c0, %c0_0] : memref<512x16xf32, #tpu.memory_space<vmem>>, vector<512x16xf32>
    %c0_1 = arith.constant 0 : index
    %c0_2 = arith.constant 0 : index
    %1 = vector.load %arg2[%c0_1, %c0_2] : memref<16x32xf32, #tpu.memory_space<vmem>>, vector<16x32xf32>
    %cst = arith.constant dense<0.000000e+00> : vector<512x32xf32>
    %2 = tpu.matmul %0, %1, %cst {dimension_numbers = #tpu.dot_dimension_numbers<[1], [0], [0], [1], [0, 0, 1, 1], [], []>} : vector<512x16xf32>, vector<16x32xf32>, vector<512x32xf32> -> vector<512x32xf32>
    %c0_3 = arith.constant 0 : index
    %c0_4 = arith.constant 0 : index
    %3 = vector.load %arg3[%c0_3, %c0_4] : memref<1x32xf32, #tpu.memory_space<vmem>>, vector<1x32xf32>
    %4 = vector.broadcast %3 : vector<1x32xf32> to vector<512x32xf32>
    %5 = arith.addf %2, %4 : vector<512x32xf32>
    %cst_5 = arith.constant 0.000000e+00 : f32
    %6 = vector.broadcast %cst_5 : f32 to vector<512x32xf32>
    %7 = arith.maximumf %5, %6 : vector<512x32xf32>
    %c0_6 = arith.constant 0 : index
    %c0_7 = arith.constant 0 : index
    %8 = vector.load %arg4[%c0_6, %c0_7] : memref<512x32xf32, #tpu.memory_space<vmem>>, vector<512x32xf32>
    tpu.vector_store %arg4[%c0_6, %c0_7], %7 {strides = array<i32>} : memref<512x32xf32, #tpu.memory_space<vmem>>, vector<512x32xf32>,
    return
  }
  func.func @transform_0(%arg0: i32) -> (i32, i32) {
    %c0_i32 = arith.constant 0 : i32
    %c0_i32_0 = arith.constant 0 : i32
    return %arg0, %c0_i32 : i32, i32
  }
  func.func @transform_1(%arg0: i32) -> (i32, i32) {
    %c0_i32 = arith.constant 0 : i32
    %c0_i32_0 = arith.constant 0 : i32
    %c0_i32_1 = arith.constant 0 : i32
    return %c0_i32, %c0_i32_0 : i32, i32
  }
  func.func @transform_2(%arg0: i32) -> (i32, i32) {
    %c0_i32 = arith.constant 0 : i32
    %c0_i32_0 = arith.constant 0 : i32
    %c0_i32_1 = arith.constant 0 : i32
    return %c0_i32, %c0_i32_0 : i32, i32
  }
  func.func @transform_3(%arg0: i32) -> (i32, i32) {
    %c0_i32 = arith.constant 0 : i32
    %c0_i32_0 = arith.constant 0 : i32
    return %arg0, %c0_i32 : i32, i32
  }
}

module attributes {stable_mosaic.version = 11 : i64} {
  func.func @_dw3x3_se_kernel(%arg0: i32, %arg1: memref<1x18x18x32xf32, #tpu.memory_space<vmem>>, %arg2: memref<9x32xf32, #tpu.memory_space<vmem>>, %arg3: memref<1x32xf32, #tpu.memory_space<vmem>>, %arg4: memref<32x8xf32, #tpu.memory_space<vmem>>, %arg5: memref<8x32xf32, #tpu.memory_space<vmem>>, %arg6: memref<1x16x16x32xf32, #tpu.memory_space<vmem>>) attributes {dimension_semantics = [#tpu.dimension_semantics<parallel>], iteration_bounds = array<i64: 2>, scalar_prefetch = 0 : i64, scratch_operands = 0 : i64, tpu.core_type = #tpu.core_type<tc>, window_params = [{transform_indices = @transform_0, window_bounds = array<i64: 1, 18, 18, 32>}, {pipeline_mode = #tpu.pipeline_mode<synchronous>, transform_indices = @transform_1, window_bounds = array<i64: 9, 32>}, {pipeline_mode = #tpu.pipeline_mode<synchronous>, transform_indices = @transform_2, window_bounds = array<i64: 1, 32>}, {pipeline_mode = #tpu.pipeline_mode<synchronous>, transform_indices = @transform_3, window_bounds = array<i64: 32, 8>}, {pipeline_mode = #tpu.pipeline_mode<synchronous>, transform_indices = @transform_4, window_bounds = array<i64: 8, 32>}, {transform_indices = @transform_5, window_bounds = array<i64: 1, 16, 16, 32>}]} {
    %cst = arith.constant 0.000000e+00 : f32
    %0 = vector.broadcast %cst : f32 to vector<16x16x32xf32>
    %c0 = arith.constant 0 : index
    %c0_0 = arith.constant 0 : index
    %c0_1 = arith.constant 0 : index
    %c0_2 = arith.constant 0 : index
    %1 = vector.load %arg1[%c0, %c0_0, %c0_1, %c0_2] : memref<1x18x18x32xf32, #tpu.memory_space<vmem>>, vector<1x16x16x32xf32>
    %2 = vector.shape_cast %1 : vector<1x16x16x32xf32> to vector<16x16x32xf32>
    %c0_3 = arith.constant 0 : index
    %c0_4 = arith.constant 0 : index
    %3 = vector.load %arg2[%c0_3, %c0_4] : memref<9x32xf32, #tpu.memory_space<vmem>>, vector<1x32xf32>
    %4 = vector.shape_cast %3 : vector<1x32xf32> to vector<1x1x32xf32>
    %5 = vector.broadcast %4 : vector<1x1x32xf32> to vector<16x16x32xf32>
    %6 = arith.mulf %2, %5 : vector<16x16x32xf32>
    %7 = arith.addf %0, %6 : vector<16x16x32xf32>
    %c0_5 = arith.constant 0 : index
    %c0_6 = arith.constant 0 : index
    %c1 = arith.constant 1 : index
    %c0_7 = arith.constant 0 : index
    %8 = vector.load %arg1[%c0_5, %c0_6, %c1, %c0_7] : memref<1x18x18x32xf32, #tpu.memory_space<vmem>>, vector<1x16x16x32xf32>
    %9 = vector.shape_cast %8 : vector<1x16x16x32xf32> to vector<16x16x32xf32>
    %c1_8 = arith.constant 1 : index
    %c0_9 = arith.constant 0 : index
    %10 = vector.load %arg2[%c1_8, %c0_9] : memref<9x32xf32, #tpu.memory_space<vmem>>, vector<1x32xf32>
    %11 = vector.shape_cast %10 : vector<1x32xf32> to vector<1x1x32xf32>
    %12 = vector.broadcast %11 : vector<1x1x32xf32> to vector<16x16x32xf32>
    %13 = arith.mulf %9, %12 : vector<16x16x32xf32>
    %14 = arith.addf %7, %13 : vector<16x16x32xf32>
    %c0_10 = arith.constant 0 : index
    %c0_11 = arith.constant 0 : index
    %c2 = arith.constant 2 : index
    %c0_12 = arith.constant 0 : index
    %15 = vector.load %arg1[%c0_10, %c0_11, %c2, %c0_12] : memref<1x18x18x32xf32, #tpu.memory_space<vmem>>, vector<1x16x16x32xf32>
    %16 = vector.shape_cast %15 : vector<1x16x16x32xf32> to vector<16x16x32xf32>
    %c2_13 = arith.constant 2 : index
    %c0_14 = arith.constant 0 : index
    %17 = vector.load %arg2[%c2_13, %c0_14] : memref<9x32xf32, #tpu.memory_space<vmem>>, vector<1x32xf32>
    %18 = vector.shape_cast %17 : vector<1x32xf32> to vector<1x1x32xf32>
    %19 = vector.broadcast %18 : vector<1x1x32xf32> to vector<16x16x32xf32>
    %20 = arith.mulf %16, %19 : vector<16x16x32xf32>
    %21 = arith.addf %14, %20 : vector<16x16x32xf32>
    %c0_15 = arith.constant 0 : index
    %c1_16 = arith.constant 1 : index
    %c0_17 = arith.constant 0 : index
    %c0_18 = arith.constant 0 : index
    %22 = vector.load %arg1[%c0_15, %c1_16, %c0_17, %c0_18] : memref<1x18x18x32xf32, #tpu.memory_space<vmem>>, vector<1x16x16x32xf32>
    %23 = vector.shape_cast %22 : vector<1x16x16x32xf32> to vector<16x16x32xf32>
    %c3 = arith.constant 3 : index
    %c0_19 = arith.constant 0 : index
    %24 = vector.load %arg2[%c3, %c0_19] : memref<9x32xf32, #tpu.memory_space<vmem>>, vector<1x32xf32>
    %25 = vector.shape_cast %24 : vector<1x32xf32> to vector<1x1x32xf32>
    %26 = vector.broadcast %25 : vector<1x1x32xf32> to vector<16x16x32xf32>
    %27 = arith.mulf %23, %26 : vector<16x16x32xf32>
    %28 = arith.addf %21, %27 : vector<16x16x32xf32>
    %c0_20 = arith.constant 0 : index
    %c1_21 = arith.constant 1 : index
    %c1_22 = arith.constant 1 : index
    %c0_23 = arith.constant 0 : index
    %29 = vector.load %arg1[%c0_20, %c1_21, %c1_22, %c0_23] : memref<1x18x18x32xf32, #tpu.memory_space<vmem>>, vector<1x16x16x32xf32>
    %30 = vector.shape_cast %29 : vector<1x16x16x32xf32> to vector<16x16x32xf32>
    %c4 = arith.constant 4 : index
    %c0_24 = arith.constant 0 : index
    %31 = vector.load %arg2[%c4, %c0_24] : memref<9x32xf32, #tpu.memory_space<vmem>>, vector<1x32xf32>
    %32 = vector.shape_cast %31 : vector<1x32xf32> to vector<1x1x32xf32>
    %33 = vector.broadcast %32 : vector<1x1x32xf32> to vector<16x16x32xf32>
    %34 = arith.mulf %30, %33 : vector<16x16x32xf32>
    %35 = arith.addf %28, %34 : vector<16x16x32xf32>
    %c0_25 = arith.constant 0 : index
    %c1_26 = arith.constant 1 : index
    %c2_27 = arith.constant 2 : index
    %c0_28 = arith.constant 0 : index
    %36 = vector.load %arg1[%c0_25, %c1_26, %c2_27, %c0_28] : memref<1x18x18x32xf32, #tpu.memory_space<vmem>>, vector<1x16x16x32xf32>
    %37 = vector.shape_cast %36 : vector<1x16x16x32xf32> to vector<16x16x32xf32>
    %c5 = arith.constant 5 : index
    %c0_29 = arith.constant 0 : index
    %38 = vector.load %arg2[%c5, %c0_29] : memref<9x32xf32, #tpu.memory_space<vmem>>, vector<1x32xf32>
    %39 = vector.shape_cast %38 : vector<1x32xf32> to vector<1x1x32xf32>
    %40 = vector.broadcast %39 : vector<1x1x32xf32> to vector<16x16x32xf32>
    %41 = arith.mulf %37, %40 : vector<16x16x32xf32>
    %42 = arith.addf %35, %41 : vector<16x16x32xf32>
    %c0_30 = arith.constant 0 : index
    %c2_31 = arith.constant 2 : index
    %c0_32 = arith.constant 0 : index
    %c0_33 = arith.constant 0 : index
    %43 = vector.load %arg1[%c0_30, %c2_31, %c0_32, %c0_33] : memref<1x18x18x32xf32, #tpu.memory_space<vmem>>, vector<1x16x16x32xf32>
    %44 = vector.shape_cast %43 : vector<1x16x16x32xf32> to vector<16x16x32xf32>
    %c6 = arith.constant 6 : index
    %c0_34 = arith.constant 0 : index
    %45 = vector.load %arg2[%c6, %c0_34] : memref<9x32xf32, #tpu.memory_space<vmem>>, vector<1x32xf32>
    %46 = vector.shape_cast %45 : vector<1x32xf32> to vector<1x1x32xf32>
    %47 = vector.broadcast %46 : vector<1x1x32xf32> to vector<16x16x32xf32>
    %48 = arith.mulf %44, %47 : vector<16x16x32xf32>
    %49 = arith.addf %42, %48 : vector<16x16x32xf32>
    %c0_35 = arith.constant 0 : index
    %c2_36 = arith.constant 2 : index
    %c1_37 = arith.constant 1 : index
    %c0_38 = arith.constant 0 : index
    %50 = vector.load %arg1[%c0_35, %c2_36, %c1_37, %c0_38] : memref<1x18x18x32xf32, #tpu.memory_space<vmem>>, vector<1x16x16x32xf32>
    %51 = vector.shape_cast %50 : vector<1x16x16x32xf32> to vector<16x16x32xf32>
    %c7 = arith.constant 7 : index
    %c0_39 = arith.constant 0 : index
    %52 = vector.load %arg2[%c7, %c0_39] : memref<9x32xf32, #tpu.memory_space<vmem>>, vector<1x32xf32>
    %53 = vector.shape_cast %52 : vector<1x32xf32> to vector<1x1x32xf32>
    %54 = vector.broadcast %53 : vector<1x1x32xf32> to vector<16x16x32xf32>
    %55 = arith.mulf %51, %54 : vector<16x16x32xf32>
    %56 = arith.addf %49, %55 : vector<16x16x32xf32>
    %c0_40 = arith.constant 0 : index
    %c2_41 = arith.constant 2 : index
    %c2_42 = arith.constant 2 : index
    %c0_43 = arith.constant 0 : index
    %57 = vector.load %arg1[%c0_40, %c2_41, %c2_42, %c0_43] : memref<1x18x18x32xf32, #tpu.memory_space<vmem>>, vector<1x16x16x32xf32>
    %58 = vector.shape_cast %57 : vector<1x16x16x32xf32> to vector<16x16x32xf32>
    %c8 = arith.constant 8 : index
    %c0_44 = arith.constant 0 : index
    %59 = vector.load %arg2[%c8, %c0_44] : memref<9x32xf32, #tpu.memory_space<vmem>>, vector<1x32xf32>
    %60 = vector.shape_cast %59 : vector<1x32xf32> to vector<1x1x32xf32>
    %61 = vector.broadcast %60 : vector<1x1x32xf32> to vector<16x16x32xf32>
    %62 = arith.mulf %58, %61 : vector<16x16x32xf32>
    %63 = arith.addf %56, %62 : vector<16x16x32xf32>
    %c0_45 = arith.constant 0 : index
    %c0_46 = arith.constant 0 : index
    %64 = vector.load %arg3[%c0_45, %c0_46] : memref<1x32xf32, #tpu.memory_space<vmem>>, vector<1x32xf32>
    %65 = vector.shape_cast %64 : vector<1x32xf32> to vector<1x1x32xf32>
    %66 = vector.broadcast %65 : vector<1x1x32xf32> to vector<16x16x32xf32>
    %67 = arith.addf %63, %66 : vector<16x16x32xf32>
    %cst_47 = arith.constant 0.000000e+00 : f32
    %68 = vector.broadcast %cst_47 : f32 to vector<16x16x32xf32>
    %69 = arith.maximumf %67, %68 : vector<16x16x32xf32>
    %cst_48 = arith.constant dense<0.000000e+00> : vector<16x32xf32>
    %70 = vector.multi_reduction <add>, %69, %cst_48 [0] : vector<16x16x32xf32> to vector<16x32xf32>
    %cst_49 = arith.constant dense<0.000000e+00> : vector<32xf32>
    %71 = vector.multi_reduction <add>, %70, %cst_49 [0] : vector<16x32xf32> to vector<32xf32>
    %72 = vector.shape_cast %71 : vector<32xf32> to vector<1x32xf32>
    %cst_50 = arith.constant 3.906250e-03 : f32
    %73 = vector.broadcast %cst_50 : f32 to vector<1x32xf32>
    %74 = arith.mulf %72, %73 : vector<1x32xf32>
    %75 = vector.shape_cast %74 : vector<1x32xf32> to vector<1x32xf32>
    %76 = vector.broadcast %75 : vector<1x32xf32> to vector<8x32xf32>
    %c0_51 = arith.constant 0 : index
    %c0_52 = arith.constant 0 : index
    %77 = vector.load %arg4[%c0_51, %c0_52] : memref<32x8xf32, #tpu.memory_space<vmem>>, vector<32x8xf32>
    %cst_53 = arith.constant dense<0.000000e+00> : vector<8x8xf32>
    %78 = tpu.matmul %76, %77, %cst_53 {dimension_numbers = #tpu.dot_dimension_numbers<[1], [0], [0], [1], [0, 0, 1, 1], [], []>} : vector<8x32xf32>, vector<32x8xf32>, vector<8x8xf32> -> vector<8x8xf32>
    %cst_54 = arith.constant 0.000000e+00 : f32
    %79 = vector.broadcast %cst_54 : f32 to vector<8x8xf32>
    %80 = arith.maximumf %78, %79 : vector<8x8xf32>
    %c0_55 = arith.constant 0 : index
    %c0_56 = arith.constant 0 : index
    %81 = vector.load %arg5[%c0_55, %c0_56] : memref<8x32xf32, #tpu.memory_space<vmem>>, vector<8x32xf32>
    %cst_57 = arith.constant dense<0.000000e+00> : vector<8x32xf32>
    %82 = tpu.matmul %80, %81, %cst_57 {dimension_numbers = #tpu.dot_dimension_numbers<[1], [0], [0], [1], [0, 0, 1, 1], [], []>} : vector<8x8xf32>, vector<8x32xf32>, vector<8x32xf32> -> vector<8x32xf32>
    %cst_58 = arith.constant 3.000000e+00 : f32
    %83 = vector.broadcast %cst_58 : f32 to vector<8x32xf32>
    %84 = arith.addf %82, %83 : vector<8x32xf32>
    %cst_59 = arith.constant 0.000000e+00 : f32
    %85 = vector.broadcast %cst_59 : f32 to vector<8x32xf32>
    %86 = arith.maximumf %84, %85 : vector<8x32xf32>
    %cst_60 = arith.constant 6.000000e+00 : f32
    %87 = vector.broadcast %cst_60 : f32 to vector<8x32xf32>
    %88 = arith.minimumf %86, %87 : vector<8x32xf32>
    %cst_61 = arith.constant 0.166666672 : f32
    %89 = vector.broadcast %cst_61 : f32 to vector<8x32xf32>
    %90 = arith.mulf %88, %89 : vector<8x32xf32>
    %91 = vector.extract_strided_slice %90 {offsets = [0, 0], sizes = [1, 32], strides = [1, 1]} : vector<8x32xf32> to vector<1x32xf32>
    %92 = vector.shape_cast %91 : vector<1x32xf32> to vector<1x1x32xf32>
    %93 = vector.broadcast %92 : vector<1x1x32xf32> to vector<16x16x32xf32>
    %94 = arith.mulf %69, %93 : vector<16x16x32xf32>
    %c0_62 = arith.constant 0 : index
    %c0_63 = arith.constant 0 : index
    %c0_64 = arith.constant 0 : index
    %c0_65 = arith.constant 0 : index
    %95 = vector.load %arg6[%c0_62, %c0_63, %c0_64, %c0_65] : memref<1x16x16x32xf32, #tpu.memory_space<vmem>>, vector<1x16x16x32xf32>
    %96 = vector.shape_cast %95 : vector<1x16x16x32xf32> to vector<16x16x32xf32>
    %97 = vector.shape_cast %94 : vector<16x16x32xf32> to vector<1x16x16x32xf32>
    tpu.vector_store %arg6[%c0_62, %c0_63, %c0_64, %c0_65], %97 {strides = array<i32>} : memref<1x16x16x32xf32, #tpu.memory_space<vmem>>, vector<1x16x16x32xf32>,
    return
  }
  func.func @transform_0(%arg0: i32) -> (i32, i32, i32, i32) {
    %c0_i32 = arith.constant 0 : i32
    %c0_i32_0 = arith.constant 0 : i32
    %c0_i32_1 = arith.constant 0 : i32
    %c0_i32_2 = arith.constant 0 : i32
    return %arg0, %c0_i32, %c0_i32_0, %c0_i32_1 : i32, i32, i32, i32
  }
  func.func @transform_1(%arg0: i32) -> (i32, i32) {
    %c0_i32 = arith.constant 0 : i32
    %c0_i32_0 = arith.constant 0 : i32
    %c0_i32_1 = arith.constant 0 : i32
    return %c0_i32, %c0_i32_0 : i32, i32
  }
  func.func @transform_2(%arg0: i32) -> (i32, i32) {
    %c0_i32 = arith.constant 0 : i32
    %c0_i32_0 = arith.constant 0 : i32
    %c0_i32_1 = arith.constant 0 : i32
    return %c0_i32, %c0_i32_0 : i32, i32
  }
  func.func @transform_3(%arg0: i32) -> (i32, i32) {
    %c0_i32 = arith.constant 0 : i32
    %c0_i32_0 = arith.constant 0 : i32
    %c0_i32_1 = arith.constant 0 : i32
    return %c0_i32, %c0_i32_0 : i32, i32
  }
  func.func @transform_4(%arg0: i32) -> (i32, i32) {
    %c0_i32 = arith.constant 0 : i32
    %c0_i32_0 = arith.constant 0 : i32
    %c0_i32_1 = arith.constant 0 : i32
    return %c0_i32, %c0_i32_0 : i32, i32
  }
  func.func @transform_5(%arg0: i32) -> (i32, i32, i32, i32) {
    %c0_i32 = arith.constant 0 : i32
    %c0_i32_0 = arith.constant 0 : i32
    %c0_i32_1 = arith.constant 0 : i32
    %c0_i32_2 = arith.constant 0 : i32
    return %arg0, %c0_i32, %c0_i32_0, %c0_i32_1 : i32, i32, i32, i32
  }
}

module attributes {stable_mosaic.version = 11 : i64} {
  func.func @_block_tail_kernel(%arg0: i32, %arg1: memref<512x32xf32, #tpu.memory_space<vmem>>, %arg2: memref<512x16xf32, #tpu.memory_space<vmem>>, %arg3: memref<32x16xf32, #tpu.memory_space<vmem>>, %arg4: memref<1x16xf32, #tpu.memory_space<vmem>>, %arg5: memref<16x32xf32, #tpu.memory_space<vmem>>, %arg6: memref<1x32xf32, #tpu.memory_space<vmem>>, %arg7: memref<32x16xf32, #tpu.memory_space<vmem>>, %arg8: memref<1x16xf32, #tpu.memory_space<vmem>>, %arg9: memref<512x16xf32, #tpu.memory_space<vmem>>) attributes {dimension_semantics = [#tpu.dimension_semantics<parallel>], iteration_bounds = array<i64: 1>, scalar_prefetch = 0 : i64, scratch_operands = 0 : i64, tpu.core_type = #tpu.core_type<tc>, window_params = [{transform_indices = @transform_0, window_bounds = array<i64: 512, 32>}, {transform_indices = @transform_1, window_bounds = array<i64: 512, 16>}, {pipeline_mode = #tpu.pipeline_mode<synchronous>, transform_indices = @transform_2, window_bounds = array<i64: 32, 16>}, {pipeline_mode = #tpu.pipeline_mode<synchronous>, transform_indices = @transform_3, window_bounds = array<i64: 1, 16>}, {pipeline_mode = #tpu.pipeline_mode<synchronous>, transform_indices = @transform_4, window_bounds = array<i64: 16, 32>}, {pipeline_mode = #tpu.pipeline_mode<synchronous>, transform_indices = @transform_5, window_bounds = array<i64: 1, 32>}, {pipeline_mode = #tpu.pipeline_mode<synchronous>, transform_indices = @transform_6, window_bounds = array<i64: 32, 16>}, {pipeline_mode = #tpu.pipeline_mode<synchronous>, transform_indices = @transform_7, window_bounds = array<i64: 1, 16>}, {transform_indices = @transform_8, window_bounds = array<i64: 512, 16>}]} {
    %c0 = arith.constant 0 : index
    %c0_0 = arith.constant 0 : index
    %0 = vector.load %arg2[%c0, %c0_0] : memref<512x16xf32, #tpu.memory_space<vmem>>, vector<512x16xf32>
    %c0_1 = arith.constant 0 : index
    %c0_2 = arith.constant 0 : index
    %1 = vector.load %arg1[%c0_1, %c0_2] : memref<512x32xf32, #tpu.memory_space<vmem>>, vector<512x32xf32>
    %c0_3 = arith.constant 0 : index
    %c0_4 = arith.constant 0 : index
    %2 = vector.load %arg3[%c0_3, %c0_4] : memref<32x16xf32, #tpu.memory_space<vmem>>, vector<32x16xf32>
    %cst = arith.constant dense<0.000000e+00> : vector<512x16xf32>
    %3 = tpu.matmul %1, %2, %cst {dimension_numbers = #tpu.dot_dimension_numbers<[1], [0], [0], [1], [0, 0, 1, 1], [], []>} : vector<512x32xf32>, vector<32x16xf32>, vector<512x16xf32> -> vector<512x16xf32>
    %4 = arith.addf %0, %3 : vector<512x16xf32>
    %c0_5 = arith.constant 0 : index
    %c0_6 = arith.constant 0 : index
    %5 = vector.load %arg4[%c0_5, %c0_6] : memref<1x16xf32, #tpu.memory_space<vmem>>, vector<1x16xf32>
    %6 = vector.broadcast %5 : vector<1x16xf32> to vector<512x16xf32>
    %7 = arith.addf %4, %6 : vector<512x16xf32>
    %c0_7 = arith.constant 0 : index
    %c0_8 = arith.constant 0 : index
    %8 = vector.load %arg5[%c0_7, %c0_8] : memref<16x32xf32, #tpu.memory_space<vmem>>, vector<16x32xf32>
    %cst_9 = arith.constant dense<0.000000e+00> : vector<512x32xf32>
    %9 = tpu.matmul %7, %8, %cst_9 {dimension_numbers = #tpu.dot_dimension_numbers<[1], [0], [0], [1], [0, 0, 1, 1], [], []>} : vector<512x16xf32>, vector<16x32xf32>, vector<512x32xf32> -> vector<512x32xf32>
    %c0_10 = arith.constant 0 : index
    %c0_11 = arith.constant 0 : index
    %10 = vector.load %arg6[%c0_10, %c0_11] : memref<1x32xf32, #tpu.memory_space<vmem>>, vector<1x32xf32>
    %11 = vector.broadcast %10 : vector<1x32xf32> to vector<512x32xf32>
    %12 = arith.addf %9, %11 : vector<512x32xf32>
    %cst_12 = arith.constant 0.000000e+00 : f32
    %13 = vector.broadcast %cst_12 : f32 to vector<512x32xf32>
    %14 = arith.maximumf %12, %13 : vector<512x32xf32>
    %c0_13 = arith.constant 0 : index
    %c0_14 = arith.constant 0 : index
    %15 = vector.load %arg7[%c0_13, %c0_14] : memref<32x16xf32, #tpu.memory_space<vmem>>, vector<32x16xf32>
    %cst_15 = arith.constant dense<0.000000e+00> : vector<512x16xf32>
    %16 = tpu.matmul %14, %15, %cst_15 {dimension_numbers = #tpu.dot_dimension_numbers<[1], [0], [0], [1], [0, 0, 1, 1], [], []>} : vector<512x32xf32>, vector<32x16xf32>, vector<512x16xf32> -> vector<512x16xf32>
    %17 = arith.addf %7, %16 : vector<512x16xf32>
    %c0_16 = arith.constant 0 : index
    %c0_17 = arith.constant 0 : index
    %18 = vector.load %arg8[%c0_16, %c0_17] : memref<1x16xf32, #tpu.memory_space<vmem>>, vector<1x16xf32>
    %19 = vector.broadcast %18 : vector<1x16xf32> to vector<512x16xf32>
    %20 = arith.addf %17, %19 : vector<512x16xf32>
    %c0_18 = arith.constant 0 : index
    %c0_19 = arith.constant 0 : index
    %21 = vector.load %arg9[%c0_18, %c0_19] : memref<512x16xf32, #tpu.memory_space<vmem>>, vector<512x16xf32>
    tpu.vector_store %arg9[%c0_18, %c0_19], %20 {strides = array<i32>} : memref<512x16xf32, #tpu.memory_space<vmem>>, vector<512x16xf32>,
    return
  }
  func.func @transform_0(%arg0: i32) -> (i32, i32) {
    %c0_i32 = arith.constant 0 : i32
    %c0_i32_0 = arith.constant 0 : i32
    return %arg0, %c0_i32 : i32, i32
  }
  func.func @transform_1(%arg0: i32) -> (i32, i32) {
    %c0_i32 = arith.constant 0 : i32
    %c0_i32_0 = arith.constant 0 : i32
    return %arg0, %c0_i32 : i32, i32
  }
  func.func @transform_2(%arg0: i32) -> (i32, i32) {
    %c0_i32 = arith.constant 0 : i32
    %c0_i32_0 = arith.constant 0 : i32
    %c0_i32_1 = arith.constant 0 : i32
    return %c0_i32, %c0_i32_0 : i32, i32
  }
  func.func @transform_3(%arg0: i32) -> (i32, i32) {
    %c0_i32 = arith.constant 0 : i32
    %c0_i32_0 = arith.constant 0 : i32
    %c0_i32_1 = arith.constant 0 : i32
    return %c0_i32, %c0_i32_0 : i32, i32
  }
  func.func @transform_4(%arg0: i32) -> (i32, i32) {
    %c0_i32 = arith.constant 0 : i32
    %c0_i32_0 = arith.constant 0 : i32
    %c0_i32_1 = arith.constant 0 : i32
    return %c0_i32, %c0_i32_0 : i32, i32
  }
  func.func @transform_5(%arg0: i32) -> (i32, i32) {
    %c0_i32 = arith.constant 0 : i32
    %c0_i32_0 = arith.constant 0 : i32
    %c0_i32_1 = arith.constant 0 : i32
    return %c0_i32, %c0_i32_0 : i32, i32
  }
  func.func @transform_6(%arg0: i32) -> (i32, i32) {
    %c0_i32 = arith.constant 0 : i32
    %c0_i32_0 = arith.constant 0 : i32
    %c0_i32_1 = arith.constant 0 : i32
    return %c0_i32, %c0_i32_0 : i32, i32
  }
  func.func @transform_7(%arg0: i32) -> (i32, i32) {
    %c0_i32 = arith.constant 0 : i32
    %c0_i32_0 = arith.constant 0 : i32
    %c0_i32_1 = arith.constant 0 : i32
    return %c0_i32, %c0_i32_0 : i32, i32
  }
  func.func @transform_8(%arg0: i32) -> (i32, i32) {
    %c0_i32 = arith.constant 0 : i32
    %c0_i32_0 = arith.constant 0 : i32
    return %arg0, %c0_i32 : i32, i32
  }
}

module attributes {stable_mosaic.version = 11 : i64} {
  func.func @_linear_kernel(%arg0: i32, %arg1: memref<128x64xf32, #tpu.memory_space<vmem>>, %arg2: memref<64x32xf32, #tpu.memory_space<vmem>>, %arg3: memref<1x32xf32, #tpu.memory_space<vmem>>, %arg4: memref<128x32xf32, #tpu.memory_space<vmem>>) attributes {dimension_semantics = [#tpu.dimension_semantics<parallel>], iteration_bounds = array<i64: 1>, scalar_prefetch = 0 : i64, scratch_operands = 0 : i64, tpu.core_type = #tpu.core_type<tc>, window_params = [{transform_indices = @transform_0, window_bounds = array<i64: 128, 64>}, {pipeline_mode = #tpu.pipeline_mode<synchronous>, transform_indices = @transform_1, window_bounds = array<i64: 64, 32>}, {pipeline_mode = #tpu.pipeline_mode<synchronous>, transform_indices = @transform_2, window_bounds = array<i64: 1, 32>}, {transform_indices = @transform_3, window_bounds = array<i64: 128, 32>}]} {
    %c0 = arith.constant 0 : index
    %c0_0 = arith.constant 0 : index
    %0 = vector.load %arg1[%c0, %c0_0] : memref<128x64xf32, #tpu.memory_space<vmem>>, vector<128x64xf32>
    %c0_1 = arith.constant 0 : index
    %c0_2 = arith.constant 0 : index
    %1 = vector.load %arg2[%c0_1, %c0_2] : memref<64x32xf32, #tpu.memory_space<vmem>>, vector<64x32xf32>
    %cst = arith.constant dense<0.000000e+00> : vector<128x32xf32>
    %2 = tpu.matmul %0, %1, %cst {dimension_numbers = #tpu.dot_dimension_numbers<[1], [0], [0], [1], [0, 0, 1, 1], [], []>} : vector<128x64xf32>, vector<64x32xf32>, vector<128x32xf32> -> vector<128x32xf32>
    %c0_3 = arith.constant 0 : index
    %c0_4 = arith.constant 0 : index
    %3 = vector.load %arg3[%c0_3, %c0_4] : memref<1x32xf32, #tpu.memory_space<vmem>>, vector<1x32xf32>
    %4 = vector.broadcast %3 : vector<1x32xf32> to vector<128x32xf32>
    %5 = arith.addf %2, %4 : vector<128x32xf32>
    %c0_5 = arith.constant 0 : index
    %c0_6 = arith.constant 0 : index
    %6 = vector.load %arg4[%c0_5, %c0_6] : memref<128x32xf32, #tpu.memory_space<vmem>>, vector<128x32xf32>
    tpu.vector_store %arg4[%c0_5, %c0_6], %5 {strides = array<i32>} : memref<128x32xf32, #tpu.memory_space<vmem>>, vector<128x32xf32>,
    return
  }
  func.func @transform_0(%arg0: i32) -> (i32, i32) {
    %c0_i32 = arith.constant 0 : i32
    %c0_i32_0 = arith.constant 0 : i32
    return %arg0, %c0_i32 : i32, i32
  }
  func.func @transform_1(%arg0: i32) -> (i32, i32) {
    %c0_i32 = arith.constant 0 : i32
    %c0_i32_0 = arith.constant 0 : i32
    %c0_i32_1 = arith.constant 0 : i32
    return %c0_i32, %c0_i32_0 : i32, i32
  }
  func.func @transform_2(%arg0: i32) -> (i32, i32) {
    %c0_i32 = arith.constant 0 : i32
    %c0_i32_0 = arith.constant 0 : i32
    %c0_i32_1 = arith.constant 0 : i32
    return %c0_i32, %c0_i32_0 : i32, i32
  }
  func.func @transform_3(%arg0: i32) -> (i32, i32) {
    %c0_i32 = arith.constant 0 : i32
    %c0_i32_0 = arith.constant 0 : i32
    return %arg0, %c0_i32 : i32, i32
  }
}

module attributes {stable_mosaic.version = 11 : i64} {
  func.func @_linear_kernel(%arg0: i32, %arg1: memref<128x32xf32, #tpu.memory_space<vmem>>, %arg2: memref<32x64xf32, #tpu.memory_space<vmem>>, %arg3: memref<1x64xf32, #tpu.memory_space<vmem>>, %arg4: memref<128x64xf32, #tpu.memory_space<vmem>>) attributes {dimension_semantics = [#tpu.dimension_semantics<parallel>], iteration_bounds = array<i64: 1>, scalar_prefetch = 0 : i64, scratch_operands = 0 : i64, tpu.core_type = #tpu.core_type<tc>, window_params = [{transform_indices = @transform_0, window_bounds = array<i64: 128, 32>}, {pipeline_mode = #tpu.pipeline_mode<synchronous>, transform_indices = @transform_1, window_bounds = array<i64: 32, 64>}, {pipeline_mode = #tpu.pipeline_mode<synchronous>, transform_indices = @transform_2, window_bounds = array<i64: 1, 64>}, {transform_indices = @transform_3, window_bounds = array<i64: 128, 64>}]} {
    %c0 = arith.constant 0 : index
    %c0_0 = arith.constant 0 : index
    %0 = vector.load %arg1[%c0, %c0_0] : memref<128x32xf32, #tpu.memory_space<vmem>>, vector<128x32xf32>
    %c0_1 = arith.constant 0 : index
    %c0_2 = arith.constant 0 : index
    %1 = vector.load %arg2[%c0_1, %c0_2] : memref<32x64xf32, #tpu.memory_space<vmem>>, vector<32x64xf32>
    %cst = arith.constant dense<0.000000e+00> : vector<128x64xf32>
    %2 = tpu.matmul %0, %1, %cst {dimension_numbers = #tpu.dot_dimension_numbers<[1], [0], [0], [1], [0, 0, 1, 1], [], []>} : vector<128x32xf32>, vector<32x64xf32>, vector<128x64xf32> -> vector<128x64xf32>
    %c0_3 = arith.constant 0 : index
    %c0_4 = arith.constant 0 : index
    %3 = vector.load %arg3[%c0_3, %c0_4] : memref<1x64xf32, #tpu.memory_space<vmem>>, vector<1x64xf32>
    %4 = vector.broadcast %3 : vector<1x64xf32> to vector<128x64xf32>
    %5 = arith.addf %2, %4 : vector<128x64xf32>
    %cst_5 = arith.constant 0.000000e+00 : f32
    %6 = vector.broadcast %cst_5 : f32 to vector<128x64xf32>
    %7 = arith.maximumf %5, %6 : vector<128x64xf32>
    %c0_6 = arith.constant 0 : index
    %c0_7 = arith.constant 0 : index
    %8 = vector.load %arg4[%c0_6, %c0_7] : memref<128x64xf32, #tpu.memory_space<vmem>>, vector<128x64xf32>
    tpu.vector_store %arg4[%c0_6, %c0_7], %7 {strides = array<i32>} : memref<128x64xf32, #tpu.memory_space<vmem>>, vector<128x64xf32>,
    return
  }
  func.func @transform_0(%arg0: i32) -> (i32, i32) {
    %c0_i32 = arith.constant 0 : i32
    %c0_i32_0 = arith.constant 0 : i32
    return %arg0, %c0_i32 : i32, i32
  }
  func.func @transform_1(%arg0: i32) -> (i32, i32) {
    %c0_i32 = arith.constant 0 : i32
    %c0_i32_0 = arith.constant 0 : i32
    %c0_i32_1 = arith.constant 0 : i32
    return %c0_i32, %c0_i32_0 : i32, i32
  }
  func.func @transform_2(%arg0: i32) -> (i32, i32) {
    %c0_i32 = arith.constant 0 : i32
    %c0_i32_0 = arith.constant 0 : i32
    %c0_i32_1 = arith.constant 0 : i32
    return %c0_i32, %c0_i32_0 : i32, i32
  }
  func.func @transform_3(%arg0: i32) -> (i32, i32) {
    %c0_i32 = arith.constant 0 : i32
    %c0_i32_0 = arith.constant 0 : i32
    return %arg0, %c0_i32 : i32, i32
  }
}

module attributes {stable_mosaic.version = 11 : i64} {
  func.func @_dw3x3_se_kernel(%arg0: i32, %arg1: memref<1x10x10x64xf32, #tpu.memory_space<vmem>>, %arg2: memref<9x64xf32, #tpu.memory_space<vmem>>, %arg3: memref<1x64xf32, #tpu.memory_space<vmem>>, %arg4: memref<64x16xf32, #tpu.memory_space<vmem>>, %arg5: memref<16x64xf32, #tpu.memory_space<vmem>>, %arg6: memref<1x8x8x64xf32, #tpu.memory_space<vmem>>) attributes {dimension_semantics = [#tpu.dimension_semantics<parallel>], iteration_bounds = array<i64: 2>, scalar_prefetch = 0 : i64, scratch_operands = 0 : i64, tpu.core_type = #tpu.core_type<tc>, window_params = [{transform_indices = @transform_0, window_bounds = array<i64: 1, 10, 10, 64>}, {pipeline_mode = #tpu.pipeline_mode<synchronous>, transform_indices = @transform_1, window_bounds = array<i64: 9, 64>}, {pipeline_mode = #tpu.pipeline_mode<synchronous>, transform_indices = @transform_2, window_bounds = array<i64: 1, 64>}, {pipeline_mode = #tpu.pipeline_mode<synchronous>, transform_indices = @transform_3, window_bounds = array<i64: 64, 16>}, {pipeline_mode = #tpu.pipeline_mode<synchronous>, transform_indices = @transform_4, window_bounds = array<i64: 16, 64>}, {transform_indices = @transform_5, window_bounds = array<i64: 1, 8, 8, 64>}]} {
    %cst = arith.constant 0.000000e+00 : f32
    %0 = vector.broadcast %cst : f32 to vector<8x8x64xf32>
    %c0 = arith.constant 0 : index
    %c0_0 = arith.constant 0 : index
    %c0_1 = arith.constant 0 : index
    %c0_2 = arith.constant 0 : index
    %1 = vector.load %arg1[%c0, %c0_0, %c0_1, %c0_2] : memref<1x10x10x64xf32, #tpu.memory_space<vmem>>, vector<1x8x8x64xf32>
    %2 = vector.shape_cast %1 : vector<1x8x8x64xf32> to vector<8x8x64xf32>
    %c0_3 = arith.constant 0 : index
    %c0_4 = arith.constant 0 : index
    %3 = vector.load %arg2[%c0_3, %c0_4] : memref<9x64xf32, #tpu.memory_space<vmem>>, vector<1x64xf32>
    %4 = vector.shape_cast %3 : vector<1x64xf32> to vector<1x1x64xf32>
    %5 = vector.broadcast %4 : vector<1x1x64xf32> to vector<8x8x64xf32>
    %6 = arith.mulf %2, %5 : vector<8x8x64xf32>
    %7 = arith.addf %0, %6 : vector<8x8x64xf32>
    %c0_5 = arith.constant 0 : index
    %c0_6 = arith.constant 0 : index
    %c1 = arith.constant 1 : index
    %c0_7 = arith.constant 0 : index
    %8 = vector.load %arg1[%c0_5, %c0_6, %c1, %c0_7] : memref<1x10x10x64xf32, #tpu.memory_space<vmem>>, vector<1x8x8x64xf32>
    %9 = vector.shape_cast %8 : vector<1x8x8x64xf32> to vector<8x8x64xf32>
    %c1_8 = arith.constant 1 : index
    %c0_9 = arith.constant 0 : index
    %10 = vector.load %arg2[%c1_8, %c0_9] : memref<9x64xf32, #tpu.memory_space<vmem>>, vector<1x64xf32>
    %11 = vector.shape_cast %10 : vector<1x64xf32> to vector<1x1x64xf32>
    %12 = vector.broadcast %11 : vector<1x1x64xf32> to vector<8x8x64xf32>
    %13 = arith.mulf %9, %12 : vector<8x8x64xf32>
    %14 = arith.addf %7, %13 : vector<8x8x64xf32>
    %c0_10 = arith.constant 0 : index
    %c0_11 = arith.constant 0 : index
    %c2 = arith.constant 2 : index
    %c0_12 = arith.constant 0 : index
    %15 = vector.load %arg1[%c0_10, %c0_11, %c2, %c0_12] : memref<1x10x10x64xf32, #tpu.memory_space<vmem>>, vector<1x8x8x64xf32>
    %16 = vector.shape_cast %15 : vector<1x8x8x64xf32> to vector<8x8x64xf32>
    %c2_13 = arith.constant 2 : index
    %c0_14 = arith.constant 0 : index
    %17 = vector.load %arg2[%c2_13, %c0_14] : memref<9x64xf32, #tpu.memory_space<vmem>>, vector<1x64xf32>
    %18 = vector.shape_cast %17 : vector<1x64xf32> to vector<1x1x64xf32>
    %19 = vector.broadcast %18 : vector<1x1x64xf32> to vector<8x8x64xf32>
    %20 = arith.mulf %16, %19 : vector<8x8x64xf32>
    %21 = arith.addf %14, %20 : vector<8x8x64xf32>
    %c0_15 = arith.constant 0 : index
    %c1_16 = arith.constant 1 : index
    %c0_17 = arith.constant 0 : index
    %c0_18 = arith.constant 0 : index
    %22 = vector.load %arg1[%c0_15, %c1_16, %c0_17, %c0_18] : memref<1x10x10x64xf32, #tpu.memory_space<vmem>>, vector<1x8x8x64xf32>
    %23 = vector.shape_cast %22 : vector<1x8x8x64xf32> to vector<8x8x64xf32>
    %c3 = arith.constant 3 : index
    %c0_19 = arith.constant 0 : index
    %24 = vector.load %arg2[%c3, %c0_19] : memref<9x64xf32, #tpu.memory_space<vmem>>, vector<1x64xf32>
    %25 = vector.shape_cast %24 : vector<1x64xf32> to vector<1x1x64xf32>
    %26 = vector.broadcast %25 : vector<1x1x64xf32> to vector<8x8x64xf32>
    %27 = arith.mulf %23, %26 : vector<8x8x64xf32>
    %28 = arith.addf %21, %27 : vector<8x8x64xf32>
    %c0_20 = arith.constant 0 : index
    %c1_21 = arith.constant 1 : index
    %c1_22 = arith.constant 1 : index
    %c0_23 = arith.constant 0 : index
    %29 = vector.load %arg1[%c0_20, %c1_21, %c1_22, %c0_23] : memref<1x10x10x64xf32, #tpu.memory_space<vmem>>, vector<1x8x8x64xf32>
    %30 = vector.shape_cast %29 : vector<1x8x8x64xf32> to vector<8x8x64xf32>
    %c4 = arith.constant 4 : index
    %c0_24 = arith.constant 0 : index
    %31 = vector.load %arg2[%c4, %c0_24] : memref<9x64xf32, #tpu.memory_space<vmem>>, vector<1x64xf32>
    %32 = vector.shape_cast %31 : vector<1x64xf32> to vector<1x1x64xf32>
    %33 = vector.broadcast %32 : vector<1x1x64xf32> to vector<8x8x64xf32>
    %34 = arith.mulf %30, %33 : vector<8x8x64xf32>
    %35 = arith.addf %28, %34 : vector<8x8x64xf32>
    %c0_25 = arith.constant 0 : index
    %c1_26 = arith.constant 1 : index
    %c2_27 = arith.constant 2 : index
    %c0_28 = arith.constant 0 : index
    %36 = vector.load %arg1[%c0_25, %c1_26, %c2_27, %c0_28] : memref<1x10x10x64xf32, #tpu.memory_space<vmem>>, vector<1x8x8x64xf32>
    %37 = vector.shape_cast %36 : vector<1x8x8x64xf32> to vector<8x8x64xf32>
    %c5 = arith.constant 5 : index
    %c0_29 = arith.constant 0 : index
    %38 = vector.load %arg2[%c5, %c0_29] : memref<9x64xf32, #tpu.memory_space<vmem>>, vector<1x64xf32>
    %39 = vector.shape_cast %38 : vector<1x64xf32> to vector<1x1x64xf32>
    %40 = vector.broadcast %39 : vector<1x1x64xf32> to vector<8x8x64xf32>
    %41 = arith.mulf %37, %40 : vector<8x8x64xf32>
    %42 = arith.addf %35, %41 : vector<8x8x64xf32>
    %c0_30 = arith.constant 0 : index
    %c2_31 = arith.constant 2 : index
    %c0_32 = arith.constant 0 : index
    %c0_33 = arith.constant 0 : index
    %43 = vector.load %arg1[%c0_30, %c2_31, %c0_32, %c0_33] : memref<1x10x10x64xf32, #tpu.memory_space<vmem>>, vector<1x8x8x64xf32>
    %44 = vector.shape_cast %43 : vector<1x8x8x64xf32> to vector<8x8x64xf32>
    %c6 = arith.constant 6 : index
    %c0_34 = arith.constant 0 : index
    %45 = vector.load %arg2[%c6, %c0_34] : memref<9x64xf32, #tpu.memory_space<vmem>>, vector<1x64xf32>
    %46 = vector.shape_cast %45 : vector<1x64xf32> to vector<1x1x64xf32>
    %47 = vector.broadcast %46 : vector<1x1x64xf32> to vector<8x8x64xf32>
    %48 = arith.mulf %44, %47 : vector<8x8x64xf32>
    %49 = arith.addf %42, %48 : vector<8x8x64xf32>
    %c0_35 = arith.constant 0 : index
    %c2_36 = arith.constant 2 : index
    %c1_37 = arith.constant 1 : index
    %c0_38 = arith.constant 0 : index
    %50 = vector.load %arg1[%c0_35, %c2_36, %c1_37, %c0_38] : memref<1x10x10x64xf32, #tpu.memory_space<vmem>>, vector<1x8x8x64xf32>
    %51 = vector.shape_cast %50 : vector<1x8x8x64xf32> to vector<8x8x64xf32>
    %c7 = arith.constant 7 : index
    %c0_39 = arith.constant 0 : index
    %52 = vector.load %arg2[%c7, %c0_39] : memref<9x64xf32, #tpu.memory_space<vmem>>, vector<1x64xf32>
    %53 = vector.shape_cast %52 : vector<1x64xf32> to vector<1x1x64xf32>
    %54 = vector.broadcast %53 : vector<1x1x64xf32> to vector<8x8x64xf32>
    %55 = arith.mulf %51, %54 : vector<8x8x64xf32>
    %56 = arith.addf %49, %55 : vector<8x8x64xf32>
    %c0_40 = arith.constant 0 : index
    %c2_41 = arith.constant 2 : index
    %c2_42 = arith.constant 2 : index
    %c0_43 = arith.constant 0 : index
    %57 = vector.load %arg1[%c0_40, %c2_41, %c2_42, %c0_43] : memref<1x10x10x64xf32, #tpu.memory_space<vmem>>, vector<1x8x8x64xf32>
    %58 = vector.shape_cast %57 : vector<1x8x8x64xf32> to vector<8x8x64xf32>
    %c8 = arith.constant 8 : index
    %c0_44 = arith.constant 0 : index
    %59 = vector.load %arg2[%c8, %c0_44] : memref<9x64xf32, #tpu.memory_space<vmem>>, vector<1x64xf32>
    %60 = vector.shape_cast %59 : vector<1x64xf32> to vector<1x1x64xf32>
    %61 = vector.broadcast %60 : vector<1x1x64xf32> to vector<8x8x64xf32>
    %62 = arith.mulf %58, %61 : vector<8x8x64xf32>
    %63 = arith.addf %56, %62 : vector<8x8x64xf32>
    %c0_45 = arith.constant 0 : index
    %c0_46 = arith.constant 0 : index
    %64 = vector.load %arg3[%c0_45, %c0_46] : memref<1x64xf32, #tpu.memory_space<vmem>>, vector<1x64xf32>
    %65 = vector.shape_cast %64 : vector<1x64xf32> to vector<1x1x64xf32>
    %66 = vector.broadcast %65 : vector<1x1x64xf32> to vector<8x8x64xf32>
    %67 = arith.addf %63, %66 : vector<8x8x64xf32>
    %cst_47 = arith.constant 0.000000e+00 : f32
    %68 = vector.broadcast %cst_47 : f32 to vector<8x8x64xf32>
    %69 = arith.maximumf %67, %68 : vector<8x8x64xf32>
    %cst_48 = arith.constant dense<0.000000e+00> : vector<8x64xf32>
    %70 = vector.multi_reduction <add>, %69, %cst_48 [0] : vector<8x8x64xf32> to vector<8x64xf32>
    %cst_49 = arith.constant dense<0.000000e+00> : vector<64xf32>
    %71 = vector.multi_reduction <add>, %70, %cst_49 [0] : vector<8x64xf32> to vector<64xf32>
    %72 = vector.shape_cast %71 : vector<64xf32> to vector<1x64xf32>
    %cst_50 = arith.constant 1.562500e-02 : f32
    %73 = vector.broadcast %cst_50 : f32 to vector<1x64xf32>
    %74 = arith.mulf %72, %73 : vector<1x64xf32>
    %75 = vector.shape_cast %74 : vector<1x64xf32> to vector<1x64xf32>
    %76 = vector.broadcast %75 : vector<1x64xf32> to vector<8x64xf32>
    %c0_51 = arith.constant 0 : index
    %c0_52 = arith.constant 0 : index
    %77 = vector.load %arg4[%c0_51, %c0_52] : memref<64x16xf32, #tpu.memory_space<vmem>>, vector<64x16xf32>
    %cst_53 = arith.constant dense<0.000000e+00> : vector<8x16xf32>
    %78 = tpu.matmul %76, %77, %cst_53 {dimension_numbers = #tpu.dot_dimension_numbers<[1], [0], [0], [1], [0, 0, 1, 1], [], []>} : vector<8x64xf32>, vector<64x16xf32>, vector<8x16xf32> -> vector<8x16xf32>
    %cst_54 = arith.constant 0.000000e+00 : f32
    %79 = vector.broadcast %cst_54 : f32 to vector<8x16xf32>
    %80 = arith.maximumf %78, %79 : vector<8x16xf32>
    %c0_55 = arith.constant 0 : index
    %c0_56 = arith.constant 0 : index
    %81 = vector.load %arg5[%c0_55, %c0_56] : memref<16x64xf32, #tpu.memory_space<vmem>>, vector<16x64xf32>
    %cst_57 = arith.constant dense<0.000000e+00> : vector<8x64xf32>
    %82 = tpu.matmul %80, %81, %cst_57 {dimension_numbers = #tpu.dot_dimension_numbers<[1], [0], [0], [1], [0, 0, 1, 1], [], []>} : vector<8x16xf32>, vector<16x64xf32>, vector<8x64xf32> -> vector<8x64xf32>
    %cst_58 = arith.constant 3.000000e+00 : f32
    %83 = vector.broadcast %cst_58 : f32 to vector<8x64xf32>
    %84 = arith.addf %82, %83 : vector<8x64xf32>
    %cst_59 = arith.constant 0.000000e+00 : f32
    %85 = vector.broadcast %cst_59 : f32 to vector<8x64xf32>
    %86 = arith.maximumf %84, %85 : vector<8x64xf32>
    %cst_60 = arith.constant 6.000000e+00 : f32
    %87 = vector.broadcast %cst_60 : f32 to vector<8x64xf32>
    %88 = arith.minimumf %86, %87 : vector<8x64xf32>
    %cst_61 = arith.constant 0.166666672 : f32
    %89 = vector.broadcast %cst_61 : f32 to vector<8x64xf32>
    %90 = arith.mulf %88, %89 : vector<8x64xf32>
    %91 = vector.extract_strided_slice %90 {offsets = [0, 0], sizes = [1, 64], strides = [1, 1]} : vector<8x64xf32> to vector<1x64xf32>
    %92 = vector.shape_cast %91 : vector<1x64xf32> to vector<1x1x64xf32>
    %93 = vector.broadcast %92 : vector<1x1x64xf32> to vector<8x8x64xf32>
    %94 = arith.mulf %69, %93 : vector<8x8x64xf32>
    %c0_62 = arith.constant 0 : index
    %c0_63 = arith.constant 0 : index
    %c0_64 = arith.constant 0 : index
    %c0_65 = arith.constant 0 : index
    %95 = vector.load %arg6[%c0_62, %c0_63, %c0_64, %c0_65] : memref<1x8x8x64xf32, #tpu.memory_space<vmem>>, vector<1x8x8x64xf32>
    %96 = vector.shape_cast %95 : vector<1x8x8x64xf32> to vector<8x8x64xf32>
    %97 = vector.shape_cast %94 : vector<8x8x64xf32> to vector<1x8x8x64xf32>
    tpu.vector_store %arg6[%c0_62, %c0_63, %c0_64, %c0_65], %97 {strides = array<i32>} : memref<1x8x8x64xf32, #tpu.memory_space<vmem>>, vector<1x8x8x64xf32>,
    return
  }
  func.func @transform_0(%arg0: i32) -> (i32, i32, i32, i32) {
    %c0_i32 = arith.constant 0 : i32
    %c0_i32_0 = arith.constant 0 : i32
    %c0_i32_1 = arith.constant 0 : i32
    %c0_i32_2 = arith.constant 0 : i32
    return %arg0, %c0_i32, %c0_i32_0, %c0_i32_1 : i32, i32, i32, i32
  }
  func.func @transform_1(%arg0: i32) -> (i32, i32) {
    %c0_i32 = arith.constant 0 : i32
    %c0_i32_0 = arith.constant 0 : i32
    %c0_i32_1 = arith.constant 0 : i32
    return %c0_i32, %c0_i32_0 : i32, i32
  }
  func.func @transform_2(%arg0: i32) -> (i32, i32) {
    %c0_i32 = arith.constant 0 : i32
    %c0_i32_0 = arith.constant 0 : i32
    %c0_i32_1 = arith.constant 0 : i32
    return %c0_i32, %c0_i32_0 : i32, i32
  }
  func.func @transform_3(%arg0: i32) -> (i32, i32) {
    %c0_i32 = arith.constant 0 : i32
    %c0_i32_0 = arith.constant 0 : i32
    %c0_i32_1 = arith.constant 0 : i32
    return %c0_i32, %c0_i32_0 : i32, i32
  }
  func.func @transform_4(%arg0: i32) -> (i32, i32) {
    %c0_i32 = arith.constant 0 : i32
    %c0_i32_0 = arith.constant 0 : i32
    %c0_i32_1 = arith.constant 0 : i32
    return %c0_i32, %c0_i32_0 : i32, i32
  }
  func.func @transform_5(%arg0: i32) -> (i32, i32, i32, i32) {
    %c0_i32 = arith.constant 0 : i32
    %c0_i32_0 = arith.constant 0 : i32
    %c0_i32_1 = arith.constant 0 : i32
    %c0_i32_2 = arith.constant 0 : i32
    return %arg0, %c0_i32, %c0_i32_0, %c0_i32_1 : i32, i32, i32, i32
  }
}

module attributes {stable_mosaic.version = 11 : i64} {
  func.func @_block_tail_kernel(%arg0: i32, %arg1: memref<128x64xf32, #tpu.memory_space<vmem>>, %arg2: memref<128x32xf32, #tpu.memory_space<vmem>>, %arg3: memref<64x32xf32, #tpu.memory_space<vmem>>, %arg4: memref<1x32xf32, #tpu.memory_space<vmem>>, %arg5: memref<32x64xf32, #tpu.memory_space<vmem>>, %arg6: memref<1x64xf32, #tpu.memory_space<vmem>>, %arg7: memref<64x32xf32, #tpu.memory_space<vmem>>, %arg8: memref<1x32xf32, #tpu.memory_space<vmem>>, %arg9: memref<128x32xf32, #tpu.memory_space<vmem>>) attributes {dimension_semantics = [#tpu.dimension_semantics<parallel>], iteration_bounds = array<i64: 1>, scalar_prefetch = 0 : i64, scratch_operands = 0 : i64, tpu.core_type = #tpu.core_type<tc>, window_params = [{transform_indices = @transform_0, window_bounds = array<i64: 128, 64>}, {transform_indices = @transform_1, window_bounds = array<i64: 128, 32>}, {pipeline_mode = #tpu.pipeline_mode<synchronous>, transform_indices = @transform_2, window_bounds = array<i64: 64, 32>}, {pipeline_mode = #tpu.pipeline_mode<synchronous>, transform_indices = @transform_3, window_bounds = array<i64: 1, 32>}, {pipeline_mode = #tpu.pipeline_mode<synchronous>, transform_indices = @transform_4, window_bounds = array<i64: 32, 64>}, {pipeline_mode = #tpu.pipeline_mode<synchronous>, transform_indices = @transform_5, window_bounds = array<i64: 1, 64>}, {pipeline_mode = #tpu.pipeline_mode<synchronous>, transform_indices = @transform_6, window_bounds = array<i64: 64, 32>}, {pipeline_mode = #tpu.pipeline_mode<synchronous>, transform_indices = @transform_7, window_bounds = array<i64: 1, 32>}, {transform_indices = @transform_8, window_bounds = array<i64: 128, 32>}]} {
    %c0 = arith.constant 0 : index
    %c0_0 = arith.constant 0 : index
    %0 = vector.load %arg2[%c0, %c0_0] : memref<128x32xf32, #tpu.memory_space<vmem>>, vector<128x32xf32>
    %c0_1 = arith.constant 0 : index
    %c0_2 = arith.constant 0 : index
    %1 = vector.load %arg1[%c0_1, %c0_2] : memref<128x64xf32, #tpu.memory_space<vmem>>, vector<128x64xf32>
    %c0_3 = arith.constant 0 : index
    %c0_4 = arith.constant 0 : index
    %2 = vector.load %arg3[%c0_3, %c0_4] : memref<64x32xf32, #tpu.memory_space<vmem>>, vector<64x32xf32>
    %cst = arith.constant dense<0.000000e+00> : vector<128x32xf32>
    %3 = tpu.matmul %1, %2, %cst {dimension_numbers = #tpu.dot_dimension_numbers<[1], [0], [0], [1], [0, 0, 1, 1], [], []>} : vector<128x64xf32>, vector<64x32xf32>, vector<128x32xf32> -> vector<128x32xf32>
    %4 = arith.addf %0, %3 : vector<128x32xf32>
    %c0_5 = arith.constant 0 : index
    %c0_6 = arith.constant 0 : index
    %5 = vector.load %arg4[%c0_5, %c0_6] : memref<1x32xf32, #tpu.memory_space<vmem>>, vector<1x32xf32>
    %6 = vector.broadcast %5 : vector<1x32xf32> to vector<128x32xf32>
    %7 = arith.addf %4, %6 : vector<128x32xf32>
    %c0_7 = arith.constant 0 : index
    %c0_8 = arith.constant 0 : index
    %8 = vector.load %arg5[%c0_7, %c0_8] : memref<32x64xf32, #tpu.memory_space<vmem>>, vector<32x64xf32>
    %cst_9 = arith.constant dense<0.000000e+00> : vector<128x64xf32>
    %9 = tpu.matmul %7, %8, %cst_9 {dimension_numbers = #tpu.dot_dimension_numbers<[1], [0], [0], [1], [0, 0, 1, 1], [], []>} : vector<128x32xf32>, vector<32x64xf32>, vector<128x64xf32> -> vector<128x64xf32>
    %c0_10 = arith.constant 0 : index
    %c0_11 = arith.constant 0 : index
    %10 = vector.load %arg6[%c0_10, %c0_11] : memref<1x64xf32, #tpu.memory_space<vmem>>, vector<1x64xf32>
    %11 = vector.broadcast %10 : vector<1x64xf32> to vector<128x64xf32>
    %12 = arith.addf %9, %11 : vector<128x64xf32>
    %cst_12 = arith.constant 0.000000e+00 : f32
    %13 = vector.broadcast %cst_12 : f32 to vector<128x64xf32>
    %14 = arith.maximumf %12, %13 : vector<128x64xf32>
    %c0_13 = arith.constant 0 : index
    %c0_14 = arith.constant 0 : index
    %15 = vector.load %arg7[%c0_13, %c0_14] : memref<64x32xf32, #tpu.memory_space<vmem>>, vector<64x32xf32>
    %cst_15 = arith.constant dense<0.000000e+00> : vector<128x32xf32>
    %16 = tpu.matmul %14, %15, %cst_15 {dimension_numbers = #tpu.dot_dimension_numbers<[1], [0], [0], [1], [0, 0, 1, 1], [], []>} : vector<128x64xf32>, vector<64x32xf32>, vector<128x32xf32> -> vector<128x32xf32>
    %17 = arith.addf %7, %16 : vector<128x32xf32>
    %c0_16 = arith.constant 0 : index
    %c0_17 = arith.constant 0 : index
    %18 = vector.load %arg8[%c0_16, %c0_17] : memref<1x32xf32, #tpu.memory_space<vmem>>, vector<1x32xf32>
    %19 = vector.broadcast %18 : vector<1x32xf32> to vector<128x32xf32>
    %20 = arith.addf %17, %19 : vector<128x32xf32>
    %c0_18 = arith.constant 0 : index
    %c0_19 = arith.constant 0 : index
    %21 = vector.load %arg9[%c0_18, %c0_19] : memref<128x32xf32, #tpu.memory_space<vmem>>, vector<128x32xf32>
    tpu.vector_store %arg9[%c0_18, %c0_19], %20 {strides = array<i32>} : memref<128x32xf32, #tpu.memory_space<vmem>>, vector<128x32xf32>,
    return
  }
  func.func @transform_0(%arg0: i32) -> (i32, i32) {
    %c0_i32 = arith.constant 0 : i32
    %c0_i32_0 = arith.constant 0 : i32
    return %arg0, %c0_i32 : i32, i32
  }
  func.func @transform_1(%arg0: i32) -> (i32, i32) {
    %c0_i32 = arith.constant 0 : i32
    %c0_i32_0 = arith.constant 0 : i32
    return %arg0, %c0_i32 : i32, i32
  }
  func.func @transform_2(%arg0: i32) -> (i32, i32) {
    %c0_i32 = arith.constant 0 : i32
    %c0_i32_0 = arith.constant 0 : i32
    %c0_i32_1 = arith.constant 0 : i32
    return %c0_i32, %c0_i32_0 : i32, i32
  }
  func.func @transform_3(%arg0: i32) -> (i32, i32) {
    %c0_i32 = arith.constant 0 : i32
    %c0_i32_0 = arith.constant 0 : i32
    %c0_i32_1 = arith.constant 0 : i32
    return %c0_i32, %c0_i32_0 : i32, i32
  }
  func.func @transform_4(%arg0: i32) -> (i32, i32) {
    %c0_i32 = arith.constant 0 : i32
    %c0_i32_0 = arith.constant 0 : i32
    %c0_i32_1 = arith.constant 0 : i32
    return %c0_i32, %c0_i32_0 : i32, i32
  }
  func.func @transform_5(%arg0: i32) -> (i32, i32) {
    %c0_i32 = arith.constant 0 : i32
    %c0_i32_0 = arith.constant 0 : i32
    %c0_i32_1 = arith.constant 0 : i32
    return %c0_i32, %c0_i32_0 : i32, i32
  }
  func.func @transform_6(%arg0: i32) -> (i32, i32) {
    %c0_i32 = arith.constant 0 : i32
    %c0_i32_0 = arith.constant 0 : i32
    %c0_i32_1 = arith.constant 0 : i32
    return %c0_i32, %c0_i32_0 : i32, i32
  }
  func.func @transform_7(%arg0: i32) -> (i32, i32) {
    %c0_i32 = arith.constant 0 : i32
    %c0_i32_0 = arith.constant 0 : i32
    %c0_i32_1 = arith.constant 0 : i32
    return %c0_i32, %c0_i32_0 : i32, i32
  }
  func.func @transform_8(%arg0: i32) -> (i32, i32) {
    %c0_i32 = arith.constant 0 : i32
    %c0_i32_0 = arith.constant 0 : i32
    return %arg0, %c0_i32 : i32, i32
  }
}

module attributes {stable_mosaic.version = 11 : i64} {
  func.func @_linear_kernel(%arg0: i32, %arg1: memref<32x128xf32, #tpu.memory_space<vmem>>, %arg2: memref<128x64xf32, #tpu.memory_space<vmem>>, %arg3: memref<1x64xf32, #tpu.memory_space<vmem>>, %arg4: memref<32x64xf32, #tpu.memory_space<vmem>>) attributes {dimension_semantics = [#tpu.dimension_semantics<parallel>], iteration_bounds = array<i64: 1>, scalar_prefetch = 0 : i64, scratch_operands = 0 : i64, tpu.core_type = #tpu.core_type<tc>, window_params = [{transform_indices = @transform_0, window_bounds = array<i64: 32, 128>}, {pipeline_mode = #tpu.pipeline_mode<synchronous>, transform_indices = @transform_1, window_bounds = array<i64: 128, 64>}, {pipeline_mode = #tpu.pipeline_mode<synchronous>, transform_indices = @transform_2, window_bounds = array<i64: 1, 64>}, {transform_indices = @transform_3, window_bounds = array<i64: 32, 64>}]} {
    %c0 = arith.constant 0 : index
    %c0_0 = arith.constant 0 : index
    %0 = vector.load %arg1[%c0, %c0_0] : memref<32x128xf32, #tpu.memory_space<vmem>>, vector<32x128xf32>
    %c0_1 = arith.constant 0 : index
    %c0_2 = arith.constant 0 : index
    %1 = vector.load %arg2[%c0_1, %c0_2] : memref<128x64xf32, #tpu.memory_space<vmem>>, vector<128x64xf32>
    %cst = arith.constant dense<0.000000e+00> : vector<32x64xf32>
    %2 = tpu.matmul %0, %1, %cst {dimension_numbers = #tpu.dot_dimension_numbers<[1], [0], [0], [1], [0, 0, 1, 1], [], []>} : vector<32x128xf32>, vector<128x64xf32>, vector<32x64xf32> -> vector<32x64xf32>
    %c0_3 = arith.constant 0 : index
    %c0_4 = arith.constant 0 : index
    %3 = vector.load %arg3[%c0_3, %c0_4] : memref<1x64xf32, #tpu.memory_space<vmem>>, vector<1x64xf32>
    %4 = vector.broadcast %3 : vector<1x64xf32> to vector<32x64xf32>
    %5 = arith.addf %2, %4 : vector<32x64xf32>
    %c0_5 = arith.constant 0 : index
    %c0_6 = arith.constant 0 : index
    %6 = vector.load %arg4[%c0_5, %c0_6] : memref<32x64xf32, #tpu.memory_space<vmem>>, vector<32x64xf32>
    tpu.vector_store %arg4[%c0_5, %c0_6], %5 {strides = array<i32>} : memref<32x64xf32, #tpu.memory_space<vmem>>, vector<32x64xf32>,
    return
  }
  func.func @transform_0(%arg0: i32) -> (i32, i32) {
    %c0_i32 = arith.constant 0 : i32
    %c0_i32_0 = arith.constant 0 : i32
    return %arg0, %c0_i32 : i32, i32
  }
  func.func @transform_1(%arg0: i32) -> (i32, i32) {
    %c0_i32 = arith.constant 0 : i32
    %c0_i32_0 = arith.constant 0 : i32
    %c0_i32_1 = arith.constant 0 : i32
    return %c0_i32, %c0_i32_0 : i32, i32
  }
  func.func @transform_2(%arg0: i32) -> (i32, i32) {
    %c0_i32 = arith.constant 0 : i32
    %c0_i32_0 = arith.constant 0 : i32
    %c0_i32_1 = arith.constant 0 : i32
    return %c0_i32, %c0_i32_0 : i32, i32
  }
  func.func @transform_3(%arg0: i32) -> (i32, i32) {
    %c0_i32 = arith.constant 0 : i32
    %c0_i32_0 = arith.constant 0 : i32
    return %arg0, %c0_i32 : i32, i32
  }
}

module attributes {stable_mosaic.version = 11 : i64} {
  func.func @_linear_kernel(%arg0: i32, %arg1: memref<32x64xf32, #tpu.memory_space<vmem>>, %arg2: memref<64x128xf32, #tpu.memory_space<vmem>>, %arg3: memref<1x128xf32, #tpu.memory_space<vmem>>, %arg4: memref<32x128xf32, #tpu.memory_space<vmem>>) attributes {dimension_semantics = [#tpu.dimension_semantics<parallel>], iteration_bounds = array<i64: 1>, scalar_prefetch = 0 : i64, scratch_operands = 0 : i64, tpu.core_type = #tpu.core_type<tc>, window_params = [{transform_indices = @transform_0, window_bounds = array<i64: 32, 64>}, {pipeline_mode = #tpu.pipeline_mode<synchronous>, transform_indices = @transform_1, window_bounds = array<i64: 64, 128>}, {pipeline_mode = #tpu.pipeline_mode<synchronous>, transform_indices = @transform_2, window_bounds = array<i64: 1, 128>}, {transform_indices = @transform_3, window_bounds = array<i64: 32, 128>}]} {
    %c0 = arith.constant 0 : index
    %c0_0 = arith.constant 0 : index
    %0 = vector.load %arg1[%c0, %c0_0] : memref<32x64xf32, #tpu.memory_space<vmem>>, vector<32x64xf32>
    %c0_1 = arith.constant 0 : index
    %c0_2 = arith.constant 0 : index
    %1 = vector.load %arg2[%c0_1, %c0_2] : memref<64x128xf32, #tpu.memory_space<vmem>>, vector<64x128xf32>
    %cst = arith.constant dense<0.000000e+00> : vector<32x128xf32>
    %2 = tpu.matmul %0, %1, %cst {dimension_numbers = #tpu.dot_dimension_numbers<[1], [0], [0], [1], [0, 0, 1, 1], [], []>} : vector<32x64xf32>, vector<64x128xf32>, vector<32x128xf32> -> vector<32x128xf32>
    %c0_3 = arith.constant 0 : index
    %c0_4 = arith.constant 0 : index
    %3 = vector.load %arg3[%c0_3, %c0_4] : memref<1x128xf32, #tpu.memory_space<vmem>>, vector<1x128xf32>
    %4 = vector.broadcast %3 : vector<1x128xf32> to vector<32x128xf32>
    %5 = arith.addf %2, %4 : vector<32x128xf32>
    %cst_5 = arith.constant 0.000000e+00 : f32
    %6 = vector.broadcast %cst_5 : f32 to vector<32x128xf32>
    %7 = arith.maximumf %5, %6 : vector<32x128xf32>
    %c0_6 = arith.constant 0 : index
    %c0_7 = arith.constant 0 : index
    %8 = vector.load %arg4[%c0_6, %c0_7] : memref<32x128xf32, #tpu.memory_space<vmem>>, vector<32x128xf32>
    tpu.vector_store %arg4[%c0_6, %c0_7], %7 {strides = array<i32>} : memref<32x128xf32, #tpu.memory_space<vmem>>, vector<32x128xf32>,
    return
  }
  func.func @transform_0(%arg0: i32) -> (i32, i32) {
    %c0_i32 = arith.constant 0 : i32
    %c0_i32_0 = arith.constant 0 : i32
    return %arg0, %c0_i32 : i32, i32
  }
  func.func @transform_1(%arg0: i32) -> (i32, i32) {
    %c0_i32 = arith.constant 0 : i32
    %c0_i32_0 = arith.constant 0 : i32
    %c0_i32_1 = arith.constant 0 : i32
    return %c0_i32, %c0_i32_0 : i32, i32
  }
  func.func @transform_2(%arg0: i32) -> (i32, i32) {
    %c0_i32 = arith.constant 0 : i32
    %c0_i32_0 = arith.constant 0 : i32
    %c0_i32_1 = arith.constant 0 : i32
    return %c0_i32, %c0_i32_0 : i32, i32
  }
  func.func @transform_3(%arg0: i32) -> (i32, i32) {
    %c0_i32 = arith.constant 0 : i32
    %c0_i32_0 = arith.constant 0 : i32
    return %arg0, %c0_i32 : i32, i32
  }
}

module attributes {stable_mosaic.version = 11 : i64} {
  func.func @_block_tail_kernel(%arg0: i32, %arg1: memref<32x128xf32, #tpu.memory_space<vmem>>, %arg2: memref<32x64xf32, #tpu.memory_space<vmem>>, %arg3: memref<128x64xf32, #tpu.memory_space<vmem>>, %arg4: memref<1x64xf32, #tpu.memory_space<vmem>>, %arg5: memref<64x128xf32, #tpu.memory_space<vmem>>, %arg6: memref<1x128xf32, #tpu.memory_space<vmem>>, %arg7: memref<128x64xf32, #tpu.memory_space<vmem>>, %arg8: memref<1x64xf32, #tpu.memory_space<vmem>>, %arg9: memref<32x64xf32, #tpu.memory_space<vmem>>) attributes {dimension_semantics = [#tpu.dimension_semantics<parallel>], iteration_bounds = array<i64: 1>, scalar_prefetch = 0 : i64, scratch_operands = 0 : i64, tpu.core_type = #tpu.core_type<tc>, window_params = [{transform_indices = @transform_0, window_bounds = array<i64: 32, 128>}, {transform_indices = @transform_1, window_bounds = array<i64: 32, 64>}, {pipeline_mode = #tpu.pipeline_mode<synchronous>, transform_indices = @transform_2, window_bounds = array<i64: 128, 64>}, {pipeline_mode = #tpu.pipeline_mode<synchronous>, transform_indices = @transform_3, window_bounds = array<i64: 1, 64>}, {pipeline_mode = #tpu.pipeline_mode<synchronous>, transform_indices = @transform_4, window_bounds = array<i64: 64, 128>}, {pipeline_mode = #tpu.pipeline_mode<synchronous>, transform_indices = @transform_5, window_bounds = array<i64: 1, 128>}, {pipeline_mode = #tpu.pipeline_mode<synchronous>, transform_indices = @transform_6, window_bounds = array<i64: 128, 64>}, {pipeline_mode = #tpu.pipeline_mode<synchronous>, transform_indices = @transform_7, window_bounds = array<i64: 1, 64>}, {transform_indices = @transform_8, window_bounds = array<i64: 32, 64>}]} {
    %c0 = arith.constant 0 : index
    %c0_0 = arith.constant 0 : index
    %0 = vector.load %arg2[%c0, %c0_0] : memref<32x64xf32, #tpu.memory_space<vmem>>, vector<32x64xf32>
    %c0_1 = arith.constant 0 : index
    %c0_2 = arith.constant 0 : index
    %1 = vector.load %arg1[%c0_1, %c0_2] : memref<32x128xf32, #tpu.memory_space<vmem>>, vector<32x128xf32>
    %c0_3 = arith.constant 0 : index
    %c0_4 = arith.constant 0 : index
    %2 = vector.load %arg3[%c0_3, %c0_4] : memref<128x64xf32, #tpu.memory_space<vmem>>, vector<128x64xf32>
    %cst = arith.constant dense<0.000000e+00> : vector<32x64xf32>
    %3 = tpu.matmul %1, %2, %cst {dimension_numbers = #tpu.dot_dimension_numbers<[1], [0], [0], [1], [0, 0, 1, 1], [], []>} : vector<32x128xf32>, vector<128x64xf32>, vector<32x64xf32> -> vector<32x64xf32>
    %4 = arith.addf %0, %3 : vector<32x64xf32>
    %c0_5 = arith.constant 0 : index
    %c0_6 = arith.constant 0 : index
    %5 = vector.load %arg4[%c0_5, %c0_6] : memref<1x64xf32, #tpu.memory_space<vmem>>, vector<1x64xf32>
    %6 = vector.broadcast %5 : vector<1x64xf32> to vector<32x64xf32>
    %7 = arith.addf %4, %6 : vector<32x64xf32>
    %c0_7 = arith.constant 0 : index
    %c0_8 = arith.constant 0 : index
    %8 = vector.load %arg5[%c0_7, %c0_8] : memref<64x128xf32, #tpu.memory_space<vmem>>, vector<64x128xf32>
    %cst_9 = arith.constant dense<0.000000e+00> : vector<32x128xf32>
    %9 = tpu.matmul %7, %8, %cst_9 {dimension_numbers = #tpu.dot_dimension_numbers<[1], [0], [0], [1], [0, 0, 1, 1], [], []>} : vector<32x64xf32>, vector<64x128xf32>, vector<32x128xf32> -> vector<32x128xf32>
    %c0_10 = arith.constant 0 : index
    %c0_11 = arith.constant 0 : index
    %10 = vector.load %arg6[%c0_10, %c0_11] : memref<1x128xf32, #tpu.memory_space<vmem>>, vector<1x128xf32>
    %11 = vector.broadcast %10 : vector<1x128xf32> to vector<32x128xf32>
    %12 = arith.addf %9, %11 : vector<32x128xf32>
    %cst_12 = arith.constant 0.000000e+00 : f32
    %13 = vector.broadcast %cst_12 : f32 to vector<32x128xf32>
    %14 = arith.maximumf %12, %13 : vector<32x128xf32>
    %c0_13 = arith.constant 0 : index
    %c0_14 = arith.constant 0 : index
    %15 = vector.load %arg7[%c0_13, %c0_14] : memref<128x64xf32, #tpu.memory_space<vmem>>, vector<128x64xf32>
    %cst_15 = arith.constant dense<0.000000e+00> : vector<32x64xf32>
    %16 = tpu.matmul %14, %15, %cst_15 {dimension_numbers = #tpu.dot_dimension_numbers<[1], [0], [0], [1], [0, 0, 1, 1], [], []>} : vector<32x128xf32>, vector<128x64xf32>, vector<32x64xf32> -> vector<32x64xf32>
    %17 = arith.addf %7, %16 : vector<32x64xf32>
    %c0_16 = arith.constant 0 : index
    %c0_17 = arith.constant 0 : index
    %18 = vector.load %arg8[%c0_16, %c0_17] : memref<1x64xf32, #tpu.memory_space<vmem>>, vector<1x64xf32>
    %19 = vector.broadcast %18 : vector<1x64xf32> to vector<32x64xf32>
    %20 = arith.addf %17, %19 : vector<32x64xf32>
    %c0_18 = arith.constant 0 : index
    %c0_19 = arith.constant 0 : index
    %21 = vector.load %arg9[%c0_18, %c0_19] : memref<32x64xf32, #tpu.memory_space<vmem>>, vector<32x64xf32>
    tpu.vector_store %arg9[%c0_18, %c0_19], %20 {strides = array<i32>} : memref<32x64xf32, #tpu.memory_space<vmem>>, vector<32x64xf32>,
    return
  }
  func.func @transform_0(%arg0: i32) -> (i32, i32) {
    %c0_i32 = arith.constant 0 : i32
    %c0_i32_0 = arith.constant 0 : i32
    return %arg0, %c0_i32 : i32, i32
  }
  func.func @transform_1(%arg0: i32) -> (i32, i32) {
    %c0_i32 = arith.constant 0 : i32
    %c0_i32_0 = arith.constant 0 : i32
    return %arg0, %c0_i32 : i32, i32
  }
  func.func @transform_2(%arg0: i32) -> (i32, i32) {
    %c0_i32 = arith.constant 0 : i32
    %c0_i32_0 = arith.constant 0 : i32
    %c0_i32_1 = arith.constant 0 : i32
    return %c0_i32, %c0_i32_0 : i32, i32
  }
  func.func @transform_3(%arg0: i32) -> (i32, i32) {
    %c0_i32 = arith.constant 0 : i32
    %c0_i32_0 = arith.constant 0 : i32
    %c0_i32_1 = arith.constant 0 : i32
    return %c0_i32, %c0_i32_0 : i32, i32
  }
  func.func @transform_4(%arg0: i32) -> (i32, i32) {
    %c0_i32 = arith.constant 0 : i32
    %c0_i32_0 = arith.constant 0 : i32
    %c0_i32_1 = arith.constant 0 : i32
    return %c0_i32, %c0_i32_0 : i32, i32
  }
  func.func @transform_5(%arg0: i32) -> (i32, i32) {
    %c0_i32 = arith.constant 0 : i32
    %c0_i32_0 = arith.constant 0 : i32
    %c0_i32_1 = arith.constant 0 : i32
    return %c0_i32, %c0_i32_0 : i32, i32
  }
  func.func @transform_6(%arg0: i32) -> (i32, i32) {
    %c0_i32 = arith.constant 0 : i32
    %c0_i32_0 = arith.constant 0 : i32
    %c0_i32_1 = arith.constant 0 : i32
    return %c0_i32, %c0_i32_0 : i32, i32
  }
  func.func @transform_7(%arg0: i32) -> (i32, i32) {
    %c0_i32 = arith.constant 0 : i32
    %c0_i32_0 = arith.constant 0 : i32
    %c0_i32_1 = arith.constant 0 : i32
    return %c0_i32, %c0_i32_0 : i32, i32
  }
  func.func @transform_8(%arg0: i32) -> (i32, i32) {
    %c0_i32 = arith.constant 0 : i32
    %c0_i32_0 = arith.constant 0 : i32
    return %arg0, %c0_i32 : i32, i32
  }
}

module attributes {stable_mosaic.version = 11 : i64} {
  func.func @_dw3x3_se_kernel(%arg0: i32, %arg1: memref<1x6x6x128xf32, #tpu.memory_space<vmem>>, %arg2: memref<9x128xf32, #tpu.memory_space<vmem>>, %arg3: memref<1x128xf32, #tpu.memory_space<vmem>>, %arg4: memref<128x32xf32, #tpu.memory_space<vmem>>, %arg5: memref<32x128xf32, #tpu.memory_space<vmem>>, %arg6: memref<1x4x4x128xf32, #tpu.memory_space<vmem>>) attributes {dimension_semantics = [#tpu.dimension_semantics<parallel>], iteration_bounds = array<i64: 2>, scalar_prefetch = 0 : i64, scratch_operands = 0 : i64, tpu.core_type = #tpu.core_type<tc>, window_params = [{transform_indices = @transform_0, window_bounds = array<i64: 1, 6, 6, 128>}, {pipeline_mode = #tpu.pipeline_mode<synchronous>, transform_indices = @transform_1, window_bounds = array<i64: 9, 128>}, {pipeline_mode = #tpu.pipeline_mode<synchronous>, transform_indices = @transform_2, window_bounds = array<i64: 1, 128>}, {pipeline_mode = #tpu.pipeline_mode<synchronous>, transform_indices = @transform_3, window_bounds = array<i64: 128, 32>}, {pipeline_mode = #tpu.pipeline_mode<synchronous>, transform_indices = @transform_4, window_bounds = array<i64: 32, 128>}, {transform_indices = @transform_5, window_bounds = array<i64: 1, 4, 4, 128>}]} {
    %cst = arith.constant 0.000000e+00 : f32
    %0 = vector.broadcast %cst : f32 to vector<4x4x128xf32>
    %c0 = arith.constant 0 : index
    %c0_0 = arith.constant 0 : index
    %c0_1 = arith.constant 0 : index
    %c0_2 = arith.constant 0 : index
    %1 = vector.load %arg1[%c0, %c0_0, %c0_1, %c0_2] : memref<1x6x6x128xf32, #tpu.memory_space<vmem>>, vector<1x4x4x128xf32>
    %2 = vector.shape_cast %1 : vector<1x4x4x128xf32> to vector<4x4x128xf32>
    %c0_3 = arith.constant 0 : index
    %c0_4 = arith.constant 0 : index
    %3 = vector.load %arg2[%c0_3, %c0_4] : memref<9x128xf32, #tpu.memory_space<vmem>>, vector<1x128xf32>
    %4 = vector.shape_cast %3 : vector<1x128xf32> to vector<1x1x128xf32>
    %5 = vector.broadcast %4 : vector<1x1x128xf32> to vector<4x4x128xf32>
    %6 = arith.mulf %2, %5 : vector<4x4x128xf32>
    %7 = arith.addf %0, %6 : vector<4x4x128xf32>
    %c0_5 = arith.constant 0 : index
    %c0_6 = arith.constant 0 : index
    %c1 = arith.constant 1 : index
    %c0_7 = arith.constant 0 : index
    %8 = vector.load %arg1[%c0_5, %c0_6, %c1, %c0_7] : memref<1x6x6x128xf32, #tpu.memory_space<vmem>>, vector<1x4x4x128xf32>
    %9 = vector.shape_cast %8 : vector<1x4x4x128xf32> to vector<4x4x128xf32>
    %c1_8 = arith.constant 1 : index
    %c0_9 = arith.constant 0 : index
    %10 = vector.load %arg2[%c1_8, %c0_9] : memref<9x128xf32, #tpu.memory_space<vmem>>, vector<1x128xf32>
    %11 = vector.shape_cast %10 : vector<1x128xf32> to vector<1x1x128xf32>
    %12 = vector.broadcast %11 : vector<1x1x128xf32> to vector<4x4x128xf32>
    %13 = arith.mulf %9, %12 : vector<4x4x128xf32>
    %14 = arith.addf %7, %13 : vector<4x4x128xf32>
    %c0_10 = arith.constant 0 : index
    %c0_11 = arith.constant 0 : index
    %c2 = arith.constant 2 : index
    %c0_12 = arith.constant 0 : index
    %15 = vector.load %arg1[%c0_10, %c0_11, %c2, %c0_12] : memref<1x6x6x128xf32, #tpu.memory_space<vmem>>, vector<1x4x4x128xf32>
    %16 = vector.shape_cast %15 : vector<1x4x4x128xf32> to vector<4x4x128xf32>
    %c2_13 = arith.constant 2 : index
    %c0_14 = arith.constant 0 : index
    %17 = vector.load %arg2[%c2_13, %c0_14] : memref<9x128xf32, #tpu.memory_space<vmem>>, vector<1x128xf32>
    %18 = vector.shape_cast %17 : vector<1x128xf32> to vector<1x1x128xf32>
    %19 = vector.broadcast %18 : vector<1x1x128xf32> to vector<4x4x128xf32>
    %20 = arith.mulf %16, %19 : vector<4x4x128xf32>
    %21 = arith.addf %14, %20 : vector<4x4x128xf32>
    %c0_15 = arith.constant 0 : index
    %c1_16 = arith.constant 1 : index
    %c0_17 = arith.constant 0 : index
    %c0_18 = arith.constant 0 : index
    %22 = vector.load %arg1[%c0_15, %c1_16, %c0_17, %c0_18] : memref<1x6x6x128xf32, #tpu.memory_space<vmem>>, vector<1x4x4x128xf32>
    %23 = vector.shape_cast %22 : vector<1x4x4x128xf32> to vector<4x4x128xf32>
    %c3 = arith.constant 3 : index
    %c0_19 = arith.constant 0 : index
    %24 = vector.load %arg2[%c3, %c0_19] : memref<9x128xf32, #tpu.memory_space<vmem>>, vector<1x128xf32>
    %25 = vector.shape_cast %24 : vector<1x128xf32> to vector<1x1x128xf32>
    %26 = vector.broadcast %25 : vector<1x1x128xf32> to vector<4x4x128xf32>
    %27 = arith.mulf %23, %26 : vector<4x4x128xf32>
    %28 = arith.addf %21, %27 : vector<4x4x128xf32>
    %c0_20 = arith.constant 0 : index
    %c1_21 = arith.constant 1 : index
    %c1_22 = arith.constant 1 : index
    %c0_23 = arith.constant 0 : index
    %29 = vector.load %arg1[%c0_20, %c1_21, %c1_22, %c0_23] : memref<1x6x6x128xf32, #tpu.memory_space<vmem>>, vector<1x4x4x128xf32>
    %30 = vector.shape_cast %29 : vector<1x4x4x128xf32> to vector<4x4x128xf32>
    %c4 = arith.constant 4 : index
    %c0_24 = arith.constant 0 : index
    %31 = vector.load %arg2[%c4, %c0_24] : memref<9x128xf32, #tpu.memory_space<vmem>>, vector<1x128xf32>
    %32 = vector.shape_cast %31 : vector<1x128xf32> to vector<1x1x128xf32>
    %33 = vector.broadcast %32 : vector<1x1x128xf32> to vector<4x4x128xf32>
    %34 = arith.mulf %30, %33 : vector<4x4x128xf32>
    %35 = arith.addf %28, %34 : vector<4x4x128xf32>
    %c0_25 = arith.constant 0 : index
    %c1_26 = arith.constant 1 : index
    %c2_27 = arith.constant 2 : index
    %c0_28 = arith.constant 0 : index
    %36 = vector.load %arg1[%c0_25, %c1_26, %c2_27, %c0_28] : memref<1x6x6x128xf32, #tpu.memory_space<vmem>>, vector<1x4x4x128xf32>
    %37 = vector.shape_cast %36 : vector<1x4x4x128xf32> to vector<4x4x128xf32>
    %c5 = arith.constant 5 : index
    %c0_29 = arith.constant 0 : index
    %38 = vector.load %arg2[%c5, %c0_29] : memref<9x128xf32, #tpu.memory_space<vmem>>, vector<1x128xf32>
    %39 = vector.shape_cast %38 : vector<1x128xf32> to vector<1x1x128xf32>
    %40 = vector.broadcast %39 : vector<1x1x128xf32> to vector<4x4x128xf32>
    %41 = arith.mulf %37, %40 : vector<4x4x128xf32>
    %42 = arith.addf %35, %41 : vector<4x4x128xf32>
    %c0_30 = arith.constant 0 : index
    %c2_31 = arith.constant 2 : index
    %c0_32 = arith.constant 0 : index
    %c0_33 = arith.constant 0 : index
    %43 = vector.load %arg1[%c0_30, %c2_31, %c0_32, %c0_33] : memref<1x6x6x128xf32, #tpu.memory_space<vmem>>, vector<1x4x4x128xf32>
    %44 = vector.shape_cast %43 : vector<1x4x4x128xf32> to vector<4x4x128xf32>
    %c6 = arith.constant 6 : index
    %c0_34 = arith.constant 0 : index
    %45 = vector.load %arg2[%c6, %c0_34] : memref<9x128xf32, #tpu.memory_space<vmem>>, vector<1x128xf32>
    %46 = vector.shape_cast %45 : vector<1x128xf32> to vector<1x1x128xf32>
    %47 = vector.broadcast %46 : vector<1x1x128xf32> to vector<4x4x128xf32>
    %48 = arith.mulf %44, %47 : vector<4x4x128xf32>
    %49 = arith.addf %42, %48 : vector<4x4x128xf32>
    %c0_35 = arith.constant 0 : index
    %c2_36 = arith.constant 2 : index
    %c1_37 = arith.constant 1 : index
    %c0_38 = arith.constant 0 : index
    %50 = vector.load %arg1[%c0_35, %c2_36, %c1_37, %c0_38] : memref<1x6x6x128xf32, #tpu.memory_space<vmem>>, vector<1x4x4x128xf32>
    %51 = vector.shape_cast %50 : vector<1x4x4x128xf32> to vector<4x4x128xf32>
    %c7 = arith.constant 7 : index
    %c0_39 = arith.constant 0 : index
    %52 = vector.load %arg2[%c7, %c0_39] : memref<9x128xf32, #tpu.memory_space<vmem>>, vector<1x128xf32>
    %53 = vector.shape_cast %52 : vector<1x128xf32> to vector<1x1x128xf32>
    %54 = vector.broadcast %53 : vector<1x1x128xf32> to vector<4x4x128xf32>
    %55 = arith.mulf %51, %54 : vector<4x4x128xf32>
    %56 = arith.addf %49, %55 : vector<4x4x128xf32>
    %c0_40 = arith.constant 0 : index
    %c2_41 = arith.constant 2 : index
    %c2_42 = arith.constant 2 : index
    %c0_43 = arith.constant 0 : index
    %57 = vector.load %arg1[%c0_40, %c2_41, %c2_42, %c0_43] : memref<1x6x6x128xf32, #tpu.memory_space<vmem>>, vector<1x4x4x128xf32>
    %58 = vector.shape_cast %57 : vector<1x4x4x128xf32> to vector<4x4x128xf32>
    %c8 = arith.constant 8 : index
    %c0_44 = arith.constant 0 : index
    %59 = vector.load %arg2[%c8, %c0_44] : memref<9x128xf32, #tpu.memory_space<vmem>>, vector<1x128xf32>
    %60 = vector.shape_cast %59 : vector<1x128xf32> to vector<1x1x128xf32>
    %61 = vector.broadcast %60 : vector<1x1x128xf32> to vector<4x4x128xf32>
    %62 = arith.mulf %58, %61 : vector<4x4x128xf32>
    %63 = arith.addf %56, %62 : vector<4x4x128xf32>
    %c0_45 = arith.constant 0 : index
    %c0_46 = arith.constant 0 : index
    %64 = vector.load %arg3[%c0_45, %c0_46] : memref<1x128xf32, #tpu.memory_space<vmem>>, vector<1x128xf32>
    %65 = vector.shape_cast %64 : vector<1x128xf32> to vector<1x1x128xf32>
    %66 = vector.broadcast %65 : vector<1x1x128xf32> to vector<4x4x128xf32>
    %67 = arith.addf %63, %66 : vector<4x4x128xf32>
    %cst_47 = arith.constant 0.000000e+00 : f32
    %68 = vector.broadcast %cst_47 : f32 to vector<4x4x128xf32>
    %69 = arith.maximumf %67, %68 : vector<4x4x128xf32>
    %cst_48 = arith.constant dense<0.000000e+00> : vector<4x128xf32>
    %70 = vector.multi_reduction <add>, %69, %cst_48 [0] : vector<4x4x128xf32> to vector<4x128xf32>
    %cst_49 = arith.constant dense<0.000000e+00> : vector<128xf32>
    %71 = vector.multi_reduction <add>, %70, %cst_49 [0] : vector<4x128xf32> to vector<128xf32>
    %72 = vector.shape_cast %71 : vector<128xf32> to vector<1x128xf32>
    %cst_50 = arith.constant 6.250000e-02 : f32
    %73 = vector.broadcast %cst_50 : f32 to vector<1x128xf32>
    %74 = arith.mulf %72, %73 : vector<1x128xf32>
    %75 = vector.shape_cast %74 : vector<1x128xf32> to vector<1x128xf32>
    %76 = vector.broadcast %75 : vector<1x128xf32> to vector<8x128xf32>
    %c0_51 = arith.constant 0 : index
    %c0_52 = arith.constant 0 : index
    %77 = vector.load %arg4[%c0_51, %c0_52] : memref<128x32xf32, #tpu.memory_space<vmem>>, vector<128x32xf32>
    %cst_53 = arith.constant dense<0.000000e+00> : vector<8x32xf32>
    %78 = tpu.matmul %76, %77, %cst_53 {dimension_numbers = #tpu.dot_dimension_numbers<[1], [0], [0], [1], [0, 0, 1, 1], [], []>} : vector<8x128xf32>, vector<128x32xf32>, vector<8x32xf32> -> vector<8x32xf32>
    %cst_54 = arith.constant 0.000000e+00 : f32
    %79 = vector.broadcast %cst_54 : f32 to vector<8x32xf32>
    %80 = arith.maximumf %78, %79 : vector<8x32xf32>
    %c0_55 = arith.constant 0 : index
    %c0_56 = arith.constant 0 : index
    %81 = vector.load %arg5[%c0_55, %c0_56] : memref<32x128xf32, #tpu.memory_space<vmem>>, vector<32x128xf32>
    %cst_57 = arith.constant dense<0.000000e+00> : vector<8x128xf32>
    %82 = tpu.matmul %80, %81, %cst_57 {dimension_numbers = #tpu.dot_dimension_numbers<[1], [0], [0], [1], [0, 0, 1, 1], [], []>} : vector<8x32xf32>, vector<32x128xf32>, vector<8x128xf32> -> vector<8x128xf32>
    %cst_58 = arith.constant 3.000000e+00 : f32
    %83 = vector.broadcast %cst_58 : f32 to vector<8x128xf32>
    %84 = arith.addf %82, %83 : vector<8x128xf32>
    %cst_59 = arith.constant 0.000000e+00 : f32
    %85 = vector.broadcast %cst_59 : f32 to vector<8x128xf32>
    %86 = arith.maximumf %84, %85 : vector<8x128xf32>
    %cst_60 = arith.constant 6.000000e+00 : f32
    %87 = vector.broadcast %cst_60 : f32 to vector<8x128xf32>
    %88 = arith.minimumf %86, %87 : vector<8x128xf32>
    %cst_61 = arith.constant 0.166666672 : f32
    %89 = vector.broadcast %cst_61 : f32 to vector<8x128xf32>
    %90 = arith.mulf %88, %89 : vector<8x128xf32>
    %91 = vector.extract_strided_slice %90 {offsets = [0, 0], sizes = [1, 128], strides = [1, 1]} : vector<8x128xf32> to vector<1x128xf32>
    %92 = vector.shape_cast %91 : vector<1x128xf32> to vector<1x1x128xf32>
    %93 = vector.broadcast %92 : vector<1x1x128xf32> to vector<4x4x128xf32>
    %94 = arith.mulf %69, %93 : vector<4x4x128xf32>
    %c0_62 = arith.constant 0 : index
    %c0_63 = arith.constant 0 : index
    %c0_64 = arith.constant 0 : index
    %c0_65 = arith.constant 0 : index
    %95 = vector.load %arg6[%c0_62, %c0_63, %c0_64, %c0_65] : memref<1x4x4x128xf32, #tpu.memory_space<vmem>>, vector<1x4x4x128xf32>
    %96 = vector.shape_cast %95 : vector<1x4x4x128xf32> to vector<4x4x128xf32>
    %97 = vector.shape_cast %94 : vector<4x4x128xf32> to vector<1x4x4x128xf32>
    tpu.vector_store %arg6[%c0_62, %c0_63, %c0_64, %c0_65], %97 {strides = array<i32>} : memref<1x4x4x128xf32, #tpu.memory_space<vmem>>, vector<1x4x4x128xf32>,
    return
  }
  func.func @transform_0(%arg0: i32) -> (i32, i32, i32, i32) {
    %c0_i32 = arith.constant 0 : i32
    %c0_i32_0 = arith.constant 0 : i32
    %c0_i32_1 = arith.constant 0 : i32
    %c0_i32_2 = arith.constant 0 : i32
    return %arg0, %c0_i32, %c0_i32_0, %c0_i32_1 : i32, i32, i32, i32
  }
  func.func @transform_1(%arg0: i32) -> (i32, i32) {
    %c0_i32 = arith.constant 0 : i32
    %c0_i32_0 = arith.constant 0 : i32
    %c0_i32_1 = arith.constant 0 : i32
    return %c0_i32, %c0_i32_0 : i32, i32
  }
  func.func @transform_2(%arg0: i32) -> (i32, i32) {
    %c0_i32 = arith.constant 0 : i32
    %c0_i32_0 = arith.constant 0 : i32
    %c0_i32_1 = arith.constant 0 : i32
    return %c0_i32, %c0_i32_0 : i32, i32
  }
  func.func @transform_3(%arg0: i32) -> (i32, i32) {
    %c0_i32 = arith.constant 0 : i32
    %c0_i32_0 = arith.constant 0 : i32
    %c0_i32_1 = arith.constant 0 : i32
    return %c0_i32, %c0_i32_0 : i32, i32
  }
  func.func @transform_4(%arg0: i32) -> (i32, i32) {
    %c0_i32 = arith.constant 0 : i32
    %c0_i32_0 = arith.constant 0 : i32
    %c0_i32_1 = arith.constant 0 : i32
    return %c0_i32, %c0_i32_0 : i32, i32
  }
  func.func @transform_5(%arg0: i32) -> (i32, i32, i32, i32) {
    %c0_i32 = arith.constant 0 : i32
    %c0_i32_0 = arith.constant 0 : i32
    %c0_i32_1 = arith.constant 0 : i32
    %c0_i32_2 = arith.constant 0 : i32
    return %arg0, %c0_i32, %c0_i32_0, %c0_i32_1 : i32, i32, i32, i32
  }
}

module attributes {stable_mosaic.version = 11 : i64} {
  func.func @_linear_kernel(%arg0: i32, %arg1: memref<32x64xf32, #tpu.memory_space<vmem>>, %arg2: memref<64x128xf32, #tpu.memory_space<vmem>>, %arg3: memref<1x128xf32, #tpu.memory_space<vmem>>, %arg4: memref<32x128xf32, #tpu.memory_space<vmem>>) attributes {dimension_semantics = [#tpu.dimension_semantics<parallel>], iteration_bounds = array<i64: 1>, scalar_prefetch = 0 : i64, scratch_operands = 0 : i64, tpu.core_type = #tpu.core_type<tc>, window_params = [{transform_indices = @transform_0, window_bounds = array<i64: 32, 64>}, {pipeline_mode = #tpu.pipeline_mode<synchronous>, transform_indices = @transform_1, window_bounds = array<i64: 64, 128>}, {pipeline_mode = #tpu.pipeline_mode<synchronous>, transform_indices = @transform_2, window_bounds = array<i64: 1, 128>}, {transform_indices = @transform_3, window_bounds = array<i64: 32, 128>}]} {
    %c0 = arith.constant 0 : index
    %c0_0 = arith.constant 0 : index
    %0 = vector.load %arg1[%c0, %c0_0] : memref<32x64xf32, #tpu.memory_space<vmem>>, vector<32x64xf32>
    %c0_1 = arith.constant 0 : index
    %c0_2 = arith.constant 0 : index
    %1 = vector.load %arg2[%c0_1, %c0_2] : memref<64x128xf32, #tpu.memory_space<vmem>>, vector<64x128xf32>
    %cst = arith.constant dense<0.000000e+00> : vector<32x128xf32>
    %2 = tpu.matmul %0, %1, %cst {dimension_numbers = #tpu.dot_dimension_numbers<[1], [0], [0], [1], [0, 0, 1, 1], [], []>} : vector<32x64xf32>, vector<64x128xf32>, vector<32x128xf32> -> vector<32x128xf32>
    %c0_3 = arith.constant 0 : index
    %c0_4 = arith.constant 0 : index
    %3 = vector.load %arg3[%c0_3, %c0_4] : memref<1x128xf32, #tpu.memory_space<vmem>>, vector<1x128xf32>
    %4 = vector.broadcast %3 : vector<1x128xf32> to vector<32x128xf32>
    %5 = arith.addf %2, %4 : vector<32x128xf32>
    %c0_5 = arith.constant 0 : index
    %c0_6 = arith.constant 0 : index
    %6 = vector.load %arg4[%c0_5, %c0_6] : memref<32x128xf32, #tpu.memory_space<vmem>>, vector<32x128xf32>
    tpu.vector_store %arg4[%c0_5, %c0_6], %5 {strides = array<i32>} : memref<32x128xf32, #tpu.memory_space<vmem>>, vector<32x128xf32>,
    return
  }
  func.func @transform_0(%arg0: i32) -> (i32, i32) {
    %c0_i32 = arith.constant 0 : i32
    %c0_i32_0 = arith.constant 0 : i32
    return %arg0, %c0_i32 : i32, i32
  }
  func.func @transform_1(%arg0: i32) -> (i32, i32) {
    %c0_i32 = arith.constant 0 : i32
    %c0_i32_0 = arith.constant 0 : i32
    %c0_i32_1 = arith.constant 0 : i32
    return %c0_i32, %c0_i32_0 : i32, i32
  }
  func.func @transform_2(%arg0: i32) -> (i32, i32) {
    %c0_i32 = arith.constant 0 : i32
    %c0_i32_0 = arith.constant 0 : i32
    %c0_i32_1 = arith.constant 0 : i32
    return %c0_i32, %c0_i32_0 : i32, i32
  }
  func.func @transform_3(%arg0: i32) -> (i32, i32) {
    %c0_i32 = arith.constant 0 : i32
    %c0_i32_0 = arith.constant 0 : i32
    return %arg0, %c0_i32 : i32, i32
  }
}

module attributes {stable_mosaic.version = 11 : i64} {
  func.func @_linear_kernel(%arg0: i32, %arg1: memref<128x32xf32, #tpu.memory_space<vmem>>, %arg2: memref<32x64xf32, #tpu.memory_space<vmem>>, %arg3: memref<1x64xf32, #tpu.memory_space<vmem>>, %arg4: memref<128x64xf32, #tpu.memory_space<vmem>>) attributes {dimension_semantics = [#tpu.dimension_semantics<parallel>], iteration_bounds = array<i64: 1>, scalar_prefetch = 0 : i64, scratch_operands = 0 : i64, tpu.core_type = #tpu.core_type<tc>, window_params = [{transform_indices = @transform_0, window_bounds = array<i64: 128, 32>}, {pipeline_mode = #tpu.pipeline_mode<synchronous>, transform_indices = @transform_1, window_bounds = array<i64: 32, 64>}, {pipeline_mode = #tpu.pipeline_mode<synchronous>, transform_indices = @transform_2, window_bounds = array<i64: 1, 64>}, {transform_indices = @transform_3, window_bounds = array<i64: 128, 64>}]} {
    %c0 = arith.constant 0 : index
    %c0_0 = arith.constant 0 : index
    %0 = vector.load %arg1[%c0, %c0_0] : memref<128x32xf32, #tpu.memory_space<vmem>>, vector<128x32xf32>
    %c0_1 = arith.constant 0 : index
    %c0_2 = arith.constant 0 : index
    %1 = vector.load %arg2[%c0_1, %c0_2] : memref<32x64xf32, #tpu.memory_space<vmem>>, vector<32x64xf32>
    %cst = arith.constant dense<0.000000e+00> : vector<128x64xf32>
    %2 = tpu.matmul %0, %1, %cst {dimension_numbers = #tpu.dot_dimension_numbers<[1], [0], [0], [1], [0, 0, 1, 1], [], []>} : vector<128x32xf32>, vector<32x64xf32>, vector<128x64xf32> -> vector<128x64xf32>
    %c0_3 = arith.constant 0 : index
    %c0_4 = arith.constant 0 : index
    %3 = vector.load %arg3[%c0_3, %c0_4] : memref<1x64xf32, #tpu.memory_space<vmem>>, vector<1x64xf32>
    %4 = vector.broadcast %3 : vector<1x64xf32> to vector<128x64xf32>
    %5 = arith.addf %2, %4 : vector<128x64xf32>
    %c0_5 = arith.constant 0 : index
    %c0_6 = arith.constant 0 : index
    %6 = vector.load %arg4[%c0_5, %c0_6] : memref<128x64xf32, #tpu.memory_space<vmem>>, vector<128x64xf32>
    tpu.vector_store %arg4[%c0_5, %c0_6], %5 {strides = array<i32>} : memref<128x64xf32, #tpu.memory_space<vmem>>, vector<128x64xf32>,
    return
  }
  func.func @transform_0(%arg0: i32) -> (i32, i32) {
    %c0_i32 = arith.constant 0 : i32
    %c0_i32_0 = arith.constant 0 : i32
    return %arg0, %c0_i32 : i32, i32
  }
  func.func @transform_1(%arg0: i32) -> (i32, i32) {
    %c0_i32 = arith.constant 0 : i32
    %c0_i32_0 = arith.constant 0 : i32
    %c0_i32_1 = arith.constant 0 : i32
    return %c0_i32, %c0_i32_0 : i32, i32
  }
  func.func @transform_2(%arg0: i32) -> (i32, i32) {
    %c0_i32 = arith.constant 0 : i32
    %c0_i32_0 = arith.constant 0 : i32
    %c0_i32_1 = arith.constant 0 : i32
    return %c0_i32, %c0_i32_0 : i32, i32
  }
  func.func @transform_3(%arg0: i32) -> (i32, i32) {
    %c0_i32 = arith.constant 0 : i32
    %c0_i32_0 = arith.constant 0 : i32
    return %arg0, %c0_i32 : i32, i32
  }
}

module attributes {stable_mosaic.version = 11 : i64} {
  func.func @_linear_kernel(%arg0: i32, %arg1: memref<512x144xf32, #tpu.memory_space<vmem>>, %arg2: memref<144x3xf32, #tpu.memory_space<vmem>>, %arg3: memref<1x3xf32, #tpu.memory_space<vmem>>, %arg4: memref<512x3xf32, #tpu.memory_space<vmem>>, %arg5: memref<512x3xf32, #tpu.memory_space<vmem>>) attributes {dimension_semantics = [#tpu.dimension_semantics<parallel>], iteration_bounds = array<i64: 1>, scalar_prefetch = 0 : i64, scratch_operands = 0 : i64, tpu.core_type = #tpu.core_type<tc>, window_params = [{transform_indices = @transform_0, window_bounds = array<i64: 512, 144>}, {pipeline_mode = #tpu.pipeline_mode<synchronous>, transform_indices = @transform_1, window_bounds = array<i64: 144, 3>}, {pipeline_mode = #tpu.pipeline_mode<synchronous>, transform_indices = @transform_2, window_bounds = array<i64: 1, 3>}, {transform_indices = @transform_3, window_bounds = array<i64: 512, 3>}, {transform_indices = @transform_4, window_bounds = array<i64: 512, 3>}]} {
    %c0 = arith.constant 0 : index
    %c0_0 = arith.constant 0 : index
    %0 = vector.load %arg1[%c0, %c0_0] : memref<512x144xf32, #tpu.memory_space<vmem>>, vector<512x144xf32>
    %c0_1 = arith.constant 0 : index
    %c0_2 = arith.constant 0 : index
    %1 = vector.load %arg2[%c0_1, %c0_2] : memref<144x3xf32, #tpu.memory_space<vmem>>, vector<144x3xf32>
    %cst = arith.constant dense<0.000000e+00> : vector<512x3xf32>
    %2 = tpu.matmul %0, %1, %cst {dimension_numbers = #tpu.dot_dimension_numbers<[1], [0], [0], [1], [0, 0, 1, 1], [], []>} : vector<512x144xf32>, vector<144x3xf32>, vector<512x3xf32> -> vector<512x3xf32>
    %c0_3 = arith.constant 0 : index
    %c0_4 = arith.constant 0 : index
    %3 = vector.load %arg3[%c0_3, %c0_4] : memref<1x3xf32, #tpu.memory_space<vmem>>, vector<1x3xf32>
    %4 = vector.broadcast %3 : vector<1x3xf32> to vector<512x3xf32>
    %5 = arith.addf %2, %4 : vector<512x3xf32>
    %c0_5 = arith.constant 0 : index
    %c0_6 = arith.constant 0 : index
    %6 = vector.load %arg4[%c0_5, %c0_6] : memref<512x3xf32, #tpu.memory_space<vmem>>, vector<512x3xf32>
    %7 = arith.addf %5, %6 : vector<512x3xf32>
    %c0_7 = arith.constant 0 : index
    %c0_8 = arith.constant 0 : index
    %8 = vector.load %arg5[%c0_7, %c0_8] : memref<512x3xf32, #tpu.memory_space<vmem>>, vector<512x3xf32>
    tpu.vector_store %arg5[%c0_7, %c0_8], %7 {strides = array<i32>} : memref<512x3xf32, #tpu.memory_space<vmem>>, vector<512x3xf32>,
    return
  }
  func.func @transform_0(%arg0: i32) -> (i32, i32) {
    %c0_i32 = arith.constant 0 : i32
    %c0_i32_0 = arith.constant 0 : i32
    return %arg0, %c0_i32 : i32, i32
  }
  func.func @transform_1(%arg0: i32) -> (i32, i32) {
    %c0_i32 = arith.constant 0 : i32
    %c0_i32_0 = arith.constant 0 : i32
    %c0_i32_1 = arith.constant 0 : i32
    return %c0_i32, %c0_i32_0 : i32, i32
  }
  func.func @transform_2(%arg0: i32) -> (i32, i32) {
    %c0_i32 = arith.constant 0 : i32
    %c0_i32_0 = arith.constant 0 : i32
    %c0_i32_1 = arith.constant 0 : i32
    return %c0_i32, %c0_i32_0 : i32, i32
  }
  func.func @transform_3(%arg0: i32) -> (i32, i32) {
    %c0_i32 = arith.constant 0 : i32
    %c0_i32_0 = arith.constant 0 : i32
    return %arg0, %c0_i32 : i32, i32
  }
  func.func @transform_4(%arg0: i32) -> (i32, i32) {
    %c0_i32 = arith.constant 0 : i32
    %c0_i32_0 = arith.constant 0 : i32
    return %arg0, %c0_i32 : i32, i32
  }
}

</mosaic_0001>

<bundles_post_ra>
// kernel: reformer_forward_pallas.21
= control target key start
LH: loop header
LB: loop body
LE: loop exit
PB: predicated region body
PF: predicated region fallthrough
CT: control target
= control target key end

     0   :  { %vm282_vm0 = vcmask 1042432   ;;  %vm89_vm1 = vcmask 220160   ;;  %vm993_vm2 = vmmov 1   ;;  %vm671_vm4 = vcmask 130048   ;;  %s1607_s1 = inlined_call_operand.vmem [shape: f32[27,16], index: 1, kind: input, shape index: {}]   ;;  %s1608_s0 = inlined_call_operand.vmem [shape: f32[512,27], index: 0, kind: input, shape index: {}]   ;;  %s1609_s2 = inlined_call_operand.vmem [shape: f32[1,16], index: 2, kind: input, shape index: {}]   ;;  %s1610_s3 = inlined_call_operand.vmem [shape: f32[512,16], index: 3, kind: output, shape index: {}]  }
   0x1   :  { %v78_v0 = vld [vmem:[%s1607_s1] sm:$0xff]  ;;  %v79_v1 = vld [vmem:[%s1607_s1 + $0x8] sm:$0xff]  ;;  %v80_v2 = vld [vmem:[%s1607_s1 + $0x10] sm:$0xff] }
   0x2   :  { %v978_v3 = vpack.c.bf16 %v79_v1, %v78_v0  ;;  %v81_v4 = vld [vmem:[%s1607_s1 + $0x18] sm:$0x7]  ;;  %v14_v5 = vld [vmem:[%s1608_s0] sm:$0xff]  ;;  %vm983_vm3 = vmpackc.low %vm282_vm0, %vm993_vm2 }
   0x3   :  { %v982_v6 = vpack.c.bf16 %v81_v4, %v80_v2  ;;  %882 = vmatprep.mubr.msk.f32.mxu0 %vm89_vm1, %v14_v5  ;;  %v46_v7 = vld [vmem:[%s1608_s0 + $0x100] sm:$0xff]  ;;  %v15_v8 = vld [vmem:[%s1608_s0 + $0x8] sm:$0xff]  ;;  %v16_v10 = vld [vmem:[%s1608_s0 + $0x10] sm:$0xff] }
   0x4   :  { %979 = vmatprep.subr.bf16.mxu0 %v978_v3  ;;  %988 = vmatprep.subr.bf16.mxu1 %v978_v3  ;;  %v47_v9 = vld [vmem:[%s1608_s0 + $0x108] sm:$0xff]  ;;  %v48_v11 = vld [vmem:[%s1608_s0 + $0x110] sm:$0xff]  ;;  %v17_v12 = vld [vmem:[%s1608_s0 + $0x18] sm:$0xff] }
   0x5   :  { %981 = vmatpush3.bf16.msra.mxu0 %v978_v3  ;;  %990 = vmatpush3.bf16.msra.mxu1 %v978_v3  ;;  %v49_v13 = vld [vmem:[%s1608_s0 + $0x118] sm:$0xff]  ;;  %v18_v14 = vld [vmem:[%s1608_s0 + $0x20] sm:$0xff]  ;;  %v19_v16 = vld [vmem:[%s1608_s0 + $0x28] sm:$0xff] }
   0x6   :  { %984 = vmatprep.subr.msk.bf16.mxu0 %vm983_vm3, %v982_v6  ;;  %989 = vmatprep.subr.msk.bf16.mxu1 %vm983_vm3, %v982_v6  ;;  %v50_v15 = vld [vmem:[%s1608_s0 + $0x120] sm:$0xff]  ;;  %v51_v17 = vld [vmem:[%s1608_s0 + $0x128] sm:$0xff]  ;;  %v20_v18 = vld [vmem:[%s1608_s0 + $0x30] sm:$0xff] }
   0x7   :  { %930 = vmatprep.mubr.msk.f32.mxu1 %vm89_vm1, %v46_v7  ;;  %v52_v19 = vld [vmem:[%s1608_s0 + $0x130] sm:$0xff]  ;;  %v21_v20 = vld [vmem:[%s1608_s0 + $0x38] sm:$0xff]  ;;  %v22_v22 = vld [vmem:[%s1608_s0 + $0x40] sm:$0xff] }
   0x8   :  { %v53_v21 = vld [vmem:[%s1608_s0 + $0x138] sm:$0xff]  ;;  %v54_v23 = vld [vmem:[%s1608_s0 + $0x140] sm:$0xff]  ;;  %v23_v24 = vld [vmem:[%s1608_s0 + $0x48] sm:$0xff] }
   0x9   :  { %987 = vmatpush3.bf16.msk.msra.mxu0 %vm983_vm3, %v982_v6  ;;  %991 = vmatpush3.bf16.msk.msra.mxu1 %vm983_vm3, %v982_v6  ;;  %v55_v25 = vld [vmem:[%s1608_s0 + $0x148] sm:$0xff]  ;;  %v24_v26 = vld [vmem:[%s1608_s0 + $0x50] sm:$0xff]  ;;  %v25_v28 = vld [vmem:[%s1608_s0 + $0x58] sm:$0xff] }
   0xa   :  { %v56_v27 = vld [vmem:[%s1608_s0 + $0x150] sm:$0xff]  ;;  %v57_v29 = vld [vmem:[%s1608_s0 + $0x158] sm:$0xff]  ;;  %v26_v30 = vld [vmem:[%s1608_s0 + $0x60] sm:$0xff] }
   0xb   :  { %v58_v31 = vld [vmem:[%s1608_s0 + $0x160] sm:$0xff]  ;;  %v27_v32 = vld [vmem:[%s1608_s0 + $0x68] sm:$0xff]  ;;  %v28_v34 = vld [vmem:[%s1608_s0 + $0x70] sm:$0xff] }
   0xc   :  { %883 = vmatmul.mubr.msk.f32.vlgmr.msra.gmra.mrb[0].mxu0 %vm89_vm1, %v15_v8  ;;  %931 = vmatmul.mubr.msk.f32.vlgmr.msra.gmra.mrb[0].mxu1 %vm89_vm1, %v47_v9  ;;  %v59_v33 = vld [vmem:[%s1608_s0 + $0x168] sm:$0xff]  ;;  %v60_v35 = vld [vmem:[%s1608_s0 + $0x170] sm:$0xff]  ;;  %v29_v36 = vld [vmem:[%s1608_s0 + $0x78] sm:$0xff] }
   0xd   :  { %885 = vmatprep.mubr.msk.f32.mxu0 %vm89_vm1, %v16_v10  ;;  %933 = vmatprep.mubr.msk.f32.mxu1 %vm89_vm1, %v48_v11  ;;  %v61_v37 = vld [vmem:[%s1608_s0 + $0x178] sm:$0xff]  ;;  %v30_v38 = vld [vmem:[%s1608_s0 + $0x80] sm:$0xff]  ;;  %v31_v40 = vld [vmem:[%s1608_s0 + $0x88] sm:$0xff] }
   0xe   :  { %v62_v39 = vld [vmem:[%s1608_s0 + $0x180] sm:$0xff]  ;;  %v63_v41 = vld [vmem:[%s1608_s0 + $0x188] sm:$0xff]  ;;  %v32_v42 = vld [vmem:[%s1608_s0 + $0x90] sm:$0xff] }
   0xf   :  { %v64_v43 = vld [vmem:[%s1608_s0 + $0x190] sm:$0xff]  ;;  %v33_v44 = vld [vmem:[%s1608_s0 + $0x98] sm:$0xff]  ;;  %v34_v46 = vld [vmem:[%s1608_s0 + $0xa0] sm:$0xff] }
  0x10   :  { %886 = vmatmul.mubr.msk.f32.gmra.mrb[2].mxu0 %vm89_vm1, %v17_v12  ;;  %934 = vmatmul.mubr.msk.f32.gmra.mrb[2].mxu1 %vm89_vm1, %v49_v13  ;;  %v65_v45 = vld [vmem:[%s1608_s0 + $0x198] sm:$0xff]  ;;  %v66_v47 = vld [vmem:[%s1608_s0 + $0x1a0] sm:$0xff]  ;;  %v35_v48 = vld [vmem:[%s1608_s0 + $0xa8] sm:$0xff] }
  0x11   :  { %888 = vmatprep.mubr.msk.f32.mxu0 %vm89_vm1, %v18_v14  ;;  %936 = vmatprep.mubr.msk.f32.mxu1 %vm89_vm1, %v50_v15  ;;  %v67_v49 = vld [vmem:[%s1608_s0 + $0x1a8] sm:$0xff]  ;;  %v36_v50 = vld [vmem:[%s1608_s0 + $0xb0] sm:$0xff]  ;;  %v37_v52 = vld [vmem:[%s1608_s0 + $0xb8] sm:$0xff] }
  0x12   :  { %v68_v51 = vld [vmem:[%s1608_s0 + $0x1b0] sm:$0xff]  ;;  %v69_v53 = vld [vmem:[%s1608_s0 + $0x1b8] sm:$0xff]  ;;  %v38_v54 = vld [vmem:[%s1608_s0 + $0xc0] sm:$0xff] }
  0x13   :  { %v70_v55 = vld [vmem:[%s1608_s0 + $0x1c0] sm:$0xff]  ;;  %v39_v56 = vld [vmem:[%s1608_s0 + $0xc8] sm:$0xff]  ;;  %v40_v58 = vld [vmem:[%s1608_s0 + $0xd0] sm:$0xff] }
  0x14   :  { %889 = vmatmul.mubr.msk.f32.gmra.mrb[4].mxu0 %vm89_vm1, %v19_v16  ;;  %937 = vmatmul.mubr.msk.f32.gmra.mrb[4].mxu1 %vm89_vm1, %v51_v17  ;;  %v71_v57 = vld [vmem:[%s1608_s0 + $0x1c8] sm:$0xff]  ;;  %v72_v59 = vld [vmem:[%s1608_s0 + $0x1d0] sm:$0xff]  ;;  %v41_v60 = vld [vmem:[%s1608_s0 + $0xd8] sm:$0xff] }
  0x15   :  { %891 = vmatprep.mubr.msk.f32.mxu0 %vm89_vm1, %v20_v18  ;;  %939 = vmatprep.mubr.msk.f32.mxu1 %vm89_vm1, %v52_v19  ;;  %v73_v61 = vld [vmem:[%s1608_s0 + $0x1d8] sm:$0xff]  ;;  %v42_v62 = vld [vmem:[%s1608_s0 + $0xe0] sm:$0xff]  ;;  %v43_v0 = vld [vmem:[%s1608_s0 + $0xe8] sm:$0xff] }
  0x16   :  { %v74_v63 = vld [vmem:[%s1608_s0 + $0x1e0] sm:$0xff]  ;;  %v75_v1 = vld [vmem:[%s1608_s0 + $0x1e8] sm:$0xff]  ;;  %v44_v2 = vld [vmem:[%s1608_s0 + $0xf0] sm:$0xff] }
  0x17   :  { %v76_v3 = vld [vmem:[%s1608_s0 + $0x1f0] sm:$0xff]  ;;  %v45_v4 = vld [vmem:[%s1608_s0 + $0xf8] sm:$0xff]  ;;  %v1285_v6 = vld [vmem:[%s1609_s2] ss:$0 sm:$0xff] }
  0x18   :  { %892 = vmatmul.mubr.msk.f32.gmra.mrb[6].mxu0 %vm89_vm1, %v21_v20  ;;  %940 = vmatmul.mubr.msk.f32.gmra.mrb[6].mxu1 %vm89_vm1, %v53_v21  ;;  %v77_v5 = vld [vmem:[%s1608_s0 + $0x1f8] sm:$0xff] }
  0x19   :  { %894 = vmatprep.mubr.msk.f32.mxu0 %vm89_vm1, %v22_v22  ;;  %942 = vmatprep.mubr.msk.f32.mxu1 %vm89_vm1, %v54_v23 }
  0x1c   :  { %895 = vmatmul.mubr.msk.f32.gmra.mrb[8].mxu0 %vm89_vm1, %v23_v24  ;;  %943 = vmatmul.mubr.msk.f32.gmra.mrb[8].mxu1 %vm89_vm1, %v55_v25 }
  0x1d   :  { %897 = vmatprep.mubr.msk.f32.mxu0 %vm89_vm1, %v24_v26  ;;  %945 = vmatprep.mubr.msk.f32.mxu1 %vm89_vm1, %v56_v27 }
  0x20   :  { %898 = vmatmul.mubr.msk.f32.gmra.mrb[10].mxu0 %vm89_vm1, %v25_v28  ;;  %946 = vmatmul.mubr.msk.f32.gmra.mrb[10].mxu1 %vm89_vm1, %v57_v29 }
  0x21   :  { %900 = vmatprep.mubr.msk.f32.mxu0 %vm89_vm1, %v26_v30  ;;  %948 = vmatprep.mubr.msk.f32.mxu1 %vm89_vm1, %v58_v31 }
  0x24   :  { %901 = vmatmul.mubr.msk.f32.gmra.mrb[12].mxu0 %vm89_vm1, %v27_v32  ;;  %949 = vmatmul.mubr.msk.f32.gmra.mrb[12].mxu1 %vm89_vm1, %v59_v33 }
  0x25   :  { %903 = vmatprep.mubr.msk.f32.mxu0 %vm89_vm1, %v28_v34  ;;  %951 = vmatprep.mubr.msk.f32.mxu1 %vm89_vm1, %v60_v35 }
  0x28   :  { %904 = vmatmul.mubr.msk.f32.gmra.mrb[14].mxu0 %vm89_vm1, %v29_v36  ;;  %952 = vmatmul.mubr.msk.f32.gmra.mrb[14].mxu1 %vm89_vm1, %v61_v37 }
  0x29   :  { %906 = vmatprep.mubr.msk.f32.mxu0 %vm89_vm1, %v30_v38  ;;  %954 = vmatprep.mubr.msk.f32.mxu1 %vm89_vm1, %v62_v39 }
  0x2c   :  { %907 = vmatmul.mubr.msk.f32.gmra.mrb[16].mxu0 %vm89_vm1, %v31_v40  ;;  %955 = vmatmul.mubr.msk.f32.gmra.mrb[16].mxu1 %vm89_vm1, %v63_v41 }
  0x2d   :  { %909 = vmatprep.mubr.msk.f32.mxu0 %vm89_vm1, %v32_v42  ;;  %957 = vmatprep.mubr.msk.f32.mxu1 %vm89_vm1, %v64_v43 }
  0x30   :  { %910 = vmatmul.mubr.msk.f32.gmra.mrb[18].mxu0 %vm89_vm1, %v33_v44  ;;  %958 = vmatmul.mubr.msk.f32.gmra.mrb[18].mxu1 %vm89_vm1, %v65_v45 }
  0x31   :  { %912 = vmatprep.mubr.msk.f32.mxu0 %vm89_vm1, %v34_v46  ;;  %960 = vmatprep.mubr.msk.f32.mxu1 %vm89_vm1, %v66_v47 }
  0x34   :  { %913 = vmatmul.mubr.msk.f32.gmra.mrb[20].mxu0 %vm89_vm1, %v35_v48  ;;  %961 = vmatmul.mubr.msk.f32.gmra.mrb[20].mxu1 %vm89_vm1, %v67_v49 }
  0x35   :  { %915 = vmatprep.mubr.msk.f32.mxu0 %vm89_vm1, %v36_v50  ;;  %963 = vmatprep.mubr.msk.f32.mxu1 %vm89_vm1, %v68_v51 }
  0x38   :  { %916 = vmatmul.mubr.msk.f32.gmra.mrb[22].mxu0 %vm89_vm1, %v37_v52  ;;  %964 = vmatmul.mubr.msk.f32.gmra.mrb[22].mxu1 %vm89_vm1, %v69_v53 }
  0x39   :  { %918 = vmatprep.mubr.msk.f32.mxu0 %vm89_vm1, %v38_v54  ;;  %966 = vmatprep.mubr.msk.f32.mxu1 %vm89_vm1, %v70_v55 }
  0x3c   :  { %919 = vmatmul.mubr.msk.f32.gmra.mrb[24].mxu0 %vm89_vm1, %v39_v56  ;;  %967 = vmatmul.mubr.msk.f32.gmra.mrb[24].mxu1 %vm89_vm1, %v71_v57 }
  0x3d   :  { %921 = vmatprep.mubr.msk.f32.mxu0 %vm89_vm1, %v40_v58  ;;  %969 = vmatprep.mubr.msk.f32.mxu1 %vm89_vm1, %v72_v59 }
  0x40   :  { %922 = vmatmul.mubr.msk.f32.gmra.mrb[26].mxu0 %vm89_vm1, %v41_v60  ;;  %970 = vmatmul.mubr.msk.f32.gmra.mrb[26].mxu1 %vm89_vm1, %v73_v61 }
  0x41   :  { %924 = vmatprep.mubr.msk.f32.mxu0 %vm89_vm1, %v42_v62  ;;  %972 = vmatprep.mubr.msk.f32.mxu1 %vm89_vm1, %v74_v63 }
  0x44   :  { %925 = vmatmul.mubr.msk.f32.gmra.mrb[28].mxu0 %vm89_vm1, %v43_v0  ;;  %973 = vmatmul.mubr.msk.f32.gmra.mrb[28].mxu1 %vm89_vm1, %v75_v1 }
  0x45   :  { %927 = vmatprep.mubr.msk.f32.mxu0 %vm89_vm1, %v44_v2  ;;  %975 = vmatprep.mubr.msk.f32.mxu1 %vm89_vm1, %v76_v3 }
  0x48   :  { %928 = vmatmul.mubr.msk.f32.gmra.mrb[30].mxu0 %vm89_vm1, %v45_v4  ;;  %976 = vmatmul.mubr.msk.f32.gmra.mrb[30].mxu1 %vm89_vm1, %v77_v5 }
  0xdf   :  { %v884_v7 = vpop.f32.mrb[0].mxu0  ;;  %v932_v8 = vpop.f32.mrb[0].mxu1 }
  0xe0   :  { %v358_v9 = vadd.f32 %v884_v7, %v1285_v6  ;;  %v518_v10 = vadd.f32 %v932_v8, %v1285_v6  ;;  %v352_v11 = vpop.f32.mrb[1].mxu0  ;;  %v512_v12 = vpop.f32.mrb[1].mxu1 }
  0xe1   :  { %v353_v13 = vadd.f32 %v1285_v6, %v352_v11  ;;  %v513_v14 = vadd.f32 %v1285_v6, %v512_v12 }
  0xe2   :  { %673 = vst.msk [vmem:[%s1610_s3 + $0x8] sm:$0xff] %vm671_vm4, %v358_v9  ;;  %705 = vst.msk [vmem:[%s1610_s3 + $0x108] sm:$0xff] %vm671_vm4, %v518_v10 }
  0xe3   :  { %672 = vst.msk [vmem:[%s1610_s3] sm:$0xff] %vm671_vm4, %v353_v13  ;;  %704 = vst.msk [vmem:[%s1610_s3 + $0x100] sm:$0xff] %vm671_vm4, %v513_v14  ;;  %v887_v15 = vpop.f32.mrb[2].mxu0  ;;  %v935_v16 = vpop.f32.mrb[2].mxu1 }
  0xe4   :  { %v368_v17 = vadd.f32 %v887_v15, %v1285_v6  ;;  %v528_v18 = vadd.f32 %v935_v16, %v1285_v6  ;;  %v362_v19 = vpop.f32.mrb[3].mxu0  ;;  %v522_v20 = vpop.f32.mrb[3].mxu1 }
  0xe5   :  { %v363_v21 = vadd.f32 %v1285_v6, %v362_v19  ;;  %v523_v22 = vadd.f32 %v1285_v6, %v522_v20 }
  0xe6   :  { %675 = vst.msk [vmem:[%s1610_s3 + $0x18] sm:$0xff] %vm671_vm4, %v368_v17  ;;  %707 = vst.msk [vmem:[%s1610_s3 + $0x118] sm:$0xff] %vm671_vm4, %v528_v18 }
  0xe7   :  { %674 = vst.msk [vmem:[%s1610_s3 + $0x10] sm:$0xff] %vm671_vm4, %v363_v21  ;;  %706 = vst.msk [vmem:[%s1610_s3 + $0x110] sm:$0xff] %vm671_vm4, %v523_v22  ;;  %v890_v23 = vpop.f32.mrb[4].mxu0  ;;  %v938_v24 = vpop.f32.mrb[4].mxu1 }
  0xe8   :  { %v378_v25 = vadd.f32 %v890_v23, %v1285_v6  ;;  %v538_v26 = vadd.f32 %v938_v24, %v1285_v6  ;;  %v372_v27 = vpop.f32.mrb[5].mxu0  ;;  %v532_v28 = vpop.f32.mrb[5].mxu1 }
  0xe9   :  { %v373_v29 = vadd.f32 %v1285_v6, %v372_v27  ;;  %v533_v30 = vadd.f32 %v1285_v6, %v532_v28 }
  0xea   :  { %677 = vst.msk [vmem:[%s1610_s3 + $0x28] sm:$0xff] %vm671_vm4, %v378_v25  ;;  %709 = vst.msk [vmem:[%s1610_s3 + $0x128] sm:$0xff] %vm671_vm4, %v538_v26 }
  0xeb   :  { %676 = vst.msk [vmem:[%s1610_s3 + $0x20] sm:$0xff] %vm671_vm4, %v373_v29  ;;  %708 = vst.msk [vmem:[%s1610_s3 + $0x120] sm:$0xff] %vm671_vm4, %v533_v30  ;;  %v893_v31 = vpop.f32.mrb[6].mxu0  ;;  %v941_v32 = vpop.f32.mrb[6].mxu1 }
  0xec   :  { %v388_v33 = vadd.f32 %v893_v31, %v1285_v6  ;;  %v548_v34 = vadd.f32 %v941_v32, %v1285_v6  ;;  %v382_v35 = vpop.f32.mrb[7].mxu0  ;;  %v542_v36 = vpop.f32.mrb[7].mxu1 }
  0xed   :  { %v383_v37 = vadd.f32 %v1285_v6, %v382_v35  ;;  %v543_v38 = vadd.f32 %v1285_v6, %v542_v36 }
  0xee   :  { %679 = vst.msk [vmem:[%s1610_s3 + $0x38] sm:$0xff] %vm671_vm4, %v388_v33  ;;  %711 = vst.msk [vmem:[%s1610_s3 + $0x138] sm:$0xff] %vm671_vm4, %v548_v34 }
  0xef   :  { %678 = vst.msk [vmem:[%s1610_s3 + $0x30] sm:$0xff] %vm671_vm4, %v383_v37  ;;  %710 = vst.msk [vmem:[%s1610_s3 + $0x130] sm:$0xff] %vm671_vm4, %v543_v38  ;;  %v896_v39 = vpop.f32.mrb[8].mxu0  ;;  %v944_v40 = vpop.f32.mrb[8].mxu1 }
  0xf0   :  { %v398_v41 = vadd.f32 %v896_v39, %v1285_v6  ;;  %v558_v42 = vadd.f32 %v944_v40, %v1285_v6  ;;  %v392_v43 = vpop.f32.mrb[9].mxu0  ;;  %v552_v44 = vpop.f32.mrb[9].mxu1 }
  0xf1   :  { %v393_v45 = vadd.f32 %v1285_v6, %v392_v43  ;;  %v553_v46 = vadd.f32 %v1285_v6, %v552_v44 }
  0xf2   :  { %681 = vst.msk [vmem:[%s1610_s3 + $0x48] sm:$0xff] %vm671_vm4, %v398_v41  ;;  %713 = vst.msk [vmem:[%s1610_s3 + $0x148] sm:$0xff] %vm671_vm4, %v558_v42 }
  0xf3   :  { %680 = vst.msk [vmem:[%s1610_s3 + $0x40] sm:$0xff] %vm671_vm4, %v393_v45  ;;  %712 = vst.msk [vmem:[%s1610_s3 + $0x140] sm:$0xff] %vm671_vm4, %v553_v46  ;;  %v899_v47 = vpop.f32.mrb[10].mxu0  ;;  %v947_v48 = vpop.f32.mrb[10].mxu1 }
  0xf4   :  { %v408_v49 = vadd.f32 %v899_v47, %v1285_v6  ;;  %v568_v50 = vadd.f32 %v947_v48, %v1285_v6  ;;  %v402_v51 = vpop.f32.mrb[11].mxu0  ;;  %v562_v52 = vpop.f32.mrb[11].mxu1 }
  0xf5   :  { %v403_v53 = vadd.f32 %v1285_v6, %v402_v51  ;;  %v563_v54 = vadd.f32 %v1285_v6, %v562_v52 }
  0xf6   :  { %683 = vst.msk [vmem:[%s1610_s3 + $0x58] sm:$0xff] %vm671_vm4, %v408_v49  ;;  %715 = vst.msk [vmem:[%s1610_s3 + $0x158] sm:$0xff] %vm671_vm4, %v568_v50 }
  0xf7   :  { %682 = vst.msk [vmem:[%s1610_s3 + $0x50] sm:$0xff] %vm671_vm4, %v403_v53  ;;  %714 = vst.msk [vmem:[%s1610_s3 + $0x150] sm:$0xff] %vm671_vm4, %v563_v54  ;;  %v902_v55 = vpop.f32.mrb[12].mxu0  ;;  %v950_v56 = vpop.f32.mrb[12].mxu1 }
  0xf8   :  { %v418_v57 = vadd.f32 %v902_v55, %v1285_v6  ;;  %v578_v58 = vadd.f32 %v950_v56, %v1285_v6  ;;  %v412_v59 = vpop.f32.mrb[13].mxu0  ;;  %v572_v60 = vpop.f32.mrb[13].mxu1 }
  0xf9   :  { %v413_v61 = vadd.f32 %v1285_v6, %v412_v59  ;;  %v573_v62 = vadd.f32 %v1285_v6, %v572_v60 }
  0xfa   :  { %685 = vst.msk [vmem:[%s1610_s3 + $0x68] sm:$0xff] %vm671_vm4, %v418_v57  ;;  %717 = vst.msk [vmem:[%s1610_s3 + $0x168] sm:$0xff] %vm671_vm4, %v578_v58 }
  0xfb   :  { %684 = vst.msk [vmem:[%s1610_s3 + $0x60] sm:$0xff] %vm671_vm4, %v413_v61  ;;  %716 = vst.msk [vmem:[%s1610_s3 + $0x160] sm:$0xff] %vm671_vm4, %v573_v62  ;;  %v905_v63 = vpop.f32.mrb[14].mxu0  ;;  %v953_v0 = vpop.f32.mrb[14].mxu1 }
  0xfc   :  { %v428_v1 = vadd.f32 %v905_v63, %v1285_v6  ;;  %v588_v2 = vadd.f32 %v953_v0, %v1285_v6  ;;  %v422_v3 = vpop.f32.mrb[15].mxu0  ;;  %v582_v4 = vpop.f32.mrb[15].mxu1 }
  0xfd   :  { %v423_v5 = vadd.f32 %v1285_v6, %v422_v3  ;;  %v583_v7 = vadd.f32 %v1285_v6, %v582_v4 }
  0xfe   :  { %687 = vst.msk [vmem:[%s1610_s3 + $0x78] sm:$0xff] %vm671_vm4, %v428_v1  ;;  %719 = vst.msk [vmem:[%s1610_s3 + $0x178] sm:$0xff] %vm671_vm4, %v588_v2 }
  0xff   :  { %686 = vst.msk [vmem:[%s1610_s3 + $0x70] sm:$0xff] %vm671_vm4, %v423_v5  ;;  %718 = vst.msk [vmem:[%s1610_s3 + $0x170] sm:$0xff] %vm671_vm4, %v583_v7  ;;  %v908_v8 = vpop.f32.mrb[16].mxu0  ;;  %v956_v9 = vpop.f32.mrb[16].mxu1 }
 0x100   :  { %v438_v10 = vadd.f32 %v908_v8, %v1285_v6  ;;  %v598_v11 = vadd.f32 %v956_v9, %v1285_v6  ;;  %v432_v12 = vpop.f32.mrb[17].mxu0  ;;  %v592_v13 = vpop.f32.mrb[17].mxu1 }
 0x101   :  { %v433_v14 = vadd.f32 %v1285_v6, %v432_v12  ;;  %v593_v15 = vadd.f32 %v1285_v6, %v592_v13 }
 0x102   :  { %689 = vst.msk [vmem:[%s1610_s3 + $0x88] sm:$0xff] %vm671_vm4, %v438_v10  ;;  %721 = vst.msk [vmem:[%s1610_s3 + $0x188] sm:$0xff] %vm671_vm4, %v598_v11 }
 0x103   :  { %688 = vst.msk [vmem:[%s1610_s3 + $0x80] sm:$0xff] %vm671_vm4, %v433_v14  ;;  %720 = vst.msk [vmem:[%s1610_s3 + $0x180] sm:$0xff] %vm671_vm4, %v593_v15  ;;  %v911_v16 = vpop.f32.mrb[18].mxu0  ;;  %v959_v17 = vpop.f32.mrb[18].mxu1 }
 0x104   :  { %v448_v18 = vadd.f32 %v911_v16, %v1285_v6  ;;  %v608_v19 = vadd.f32 %v959_v17, %v1285_v6  ;;  %v442_v20 = vpop.f32.mrb[19].mxu0  ;;  %v602_v21 = vpop.f32.mrb[19].mxu1 }
 0x105   :  { %v443_v22 = vadd.f32 %v1285_v6, %v442_v20  ;;  %v603_v23 = vadd.f32 %v1285_v6, %v602_v21 }
 0x106   :  { %691 = vst.msk [vmem:[%s1610_s3 + $0x98] sm:$0xff] %vm671_vm4, %v448_v18  ;;  %723 = vst.msk [vmem:[%s1610_s3 + $0x198] sm:$0xff] %vm671_vm4, %v608_v19 }
 0x107   :  { %690 = vst.msk [vmem:[%s1610_s3 + $0x90] sm:$0xff] %vm671_vm4, %v443_v22  ;;  %722 = vst.msk [vmem:[%s1610_s3 + $0x190] sm:$0xff] %vm671_vm4, %v603_v23  ;;  %v914_v24 = vpop.f32.mrb[20].mxu0  ;;  %v962_v25 = vpop.f32.mrb[20].mxu1 }
 0x108   :  { %v458_v26 = vadd.f32 %v914_v24, %v1285_v6  ;;  %v618_v27 = vadd.f32 %v962_v25, %v1285_v6  ;;  %v452_v28 = vpop.f32.mrb[21].mxu0  ;;  %v612_v29 = vpop.f32.mrb[21].mxu1 }
 0x109   :  { %v453_v30 = vadd.f32 %v1285_v6, %v452_v28  ;;  %v613_v31 = vadd.f32 %v1285_v6, %v612_v29 }
 0x10a   :  { %693 = vst.msk [vmem:[%s1610_s3 + $0xa8] sm:$0xff] %vm671_vm4, %v458_v26  ;;  %725 = vst.msk [vmem:[%s1610_s3 + $0x1a8] sm:$0xff] %vm671_vm4, %v618_v27 }
 0x10b   :  { %692 = vst.msk [vmem:[%s1610_s3 + $0xa0] sm:$0xff] %vm671_vm4, %v453_v30  ;;  %724 = vst.msk [vmem:[%s1610_s3 + $0x1a0] sm:$0xff] %vm671_vm4, %v613_v31  ;;  %v917_v32 = vpop.f32.mrb[22].mxu0  ;;  %v965_v33 = vpop.f32.mrb[22].mxu1 }
 0x10c   :  { %v468_v34 = vadd.f32 %v917_v32, %v1285_v6  ;;  %v628_v35 = vadd.f32 %v965_v33, %v1285_v6  ;;  %v462_v36 = vpop.f32.mrb[23].mxu0  ;;  %v622_v37 = vpop.f32.mrb[23].mxu1 }
 0x10d   :  { %v463_v38 = vadd.f32 %v1285_v6, %v462_v36  ;;  %v623_v39 = vadd.f32 %v1285_v6, %v622_v37 }
 0x10e   :  { %695 = vst.msk [vmem:[%s1610_s3 + $0xb8] sm:$0xff] %vm671_vm4, %v468_v34  ;;  %727 = vst.msk [vmem:[%s1610_s3 + $0x1b8] sm:$0xff] %vm671_vm4, %v628_v35 }
 0x10f   :  { %694 = vst.msk [vmem:[%s1610_s3 + $0xb0] sm:$0xff] %vm671_vm4, %v463_v38  ;;  %726 = vst.msk [vmem:[%s1610_s3 + $0x1b0] sm:$0xff] %vm671_vm4, %v623_v39  ;;  %v920_v40 = vpop.f32.mrb[24].mxu0  ;;  %v968_v41 = vpop.f32.mrb[24].mxu1 }
 0x110   :  { %v478_v42 = vadd.f32 %v920_v40, %v1285_v6  ;;  %v638_v43 = vadd.f32 %v968_v41, %v1285_v6  ;;  %v472_v44 = vpop.f32.mrb[25].mxu0  ;;  %v632_v45 = vpop.f32.mrb[25].mxu1 }
 0x111   :  { %v473_v46 = vadd.f32 %v1285_v6, %v472_v44  ;;  %v633_v47 = vadd.f32 %v1285_v6, %v632_v45 }
 0x112   :  { %697 = vst.msk [vmem:[%s1610_s3 + $0xc8] sm:$0xff] %vm671_vm4, %v478_v42  ;;  %729 = vst.msk [vmem:[%s1610_s3 + $0x1c8] sm:$0xff] %vm671_vm4, %v638_v43 }
 0x113   :  { %696 = vst.msk [vmem:[%s1610_s3 + $0xc0] sm:$0xff] %vm671_vm4, %v473_v46  ;;  %728 = vst.msk [vmem:[%s1610_s3 + $0x1c0] sm:$0xff] %vm671_vm4, %v633_v47  ;;  %v923_v48 = vpop.f32.mrb[26].mxu0  ;;  %v971_v49 = vpop.f32.mrb[26].mxu1 }
 0x114   :  { %v488_v50 = vadd.f32 %v923_v48, %v1285_v6  ;;  %v648_v51 = vadd.f32 %v971_v49, %v1285_v6  ;;  %v482_v52 = vpop.f32.mrb[27].mxu0  ;;  %v642_v53 = vpop.f32.mrb[27].mxu1 }
 0x115   :  { %v483_v54 = vadd.f32 %v1285_v6, %v482_v52  ;;  %v643_v55 = vadd.f32 %v1285_v6, %v642_v53 }
 0x116   :  { %699 = vst.msk [vmem:[%s1610_s3 + $0xd8] sm:$0xff] %vm671_vm4, %v488_v50  ;;  %731 = vst.msk [vmem:[%s1610_s3 + $0x1d8] sm:$0xff] %vm671_vm4, %v648_v51 }
 0x117   :  { %698 = vst.msk [vmem:[%s1610_s3 + $0xd0] sm:$0xff] %vm671_vm4, %v483_v54  ;;  %730 = vst.msk [vmem:[%s1610_s3 + $0x1d0] sm:$0xff] %vm671_vm4, %v643_v55  ;;  %v926_v56 = vpop.f32.mrb[28].mxu0  ;;  %v974_v57 = vpop.f32.mrb[28].mxu1 }
 0x118   :  { %v498_v58 = vadd.f32 %v926_v56, %v1285_v6  ;;  %v658_v59 = vadd.f32 %v974_v57, %v1285_v6  ;;  %v492_v60 = vpop.f32.mrb[29].mxu0  ;;  %v652_v61 = vpop.f32.mrb[29].mxu1 }
 0x119   :  { %v493_v62 = vadd.f32 %v1285_v6, %v492_v60  ;;  %v653_v63 = vadd.f32 %v1285_v6, %v652_v61 }
 0x11a   :  { %701 = vst.msk [vmem:[%s1610_s3 + $0xe8] sm:$0xff] %vm671_vm4, %v498_v58  ;;  %733 = vst.msk [vmem:[%s1610_s3 + $0x1e8] sm:$0xff] %vm671_vm4, %v658_v59 }
 0x11b   :  { %700 = vst.msk [vmem:[%s1610_s3 + $0xe0] sm:$0xff] %vm671_vm4, %v493_v62  ;;  %732 = vst.msk [vmem:[%s1610_s3 + $0x1e0] sm:$0xff] %vm671_vm4, %v653_v63  ;;  %v929_v0 = vpop.f32.mrb[30].mxu0  ;;  %v977_v1 = vpop.f32.mrb[30].mxu1 }
 0x11c   :  { %v508_v2 = vadd.f32 %v929_v0, %v1285_v6  ;;  %v668_v3 = vadd.f32 %v977_v1, %v1285_v6  ;;  %v502_v4 = vpop.f32.mrb[31].mxu0  ;;  %v662_v5 = vpop.f32.mrb[31].mxu1 }
 0x11d   :  { %v503_v7 = vadd.f32 %v1285_v6, %v502_v4  ;;  %v663_v8 = vadd.f32 %v1285_v6, %v662_v5 }
 0x11e   :  { %703 = vst.msk [vmem:[%s1610_s3 + $0xf8] sm:$0xff] %vm671_vm4, %v508_v2  ;;  %735 = vst.msk [vmem:[%s1610_s3 + $0x1f8] sm:$0xff] %vm671_vm4, %v668_v3 }
 0x11f   :  { %702 = vst.msk [vmem:[%s1610_s3 + $0xf0] sm:$0xff] %vm671_vm4, %v503_v7  ;;  %734 = vst.msk [vmem:[%s1610_s3 + $0x1f0] sm:$0xff] %vm671_vm4, %v663_v8 }

// kernel: reformer_forward_pallas.22
= control target key start
LH: loop header
LB: loop body
LE: loop exit
PB: predicated region body
PF: predicated region fallthrough
CT: control target
= control target key end

     0   :  { %vm87_vm0 = vcmask 130048   ;;  %vm729_vm1 = vcmask 261120   ;;  %s1642_s1 = inlined_call_operand.vmem [shape: f32[16,32], index: 1, kind: input, shape index: {}]   ;;  %s1643_s0 = inlined_call_operand.vmem [shape: f32[512,16], index: 0, kind: input, shape index: {}]   ;;  %s1644_s2 = inlined_call_operand.vmem [shape: f32[1,32], index: 2, kind: input, shape index: {}]   ;;  %s1645_s3 = inlined_call_operand.vmem [shape: f32[512,32], index: 3, kind: output, shape index: {}]  }
   0x1   :  { %v78_v0 = vld [vmem:[%s1642_s1] sm:$0xff]  ;;  %v79_v1 = vld [vmem:[%s1642_s1 + $0x8] sm:$0xff]  ;;  %v16_v7 = vld [vmem:[%s1643_s0 + $0x10] sm:$0xff] }
   0x2   :  { %v14_v2 = vld [vmem:[%s1643_s0] sm:$0xff]  ;;  %v1029_v3 = vpack.c.bf16 %v79_v1, %v78_v0  ;;  %v15_v5 = vld [vmem:[%s1643_s0 + $0x8] sm:$0xff]  ;;  %v48_v8 = vld [vmem:[%s1643_s0 + $0x110] sm:$0xff] }
   0x3   :  { %933 = vmatprep.mubr.msk.f32.mxu0 %vm87_vm0, %v14_v2  ;;  %v46_v4 = vld [vmem:[%s1643_s0 + $0x100] sm:$0xff]  ;;  %v47_v6 = vld [vmem:[%s1643_s0 + $0x108] sm:$0xff]  ;;  %v17_v9 = vld [vmem:[%s1643_s0 + $0x18] sm:$0xff] }
   0x4   :  { %981 = vmatprep.mubr.msk.f32.mxu1 %vm87_vm0, %v46_v4  ;;  %1030 = vmatprep.subr.bf16.mxu0 %v1029_v3  ;;  %v49_v10 = vld [vmem:[%s1643_s0 + $0x118] sm:$0xff]  ;;  %v18_v11 = vld [vmem:[%s1643_s0 + $0x20] sm:$0xff]  ;;  %v19_v13 = vld [vmem:[%s1643_s0 + $0x28] sm:$0xff] }
   0x5   :  { %1033 = vmatprep.subr.bf16.mxu1 %v1029_v3  ;;  %1032 = vmatpush3.bf16.msra.mxu0 %v1029_v3  ;;  %v50_v12 = vld [vmem:[%s1643_s0 + $0x120] sm:$0xff]  ;;  %v51_v14 = vld [vmem:[%s1643_s0 + $0x128] sm:$0xff]  ;;  %v20_v15 = vld [vmem:[%s1643_s0 + $0x30] sm:$0xff] }
   0x6   :  { %1034 = vmatpush3.bf16.msra.mxu1 %v1029_v3  ;;  %v52_v16 = vld [vmem:[%s1643_s0 + $0x130] sm:$0xff]  ;;  %v21_v17 = vld [vmem:[%s1643_s0 + $0x38] sm:$0xff]  ;;  %v22_v19 = vld [vmem:[%s1643_s0 + $0x40] sm:$0xff] }
   0x7   :  { %v53_v18 = vld [vmem:[%s1643_s0 + $0x138] sm:$0xff]  ;;  %v54_v20 = vld [vmem:[%s1643_s0 + $0x140] sm:$0xff]  ;;  %v23_v21 = vld [vmem:[%s1643_s0 + $0x48] sm:$0xff] }
   0x8   :  { %934 = vmatmul.mubr.msk.f32.vlgmr.msra.gmra.mrb[0].mxu0 %vm87_vm0, %v15_v5  ;;  %v55_v22 = vld [vmem:[%s1643_s0 + $0x148] sm:$0xff]  ;;  %v24_v23 = vld [vmem:[%s1643_s0 + $0x50] sm:$0xff]  ;;  %v25_v25 = vld [vmem:[%s1643_s0 + $0x58] sm:$0xff] }
   0x9   :  { %982 = vmatmul.mubr.msk.f32.vlgmr.msra.gmra.mrb[0].mxu1 %vm87_vm0, %v47_v6  ;;  %936 = vmatprep.mubr.msk.f32.mxu0 %vm87_vm0, %v16_v7  ;;  %v56_v24 = vld [vmem:[%s1643_s0 + $0x150] sm:$0xff]  ;;  %v57_v26 = vld [vmem:[%s1643_s0 + $0x158] sm:$0xff]  ;;  %v26_v27 = vld [vmem:[%s1643_s0 + $0x60] sm:$0xff] }
   0xa   :  { %984 = vmatprep.mubr.msk.f32.mxu1 %vm87_vm0, %v48_v8  ;;  %v58_v28 = vld [vmem:[%s1643_s0 + $0x160] sm:$0xff]  ;;  %v27_v29 = vld [vmem:[%s1643_s0 + $0x68] sm:$0xff]  ;;  %v28_v31 = vld [vmem:[%s1643_s0 + $0x70] sm:$0xff] }
   0xb   :  { %v59_v30 = vld [vmem:[%s1643_s0 + $0x168] sm:$0xff]  ;;  %v60_v32 = vld [vmem:[%s1643_s0 + $0x170] sm:$0xff]  ;;  %v29_v33 = vld [vmem:[%s1643_s0 + $0x78] sm:$0xff] }
   0xc   :  { %937 = vmatmul.mubr.msk.f32.gmra.mrb[2].mxu0 %vm87_vm0, %v17_v9  ;;  %v61_v34 = vld [vmem:[%s1643_s0 + $0x178] sm:$0xff]  ;;  %v30_v35 = vld [vmem:[%s1643_s0 + $0x80] sm:$0xff]  ;;  %v31_v37 = vld [vmem:[%s1643_s0 + $0x88] sm:$0xff] }
   0xd   :  { %985 = vmatmul.mubr.msk.f32.gmra.mrb[2].mxu1 %vm87_vm0, %v49_v10  ;;  %939 = vmatprep.mubr.msk.f32.mxu0 %vm87_vm0, %v18_v11  ;;  %v62_v36 = vld [vmem:[%s1643_s0 + $0x180] sm:$0xff]  ;;  %v63_v38 = vld [vmem:[%s1643_s0 + $0x188] sm:$0xff]  ;;  %v32_v39 = vld [vmem:[%s1643_s0 + $0x90] sm:$0xff] }
   0xe   :  { %987 = vmatprep.mubr.msk.f32.mxu1 %vm87_vm0, %v50_v12  ;;  %v64_v40 = vld [vmem:[%s1643_s0 + $0x190] sm:$0xff]  ;;  %v33_v41 = vld [vmem:[%s1643_s0 + $0x98] sm:$0xff]  ;;  %v34_v43 = vld [vmem:[%s1643_s0 + $0xa0] sm:$0xff] }
   0xf   :  { %v65_v42 = vld [vmem:[%s1643_s0 + $0x198] sm:$0xff]  ;;  %v66_v44 = vld [vmem:[%s1643_s0 + $0x1a0] sm:$0xff]  ;;  %v35_v45 = vld [vmem:[%s1643_s0 + $0xa8] sm:$0xff] }
  0x10   :  { %940 = vmatmul.mubr.msk.f32.gmra.mrb[4].mxu0 %vm87_vm0, %v19_v13  ;;  %v67_v46 = vld [vmem:[%s1643_s0 + $0x1a8] sm:$0xff]  ;;  %v36_v47 = vld [vmem:[%s1643_s0 + $0xb0] sm:$0xff]  ;;  %v37_v49 = vld [vmem:[%s1643_s0 + $0xb8] sm:$0xff] }
  0x11   :  { %988 = vmatmul.mubr.msk.f32.gmra.mrb[4].mxu1 %vm87_vm0, %v51_v14  ;;  %942 = vmatprep.mubr.msk.f32.mxu0 %vm87_vm0, %v20_v15  ;;  %v68_v48 = vld [vmem:[%s1643_s0 + $0x1b0] sm:$0xff]  ;;  %v69_v50 = vld [vmem:[%s1643_s0 + $0x1b8] sm:$0xff]  ;;  %v38_v51 = vld [vmem:[%s1643_s0 + $0xc0] sm:$0xff] }
  0x12   :  { %990 = vmatprep.mubr.msk.f32.mxu1 %vm87_vm0, %v52_v16  ;;  %v70_v52 = vld [vmem:[%s1643_s0 + $0x1c0] sm:$0xff]  ;;  %v39_v53 = vld [vmem:[%s1643_s0 + $0xc8] sm:$0xff]  ;;  %v40_v55 = vld [vmem:[%s1643_s0 + $0xd0] sm:$0xff] }
  0x13   :  { %v71_v54 = vld [vmem:[%s1643_s0 + $0x1c8] sm:$0xff]  ;;  %v72_v56 = vld [vmem:[%s1643_s0 + $0x1d0] sm:$0xff]  ;;  %v41_v57 = vld [vmem:[%s1643_s0 + $0xd8] sm:$0xff] }
  0x14   :  { %943 = vmatmul.mubr.msk.f32.gmra.mrb[6].mxu0 %vm87_vm0, %v21_v17  ;;  %v73_v58 = vld [vmem:[%s1643_s0 + $0x1d8] sm:$0xff]  ;;  %v42_v59 = vld [vmem:[%s1643_s0 + $0xe0] sm:$0xff]  ;;  %v43_v61 = vld [vmem:[%s1643_s0 + $0xe8] sm:$0xff] }
  0x15   :  { %991 = vmatmul.mubr.msk.f32.gmra.mrb[6].mxu1 %vm87_vm0, %v53_v18  ;;  %945 = vmatprep.mubr.msk.f32.mxu0 %vm87_vm0, %v22_v19  ;;  %v74_v60 = vld [vmem:[%s1643_s0 + $0x1e0] sm:$0xff]  ;;  %v75_v62 = vld [vmem:[%s1643_s0 + $0x1e8] sm:$0xff]  ;;  %v44_v63 = vld [vmem:[%s1643_s0 + $0xf0] sm:$0xff] }
  0x16   :  { %993 = vmatprep.mubr.msk.f32.mxu1 %vm87_vm0, %v54_v20  ;;  %v76_v0 = vld [vmem:[%s1643_s0 + $0x1f0] sm:$0xff]  ;;  %v45_v1 = vld [vmem:[%s1643_s0 + $0xf8] sm:$0xff]  ;;  %v1320_v3 = vld [vmem:[%s1644_s2] ss:$0 sm:$0xff] }
  0x17   :  { %v77_v2 = vld [vmem:[%s1643_s0 + $0x1f8] sm:$0xff] }
  0x18   :  { %946 = vmatmul.mubr.msk.f32.gmra.mrb[8].mxu0 %vm87_vm0, %v23_v21 }
  0x19   :  { %994 = vmatmul.mubr.msk.f32.gmra.mrb[8].mxu1 %vm87_vm0, %v55_v22  ;;  %948 = vmatprep.mubr.msk.f32.mxu0 %vm87_vm0, %v24_v23 }
  0x1a   :  { %996 = vmatprep.mubr.msk.f32.mxu1 %vm87_vm0, %v56_v24 }
  0x1c   :  { %949 = vmatmul.mubr.msk.f32.gmra.mrb[10].mxu0 %vm87_vm0, %v25_v25 }
  0x1d   :  { %997 = vmatmul.mubr.msk.f32.gmra.mrb[10].mxu1 %vm87_vm0, %v57_v26  ;;  %951 = vmatprep.mubr.msk.f32.mxu0 %vm87_vm0, %v26_v27 }
  0x1e   :  { %999 = vmatprep.mubr.msk.f32.mxu1 %vm87_vm0, %v58_v28 }
  0x20   :  { %952 = vmatmul.mubr.msk.f32.gmra.mrb[12].mxu0 %vm87_vm0, %v27_v29 }
  0x21   :  { %1000 = vmatmul.mubr.msk.f32.gmra.mrb[12].mxu1 %vm87_vm0, %v59_v30  ;;  %954 = vmatprep.mubr.msk.f32.mxu0 %vm87_vm0, %v28_v31 }
  0x22   :  { %1002 = vmatprep.mubr.msk.f32.mxu1 %vm87_vm0, %v60_v32 }
  0x24   :  { %955 = vmatmul.mubr.msk.f32.gmra.mrb[14].mxu0 %vm87_vm0, %v29_v33 }
  0x25   :  { %1003 = vmatmul.mubr.msk.f32.gmra.mrb[14].mxu1 %vm87_vm0, %v61_v34  ;;  %957 = vmatprep.mubr.msk.f32.mxu0 %vm87_vm0, %v30_v35 }
  0x26   :  { %1005 = vmatprep.mubr.msk.f32.mxu1 %vm87_vm0, %v62_v36 }
  0x28   :  { %958 = vmatmul.mubr.msk.f32.gmra.mrb[16].mxu0 %vm87_vm0, %v31_v37 }
  0x29   :  { %1006 = vmatmul.mubr.msk.f32.gmra.mrb[16].mxu1 %vm87_vm0, %v63_v38  ;;  %960 = vmatprep.mubr.msk.f32.mxu0 %vm87_vm0, %v32_v39 }
  0x2a   :  { %1008 = vmatprep.mubr.msk.f32.mxu1 %vm87_vm0, %v64_v40 }
  0x2c   :  { %961 = vmatmul.mubr.msk.f32.gmra.mrb[18].mxu0 %vm87_vm0, %v33_v41 }
  0x2d   :  { %1009 = vmatmul.mubr.msk.f32.gmra.mrb[18].mxu1 %vm87_vm0, %v65_v42  ;;  %963 = vmatprep.mubr.msk.f32.mxu0 %vm87_vm0, %v34_v43 }
  0x2e   :  { %1011 = vmatprep.mubr.msk.f32.mxu1 %vm87_vm0, %v66_v44 }
  0x30   :  { %964 = vmatmul.mubr.msk.f32.gmra.mrb[20].mxu0 %vm87_vm0, %v35_v45 }
  0x31   :  { %1012 = vmatmul.mubr.msk.f32.gmra.mrb[20].mxu1 %vm87_vm0, %v67_v46  ;;  %966 = vmatprep.mubr.msk.f32.mxu0 %vm87_vm0, %v36_v47 }
  0x32   :  { %1014 = vmatprep.mubr.msk.f32.mxu1 %vm87_vm0, %v68_v48 }
  0x34   :  { %967 = vmatmul.mubr.msk.f32.gmra.mrb[22].mxu0 %vm87_vm0, %v37_v49 }
  0x35   :  { %1015 = vmatmul.mubr.msk.f32.gmra.mrb[22].mxu1 %vm87_vm0, %v69_v50  ;;  %969 = vmatprep.mubr.msk.f32.mxu0 %vm87_vm0, %v38_v51 }
  0x36   :  { %1017 = vmatprep.mubr.msk.f32.mxu1 %vm87_vm0, %v70_v52 }
  0x38   :  { %970 = vmatmul.mubr.msk.f32.gmra.mrb[24].mxu0 %vm87_vm0, %v39_v53 }
  0x39   :  { %1018 = vmatmul.mubr.msk.f32.gmra.mrb[24].mxu1 %vm87_vm0, %v71_v54  ;;  %972 = vmatprep.mubr.msk.f32.mxu0 %vm87_vm0, %v40_v55 }
  0x3a   :  { %1020 = vmatprep.mubr.msk.f32.mxu1 %vm87_vm0, %v72_v56 }
  0x3c   :  { %973 = vmatmul.mubr.msk.f32.gmra.mrb[26].mxu0 %vm87_vm0, %v41_v57 }
  0x3d   :  { %1021 = vmatmul.mubr.msk.f32.gmra.mrb[26].mxu1 %vm87_vm0, %v73_v58  ;;  %975 = vmatprep.mubr.msk.f32.mxu0 %vm87_vm0, %v42_v59 }
  0x3e   :  { %1023 = vmatprep.mubr.msk.f32.mxu1 %vm87_vm0, %v74_v60 }
  0x40   :  { %976 = vmatmul.mubr.msk.f32.gmra.mrb[28].mxu0 %vm87_vm0, %v43_v61 }
  0x41   :  { %1024 = vmatmul.mubr.msk.f32.gmra.mrb[28].mxu1 %vm87_vm0, %v75_v62  ;;  %978 = vmatprep.mubr.msk.f32.mxu0 %vm87_vm0, %v44_v63 }
  0x42   :  { %1026 = vmatprep.mubr.msk.f32.mxu1 %vm87_vm0, %v76_v0 }
  0x44   :  { %979 = vmatmul.mubr.msk.f32.gmra.mrb[30].mxu0 %vm87_vm0, %v45_v1 }
  0x45   :  { %1027 = vmatmul.mubr.msk.f32.gmra.mrb[30].mxu1 %vm87_vm0, %v77_v2 }
  0xdb   :  { %v935_v4 = vpop.f32.mrb[0].mxu0 }
  0xdc   :  { %v983_v5 = vpop.f32.mrb[0].mxu1  ;;  %v352_v6 = vadd.f32 %v935_v4, %v1320_v3  ;;  %v346_v8 = vpop.f32.mrb[1].mxu0 }
  0xdd   :  { %v512_v7 = vadd.f32 %v983_v5, %v1320_v3  ;;  %v506_v9 = vpop.f32.mrb[1].mxu1  ;;  %v347_v10 = vadd.f32 %v1320_v3, %v346_v8 }
  0xde   :  { %v507_v11 = vadd.f32 %v1320_v3, %v506_v9  ;;  %v666_v12 = vmax.f32 %v352_v6, 0.0 }
  0xdf   :  { %v698_v13 = vmax.f32 %v512_v7, 0.0  ;;  %v665_v14 = vmax.f32 %v347_v10, 0.0  ;;  %v938_v16 = vpop.f32.mrb[2].mxu0 }
  0xe0   :  { %v697_v15 = vmax.f32 %v507_v11, 0.0  ;;  %v986_v17 = vpop.f32.mrb[2].mxu1  ;;  %731 = vst.msk [vmem:[%s1645_s3 + $0x8] sm:$0xff] %vm729_vm1, %v666_v12  ;;  %v362_v18 = vadd.f32 %v938_v16, %v1320_v3  ;;  %v356_v20 = vpop.f32.mrb[3].mxu0 }
  0xe1   :  { %763 = vst.msk [vmem:[%s1645_s3 + $0x108] sm:$0xff] %vm729_vm1, %v698_v13  ;;  %v522_v19 = vadd.f32 %v986_v17, %v1320_v3  ;;  %v516_v21 = vpop.f32.mrb[3].mxu1  ;;  %730 = vst.msk [vmem:[%s1645_s3] sm:$0xff] %vm729_vm1, %v665_v14  ;;  %v357_v22 = vadd.f32 %v1320_v3, %v356_v20 }
  0xe2   :  { %762 = vst.msk [vmem:[%s1645_s3 + $0x100] sm:$0xff] %vm729_vm1, %v697_v15  ;;  %v517_v23 = vadd.f32 %v1320_v3, %v516_v21  ;;  %v668_v24 = vmax.f32 %v362_v18, 0.0 }
  0xe3   :  { %v700_v25 = vmax.f32 %v522_v19, 0.0  ;;  %v667_v26 = vmax.f32 %v357_v22, 0.0  ;;  %v941_v28 = vpop.f32.mrb[4].mxu0 }
  0xe4   :  { %v699_v27 = vmax.f32 %v517_v23, 0.0  ;;  %v989_v29 = vpop.f32.mrb[4].mxu1  ;;  %733 = vst.msk [vmem:[%s1645_s3 + $0x18] sm:$0xff] %vm729_vm1, %v668_v24  ;;  %v372_v30 = vadd.f32 %v941_v28, %v1320_v3  ;;  %v366_v32 = vpop.f32.mrb[5].mxu0 }
  0xe5   :  { %765 = vst.msk [vmem:[%s1645_s3 + $0x118] sm:$0xff] %vm729_vm1, %v700_v25  ;;  %v532_v31 = vadd.f32 %v989_v29, %v1320_v3  ;;  %v526_v33 = vpop.f32.mrb[5].mxu1  ;;  %732 = vst.msk [vmem:[%s1645_s3 + $0x10] sm:$0xff] %vm729_vm1, %v667_v26  ;;  %v367_v34 = vadd.f32 %v1320_v3, %v366_v32 }
  0xe6   :  { %764 = vst.msk [vmem:[%s1645_s3 + $0x110] sm:$0xff] %vm729_vm1, %v699_v27  ;;  %v527_v35 = vadd.f32 %v1320_v3, %v526_v33  ;;  %v670_v36 = vmax.f32 %v372_v30, 0.0 }
  0xe7   :  { %v702_v37 = vmax.f32 %v532_v31, 0.0  ;;  %v669_v38 = vmax.f32 %v367_v34, 0.0  ;;  %v944_v40 = vpop.f32.mrb[6].mxu0 }
  0xe8   :  { %v701_v39 = vmax.f32 %v527_v35, 0.0  ;;  %v992_v41 = vpop.f32.mrb[6].mxu1  ;;  %735 = vst.msk [vmem:[%s1645_s3 + $0x28] sm:$0xff] %vm729_vm1, %v670_v36  ;;  %v382_v42 = vadd.f32 %v944_v40, %v1320_v3  ;;  %v376_v44 = vpop.f32.mrb[7].mxu0 }
  0xe9   :  { %767 = vst.msk [vmem:[%s1645_s3 + $0x128] sm:$0xff] %vm729_vm1, %v702_v37  ;;  %v542_v43 = vadd.f32 %v992_v41, %v1320_v3  ;;  %v536_v45 = vpop.f32.mrb[7].mxu1  ;;  %734 = vst.msk [vmem:[%s1645_s3 + $0x20] sm:$0xff] %vm729_vm1, %v669_v38  ;;  %v377_v46 = vadd.f32 %v1320_v3, %v376_v44 }
  0xea   :  { %766 = vst.msk [vmem:[%s1645_s3 + $0x120] sm:$0xff] %vm729_vm1, %v701_v39  ;;  %v537_v47 = vadd.f32 %v1320_v3, %v536_v45  ;;  %v672_v48 = vmax.f32 %v382_v42, 0.0 }
  0xeb   :  { %v704_v49 = vmax.f32 %v542_v43, 0.0  ;;  %v671_v50 = vmax.f32 %v377_v46, 0.0  ;;  %v947_v52 = vpop.f32.mrb[8].mxu0 }
  0xec   :  { %v703_v51 = vmax.f32 %v537_v47, 0.0  ;;  %v995_v53 = vpop.f32.mrb[8].mxu1  ;;  %737 = vst.msk [vmem:[%s1645_s3 + $0x38] sm:$0xff] %vm729_vm1, %v672_v48  ;;  %v392_v54 = vadd.f32 %v947_v52, %v1320_v3  ;;  %v386_v56 = vpop.f32.mrb[9].mxu0 }
  0xed   :  { %769 = vst.msk [vmem:[%s1645_s3 + $0x138] sm:$0xff] %vm729_vm1, %v704_v49  ;;  %v552_v55 = vadd.f32 %v995_v53, %v1320_v3  ;;  %v546_v57 = vpop.f32.mrb[9].mxu1  ;;  %736 = vst.msk [vmem:[%s1645_s3 + $0x30] sm:$0xff] %vm729_vm1, %v671_v50  ;;  %v387_v58 = vadd.f32 %v1320_v3, %v386_v56 }
  0xee   :  { %768 = vst.msk [vmem:[%s1645_s3 + $0x130] sm:$0xff] %vm729_vm1, %v703_v51  ;;  %v547_v59 = vadd.f32 %v1320_v3, %v546_v57  ;;  %v674_v60 = vmax.f32 %v392_v54, 0.0 }
  0xef   :  { %v706_v61 = vmax.f32 %v552_v55, 0.0  ;;  %v673_v62 = vmax.f32 %v387_v58, 0.0  ;;  %v950_v0 = vpop.f32.mrb[10].mxu0 }
  0xf0   :  { %v705_v63 = vmax.f32 %v547_v59, 0.0  ;;  %v998_v1 = vpop.f32.mrb[10].mxu1  ;;  %739 = vst.msk [vmem:[%s1645_s3 + $0x48] sm:$0xff] %vm729_vm1, %v674_v60  ;;  %v402_v2 = vadd.f32 %v950_v0, %v1320_v3  ;;  %v396_v5 = vpop.f32.mrb[11].mxu0 }
  0xf1   :  { %771 = vst.msk [vmem:[%s1645_s3 + $0x148] sm:$0xff] %vm729_vm1, %v706_v61  ;;  %v562_v4 = vadd.f32 %v998_v1, %v1320_v3  ;;  %v556_v6 = vpop.f32.mrb[11].mxu1  ;;  %738 = vst.msk [vmem:[%s1645_s3 + $0x40] sm:$0xff] %vm729_vm1, %v673_v62  ;;  %v397_v7 = vadd.f32 %v1320_v3, %v396_v5 }
  0xf2   :  { %770 = vst.msk [vmem:[%s1645_s3 + $0x140] sm:$0xff] %vm729_vm1, %v705_v63  ;;  %v557_v8 = vadd.f32 %v1320_v3, %v556_v6  ;;  %v676_v9 = vmax.f32 %v402_v2, 0.0 }
  0xf3   :  { %v708_v10 = vmax.f32 %v562_v4, 0.0  ;;  %v675_v11 = vmax.f32 %v397_v7, 0.0  ;;  %v953_v13 = vpop.f32.mrb[12].mxu0 }
  0xf4   :  { %v707_v12 = vmax.f32 %v557_v8, 0.0  ;;  %v1001_v14 = vpop.f32.mrb[12].mxu1  ;;  %741 = vst.msk [vmem:[%s1645_s3 + $0x58] sm:$0xff] %vm729_vm1, %v676_v9  ;;  %v412_v15 = vadd.f32 %v953_v13, %v1320_v3  ;;  %v406_v17 = vpop.f32.mrb[13].mxu0 }
  0xf5   :  { %773 = vst.msk [vmem:[%s1645_s3 + $0x158] sm:$0xff] %vm729_vm1, %v708_v10  ;;  %v572_v16 = vadd.f32 %v1001_v14, %v1320_v3  ;;  %v566_v18 = vpop.f32.mrb[13].mxu1  ;;  %740 = vst.msk [vmem:[%s1645_s3 + $0x50] sm:$0xff] %vm729_vm1, %v675_v11  ;;  %v407_v19 = vadd.f32 %v1320_v3, %v406_v17 }
  0xf6   :  { %772 = vst.msk [vmem:[%s1645_s3 + $0x150] sm:$0xff] %vm729_vm1, %v707_v12  ;;  %v567_v20 = vadd.f32 %v1320_v3, %v566_v18  ;;  %v678_v21 = vmax.f32 %v412_v15, 0.0 }
  0xf7   :  { %v710_v22 = vmax.f32 %v572_v16, 0.0  ;;  %v677_v23 = vmax.f32 %v407_v19, 0.0  ;;  %v956_v25 = vpop.f32.mrb[14].mxu0 }
  0xf8   :  { %v709_v24 = vmax.f32 %v567_v20, 0.0  ;;  %v1004_v26 = vpop.f32.mrb[14].mxu1  ;;  %743 = vst.msk [vmem:[%s1645_s3 + $0x68] sm:$0xff] %vm729_vm1, %v678_v21  ;;  %v422_v27 = vadd.f32 %v956_v25, %v1320_v3  ;;  %v416_v29 = vpop.f32.mrb[15].mxu0 }
  0xf9   :  { %775 = vst.msk [vmem:[%s1645_s3 + $0x168] sm:$0xff] %vm729_vm1, %v710_v22  ;;  %v582_v28 = vadd.f32 %v1004_v26, %v1320_v3  ;;  %v576_v30 = vpop.f32.mrb[15].mxu1  ;;  %742 = vst.msk [vmem:[%s1645_s3 + $0x60] sm:$0xff] %vm729_vm1, %v677_v23  ;;  %v417_v31 = vadd.f32 %v1320_v3, %v416_v29 }
  0xfa   :  { %774 = vst.msk [vmem:[%s1645_s3 + $0x160] sm:$0xff] %vm729_vm1, %v709_v24  ;;  %v577_v32 = vadd.f32 %v1320_v3, %v576_v30  ;;  %v680_v33 = vmax.f32 %v422_v27, 0.0 }
  0xfb   :  { %v712_v34 = vmax.f32 %v582_v28, 0.0  ;;  %v679_v35 = vmax.f32 %v417_v31, 0.0  ;;  %v959_v37 = vpop.f32.mrb[16].mxu0 }
  0xfc   :  { %v711_v36 = vmax.f32 %v577_v32, 0.0  ;;  %v1007_v38 = vpop.f32.mrb[16].mxu1  ;;  %745 = vst.msk [vmem:[%s1645_s3 + $0x78] sm:$0xff] %vm729_vm1, %v680_v33  ;;  %v432_v39 = vadd.f32 %v959_v37, %v1320_v3  ;;  %v426_v41 = vpop.f32.mrb[17].mxu0 }
  0xfd   :  { %777 = vst.msk [vmem:[%s1645_s3 + $0x178] sm:$0xff] %vm729_vm1, %v712_v34  ;;  %v592_v40 = vadd.f32 %v1007_v38, %v1320_v3  ;;  %v586_v42 = vpop.f32.mrb[17].mxu1  ;;  %744 = vst.msk [vmem:[%s1645_s3 + $0x70] sm:$0xff] %vm729_vm1, %v679_v35  ;;  %v427_v43 = vadd.f32 %v1320_v3, %v426_v41 }
  0xfe   :  { %776 = vst.msk [vmem:[%s1645_s3 + $0x170] sm:$0xff] %vm729_vm1, %v711_v36  ;;  %v587_v44 = vadd.f32 %v1320_v3, %v586_v42  ;;  %v682_v45 = vmax.f32 %v432_v39, 0.0 }
  0xff   :  { %v714_v46 = vmax.f32 %v592_v40, 0.0  ;;  %v681_v47 = vmax.f32 %v427_v43, 0.0  ;;  %v962_v49 = vpop.f32.mrb[18].mxu0 }
 0x100   :  { %v713_v48 = vmax.f32 %v587_v44, 0.0  ;;  %v1010_v50 = vpop.f32.mrb[18].mxu1  ;;  %747 = vst.msk [vmem:[%s1645_s3 + $0x88] sm:$0xff] %vm729_vm1, %v682_v45  ;;  %v442_v51 = vadd.f32 %v962_v49, %v1320_v3  ;;  %v436_v53 = vpop.f32.mrb[19].mxu0 }
 0x101   :  { %779 = vst.msk [vmem:[%s1645_s3 + $0x188] sm:$0xff] %vm729_vm1, %v714_v46  ;;  %v602_v52 = vadd.f32 %v1010_v50, %v1320_v3  ;;  %v596_v54 = vpop.f32.mrb[19].mxu1  ;;  %746 = vst.msk [vmem:[%s1645_s3 + $0x80] sm:$0xff] %vm729_vm1, %v681_v47  ;;  %v437_v55 = vadd.f32 %v1320_v3, %v436_v53 }
 0x102   :  { %778 = vst.msk [vmem:[%s1645_s3 + $0x180] sm:$0xff] %vm729_vm1, %v713_v48  ;;  %v597_v56 = vadd.f32 %v1320_v3, %v596_v54  ;;  %v684_v57 = vmax.f32 %v442_v51, 0.0 }
 0x103   :  { %v716_v58 = vmax.f32 %v602_v52, 0.0  ;;  %v683_v59 = vmax.f32 %v437_v55, 0.0  ;;  %v965_v61 = vpop.f32.mrb[20].mxu0 }
 0x104   :  { %v715_v60 = vmax.f32 %v597_v56, 0.0  ;;  %v1013_v62 = vpop.f32.mrb[20].mxu1  ;;  %749 = vst.msk [vmem:[%s1645_s3 + $0x98] sm:$0xff] %vm729_vm1, %v684_v57  ;;  %v452_v63 = vadd.f32 %v965_v61, %v1320_v3  ;;  %v446_v1 = vpop.f32.mrb[21].mxu0 }
 0x105   :  { %781 = vst.msk [vmem:[%s1645_s3 + $0x198] sm:$0xff] %vm729_vm1, %v716_v58  ;;  %v612_v0 = vadd.f32 %v1013_v62, %v1320_v3  ;;  %v606_v2 = vpop.f32.mrb[21].mxu1  ;;  %748 = vst.msk [vmem:[%s1645_s3 + $0x90] sm:$0xff] %vm729_vm1, %v683_v59  ;;  %v447_v4 = vadd.f32 %v1320_v3, %v446_v1 }
 0x106   :  { %780 = vst.msk [vmem:[%s1645_s3 + $0x190] sm:$0xff] %vm729_vm1, %v715_v60  ;;  %v607_v5 = vadd.f32 %v1320_v3, %v606_v2  ;;  %v686_v6 = vmax.f32 %v452_v63, 0.0 }
 0x107   :  { %v718_v7 = vmax.f32 %v612_v0, 0.0  ;;  %v685_v8 = vmax.f32 %v447_v4, 0.0  ;;  %v968_v10 = vpop.f32.mrb[22].mxu0 }
 0x108   :  { %v717_v9 = vmax.f32 %v607_v5, 0.0  ;;  %v1016_v11 = vpop.f32.mrb[22].mxu1  ;;  %751 = vst.msk [vmem:[%s1645_s3 + $0xa8] sm:$0xff] %vm729_vm1, %v686_v6  ;;  %v462_v12 = vadd.f32 %v968_v10, %v1320_v3  ;;  %v456_v14 = vpop.f32.mrb[23].mxu0 }
 0x109   :  { %783 = vst.msk [vmem:[%s1645_s3 + $0x1a8] sm:$0xff] %vm729_vm1, %v718_v7  ;;  %v622_v13 = vadd.f32 %v1016_v11, %v1320_v3  ;;  %v616_v15 = vpop.f32.mrb[23].mxu1  ;;  %750 = vst.msk [vmem:[%s1645_s3 + $0xa0] sm:$0xff] %vm729_vm1, %v685_v8  ;;  %v457_v16 = vadd.f32 %v1320_v3, %v456_v14 }
 0x10a   :  { %782 = vst.msk [vmem:[%s1645_s3 + $0x1a0] sm:$0xff] %vm729_vm1, %v717_v9  ;;  %v617_v17 = vadd.f32 %v1320_v3, %v616_v15  ;;  %v688_v18 = vmax.f32 %v462_v12, 0.0 }
 0x10b   :  { %v720_v19 = vmax.f32 %v622_v13, 0.0  ;;  %v687_v20 = vmax.f32 %v457_v16, 0.0  ;;  %v971_v22 = vpop.f32.mrb[24].mxu0 }
 0x10c   :  { %v719_v21 = vmax.f32 %v617_v17, 0.0  ;;  %v1019_v23 = vpop.f32.mrb[24].mxu1  ;;  %753 = vst.msk [vmem:[%s1645_s3 + $0xb8] sm:$0xff] %vm729_vm1, %v688_v18  ;;  %v472_v24 = vadd.f32 %v971_v22, %v1320_v3  ;;  %v466_v26 = vpop.f32.mrb[25].mxu0 }
 0x10d   :  { %785 = vst.msk [vmem:[%s1645_s3 + $0x1b8] sm:$0xff] %vm729_vm1, %v720_v19  ;;  %v632_v25 = vadd.f32 %v1019_v23, %v1320_v3  ;;  %v626_v27 = vpop.f32.mrb[25].mxu1  ;;  %752 = vst.msk [vmem:[%s1645_s3 + $0xb0] sm:$0xff] %vm729_vm1, %v687_v20  ;;  %v467_v28 = vadd.f32 %v1320_v3, %v466_v26 }
 0x10e   :  { %784 = vst.msk [vmem:[%s1645_s3 + $0x1b0] sm:$0xff] %vm729_vm1, %v719_v21  ;;  %v627_v29 = vadd.f32 %v1320_v3, %v626_v27  ;;  %v690_v30 = vmax.f32 %v472_v24, 0.0 }
 0x10f   :  { %v722_v31 = vmax.f32 %v632_v25, 0.0  ;;  %v689_v32 = vmax.f32 %v467_v28, 0.0  ;;  %v974_v34 = vpop.f32.mrb[26].mxu0 }
 0x110   :  { %v721_v33 = vmax.f32 %v627_v29, 0.0  ;;  %v1022_v35 = vpop.f32.mrb[26].mxu1  ;;  %755 = vst.msk [vmem:[%s1645_s3 + $0xc8] sm:$0xff] %vm729_vm1, %v690_v30  ;;  %v482_v36 = vadd.f32 %v974_v34, %v1320_v3  ;;  %v476_v38 = vpop.f32.mrb[27].mxu0 }
 0x111   :  { %787 = vst.msk [vmem:[%s1645_s3 + $0x1c8] sm:$0xff] %vm729_vm1, %v722_v31  ;;  %v642_v37 = vadd.f32 %v1022_v35, %v1320_v3  ;;  %v636_v39 = vpop.f32.mrb[27].mxu1  ;;  %754 = vst.msk [vmem:[%s1645_s3 + $0xc0] sm:$0xff] %vm729_vm1, %v689_v32  ;;  %v477_v40 = vadd.f32 %v1320_v3, %v476_v38 }
 0x112   :  { %786 = vst.msk [vmem:[%s1645_s3 + $0x1c0] sm:$0xff] %vm729_vm1, %v721_v33  ;;  %v637_v41 = vadd.f32 %v1320_v3, %v636_v39  ;;  %v692_v42 = vmax.f32 %v482_v36, 0.0 }
 0x113   :  { %v724_v43 = vmax.f32 %v642_v37, 0.0  ;;  %v691_v44 = vmax.f32 %v477_v40, 0.0  ;;  %v977_v46 = vpop.f32.mrb[28].mxu0 }
 0x114   :  { %v723_v45 = vmax.f32 %v637_v41, 0.0  ;;  %v1025_v47 = vpop.f32.mrb[28].mxu1  ;;  %757 = vst.msk [vmem:[%s1645_s3 + $0xd8] sm:$0xff] %vm729_vm1, %v692_v42  ;;  %v492_v48 = vadd.f32 %v977_v46, %v1320_v3  ;;  %v486_v50 = vpop.f32.mrb[29].mxu0 }
 0x115   :  { %789 = vst.msk [vmem:[%s1645_s3 + $0x1d8] sm:$0xff] %vm729_vm1, %v724_v43  ;;  %v652_v49 = vadd.f32 %v1025_v47, %v1320_v3  ;;  %v646_v51 = vpop.f32.mrb[29].mxu1  ;;  %756 = vst.msk [vmem:[%s1645_s3 + $0xd0] sm:$0xff] %vm729_vm1, %v691_v44  ;;  %v487_v52 = vadd.f32 %v1320_v3, %v486_v50 }
 0x116   :  { %788 = vst.msk [vmem:[%s1645_s3 + $0x1d0] sm:$0xff] %vm729_vm1, %v723_v45  ;;  %v647_v53 = vadd.f32 %v1320_v3, %v646_v51  ;;  %v694_v54 = vmax.f32 %v492_v48, 0.0 }
 0x117   :  { %v726_v55 = vmax.f32 %v652_v49, 0.0  ;;  %v693_v56 = vmax.f32 %v487_v52, 0.0  ;;  %v980_v58 = vpop.f32.mrb[30].mxu0 }
 0x118   :  { %v725_v57 = vmax.f32 %v647_v53, 0.0  ;;  %v1028_v59 = vpop.f32.mrb[30].mxu1  ;;  %759 = vst.msk [vmem:[%s1645_s3 + $0xe8] sm:$0xff] %vm729_vm1, %v694_v54  ;;  %v502_v60 = vadd.f32 %v980_v58, %v1320_v3  ;;  %v496_v62 = vpop.f32.mrb[31].mxu0 }
 0x119   :  { %791 = vst.msk [vmem:[%s1645_s3 + $0x1e8] sm:$0xff] %vm729_vm1, %v726_v55  ;;  %v662_v61 = vadd.f32 %v1028_v59, %v1320_v3  ;;  %v656_v63 = vpop.f32.mrb[31].mxu1  ;;  %758 = vst.msk [vmem:[%s1645_s3 + $0xe0] sm:$0xff] %vm729_vm1, %v693_v56  ;;  %v497_v0 = vadd.f32 %v1320_v3, %v496_v62 }
 0x11a   :  { %790 = vst.msk [vmem:[%s1645_s3 + $0x1e0] sm:$0xff] %vm729_vm1, %v725_v57  ;;  %v657_v1 = vadd.f32 %v1320_v3, %v656_v63  ;;  %v696_v2 = vmax.f32 %v502_v60, 0.0 }
 0x11b   :  { %v728_v4 = vmax.f32 %v662_v61, 0.0  ;;  %v695_v5 = vmax.f32 %v497_v0, 0.0 }
 0x11c   :  { %v727_v6 = vmax.f32 %v657_v1, 0.0  ;;  %761 = vst.msk [vmem:[%s1645_s3 + $0xf8] sm:$0xff] %vm729_vm1, %v696_v2 }
 0x11d   :  { %793 = vst.msk [vmem:[%s1645_s3 + $0x1f8] sm:$0xff] %vm729_vm1, %v728_v4  ;;  %760 = vst.msk [vmem:[%s1645_s3 + $0xf0] sm:$0xff] %vm729_vm1, %v695_v5 }
 0x11e   :  { %792 = vst.msk [vmem:[%s1645_s3 + $0x1f0] sm:$0xff] %vm729_vm1, %v727_v6 }

// kernel: reformer_forward_pallas.23
= control target key start
LH: loop header
LB: loop body
LE: loop exit
PB: predicated region body
PF: predicated region fallthrough
CT: control target
= control target key end

     0   :  { %s1856_s18 = smov 0   ;;  %s3809_s0 = inlined_call_operand.vmem [shape: f32[2,18,18,32], index: 0, kind: input, shape index: {}]   ;;  %s3810_s1 = inlined_call_operand.vmem [shape: f32[9,32], index: 1, kind: input, shape index: {}]   ;;  %s3811_s2 = inlined_call_operand.vmem [shape: f32[1,32], index: 2, kind: input, shape index: {}]   ;;  %s3812_s3 = inlined_call_operand.vmem [shape: f32[32,8], index: 3, kind: input, shape index: {}]   ;;  %s3813_s4 = inlined_call_operand.vmem [shape: f32[8,32], index: 4, kind: input, shape index: {}]   ;;  %s3814_s5 = inlined_call_operand.vmem [shape: f32[2,16,16,32], index: 5, kind: output, shape index: {}]  }
   0x1 LB: > { %s1559_s19 = sadd.s32 4294967295, %s1821_s18   ;;  %p1563_p0 = scmp.ge.s32.totalorder %s1821_s18, 1  ;;  %s1821_s18 = sphi %s1856_s18, %s15_s18  }
   0x2   : > { %p187_p1 = scmp.lt.s32.totalorder %s1821_s18, 3 }
   0x4   : > { %p188_p2 = pnand %p1563_p0, %p187_p1 }
   0x6   : > { %191 = sbr.rel (%p188_p2) target bundleno = 693 (0x2b5), region = 40 }
   0xd   : > { %p215_p3 = scmp.lt.s32.totalorder %s1559_s19, 1  ;;  %v1875_v0 = vld [vmem:[%s3810_s1] ss:$0 sm:$0xff]  ;;  %v1882_v3 = vld [vmem:[%s3810_s1 + $0x3] ss:$0 sm:$0xff]  ;;  %vm1207_vm0 = vcmask 261120  }
   0xe   : > { %3921 = vst [vmem:[#allocation2_spill] sm:$0xff] %v1882_v3  ;;  %v1985_v41 = vld [vmem:[%s3810_s1 + $0x1] ss:$0 sm:$0xff]  ;;  %vm1824_vm1 = vmmov 0   ;;  %vm1359_vm2 = vcmask 64512  }
   0xf   : > { %s4274_s19 = smov (!%p215_p3, %s1559_s19), 1 }
  0x10   : > { %s1803_s20 = smul.u32 432, %s4274_s19  ;;  %s1773_s6 = sshll.u32 %s4274_s19, 8 }
  0x11   : > { %s3676_s9 = scalar_lea.vmem %s3814_s5, %s1773_s6 }
  0x12   : > { %s1870_s23 = scalar_lea.vmem %s3809_s0, %s1803_s20 }
  0x13   : > { %v225_v1 = vld [vmem:[%s1870_s23] sm:$0xff]  ;;  %v226_v2 = vld [vmem:[%s1870_s23 + $0x8] sm:$0xff]  ;;  %v227_v4 = vld [vmem:[%s1870_s23 + $0x18] sm:$0xff] }
  0x14   : > { %v228_v5 = vld [vmem:[%s1870_s23 + $0x20] sm:$0xff]  ;;  %v229_v6 = vld [vmem:[%s1870_s23 + $0x30] sm:$0xff]  ;;  %v230_v7 = vld [vmem:[%s1870_s23 + $0x38] sm:$0xff]  ;;  %v1896_v13 = vmul.f32 %v1875_v0, %v225_v1  ;;  %v1908_v17 = vmul.f32 %v1875_v0, %v226_v2  ;;  %v1911_v18 = vmul.f32 %v1875_v0, %v227_v4  ;;  %v1917_v20 = vmul.f32 %v1882_v3, %v227_v4 }
  0x15   : > { %v231_v8 = vld [vmem:[%s1870_s23 + $0x48] sm:$0xff]  ;;  %v232_v9 = vld [vmem:[%s1870_s23 + $0x50] sm:$0xff]  ;;  %v233_v10 = vld [vmem:[%s1870_s23 + $0x60] sm:$0xff]  ;;  %v1914_v19 = vmul.f32 %v1875_v0, %v228_v5  ;;  %v1929_v24 = vmul.f32 %v1875_v0, %v229_v6  ;;  %v1932_v25 = vmul.f32 %v1875_v0, %v230_v7  ;;  %v1938_v27 = vmul.f32 %v1882_v3, %v228_v5 }
  0x16   : > { %v234_v11 = vld [vmem:[%s1870_s23 + $0x68] sm:$0xff]  ;;  %v1893_v12 = vld [vmem:[%s1870_s23 + $0x78] sm:$0xff]  ;;  %v1899_v14 = vld [vmem:[%s1870_s23 + $0x80] sm:$0xff]  ;;  %3922 = vst [vmem:[#allocation3_spill] sm:$0xff] %v1917_v20  ;;  %v1935_v26 = vmul.f32 %v1875_v0, %v231_v8  ;;  %v1950_v31 = vmul.f32 %v1875_v0, %v232_v9  ;;  %v1953_v32 = vmul.f32 %v1875_v0, %v233_v10  ;;  %v1959_v34 = vmul.f32 %v1882_v3, %v229_v6 }
  0x17   : > { %v1902_v15 = vld [vmem:[%s1870_s23 + $0x90] sm:$0xff]  ;;  %v1905_v16 = vld [vmem:[%s1870_s23 + $0x98] sm:$0xff]  ;;  %v1920_v21 = vld [vmem:[%s1870_s23 + $0xa8] sm:$0xff]  ;;  %3926 = vst [vmem:[#allocation7_spill] sm:$0xff] %v1938_v27  ;;  %v1956_v33 = vmul.f32 %v1875_v0, %v234_v11  ;;  %v1972_v38 = vmul.f32 %v1875_v0, %v1893_v12  ;;  %v1976_v39 = vmul.f32 %v1875_v0, %v1899_v14  ;;  %v1988_v42 = vmul.f32 %v1882_v3, %v230_v7 }
  0x18   : > { %3923 = vst [vmem:[#allocation4_spill] sm:$0xff] %v1920_v21  ;;  %v1923_v22 = vld [vmem:[%s1870_s23 + $0xb0] sm:$0xff]  ;;  %v1926_v23 = vld [vmem:[%s1870_s23 + $0xc0] sm:$0xff]  ;;  %v1941_v28 = vld [vmem:[%s1870_s23 + $0xc8] sm:$0xff]  ;;  %v1980_v40 = vmul.f32 %v1875_v0, %v1902_v15  ;;  %v2001_v46 = vmul.f32 %v1875_v0, %v1905_v16  ;;  %v2005_v47 = vmul.f32 %v1875_v0, %v1920_v21  ;;  %v2012_v49 = vmul.f32 %v1882_v3, %v231_v8 }
  0x19   : > { %3924 = vst [vmem:[#allocation5_spill] sm:$0xff] %v1923_v22  ;;  %3925 = vst [vmem:[#allocation6_spill] sm:$0xff] %v1926_v23  ;;  %v1944_v29 = vld [vmem:[%s1870_s23 + $0xd8] sm:$0xff]  ;;  %v1947_v30 = vld [vmem:[%s1870_s23 + $0xe0] sm:$0xff]  ;;  %v2009_v48 = vmul.f32 %v1875_v0, %v1923_v22  ;;  %v2022_v52 = vmul.f32 %v1875_v0, %v1926_v23  ;;  %v2026_v53 = vmul.f32 %v1875_v0, %v1941_v28 }
  0x1a   : > { %3927 = vst [vmem:[#allocation8_spill] sm:$0xff] %v1941_v28  ;;  %3928 = vst [vmem:[#allocation9_spill] sm:$0xff] %v1944_v29  ;;  %v1962_v35 = vld [vmem:[%s1870_s23 + $0xf0] sm:$0xff]  ;;  %v1965_v36 = vld [vmem:[%s1870_s23 + $0xf8] sm:$0xff]  ;;  %v2030_v54 = vmul.f32 %v1875_v0, %v1944_v29  ;;  %v2034_v56 = vmul.f32 %v1882_v3, %v232_v9  ;;  %v2044_v59 = vmul.f32 %v1875_v0, %v1947_v30 }
  0x1b   : > { %3929 = vst [vmem:[#allocation10_spill] sm:$0xff] %v1947_v30  ;;  %3930 = vst [vmem:[#allocation11_spill] sm:$0xff] %v1959_v34  ;;  %v1968_v37 = vld [vmem:[%s1870_s23 + $0x108] sm:$0xff]  ;;  %v1991_v43 = vld [vmem:[%s1870_s23 + $0x110] sm:$0xff]  ;;  %v2048_v60 = vmul.f32 %v1875_v0, %v1962_v35  ;;  %v2052_v61 = vmul.f32 %v1875_v0, %v1965_v36  ;;  %v2056_v63 = vmul.f32 %v1882_v3, %v233_v10 }
  0x1c   : > { %3931 = vst [vmem:[#allocation12_spill] sm:$0xff] %v1962_v35  ;;  %3932 = vst [vmem:[#allocation13_spill] sm:$0xff] %v1965_v36  ;;  %v1994_v44 = vld [vmem:[%s1870_s23 + $0x120] sm:$0xff]  ;;  %v1997_v45 = vld [vmem:[%s1870_s23 + $0x128] sm:$0xff]  ;;  %v2066_v4 = vmul.f32 %v1875_v0, %v1968_v37  ;;  %v2070_v5 = vmul.f32 %v1875_v0, %v1991_v43  ;;  %v2080_v8 = vmul.f32 %v1882_v3, %v234_v11 }
  0x1d   : > { %3933 = vst [vmem:[#allocation14_spill] sm:$0xff] %v1968_v37  ;;  %3934 = vst [vmem:[#allocation15_spill] sm:$0xff] %v1988_v42  ;;  %v2015_v50 = vld [vmem:[%s1870_s23 + $0x138] sm:$0xff]  ;;  %v2018_v51 = vld [vmem:[%s1870_s23 + $0x140] sm:$0xff]  ;;  %v2074_v6 = vmul.f32 %v1875_v0, %v1994_v44  ;;  %v2084_v9 = vmul.f32 %v1875_v0, %v1997_v45  ;;  %v2099_v11 = vmul.f32 %v1882_v3, %v1893_v12 }
  0x1e   : > { %3935 = vst [vmem:[#allocation16_spill] sm:$0xff] %v1991_v43  ;;  %3936 = vst [vmem:[#allocation17_spill] sm:$0xff] %v1994_v44  ;;  %v326_v55 = vld [vmem:[%s1870_s23 + $0x1] sm:$0xff]  ;;  %v2037_v57 = vld [vmem:[%s1870_s23 + $0x150] sm:$0xff]  ;;  %v2088_v10 = vmul.f32 %v1875_v0, %v2015_v50 }
  0x1f   : > { %3937 = vst [vmem:[#allocation18_spill] sm:$0xff] %v1997_v45  ;;  %3938 = vst [vmem:[#allocation19_spill] sm:$0xff] %v2012_v49  ;;  %v2040_v58 = vld [vmem:[%s1870_s23 + $0x158] sm:$0xff]  ;;  %v327_v62 = vld [vmem:[%s1870_s23 + $0x9] sm:$0xff]  ;;  %v363_v49 = vmul.f32 %v1985_v41, %v326_v55  ;;  %v2107_v42 = vmul.f32 %v1875_v0, %v2037_v57 }
  0x20   : > { %3939 = vst [vmem:[#allocation20_spill] sm:$0xff] %v2015_v50  ;;  %3940 = vst [vmem:[#allocation21_spill] sm:$0xff] %v2018_v51  ;;  %v2059_v1 = vld [vmem:[%s1870_s23 + $0x168] sm:$0xff]  ;;  %v2062_v2 = vld [vmem:[%s1870_s23 + $0x170] sm:$0xff]  ;;  %v2111_v34 = vmul.f32 %v1875_v0, %v2040_v58 }
  0x21   : > { %3941 = vst [vmem:[#allocation22_spill] sm:$0xff] %v2034_v56  ;;  %3942 = vst [vmem:[#allocation23_spill] sm:$0xff] %v2037_v57  ;;  %v2077_v7 = vld [vmem:[%s1870_s23 + $0x19] sm:$0xff]  ;;  %v2094_v56 = vld [vmem:[%s1870_s23 + $0x31] sm:$0xff]  ;;  %v2125_v20 = vmul.f32 %v1875_v0, %v2059_v1  ;;  %v2129_v57 = vmul.f32 %v1875_v0, %v2062_v2 }
  0x22   : > { %3943 = vst [vmem:[#allocation24_spill] sm:$0xff] %v2040_v58  ;;  %3944 = vst [vmem:[#allocation25_spill] sm:$0xff] %v2056_v63  ;;  %v2091_v63 = vld [vmem:[%s1870_s23 + $0x21] sm:$0xff]  ;;  %v2114_v55 = vld [vmem:[%s1870_s23 + $0x39] sm:$0xff]  ;;  %v365_v45 = vmul.f32 %v1985_v41, %v2077_v7  ;;  %v367_v43 = vmul.f32 %v1985_v41, %v2094_v56 }
  0x23   : > { %3945 = vst [vmem:[#allocation26_spill] sm:$0xff] %v2059_v1  ;;  %3946 = vst [vmem:[#allocation27_spill] sm:$0xff] %v2062_v2  ;;  %v2117_v27 = vld [vmem:[%s1870_s23 + $0x49] sm:$0xff]  ;;  %v2120_v12 = vld [vmem:[%s1870_s23 + $0x51] sm:$0xff]  ;;  %v366_v44 = vmul.f32 %v1985_v41, %v2091_v63 }
  0x24   : > { %3947 = vst [vmem:[#allocation28_spill] sm:$0xff] %v2077_v7  ;;  %3948 = vst [vmem:[#allocation29_spill] sm:$0xff] %v2080_v8  ;;  %v2103_v8 = vmul.f32 %v1875_v0, %v2018_v51  ;;  %v2132_v58 = vld [vmem:[%s1870_s23 + $0x61] sm:$0xff]  ;;  %v2135_v51 = vld [vmem:[%s1870_s23 + $0x69] sm:$0xff]  ;;  %v2161_v7 = vmul.f32 %v1882_v3, %v1902_v15  ;;  %v369_v15 = vmul.f32 %v1985_v41, %v2117_v27 }
  0x25   : > { %3949 = vst [vmem:[#allocation30_spill] sm:$0xff] %v2091_v63  ;;  %3950 = vst [vmem:[#allocation31_spill] sm:$0xff] %v2094_v56  ;;  %v2138_v50 = vld [vmem:[%s1870_s23 + $0x79] sm:$0xff]  ;;  %v2147_v1 = vld [vmem:[%s1870_s23 + $0x81] sm:$0xff]  ;;  %v368_v56 = vmul.f32 %v1985_v41, %v2114_v55  ;;  %v370_v63 = vmul.f32 %v1985_v41, %v2120_v12 }
  0x26   : > { %3951 = vst [vmem:[#allocation32_spill] sm:$0xff] %v2099_v11  ;;  %3952 = vst [vmem:[#allocation33_spill] sm:$0xff] %v2114_v55  ;;  %v364_v11 = vmul.f32 %v1985_v41, %v327_v62  ;;  %v2144_v62 = vmul.f32 %v1882_v3, %v1899_v14  ;;  %v2150_v0 = vld [vmem:[%s1870_s23 + $0x91] sm:$0xff]  ;;  %v2153_v2 = vld [vmem:[%s1870_s23 + $0x99] sm:$0xff]  ;;  %v2165_v14 = vmul.f32 %v1882_v3, %v1905_v16 }
  0x27   : > { %3953 = vst [vmem:[#allocation34_spill] sm:$0xff] %v2117_v27  ;;  %3954 = vst [vmem:[#allocation35_spill] sm:$0xff] %v2120_v12  ;;  %v2171_v37 = vld [vmem:[%s1870_s23 + $0xb1] sm:$0xff]  ;;  %v2174_v36 = vld [vmem:[%s1870_s23 + $0xc1] sm:$0xff]  ;;  %v2183_v16 = vadd.f32 %v363_v49, %v1896_v13  ;;  %v371_v55 = vmul.f32 %v1985_v41, %v2132_v58  ;;  %v372_v27 = vmul.f32 %v1985_v41, %v2135_v51 }
  0x28   : > { %3955 = vst [vmem:[#allocation36_spill] sm:$0xff] %v2132_v58  ;;  %3956 = vst [vmem:[#allocation37_spill] sm:$0xff] %v2135_v51  ;;  %v2192_v35 = vld [vmem:[%s1870_s23 + $0xe1] sm:$0xff]  ;;  %v373_v12 = vmul.f32 %v1985_v41, %v2138_v50  ;;  %v2201_v13 = vadd.f32 %v364_v11, %v1908_v17  ;;  %v2204_v49 = vld [vmem:[%s1870_s23 + $0xf1] sm:$0xff]  ;;  %v374_v58 = vmul.f32 %v1985_v41, %v2147_v1 }
  0x29   : > { %3957 = vst [vmem:[#allocation38_spill] sm:$0xff] %v2138_v50  ;;  %3958 = vst [vmem:[#allocation39_spill] sm:$0xff] %v2144_v62  ;;  %v2168_v62 = vld [vmem:[%s1870_s23 + $0xa9] sm:$0xff]  ;;  %v2207_v30 = vld [vmem:[%s1870_s23 + $0xf9] sm:$0xff]  ;;  %v375_v51 = vmul.f32 %v1985_v41, %v2150_v0  ;;  %v376_v50 = vmul.f32 %v1985_v41, %v2153_v2  ;;  %v2219_v17 = vadd.f32 %v365_v45, %v1911_v18 }
  0x2a   : > { %3959 = vst [vmem:[#allocation40_spill] sm:$0xff] %v2147_v1  ;;  %3960 = vst [vmem:[#allocation41_spill] sm:$0xff] %v2150_v0  ;;  %v2210_v29 = vld [vmem:[%s1870_s23 + $0x109] sm:$0xff]  ;;  %v2222_v11 = vld [vmem:[%s1870_s23 + $0x111] sm:$0xff]  ;;  %v377_v1 = vmul.f32 %v1985_v41, %v2168_v62  ;;  %v378_v0 = vmul.f32 %v1985_v41, %v2171_v37  ;;  %v2237_v18 = vadd.f32 %v366_v44, %v1914_v19 }
  0x2b   : > { %3961 = vst [vmem:[#allocation42_spill] sm:$0xff] %v2153_v2  ;;  %3962 = vst [vmem:[#allocation43_spill] sm:$0xff] %v2161_v7  ;;  %v2189_v7 = vld [vmem:[%s1870_s23 + $0xd9] sm:$0xff]  ;;  %v2225_v28 = vld [vmem:[%s1870_s23 + $0x121] sm:$0xff]  ;;  %v379_v2 = vmul.f32 %v1985_v41, %v2174_v36 }
  0x2c   : > { %3963 = vst [vmem:[#allocation44_spill] sm:$0xff] %v2165_v14  ;;  %3964 = vst [vmem:[#allocation45_spill] sm:$0xff] %v2168_v62  ;;  %v2186_v14 = vld [vmem:[%s1870_s23 + $0xc9] sm:$0xff]  ;;  %v2240_v45 = vld [vmem:[%s1870_s23 + $0x139] sm:$0xff]  ;;  %v381_v62 = vmul.f32 %v1985_v41, %v2189_v7 }
  0x2d   : > { %3965 = vst [vmem:[#allocation46_spill] sm:$0xff] %v2171_v37  ;;  %3966 = vst [vmem:[#allocation47_spill] sm:$0xff] %v2174_v36  ;;  %v2228_v23 = vld [vmem:[%s1870_s23 + $0x129] sm:$0xff]  ;;  %v2243_v22 = vld [vmem:[%s1870_s23 + $0x141] sm:$0xff]  ;;  %v380_v21 = vmul.f32 %v1985_v41, %v2186_v14  ;;  %v382_v37 = vmul.f32 %v1985_v41, %v2192_v35  ;;  %v2255_v36 = vadd.f32 %v367_v43, %v1929_v24 }
  0x2e   : > { %3967 = vst [vmem:[#allocation48_spill] sm:$0xff] %v2186_v14  ;;  %3968 = vst [vmem:[#allocation49_spill] sm:$0xff] %v2189_v7  ;;  %v2246_v3 = vld [vmem:[%s1870_s23 + $0x151] sm:$0xff]  ;;  %v2258_v19 = vld [vmem:[%s1870_s23 + $0x159] sm:$0xff]  ;;  %v384_v14 = vmul.f32 %v1985_v41, %v2207_v30  ;;  %v385_v7 = vmul.f32 %v1985_v41, %v2210_v29  ;;  %v386_v24 = vmul.f32 %v1985_v41, %v2222_v11 }
  0x2f   : > { %3969 = vst [vmem:[#allocation50_spill] sm:$0xff] %v2192_v35  ;;  %3970 = vst [vmem:[#allocation51_spill] sm:$0xff] %v2204_v49  ;;  %v2261_v44 = vld [vmem:[%s1870_s23 + $0x169] sm:$0xff]  ;;  %v2273_v35 = vadd.f32 %v368_v56, %v1932_v25  ;;  %v387_v43 = vmul.f32 %v1985_v41, %v2225_v28  ;;  %v390_v25 = vmul.f32 %v1985_v41, %v2243_v22 }
  0x30   : > { %3971 = vst [vmem:[#allocation52_spill] sm:$0xff] %v2207_v30  ;;  %3972 = vst [vmem:[#allocation53_spill] sm:$0xff] %v2210_v29  ;;  %v389_v30 = vmul.f32 %v1985_v41, %v2240_v45  ;;  %v391_v56 = vmul.f32 %v1985_v41, %v2246_v3 }
  0x31   : > { %3973 = vst [vmem:[#allocation54_spill] sm:$0xff] %v2219_v17  ;;  %3974 = vst [vmem:[#allocation55_spill] sm:$0xff] %v2222_v11  ;;  %v383_v17 = vmul.f32 %v1985_v41, %v2204_v49  ;;  %v2282_v49 = vadd.f32 %v369_v15, %v1935_v26  ;;  %v2291_v11 = vadd.f32 %v370_v63, %v1950_v31 }
  0x32   : > { %3975 = vst [vmem:[#allocation56_spill] sm:$0xff] %v2225_v28  ;;  %3976 = vst [vmem:[#allocation57_spill] sm:$0xff] %v2228_v23  ;;  %v393_v26 = vmul.f32 %v1985_v41, %v2261_v44  ;;  %v2306_v31 = vadd.f32 %v373_v12, %v1972_v38  ;;  %v2309_v63 = vadd.f32 %v374_v58, %v1976_v39  ;;  %v2340_v58 = vld [vmem:[%s1870_s23 + $0x32] sm:$0xff] }
  0x33   : > { %3977 = vst [vmem:[#allocation58_spill] sm:$0xff] %v2237_v18  ;;  %3978 = vst [vmem:[#allocation59_spill] sm:$0xff] %v2240_v45  ;;  %v2264_v18 = vld [vmem:[%s1870_s23 + $0x171] sm:$0xff]  ;;  %v2327_v38 = vadd.f32 %v378_v0, %v2009_v48  ;;  %v2330_v39 = vadd.f32 %v379_v2, %v2022_v52  ;;  %v2349_v48 = vadd.f32 %v382_v37, %v2044_v59  ;;  %v2355_v52 = vld [vmem:[%s1870_s23 + $0x3a] sm:$0xff] }
  0x34   : > { %3979 = vst [vmem:[#allocation60_spill] sm:$0xff] %v2243_v22  ;;  %3980 = vst [vmem:[#allocation61_spill] sm:$0xff] %v2246_v3  ;;  %v394_v15 = vmul.f32 %v1985_v41, %v2264_v18  ;;  %v2300_v22 = vadd.f32 %v371_v55, %v1953_v32  ;;  %v2303_v3 = vadd.f32 %v372_v27, %v1956_v33  ;;  %v2318_v32 = vld [vmem:[%s3810_s1 + $0x2] ss:$0 sm:$0xff]  ;;  %v2361_v2 = vld [vmem:[%s1870_s23 + $0x52] sm:$0xff] }
  0x35   : > { %3981 = vst [vmem:[#allocation62_spill] sm:$0xff] %v2255_v36  ;;  %3982 = vst [vmem:[#allocation63_spill] sm:$0xff] %v2258_v19  ;;  %v388_v36 = vmul.f32 %v1985_v41, %v2228_v23  ;;  %v392_v23 = vmul.f32 %v1985_v41, %v2258_v19  ;;  %v2312_v19 = vadd.f32 %v375_v51, %v1980_v40  ;;  %v428_v40 = vld [vmem:[%s1870_s23 + $0xa] sm:$0xff]  ;;  %v2334_v41 = vld [vmem:[%s1870_s23 + $0x1a] sm:$0xff] }
  0x36   : > { %3983 = vst [vmem:[#allocation64_spill] sm:$0xff] %v2261_v44  ;;  %3984 = vst [vmem:[#allocation65_spill] sm:$0xff] %v2264_v18  ;;  %v427_v44 = vld [vmem:[%s1870_s23 + $0x2] sm:$0xff]  ;;  %v2321_v27 = vadd.f32 %v376_v50, %v2001_v46  ;;  %v2324_v33 = vadd.f32 %v377_v1, %v2005_v47  ;;  %v2343_v46 = vadd.f32 %v380_v21, %v2026_v53  ;;  %v2358_v1 = vld [vmem:[%s1870_s23 + $0x4a] sm:$0xff] }
  0x37   : > { %3985 = vst [vmem:[#allocation66_spill] sm:$0xff] %v2334_v41  ;;  %v2337_v51 = vld [vmem:[%s1870_s23 + $0x22] sm:$0xff]  ;;  %3987 = vst [vmem:[#allocation68_spill] sm:$0xff] %v2340_v58  ;;  %v2346_v47 = vadd.f32 %v381_v62, %v2030_v54  ;;  %v2352_v50 = vadd.f32 %v383_v17, %v2048_v60  ;;  %v2364_v21 = vadd.f32 %v384_v14, %v2052_v61  ;;  %v2379_v60 = vld [vmem:[%s1870_s23 + $0x6a] sm:$0xff] }
  0x38   : > { %3986 = vst [vmem:[#allocation67_spill] sm:$0xff] %v2337_v51  ;;  %3988 = vst [vmem:[#allocation69_spill] sm:$0xff] %v2355_v52  ;;  %v2367_v53 = vadd.f32 %v385_v7, %v2066_v4  ;;  %v2370_v37 = vadd.f32 %v386_v24, %v2070_v5  ;;  %v2373_v54 = vadd.f32 %v387_v43, %v2074_v6  ;;  %v2376_v59 = vld [vmem:[%s1870_s23 + $0x62] sm:$0xff]  ;;  %v2382_v55 = vld [vmem:[%s1870_s23 + $0x7a] sm:$0xff] }
  0x39   : > { %3989 = vst [vmem:[#allocation70_spill] sm:$0xff] %v2358_v1  ;;  %3990 = vst [vmem:[#allocation71_spill] sm:$0xff] %v2361_v2  ;;  %v2385_v61 = vadd.f32 %v388_v36, %v2084_v9  ;;  %v2388_v4 = vadd.f32 %v389_v30, %v2088_v10  ;;  %v2391_v5 = vadd.f32 %v390_v25, %v2103_v8  ;;  %v2397_v7 = vld [vmem:[%s1870_s23 + $0x82] sm:$0xff]  ;;  %v2400_v12 = vld [vmem:[%s1870_s23 + $0x92] sm:$0xff] }
  0x3a   : > { %3991 = vst [vmem:[#allocation72_spill] sm:$0xff] %v2364_v21  ;;  %3992 = vst [vmem:[#allocation73_spill] sm:$0xff] %v2367_v53  ;;  %v2394_v6 = vadd.f32 %v391_v56, %v2107_v42  ;;  %v2403_v62 = vld [vmem:[%s1870_s23 + $0x9a] sm:$0xff]  ;;  %v2406_v36 = vadd.f32 %v392_v23, %v2111_v34  ;;  %v2409_v30 = vadd.f32 %v393_v26, %v2125_v20  ;;  %v2415_v42 = vld [vmem:[%s1870_s23 + $0xaa] sm:$0xff] }
  0x3b   : > { %3993 = vst [vmem:[#allocation74_spill] sm:$0xff] %v2370_v37  ;;  %3994 = vst [vmem:[#allocation75_spill] sm:$0xff] %v2373_v54  ;;  %v2412_v8 = vadd.f32 %v394_v15, %v2129_v57  ;;  %v2418_v9 = vld [vmem:[%s1870_s23 + $0xb2] sm:$0xff]  ;;  %v2421_v10 = vld [vmem:[%s1870_s23 + $0xc2] sm:$0xff]  ;;  %v464_v0 = vmul.f32 %v2318_v32, %v427_v44  ;;  %v465_v34 = vmul.f32 %v2318_v32, %v428_v40 }
  0x3c   : > { %3995 = vst [vmem:[#allocation76_spill] sm:$0xff] %v2376_v59  ;;  %3996 = vst [vmem:[#allocation77_spill] sm:$0xff] %v2379_v60  ;;  %v2425_v14 = vld [vmem:[%s1870_s23 + $0xca] sm:$0xff]  ;;  %v2428_v23 = vld [vmem:[%s1870_s23 + $0xda] sm:$0xff]  ;;  %v466_v57 = vmul.f32 %v2318_v32, %v2334_v41  ;;  %v467_v17 = vmul.f32 %v2318_v32, %v2337_v51  ;;  %v468_v44 = vmul.f32 %v2318_v32, %v2340_v58 }
  0x3d   : > { %3997 = vst [vmem:[#allocation78_spill] sm:$0xff] %v2382_v55  ;;  %3998 = vst [vmem:[#allocation79_spill] sm:$0xff] %v2385_v61  ;;  %v2431_v20 = vld [vmem:[%s1870_s23 + $0xe2] sm:$0xff]  ;;  %v2441_v24 = vld [vmem:[%s1870_s23 + $0xf2] sm:$0xff]  ;;  %v469_v56 = vmul.f32 %v2318_v32, %v2355_v52  ;;  %v470_v26 = vmul.f32 %v2318_v32, %v2358_v1  ;;  %v471_v15 = vmul.f32 %v2318_v32, %v2361_v2 }
  0x3e   : > { %3999 = vst [vmem:[#allocation80_spill] sm:$0xff] %v2388_v4  ;;  %4000 = vst [vmem:[#allocation81_spill] sm:$0xff] %v2391_v5  ;;  %v2444_v43 = vld [vmem:[%s1870_s23 + $0xfa] sm:$0xff]  ;;  %v2447_v25 = vld [vmem:[%s1870_s23 + $0x10a] sm:$0xff]  ;;  %v472_v40 = vmul.f32 %v2318_v32, %v2376_v59  ;;  %v473_v52 = vmul.f32 %v2318_v32, %v2379_v60  ;;  %v474_v1 = vmul.f32 %v2318_v32, %v2382_v55 }
  0x3f   : > { %4001 = vst [vmem:[#allocation82_spill] sm:$0xff] %v2394_v6  ;;  %4002 = vst [vmem:[#allocation83_spill] sm:$0xff] %v2397_v7  ;;  %v2458_v58 = vld [vmem:[%s1870_s23 + $0x112] sm:$0xff]  ;;  %v2461_v51 = vld [vmem:[%s1870_s23 + $0x122] sm:$0xff]  ;;  %v475_v2 = vmul.f32 %v2318_v32, %v2397_v7  ;;  %v476_v59 = vmul.f32 %v2318_v32, %v2400_v12  ;;  %v477_v29 = vmul.f32 %v2318_v32, %v2403_v62 }
  0x40   : > { %4003 = vst [vmem:[#allocation84_spill] sm:$0xff] %v2400_v12  ;;  %4004 = vst [vmem:[#allocation85_spill] sm:$0xff] %v2403_v62  ;;  %v2464_v41 = vld [vmem:[%s1870_s23 + $0x12a] sm:$0xff]  ;;  %v2475_v18 = vld [vmem:[%s1870_s23 + $0x13a] sm:$0xff]  ;;  %v478_v60 = vmul.f32 %v2318_v32, %v2415_v42  ;;  %v479_v55 = vmul.f32 %v2318_v32, %v2418_v9  ;;  %v480_v7 = vmul.f32 %v2318_v32, %v2421_v10 }
  0x41   : > { %4005 = vst [vmem:[#allocation86_spill] sm:$0xff] %v2406_v36  ;;  %4006 = vst [vmem:[#allocation87_spill] sm:$0xff] %v2409_v30  ;;  %v2478_v45 = vld [vmem:[%s1870_s23 + $0x142] sm:$0xff]  ;;  %v2481_v28 = vld [vmem:[%s1870_s23 + $0x152] sm:$0xff]  ;;  %v481_v36 = vmul.f32 %v2318_v32, %v2425_v14  ;;  %v482_v62 = vmul.f32 %v2318_v32, %v2428_v23  ;;  %v486_v6 = vmul.f32 %v2318_v32, %v2447_v25 }
  0x42   : > { %4007 = vst [vmem:[#allocation88_spill] sm:$0xff] %v2412_v8  ;;  %4008 = vst [vmem:[#allocation89_spill] sm:$0xff] %v2415_v42  ;;  %v2492_v8 = vld [vmem:[%s1870_s23 + $0x15a] sm:$0xff]  ;;  %v2495_v12 = vld [vmem:[%s1870_s23 + $0x16a] sm:$0xff]  ;;  %v483_v42 = vmul.f32 %v2318_v32, %v2431_v20  ;;  %v487_v5 = vmul.f32 %v2318_v32, %v2458_v58  ;;  %v497_v4 = vadd.f32 %v465_v34, %v2201_v13 }
  0x43   : > { %4009 = vst [vmem:[#allocation90_spill] sm:$0xff] %v2418_v9  ;;  %4010 = vst [vmem:[#allocation91_spill] sm:$0xff] %v2421_v10  ;;  %v2498_v30 = vld [vmem:[%s1870_s23 + $0x172] sm:$0xff]  ;;  %v484_v9 = vmul.f32 %v2318_v32, %v2441_v24  ;;  %v485_v10 = vmul.f32 %v2318_v32, %v2444_v43  ;;  %v4027_v54 = vld [vmem:[#allocation58_spill] sm:$0xff]  ;;  %v503_v21 = vadd.f32 %v471_v15, %v2291_v11 }
  0x44   : > { %4011 = vst [vmem:[#allocation92_spill] sm:$0xff] %v2425_v14  ;;  %4012 = vst [vmem:[#allocation93_spill] sm:$0xff] %v2428_v23  ;;  %v488_v14 = vmul.f32 %v2318_v32, %v2461_v51  ;;  %v489_v23 = vmul.f32 %v2318_v32, %v2464_v41  ;;  %v4028_v37 = vld [vmem:[#allocation62_spill] sm:$0xff]  ;;  %v507_v13 = vadd.f32 %v475_v2, %v2309_v63  ;;  %v4033_v2 = vld [vmem:[#allocation79_spill] sm:$0xff] }
  0x45   : > { %4013 = vst [vmem:[#allocation94_spill] sm:$0xff] %v2431_v20  ;;  %4014 = vst [vmem:[#allocation95_spill] sm:$0xff] %v2441_v24  ;;  %v490_v20 = vmul.f32 %v2318_v32, %v2475_v18  ;;  %v491_v24 = vmul.f32 %v2318_v32, %v2478_v45  ;;  %v500_v53 = vadd.f32 %v468_v44, %v4028_v37  ;;  %v4043_v34 = vld [vmem:[#allocation6_spill] sm:$0xff] }
  0x46   : > { %4015 = vst [vmem:[#allocation96_spill] sm:$0xff] %v2444_v43  ;;  %4016 = vst [vmem:[#allocation97_spill] sm:$0xff] %v2447_v25  ;;  %v492_v43 = vmul.f32 %v2318_v32, %v2481_v28  ;;  %v493_v25 = vmul.f32 %v2318_v32, %v2492_v8  ;;  %v510_v37 = vadd.f32 %v478_v60, %v2324_v33  ;;  %v4032_v33 = vld [vmem:[#allocation75_spill] sm:$0xff]  ;;  %v4035_v60 = vld [vmem:[#allocation81_spill] sm:$0xff] }
  0x47   : > { %4017 = vst [vmem:[#allocation98_spill] sm:$0xff] %v2458_v58  ;;  %4018 = vst [vmem:[#allocation99_spill] sm:$0xff] %v2461_v51  ;;  %v494_v58 = vmul.f32 %v2318_v32, %v2495_v12  ;;  %v495_v51 = vmul.f32 %v2318_v32, %v2498_v30  ;;  %v505_v32 = vadd.f32 %v473_v52, %v2303_v3  ;;  %v4029_v52 = vld [vmem:[#allocation72_spill] sm:$0xff] }
  0x48   : > { %4019 = vst [vmem:[#allocation100_spill] sm:$0xff] %v2464_v41  ;;  %4020 = vst [vmem:[#allocation101_spill] sm:$0xff] %v2475_v18  ;;  %v496_v41 = vadd.f32 %v464_v0, %v2183_v16  ;;  %v4026_v18 = vld [vmem:[#allocation54_spill] sm:$0xff]  ;;  %v506_v16 = vadd.f32 %v474_v1, %v2306_v31  ;;  %v513_v11 = vadd.f32 %v481_v36, %v2343_v46  ;;  %v4030_v1 = vld [vmem:[#allocation73_spill] sm:$0xff] }
  0x49   : > { %4021 = vst [vmem:[#allocation102_spill] sm:$0xff] %v2478_v45  ;;  %4022 = vst [vmem:[#allocation103_spill] sm:$0xff] %v2481_v28  ;;  %v498_v61 = vadd.f32 %v466_v57, %v4026_v18  ;;  %v499_v45 = vadd.f32 %v467_v17, %v4027_v54  ;;  %v501_v28 = vadd.f32 %v469_v56, %v2273_v35  ;;  %v4045_v17 = vld [vmem:[#allocation9_spill] sm:$0xff] }
  0x4a   : > { %4023 = vst [vmem:[#allocation104_spill] sm:$0xff] %v2492_v8  ;;  %4024 = vst [vmem:[#allocation105_spill] sm:$0xff] %v2495_v12  ;;  %v502_v8 = vadd.f32 %v470_v26, %v2282_v49  ;;  %v504_v12 = vadd.f32 %v472_v40, %v2300_v22  ;;  %v508_v18 = vadd.f32 %v476_v59, %v2312_v19  ;;  %v4034_v59 = vld [vmem:[#allocation80_spill] sm:$0xff]  ;;  %v4050_v26 = vld [vmem:[#allocation13_spill] sm:$0xff] }
  0x4b   : > { %4025 = vst [vmem:[#allocation106_spill] sm:$0xff] %v2498_v30  ;;  %v509_v54 = vadd.f32 %v477_v29, %v2321_v27  ;;  %v511_v35 = vadd.f32 %v479_v55, %v2327_v38  ;;  %v512_v49 = vadd.f32 %v480_v7, %v2330_v39  ;;  %v514_v22 = vadd.f32 %v482_v62, %v2346_v47  ;;  %v4031_v29 = vld [vmem:[#allocation74_spill] sm:$0xff]  ;;  %v4038_v62 = vld [vmem:[#allocation87_spill] sm:$0xff] }
  0x4c   : > { %v515_v3 = vadd.f32 %v483_v42, %v2349_v48  ;;  %v516_v31 = vadd.f32 %v484_v9, %v2352_v50  ;;  %v517_v63 = vadd.f32 %v485_v10, %v4029_v52  ;;  %v518_v19 = vadd.f32 %v486_v6, %v4030_v1  ;;  %v4036_v55 = vld [vmem:[#allocation82_spill] sm:$0xff]  ;;  %v4039_v42 = vld [vmem:[#allocation88_spill] sm:$0xff]  ;;  %v4066_v30 = vld [vmem:[#allocation15_spill] sm:$0xff] }
  0x4d   : > { %v519_v27 = vadd.f32 %v487_v5, %v4031_v29  ;;  %v520_v38 = vadd.f32 %v488_v14, %v4032_v33  ;;  %v521_v39 = vadd.f32 %v489_v23, %v4033_v2  ;;  %v522_v46 = vadd.f32 %v490_v20, %v4034_v59  ;;  %v4037_v7 = vld [vmem:[#allocation86_spill] sm:$0xff]  ;;  %v4040_v6 = vld [vmem:[#allocation4_spill] sm:$0xff]  ;;  %v4042_v5 = vld [vmem:[#allocation5_spill] sm:$0xff] }
  0x4e   : > { %v523_v47 = vadd.f32 %v491_v24, %v4035_v60  ;;  %v524_v48 = vadd.f32 %v492_v43, %v4036_v55  ;;  %v525_v50 = vadd.f32 %v493_v25, %v4037_v7  ;;  %v526_v36 = vadd.f32 %v494_v58, %v4038_v62  ;;  %v4041_v10 = vld [vmem:[#allocation2_spill] sm:$0xff]  ;;  %v4044_v20 = vld [vmem:[#allocation8_spill] sm:$0xff]  ;;  %v2576_v58 = vld [vmem:[%s1870_s23 + $0x188] sm:$0xff] }
  0x4f   : > { %v527_v9 = vadd.f32 %v495_v51, %v4039_v42  ;;  %v578_v0 = vmul.f32 %v4041_v10, %v4040_v6  ;;  %v579_v14 = vmul.f32 %v4041_v10, %v4042_v5  ;;  %v580_v23 = vmul.f32 %v4041_v10, %v4043_v34  ;;  %v2573_v24 = vld [vmem:[%s1870_s23 + $0x180] sm:$0xff]  ;;  %4047 = vst [vmem:[#allocation58_spill] sm:$0xff] %v2576_v58  ;;  %v4049_v25 = vld [vmem:[#allocation12_spill] sm:$0xff]  ;;  %v4053_v33 = vld [vmem:[#allocation17_spill] sm:$0xff] }
  0x50   : > { %v581_v57 = vmul.f32 %v4041_v10, %v4044_v20  ;;  %v582_v44 = vmul.f32 %v4041_v10, %v4045_v17  ;;  %4046 = vst [vmem:[#allocation54_spill] sm:$0xff] %v2573_v24  ;;  %v4048_v51 = vld [vmem:[#allocation10_spill] sm:$0xff]  ;;  %v584_v56 = vmul.f32 %v4041_v10, %v4049_v25  ;;  %v585_v15 = vmul.f32 %v4041_v10, %v4050_v26  ;;  %v4052_v1 = vld [vmem:[#allocation16_spill] sm:$0xff]  ;;  %v4056_v62 = vld [vmem:[#allocation21_spill] sm:$0xff] }
  0x51   : > { %v583_v43 = vmul.f32 %v4041_v10, %v4048_v51  ;;  %v4051_v40 = vld [vmem:[#allocation14_spill] sm:$0xff]  ;;  %v587_v29 = vmul.f32 %v4041_v10, %v4052_v1  ;;  %v588_v2 = vmul.f32 %v4041_v10, %v4053_v33  ;;  %v4055_v55 = vld [vmem:[#allocation20_spill] sm:$0xff]  ;;  %v591_v42 = vmul.f32 %v4041_v10, %v4056_v62  ;;  %v4057_v6 = vld [vmem:[#allocation23_spill] sm:$0xff] }
  0x52   : > { %v586_v52 = vmul.f32 %v4041_v10, %v4051_v40  ;;  %v4054_v59 = vld [vmem:[#allocation18_spill] sm:$0xff]  ;;  %v590_v7 = vmul.f32 %v4041_v10, %v4055_v55  ;;  %v592_v5 = vmul.f32 %v4041_v10, %v4057_v6  ;;  %v4058_v34 = vld [vmem:[#allocation24_spill] sm:$0xff]  ;;  %v4060_v25 = vld [vmem:[#allocation27_spill] sm:$0xff]  ;;  %v596_v40 = vmul.f32 %v4041_v10, %v2573_v24 }
  0x53   : > { %v589_v60 = vmul.f32 %v4041_v10, %v4054_v59  ;;  %v593_v20 = vmul.f32 %v4041_v10, %v4058_v34  ;;  %v4059_v17 = vld [vmem:[#allocation26_spill] sm:$0xff]  ;;  %v595_v26 = vmul.f32 %v4041_v10, %v4060_v25  ;;  %v597_v1 = vmul.f32 %v4041_v10, %v2576_v58  ;;  %v4061_v33 = vld [vmem:[#allocation3_spill] sm:$0xff] }
  0x54   : > { %v594_v51 = vmul.f32 %v4041_v10, %v4059_v17  ;;  %v2609_v59 = vadd.f32 %v4061_v33, %v496_v41  ;;  %v4063_v55 = vld [vmem:[#allocation7_spill] sm:$0xff]  ;;  %v2618_v17 = vadd.f32 %v4066_v30, %v499_v45  ;;  %v4068_v10 = vld [vmem:[#allocation22_spill] sm:$0xff]  ;;  %v4069_v33 = vld [vmem:[#allocation25_spill] sm:$0xff] }
  0x55   : > { %v2612_v62 = vadd.f32 %v4063_v55, %v497_v4  ;;  %v4065_v6 = vld [vmem:[#allocation11_spill] sm:$0xff]  ;;  %v2624_v58 = vadd.f32 %v4068_v10, %v501_v28  ;;  %v2627_v41 = vadd.f32 %v4069_v33, %v502_v8  ;;  %v4071_v55 = vld [vmem:[#allocation32_spill] sm:$0xff]  ;;  %v2644_v28 = vadd.f32 %v578_v0, %v508_v18 }
  0x56   : > { %4062 = vst [vmem:[#allocation62_spill] sm:$0xff] %v2609_v59  ;;  %v2615_v34 = vadd.f32 %v4065_v6, %v498_v61  ;;  %v4067_v25 = vld [vmem:[#allocation19_spill] sm:$0xff]  ;;  %v4070_v59 = vld [vmem:[#allocation29_spill] sm:$0xff]  ;;  %v2646_v10 = vadd.f32 %v579_v14, %v509_v54  ;;  %v2648_v8 = vadd.f32 %v580_v23, %v510_v37  ;;  %v2658_v33 = vadd.f32 %v585_v15, %v515_v3 }
  0x57   : > { %4064 = vst [vmem:[#allocation72_spill] sm:$0xff] %v2612_v62  ;;  %v2621_v24 = vadd.f32 %v4067_v25, %v500_v53  ;;  %v2630_v4 = vadd.f32 %v4070_v59, %v503_v21  ;;  %v2633_v62 = vadd.f32 %v4071_v55, %v504_v12  ;;  %v4072_v61 = vld [vmem:[#allocation39_spill] sm:$0xff]  ;;  %v4074_v53 = vld [vmem:[#allocation44_spill] sm:$0xff]  ;;  %v2650_v21 = vadd.f32 %v581_v57, %v511_v35  ;;  %v4089_v57 = vld [vmem:[#allocation33_spill] sm:$0xff] }
  0x58   : > { %v2636_v6 = vadd.f32 %v4072_v61, %v505_v32  ;;  %v4073_v45 = vld [vmem:[#allocation43_spill] sm:$0xff]  ;;  %v2642_v25 = vadd.f32 %v4074_v53, %v507_v13  ;;  %v2652_v59 = vadd.f32 %v582_v44, %v512_v49  ;;  %v2654_v12 = vadd.f32 %v583_v43, %v513_v11  ;;  %v1635_v13 = vld [vmem:[%s3810_s1 + $0x4] ss:$0 sm:$0xff]  ;;  %v4101_v61 = vld [vmem:[#allocation48_spill] sm:$0xff] }
  0x59   : > { %v2639_v30 = vadd.f32 %v4073_v45, %v506_v16  ;;  %v2656_v32 = vadd.f32 %v584_v56, %v514_v22  ;;  %v2660_v16 = vadd.f32 %v586_v52, %v516_v31  ;;  %v2665_v18 = vadd.f32 %v587_v29, %v517_v63  ;;  %v4095_v29 = vld [vmem:[#allocation40_spill] sm:$0xff]  ;;  %v4102_v53 = vld [vmem:[#allocation49_spill] sm:$0xff] }
  0x5a   : > { %v2667_v54 = vadd.f32 %v588_v2, %v518_v19  ;;  %v2669_v37 = vadd.f32 %v589_v60, %v519_v27  ;;  %v2671_v35 = vadd.f32 %v590_v7, %v520_v38  ;;  %v2673_v49 = vadd.f32 %v591_v42, %v521_v39  ;;  %v4086_v19 = vld [vmem:[#allocation28_spill] sm:$0xff]  ;;  %v4087_v27 = vld [vmem:[#allocation30_spill] sm:$0xff]  ;;  %v4088_v38 = vld [vmem:[#allocation31_spill] sm:$0xff] }
  0x5b   : > { %4075 = vst [vmem:[#allocation73_spill] sm:$0xff] %v2665_v18  ;;  %v2675_v11 = vadd.f32 %v592_v5, %v522_v46  ;;  %v2677_v22 = vadd.f32 %v593_v20, %v523_v47  ;;  %v2679_v3 = vadd.f32 %v594_v51, %v524_v48  ;;  %v2681_v31 = vadd.f32 %v595_v26, %v525_v50  ;;  %v4090_v47 = vld [vmem:[#allocation34_spill] sm:$0xff]  ;;  %v4091_v48 = vld [vmem:[#allocation35_spill] sm:$0xff]  ;;  %v4092_v50 = vld [vmem:[#allocation36_spill] sm:$0xff] }
  0x5c   : > { %4076 = vst [vmem:[#allocation74_spill] sm:$0xff] %v2667_v54  ;;  %4077 = vst [vmem:[#allocation75_spill] sm:$0xff] %v2669_v37  ;;  %v2683_v0 = vadd.f32 %v596_v40, %v526_v36  ;;  %v2685_v63 = vadd.f32 %v597_v1, %v527_v9  ;;  %v667_v14 = vmul.f32 %v1635_v13, %v4086_v19  ;;  %v4093_v36 = vld [vmem:[#allocation37_spill] sm:$0xff]  ;;  %v4094_v9 = vld [vmem:[#allocation38_spill] sm:$0xff] }
  0x5d   : > { %4078 = vst [vmem:[#allocation79_spill] sm:$0xff] %v2671_v35  ;;  %4079 = vst [vmem:[#allocation80_spill] sm:$0xff] %v2673_v49  ;;  %v668_v23 = vmul.f32 %v1635_v13, %v4087_v27  ;;  %v669_v39 = vmul.f32 %v1635_v13, %v4088_v38  ;;  %v670_v46 = vmul.f32 %v1635_v13, %v4089_v57  ;;  %v4096_v60 = vld [vmem:[#allocation41_spill] sm:$0xff]  ;;  %v4097_v42 = vld [vmem:[#allocation42_spill] sm:$0xff] }
  0x5e   : > { %4080 = vst [vmem:[#allocation81_spill] sm:$0xff] %v2675_v11  ;;  %4081 = vst [vmem:[#allocation82_spill] sm:$0xff] %v2677_v22  ;;  %v671_v44 = vmul.f32 %v1635_v13, %v4090_v47  ;;  %v672_v43 = vmul.f32 %v1635_v13, %v4091_v48  ;;  %v673_v56 = vmul.f32 %v1635_v13, %v4092_v50  ;;  %v4098_v20 = vld [vmem:[#allocation45_spill] sm:$0xff]  ;;  %v4099_v26 = vld [vmem:[#allocation46_spill] sm:$0xff] }
  0x5f   : > { %4082 = vst [vmem:[#allocation86_spill] sm:$0xff] %v2679_v3  ;;  %4083 = vst [vmem:[#allocation87_spill] sm:$0xff] %v2681_v31  ;;  %v674_v15 = vmul.f32 %v1635_v13, %v4093_v36  ;;  %v675_v52 = vmul.f32 %v1635_v13, %v4094_v9  ;;  %v676_v2 = vmul.f32 %v1635_v13, %v4095_v29  ;;  %v4100_v1 = vld [vmem:[#allocation47_spill] sm:$0xff]  ;;  %v4105_v57 = vld [vmem:[#allocation50_spill] sm:$0xff] }
  0x60   : > { %4084 = vst [vmem:[#allocation88_spill] sm:$0xff] %v2683_v0  ;;  %4085 = vst [vmem:[#allocation4_spill] sm:$0xff] %v2685_v63  ;;  %v677_v7 = vmul.f32 %v1635_v13, %v4096_v60  ;;  %v678_v5 = vmul.f32 %v1635_v13, %v4097_v42  ;;  %v679_v51 = vmul.f32 %v1635_v13, %v4098_v20  ;;  %v2705_v27 = vld [vmem:[%s1870_s23 + $0x181] sm:$0xff]  ;;  %v2708_v38 = vld [vmem:[%s1870_s23 + $0x189] sm:$0xff] }
  0x61   : > { %v680_v40 = vmul.f32 %v1635_v13, %v4099_v26  ;;  %v681_v55 = vmul.f32 %v1635_v13, %v4100_v1  ;;  %v682_v45 = vmul.f32 %v1635_v13, %v4101_v61  ;;  %v683_v19 = vmul.f32 %v1635_v13, %v4102_v53  ;;  %4103 = vst [vmem:[#allocation2_spill] sm:$0xff] %v2705_v27  ;;  %v4106_v48 = vld [vmem:[#allocation51_spill] sm:$0xff]  ;;  %v4107_v36 = vld [vmem:[#allocation52_spill] sm:$0xff]  ;;  %v4108_v29 = vld [vmem:[#allocation53_spill] sm:$0xff] }
  0x62   : > { %4104 = vst [vmem:[#allocation5_spill] sm:$0xff] %v2708_v38  ;;  %v684_v47 = vmul.f32 %v1635_v13, %v4105_v57  ;;  %v685_v50 = vmul.f32 %v1635_v13, %v4106_v48  ;;  %v686_v9 = vmul.f32 %v1635_v13, %v4107_v36  ;;  %v687_v60 = vmul.f32 %v1635_v13, %v4108_v29  ;;  %v4109_v42 = vld [vmem:[#allocation55_spill] sm:$0xff]  ;;  %v4110_v26 = vld [vmem:[#allocation56_spill] sm:$0xff]  ;;  %v4111_v63 = vld [vmem:[#allocation57_spill] sm:$0xff] }
  0x63   : > { %v688_v20 = vmul.f32 %v1635_v13, %v4109_v42  ;;  %v689_v1 = vmul.f32 %v1635_v13, %v4110_v26  ;;  %v690_v61 = vmul.f32 %v1635_v13, %v4111_v63  ;;  %v4112_v0 = vld [vmem:[#allocation59_spill] sm:$0xff]  ;;  %v4113_v31 = vld [vmem:[#allocation60_spill] sm:$0xff]  ;;  %v4114_v22 = vld [vmem:[#allocation61_spill] sm:$0xff]  ;;  %v697_v29 = vmul.f32 %v1635_v13, %v2705_v27 }
  0x64   : > { %v691_v53 = vmul.f32 %v1635_v13, %v4112_v0  ;;  %v692_v3 = vmul.f32 %v1635_v13, %v4113_v31  ;;  %v693_v11 = vmul.f32 %v1635_v13, %v4114_v22  ;;  %v4115_v49 = vld [vmem:[#allocation63_spill] sm:$0xff]  ;;  %v4116_v35 = vld [vmem:[#allocation64_spill] sm:$0xff]  ;;  %v4117_v37 = vld [vmem:[#allocation65_spill] sm:$0xff]  ;;  %v698_v42 = vmul.f32 %v1635_v13, %v2708_v38 }
  0x65   : > { %v694_v57 = vmul.f32 %v1635_v13, %v4115_v49  ;;  %v695_v48 = vmul.f32 %v1635_v13, %v4116_v35  ;;  %v696_v36 = vmul.f32 %v1635_v13, %v4117_v37  ;;  %v4118_v54 = vld [vmem:[#allocation62_spill] sm:$0xff]  ;;  %v4119_v63 = vld [vmem:[#allocation72_spill] sm:$0xff]  ;;  %v2732_v31 = vadd.f32 %v669_v39, %v2615_v34  ;;  %v4164_v27 = vld [vmem:[#allocation97_spill] sm:$0xff] }
  0x66   : > { %v2726_v26 = vadd.f32 %v667_v14, %v4118_v54  ;;  %v2729_v18 = vadd.f32 %v668_v23, %v4119_v63  ;;  %v2735_v22 = vadd.f32 %v670_v46, %v2618_v17  ;;  %v2738_v35 = vadd.f32 %v671_v44, %v2621_v24  ;;  %v4163_v38 = vld [vmem:[#allocation96_spill] sm:$0xff] }
  0x67   : > { %v2741_v37 = vadd.f32 %v672_v43, %v2624_v58  ;;  %v2744_v13 = vadd.f32 %v673_v56, %v2627_v41  ;;  %v2747_v54 = vadd.f32 %v674_v15, %v2630_v4  ;;  %v2750_v49 = vadd.f32 %v675_v52, %v2633_v62  ;;  %v4132_v43 = vld [vmem:[#allocation82_spill] sm:$0xff] }
  0x68   : > { %v2753_v34 = vadd.f32 %v676_v2, %v2636_v6  ;;  %v2756_v17 = vadd.f32 %v677_v7, %v2639_v30  ;;  %v2759_v24 = vadd.f32 %v678_v5, %v2642_v25  ;;  %v2762_v58 = vadd.f32 %v679_v51, %v2644_v28  ;;  %v4134_v15 = vld [vmem:[#allocation86_spill] sm:$0xff]  ;;  %v4136_v2 = vld [vmem:[#allocation87_spill] sm:$0xff]  ;;  %v4138_v5 = vld [vmem:[#allocation88_spill] sm:$0xff] }
  0x69   : > { %v2765_v41 = vadd.f32 %v680_v40, %v2646_v10  ;;  %v2768_v4 = vadd.f32 %v681_v55, %v2648_v8  ;;  %v2771_v62 = vadd.f32 %v682_v45, %v2650_v21  ;;  %v2774_v6 = vadd.f32 %v683_v19, %v2652_v59  ;;  %v1668_v8 = vld [vmem:[%s3810_s1 + $0x5] ss:$0 sm:$0xff]  ;;  %v4120_v21 = vld [vmem:[#allocation73_spill] sm:$0xff]  ;;  %v4140_v40 = vld [vmem:[#allocation4_spill] sm:$0xff] }
  0x6a   : > { %v2777_v30 = vadd.f32 %v684_v47, %v2654_v12  ;;  %v2780_v25 = vadd.f32 %v685_v50, %v2656_v32  ;;  %v2783_v28 = vadd.f32 %v686_v9, %v2658_v33  ;;  %v2786_v10 = vadd.f32 %v687_v60, %v2660_v16  ;;  %v4122_v59 = vld [vmem:[#allocation74_spill] sm:$0xff]  ;;  %v4124_v12 = vld [vmem:[#allocation75_spill] sm:$0xff]  ;;  %v4128_v33 = vld [vmem:[#allocation80_spill] sm:$0xff] }
  0x6b   : > { %v2792_v0 = vadd.f32 %v688_v20, %v4120_v21  ;;  %v2795_v14 = vadd.f32 %v689_v1, %v4122_v59  ;;  %v2798_v23 = vadd.f32 %v690_v61, %v4124_v12  ;;  %v4126_v32 = vld [vmem:[#allocation79_spill] sm:$0xff]  ;;  %v2804_v46 = vadd.f32 %v692_v3, %v4128_v33  ;;  %v4130_v16 = vld [vmem:[#allocation81_spill] sm:$0xff]  ;;  %v4142_v3 = vld [vmem:[#allocation66_spill] sm:$0xff] }
  0x6c   : > { %v2801_v39 = vadd.f32 %v691_v53, %v4126_v32  ;;  %v2807_v44 = vadd.f32 %v693_v11, %v4130_v16  ;;  %v2810_v56 = vadd.f32 %v694_v57, %v4132_v43  ;;  %v2813_v52 = vadd.f32 %v695_v48, %v4134_v15  ;;  %v4143_v19 = vld [vmem:[#allocation67_spill] sm:$0xff]  ;;  %v4144_v47 = vld [vmem:[#allocation68_spill] sm:$0xff]  ;;  %v4145_v9 = vld [vmem:[#allocation69_spill] sm:$0xff] }
  0x6d   : > { %4121 = vst [vmem:[#allocation6_spill] sm:$0xff] %v2792_v0  ;;  %4123 = vst [vmem:[#allocation8_spill] sm:$0xff] %v2795_v14  ;;  %v2816_v7 = vadd.f32 %v696_v36, %v4136_v2  ;;  %v2819_v51 = vadd.f32 %v697_v29, %v4138_v5  ;;  %v2822_v55 = vadd.f32 %v698_v42, %v4140_v40  ;;  %v4146_v20 = vld [vmem:[#allocation70_spill] sm:$0xff]  ;;  %v4147_v61 = vld [vmem:[#allocation71_spill] sm:$0xff] }
  0x6e   : > { %4125 = vst [vmem:[#allocation9_spill] sm:$0xff] %v2798_v23  ;;  %4127 = vst [vmem:[#allocation10_spill] sm:$0xff] %v2801_v39  ;;  %v768_v45 = vmul.f32 %v1668_v8, %v4142_v3  ;;  %v769_v11 = vmul.f32 %v1668_v8, %v4143_v19  ;;  %v770_v50 = vmul.f32 %v1668_v8, %v4144_v47  ;;  %v4148_v57 = vld [vmem:[#allocation76_spill] sm:$0xff]  ;;  %v4149_v36 = vld [vmem:[#allocation77_spill] sm:$0xff] }
  0x6f   : > { %4129 = vst [vmem:[#allocation12_spill] sm:$0xff] %v2804_v46  ;;  %4131 = vst [vmem:[#allocation13_spill] sm:$0xff] %v2807_v44  ;;  %v771_v60 = vmul.f32 %v1668_v8, %v4145_v9  ;;  %v772_v1 = vmul.f32 %v1668_v8, %v4146_v20  ;;  %v773_v53 = vmul.f32 %v1668_v8, %v4147_v61  ;;  %v4150_v42 = vld [vmem:[#allocation78_spill] sm:$0xff]  ;;  %v4151_v21 = vld [vmem:[#allocation83_spill] sm:$0xff] }
  0x70   : > { %4133 = vst [vmem:[#allocation14_spill] sm:$0xff] %v2810_v56  ;;  %4135 = vst [vmem:[#allocation16_spill] sm:$0xff] %v2813_v52  ;;  %v774_v48 = vmul.f32 %v1668_v8, %v4148_v57  ;;  %v775_v29 = vmul.f32 %v1668_v8, %v4149_v36  ;;  %v776_v63 = vmul.f32 %v1668_v8, %v4150_v42  ;;  %v4152_v12 = vld [vmem:[#allocation84_spill] sm:$0xff]  ;;  %v4153_v33 = vld [vmem:[#allocation85_spill] sm:$0xff] }
  0x71   : > { %4137 = vst [vmem:[#allocation17_spill] sm:$0xff] %v2816_v7  ;;  %4139 = vst [vmem:[#allocation18_spill] sm:$0xff] %v2819_v51  ;;  %v777_v59 = vmul.f32 %v1668_v8, %v4151_v21  ;;  %v778_v32 = vmul.f32 %v1668_v8, %v4152_v12  ;;  %v779_v16 = vmul.f32 %v1668_v8, %v4153_v33  ;;  %v4154_v43 = vld [vmem:[#allocation89_spill] sm:$0xff]  ;;  %v4155_v2 = vld [vmem:[#allocation90_spill] sm:$0xff] }
  0x72   : > { %4141 = vst [vmem:[#allocation20_spill] sm:$0xff] %v2822_v55  ;;  %v780_v15 = vmul.f32 %v1668_v8, %v4154_v43  ;;  %v781_v5 = vmul.f32 %v1668_v8, %v4155_v2  ;;  %v4156_v40 = vld [vmem:[#allocation91_spill] sm:$0xff]  ;;  %v4157_v19 = vld [vmem:[#allocation92_spill] sm:$0xff]  ;;  %v4158_v9 = vld [vmem:[#allocation93_spill] sm:$0xff]  ;;  %v787_v33 = vmul.f32 %v1668_v8, %v4163_v38  ;;  %v788_v43 = vmul.f32 %v1668_v8, %v4164_v27 }
  0x73   : > { %v782_v3 = vmul.f32 %v1668_v8, %v4156_v40  ;;  %v783_v47 = vmul.f32 %v1668_v8, %v4157_v19  ;;  %v784_v20 = vmul.f32 %v1668_v8, %v4158_v9  ;;  %v2842_v61 = vld [vmem:[%s1870_s23 + $0x182] sm:$0xff]  ;;  %v2845_v57 = vld [vmem:[%s1870_s23 + $0x18a] sm:$0xff]  ;;  %v4168_v52 = vld [vmem:[#allocation101_spill] sm:$0xff] }
  0x74   : > { %4159 = vst [vmem:[#allocation21_spill] sm:$0xff] %v2842_v61  ;;  %4160 = vst [vmem:[#allocation23_spill] sm:$0xff] %v2845_v57  ;;  %v4161_v36 = vld [vmem:[#allocation94_spill] sm:$0xff]  ;;  %v4162_v21 = vld [vmem:[#allocation95_spill] sm:$0xff]  ;;  %v792_v9 = vmul.f32 %v1668_v8, %v4168_v52  ;;  %v798_v27 = vmul.f32 %v1668_v8, %v2842_v61  ;;  %v2866_v52 = vadd.f32 %v769_v11, %v2729_v18 }
  0x75   : > { %v785_v42 = vmul.f32 %v1668_v8, %v4161_v36  ;;  %v786_v12 = vmul.f32 %v1668_v8, %v4162_v21  ;;  %v4165_v55 = vld [vmem:[#allocation98_spill] sm:$0xff]  ;;  %v4166_v51 = vld [vmem:[#allocation99_spill] sm:$0xff]  ;;  %v4167_v7 = vld [vmem:[#allocation100_spill] sm:$0xff]  ;;  %v2884_v18 = vadd.f32 %v775_v29, %v2747_v54 }
  0x76   : > { %v789_v2 = vmul.f32 %v1668_v8, %v4165_v55  ;;  %v790_v40 = vmul.f32 %v1668_v8, %v4166_v51  ;;  %v791_v19 = vmul.f32 %v1668_v8, %v4167_v7  ;;  %v4169_v56 = vld [vmem:[#allocation102_spill] sm:$0xff]  ;;  %v4170_v46 = vld [vmem:[#allocation103_spill] sm:$0xff]  ;;  %v4171_v23 = vld [vmem:[#allocation104_spill] sm:$0xff]  ;;  %v799_v55 = vmul.f32 %v1668_v8, %v2845_v57 }
  0x77   : > { %v793_v44 = vmul.f32 %v1668_v8, %v4169_v56  ;;  %v794_v39 = vmul.f32 %v1668_v8, %v4170_v46  ;;  %v795_v36 = vmul.f32 %v1668_v8, %v4171_v23  ;;  %v4172_v14 = vld [vmem:[#allocation105_spill] sm:$0xff]  ;;  %v4173_v0 = vld [vmem:[#allocation106_spill] sm:$0xff]  ;;  %v2863_v51 = vadd.f32 %v768_v45, %v2726_v26  ;;  %v1669_v54 = vld [vmem:[%s1870_s23 + $0x30] sm:$0xff] }
  0x78   : > { %v796_v21 = vmul.f32 %v1668_v8, %v4172_v14  ;;  %v797_v38 = vmul.f32 %v1668_v8, %v4173_v0  ;;  %v2869_v56 = vadd.f32 %v770_v50, %v2732_v31  ;;  %v2872_v23 = vadd.f32 %v771_v60, %v2735_v22  ;;  %v1670_v8 = vld [vmem:[%s1870_s23 + $0x38] sm:$0xff]  ;;  %v1671_v46 = vld [vmem:[%s1870_s23 + $0x48] sm:$0xff]  ;;  %v1672_v7 = vld [vmem:[%s1870_s23 + $0x50] sm:$0xff] }
  0x79   : > { %v2875_v0 = vadd.f32 %v772_v1, %v2738_v35  ;;  %v2878_v14 = vadd.f32 %v773_v53, %v2741_v37  ;;  %v2881_v26 = vadd.f32 %v774_v48, %v2744_v13  ;;  %v2887_v31 = vadd.f32 %v776_v63, %v2750_v49  ;;  %v2905_v49 = vld [vmem:[%s3810_s1 + $0x6] ss:$0 sm:$0xff]  ;;  %v1674_v11 = vld [vmem:[%s1870_s23 + $0x68] sm:$0xff]  ;;  %v1675_v50 = vld [vmem:[%s1870_s23 + $0x78] sm:$0xff] }
  0x7a   : > { %v2890_v22 = vadd.f32 %v777_v59, %v2753_v34  ;;  %v2893_v35 = vadd.f32 %v778_v32, %v2756_v17  ;;  %v2896_v37 = vadd.f32 %v779_v16, %v2759_v24  ;;  %v2899_v13 = vadd.f32 %v780_v15, %v2762_v58  ;;  %v4174_v60 = vld [vmem:[#allocation6_spill] sm:$0xff]  ;;  %v1677_v63 = vld [vmem:[%s1870_s23 + $0x90] sm:$0xff]  ;;  %v1678_v59 = vld [vmem:[%s1870_s23 + $0x98] sm:$0xff] }
  0x7b   : > { %v2908_v34 = vadd.f32 %v781_v5, %v2765_v41  ;;  %v2911_v17 = vadd.f32 %v782_v3, %v2768_v4  ;;  %v2914_v24 = vadd.f32 %v783_v47, %v2771_v62  ;;  %v2917_v58 = vadd.f32 %v784_v20, %v2774_v6  ;;  %v1673_v6 = vld [vmem:[%s1870_s23 + $0x60] sm:$0xff]  ;;  %v4181_v32 = vld [vmem:[#allocation12_spill] sm:$0xff]  ;;  %v4183_v15 = vld [vmem:[#allocation13_spill] sm:$0xff] }
  0x7c   : > { %v2923_v45 = vadd.f32 %v785_v42, %v2777_v30  ;;  %v2926_v41 = vadd.f32 %v786_v12, %v2780_v25  ;;  %v2929_v4 = vadd.f32 %v787_v33, %v2783_v28  ;;  %v2932_v62 = vadd.f32 %v788_v43, %v2786_v10  ;;  %v4175_v30 = vld [vmem:[#allocation8_spill] sm:$0xff]  ;;  %v4177_v25 = vld [vmem:[#allocation9_spill] sm:$0xff]  ;;  %v4179_v28 = vld [vmem:[#allocation10_spill] sm:$0xff] }
  0x7d   : > { %v2938_v1 = vadd.f32 %v789_v2, %v4174_v60  ;;  %v2941_v53 = vadd.f32 %v790_v40, %v4175_v30  ;;  %v2944_v48 = vadd.f32 %v791_v19, %v4177_v25  ;;  %v2947_v29 = vadd.f32 %v792_v9, %v4179_v28  ;;  %v1676_v10 = vld [vmem:[%s1870_s23 + $0x80] sm:$0xff]  ;;  %v4187_v20 = vld [vmem:[#allocation16_spill] sm:$0xff]  ;;  %v1679_v12 = vld [vmem:[%s1870_s23 + $0xa8] sm:$0xff] }
  0x7e   : > { %v2953_v16 = vadd.f32 %v793_v44, %v4181_v32  ;;  %v2956_v5 = vadd.f32 %v794_v39, %v4183_v15  ;;  %v4185_v3 = vld [vmem:[#allocation14_spill] sm:$0xff]  ;;  %v2962_v42 = vadd.f32 %v796_v21, %v4187_v20  ;;  %v1680_v33 = vld [vmem:[%s1870_s23 + $0xb0] sm:$0xff]  ;;  %v4189_v2 = vld [vmem:[#allocation17_spill] sm:$0xff]  ;;  %v870_v21 = vmul.f32 %v2905_v49, %v1669_v54 }
  0x7f   : > { %4176 = vst [vmem:[#allocation24_spill] sm:$0xff] %v2941_v53  ;;  %4178 = vst [vmem:[#allocation26_spill] sm:$0xff] %v2944_v48  ;;  %v2959_v47 = vadd.f32 %v795_v36, %v4185_v3  ;;  %v1681_v43 = vld [vmem:[%s1870_s23 + $0xc0] sm:$0xff]  ;;  %v2968_v40 = vadd.f32 %v797_v38, %v4189_v2  ;;  %v4193_v39 = vld [vmem:[#allocation20_spill] sm:$0xff]  ;;  %v871_v38 = vmul.f32 %v2905_v49, %v1670_v8 }
  0x80   : > { %4180 = vst [vmem:[#allocation27_spill] sm:$0xff] %v2947_v29  ;;  %4182 = vst [vmem:[#allocation3_spill] sm:$0xff] %v2953_v16  ;;  %v4191_v44 = vld [vmem:[#allocation18_spill] sm:$0xff]  ;;  %v2974_v9 = vadd.f32 %v799_v55, %v4193_v39  ;;  %v1682_v36 = vld [vmem:[%s1870_s23 + $0xc8] sm:$0xff]  ;;  %v872_v15 = vmul.f32 %v2905_v49, %v1671_v46  ;;  %v874_v55 = vmul.f32 %v2905_v49, %v1673_v6 }
  0x81   : > { %4184 = vst [vmem:[#allocation7_spill] sm:$0xff] %v2956_v5  ;;  %4186 = vst [vmem:[#allocation11_spill] sm:$0xff] %v2959_v47  ;;  %v2971_v19 = vadd.f32 %v798_v27, %v4191_v44  ;;  %v1683_v60 = vld [vmem:[%s1870_s23 + $0xd8] sm:$0xff]  ;;  %v1684_v30 = vld [vmem:[%s1870_s23 + $0xe0] sm:$0xff]  ;;  %v873_v27 = vmul.f32 %v2905_v49, %v1672_v7  ;;  %v875_v54 = vmul.f32 %v2905_v49, %v1674_v11 }
  0x82   : > { %4188 = vst [vmem:[#allocation15_spill] sm:$0xff] %v2962_v42  ;;  %4190 = vst [vmem:[#allocation19_spill] sm:$0xff] %v2968_v40  ;;  %v1685_v25 = vld [vmem:[%s1870_s23 + $0xf0] sm:$0xff]  ;;  %v1686_v28 = vld [vmem:[%s1870_s23 + $0xf8] sm:$0xff]  ;;  %v876_v44 = vmul.f32 %v2905_v49, %v1675_v50  ;;  %v877_v39 = vmul.f32 %v2905_v49, %v1676_v10  ;;  %v878_v8 = vmul.f32 %v2905_v49, %v1677_v63 }
  0x83   : > { %4192 = vst [vmem:[#allocation22_spill] sm:$0xff] %v2971_v19  ;;  %4194 = vst [vmem:[#allocation25_spill] sm:$0xff] %v2974_v9  ;;  %v1687_v32 = vld [vmem:[%s1870_s23 + $0x108] sm:$0xff]  ;;  %v1688_v3 = vld [vmem:[%s1870_s23 + $0x110] sm:$0xff]  ;;  %v879_v6 = vmul.f32 %v2905_v49, %v1678_v59  ;;  %v880_v61 = vmul.f32 %v2905_v49, %v1679_v12  ;;  %v881_v9 = vmul.f32 %v2905_v49, %v1680_v33 }
  0x84   : > { %v1689_v20 = vld [vmem:[%s1870_s23 + $0x120] sm:$0xff]  ;;  %v1690_v2 = vld [vmem:[%s1870_s23 + $0x128] sm:$0xff]  ;;  %v1691_v46 = vld [vmem:[%s1870_s23 + $0x138] sm:$0xff]  ;;  %v882_v19 = vmul.f32 %v2905_v49, %v1681_v43  ;;  %v883_v10 = vmul.f32 %v2905_v49, %v1682_v36  ;;  %v884_v42 = vmul.f32 %v2905_v49, %v1683_v60  ;;  %v885_v63 = vmul.f32 %v2905_v49, %v1684_v30 }
  0x85   : > { %v1692_v7 = vld [vmem:[%s1870_s23 + $0x140] sm:$0xff]  ;;  %v1693_v57 = vld [vmem:[%s1870_s23 + $0x150] sm:$0xff]  ;;  %v1694_v11 = vld [vmem:[%s1870_s23 + $0x158] sm:$0xff]  ;;  %v886_v47 = vmul.f32 %v2905_v49, %v1685_v25  ;;  %v887_v59 = vmul.f32 %v2905_v49, %v1686_v28  ;;  %v888_v12 = vmul.f32 %v2905_v49, %v1687_v32  ;;  %v889_v33 = vmul.f32 %v2905_v49, %v1688_v3 }
  0x86   : > { %v1695_v40 = vld [vmem:[%s1870_s23 + $0x168] sm:$0xff]  ;;  %v1696_v50 = vld [vmem:[%s1870_s23 + $0x170] sm:$0xff]  ;;  %v1699_v5 = vld [vmem:[%s1870_s23 + $0x198] sm:$0xff]  ;;  %v890_v43 = vmul.f32 %v2905_v49, %v1689_v20  ;;  %v891_v29 = vmul.f32 %v2905_v49, %v1690_v2  ;;  %v892_v36 = vmul.f32 %v2905_v49, %v1691_v46  ;;  %v893_v60 = vmul.f32 %v2905_v49, %v1692_v7 }
  0x87   : > { %v1700_v16 = vld [vmem:[%s1870_s23 + $0x1a0] sm:$0xff]  ;;  %v894_v30 = vmul.f32 %v2905_v49, %v1693_v57  ;;  %v895_v25 = vmul.f32 %v2905_v49, %v1694_v11  ;;  %v896_v48 = vmul.f32 %v2905_v49, %v1695_v40  ;;  %v897_v28 = vmul.f32 %v2905_v49, %v1696_v50 }
  0x88   : > { %v4195_v53 = vld [vmem:[#allocation54_spill] sm:$0xff]  ;;  %v900_v2 = vmul.f32 %v2905_v49, %v1699_v5  ;;  %v901_v46 = vmul.f32 %v2905_v49, %v1700_v16  ;;  %v3028_v7 = vadd.f32 %v870_v21, %v2863_v51  ;;  %v3031_v57 = vadd.f32 %v871_v38, %v2866_v52  ;;  %v1705_v16 = vld [vmem:[%s1870_s23 + $0x51] sm:$0xff] }
  0x89   : > { %v898_v32 = vmul.f32 %v2905_v49, %v4195_v53  ;;  %v4196_v3 = vld [vmem:[#allocation58_spill] sm:$0xff]  ;;  %v3034_v40 = vadd.f32 %v872_v15, %v2869_v56  ;;  %v3037_v11 = vadd.f32 %v873_v27, %v2872_v23  ;;  %v3040_v53 = vadd.f32 %v874_v55, %v2875_v0  ;;  %v1710_v27 = vld [vmem:[%s1870_s23 + $0x91] sm:$0xff] }
  0x8a   : > { %v899_v20 = vmul.f32 %v2905_v49, %v4196_v3  ;;  %v3043_v5 = vadd.f32 %v875_v54, %v2878_v14  ;;  %v3046_v51 = vadd.f32 %v876_v44, %v2881_v26  ;;  %v3049_v52 = vadd.f32 %v877_v39, %v2884_v18  ;;  %v1702_v18 = vld [vmem:[%s1870_s23 + $0x31] sm:$0xff]  ;;  %v1704_v49 = vld [vmem:[%s1870_s23 + $0x49] sm:$0xff]  ;;  %v1711_v55 = vld [vmem:[%s1870_s23 + $0x99] sm:$0xff] }
  0x8b   : > { %v3052_v56 = vadd.f32 %v878_v8, %v2887_v31  ;;  %v3055_v23 = vadd.f32 %v879_v6, %v2890_v22  ;;  %v3058_v0 = vadd.f32 %v880_v61, %v2893_v35  ;;  %v3061_v14 = vadd.f32 %v881_v9, %v2896_v37  ;;  %v3070_v31 = vld [vmem:[%s3810_s1 + $0x7] ss:$0 sm:$0xff]  ;;  %v4203_v54 = vld [vmem:[#allocation3_spill] sm:$0xff]  ;;  %v1718_v3 = vld [vmem:[%s1870_s23 + $0xf1] sm:$0xff] }
  0x8c   : > { %v3064_v26 = vadd.f32 %v882_v19, %v2899_v13  ;;  %v3073_v22 = vadd.f32 %v883_v10, %v2908_v34  ;;  %v3076_v61 = vadd.f32 %v884_v42, %v2911_v17  ;;  %v3079_v35 = vadd.f32 %v885_v63, %v2914_v24  ;;  %v1703_v13 = vld [vmem:[%s1870_s23 + $0x39] sm:$0xff]  ;;  %v4207_v39 = vld [vmem:[#allocation11_spill] sm:$0xff]  ;;  %v1713_v63 = vld [vmem:[%s1870_s23 + $0xb1] sm:$0xff] }
  0x8d   : > { %v3082_v37 = vadd.f32 %v886_v47, %v2917_v58  ;;  %v3088_v19 = vadd.f32 %v887_v59, %v2923_v45  ;;  %v3091_v34 = vadd.f32 %v888_v12, %v2926_v41  ;;  %v3094_v17 = vadd.f32 %v889_v33, %v2929_v4  ;;  %v1706_v58 = vld [vmem:[%s1870_s23 + $0x61] sm:$0xff]  ;;  %v1707_v47 = vld [vmem:[%s1870_s23 + $0x69] sm:$0xff]  ;;  %v1708_v42 = vld [vmem:[%s1870_s23 + $0x79] sm:$0xff] }
  0x8e   : > { %v3097_v24 = vadd.f32 %v890_v43, %v2932_v62  ;;  %v3103_v9 = vadd.f32 %v891_v29, %v2938_v1  ;;  %v4197_v45 = vld [vmem:[#allocation24_spill] sm:$0xff]  ;;  %v4199_v41 = vld [vmem:[#allocation26_spill] sm:$0xff]  ;;  %v4201_v4 = vld [vmem:[#allocation27_spill] sm:$0xff]  ;;  %v3118_v1 = vadd.f32 %v895_v25, %v4203_v54  ;;  %v3124_v8 = vadd.f32 %v897_v28, %v4207_v39 }
  0x8f   : > { %v3106_v21 = vadd.f32 %v892_v36, %v4197_v45  ;;  %v3109_v38 = vadd.f32 %v893_v60, %v4199_v41  ;;  %v3112_v15 = vadd.f32 %v894_v30, %v4201_v4  ;;  %v1709_v62 = vld [vmem:[%s1870_s23 + $0x81] sm:$0xff]  ;;  %v1712_v10 = vld [vmem:[%s1870_s23 + $0xa9] sm:$0xff]  ;;  %v1716_v25 = vld [vmem:[%s1870_s23 + $0xd9] sm:$0xff]  ;;  %v973_v4 = vmul.f32 %v3070_v31, %v1704_v49 }
  0x90   : > { %4204 = vst [vmem:[#allocation43_spill] sm:$0xff] %v3118_v1  ;;  %v4205_v29 = vld [vmem:[#allocation7_spill] sm:$0xff]  ;;  %4208 = vst [vmem:[#allocation28_spill] sm:$0xff] %v3124_v8  ;;  %v4213_v43 = vld [vmem:[#allocation22_spill] sm:$0xff]  ;;  %v987_v8 = vmul.f32 %v3070_v31, %v1718_v3 }
  0x91   : > { %4198 = vst [vmem:[#allocation29_spill] sm:$0xff] %v3106_v21  ;;  %4200 = vst [vmem:[#allocation32_spill] sm:$0xff] %v3109_v38  ;;  %v3121_v44 = vadd.f32 %v896_v48, %v4205_v29  ;;  %v4209_v6 = vld [vmem:[#allocation15_spill] sm:$0xff]  ;;  %v3136_v36 = vadd.f32 %v900_v2, %v4213_v43  ;;  %v4215_v48 = vld [vmem:[#allocation25_spill] sm:$0xff]  ;;  %v974_v2 = vmul.f32 %v3070_v31, %v1705_v16 }
  0x92   : > { %4202 = vst [vmem:[#allocation39_spill] sm:$0xff] %v3112_v15  ;;  %v3127_v50 = vadd.f32 %v898_v32, %v4209_v6  ;;  %v1714_v59 = vld [vmem:[%s1870_s23 + $0xc1] sm:$0xff]  ;;  %v3139_v60 = vadd.f32 %v901_v46, %v4215_v48  ;;  %v1715_v30 = vld [vmem:[%s1870_s23 + $0xc9] sm:$0xff]  ;;  %v971_v32 = vmul.f32 %v3070_v31, %v1702_v18  ;;  %v1719_v45 = vld [vmem:[%s1870_s23 + $0xf9] sm:$0xff]  ;;  %v975_v46 = vmul.f32 %v3070_v31, %v1706_v58 }
  0x93   : > { %4206 = vst [vmem:[#allocation44_spill] sm:$0xff] %v3121_v44  ;;  %v4211_v12 = vld [vmem:[#allocation19_spill] sm:$0xff]  ;;  %4214 = vst [vmem:[#allocation33_spill] sm:$0xff] %v3136_v36  ;;  %v1721_v54 = vld [vmem:[%s1870_s23 + $0x111] sm:$0xff]  ;;  %v976_v18 = vmul.f32 %v3070_v31, %v1707_v47  ;;  %v977_v6 = vmul.f32 %v3070_v31, %v1708_v42  ;;  %v980_v58 = vmul.f32 %v3070_v31, %v1711_v55 }
  0x94   : > { %4210 = vst [vmem:[#allocation30_spill] sm:$0xff] %v3127_v50  ;;  %v3133_v33 = vadd.f32 %v899_v20, %v4211_v12  ;;  %4216 = vst [vmem:[#allocation34_spill] sm:$0xff] %v3139_v60  ;;  %v1717_v28 = vld [vmem:[%s1870_s23 + $0xe1] sm:$0xff]  ;;  %v1720_v41 = vld [vmem:[%s1870_s23 + $0x109] sm:$0xff]  ;;  %v972_v20 = vmul.f32 %v3070_v31, %v1703_v13  ;;  %v978_v12 = vmul.f32 %v3070_v31, %v1709_v62 }
  0x95   : > { %v1722_v29 = vld [vmem:[%s1870_s23 + $0x121] sm:$0xff]  ;;  %v1723_v39 = vld [vmem:[%s1870_s23 + $0x129] sm:$0xff]  ;;  %v979_v13 = vmul.f32 %v3070_v31, %v1710_v27  ;;  %v1724_v49 = vld [vmem:[%s1870_s23 + $0x139] sm:$0xff]  ;;  %v981_v48 = vmul.f32 %v3070_v31, %v1712_v10  ;;  %v982_v60 = vmul.f32 %v3070_v31, %v1713_v63  ;;  %v983_v36 = vmul.f32 %v3070_v31, %v1714_v59 }
  0x96   : > { %4212 = vst [vmem:[#allocation31_spill] sm:$0xff] %v3133_v33  ;;  %v1725_v16 = vld [vmem:[%s1870_s23 + $0x141] sm:$0xff]  ;;  %v1726_v43 = vld [vmem:[%s1870_s23 + $0x151] sm:$0xff]  ;;  %v1727_v47 = vld [vmem:[%s1870_s23 + $0x159] sm:$0xff]  ;;  %v984_v62 = vmul.f32 %v3070_v31, %v1715_v30  ;;  %v985_v50 = vmul.f32 %v3070_v31, %v1716_v25  ;;  %v986_v27 = vmul.f32 %v3070_v31, %v1717_v28  ;;  %v988_v55 = vmul.f32 %v3070_v31, %v1719_v45 }
  0x97   : > { %v1728_v33 = vld [vmem:[%s1870_s23 + $0x169] sm:$0xff]  ;;  %v1729_v42 = vld [vmem:[%s1870_s23 + $0x171] sm:$0xff]  ;;  %v1732_v44 = vld [vmem:[%s1870_s23 + $0x199] sm:$0xff]  ;;  %v989_v10 = vmul.f32 %v3070_v31, %v1720_v41  ;;  %v990_v63 = vmul.f32 %v3070_v31, %v1721_v54  ;;  %v991_v59 = vmul.f32 %v3070_v31, %v1722_v29  ;;  %v992_v15 = vmul.f32 %v3070_v31, %v1723_v39 }
  0x98   : > { %v1733_v1 = vld [vmem:[%s1870_s23 + $0x1a1] sm:$0xff]  ;;  %v993_v30 = vmul.f32 %v3070_v31, %v1724_v49  ;;  %v994_v25 = vmul.f32 %v3070_v31, %v1725_v16  ;;  %v995_v28 = vmul.f32 %v3070_v31, %v1726_v43  ;;  %v996_v3 = vmul.f32 %v3070_v31, %v1727_v47  ;;  %v4218_v54 = vld [vmem:[#allocation5_spill] sm:$0xff] }
  0x99   : > { %v997_v38 = vmul.f32 %v3070_v31, %v1728_v33  ;;  %v998_v45 = vmul.f32 %v3070_v31, %v1729_v42  ;;  %v4217_v21 = vld [vmem:[#allocation2_spill] sm:$0xff]  ;;  %v1000_v29 = vmul.f32 %v3070_v31, %v4218_v54  ;;  %v1001_v39 = vmul.f32 %v3070_v31, %v1732_v44  ;;  %v1751_v54 = vld [vmem:[%s1870_s23 + $0xf2] sm:$0xff] }
  0x9a   : > { %v999_v41 = vmul.f32 %v3070_v31, %v4217_v21  ;;  %v1002_v49 = vmul.f32 %v3070_v31, %v1733_v1  ;;  %v3193_v16 = vadd.f32 %v971_v32, %v3028_v7  ;;  %v3196_v43 = vadd.f32 %v972_v20, %v3031_v57  ;;  %v1736_v31 = vld [vmem:[%s1870_s23 + $0x3a] sm:$0xff]  ;;  %v1737_v1 = vld [vmem:[%s1870_s23 + $0x4a] sm:$0xff] }
  0x9b   : > { %v3199_v33 = vadd.f32 %v973_v4, %v3034_v40  ;;  %v3202_v47 = vadd.f32 %v974_v2, %v3037_v11  ;;  %v3205_v21 = vadd.f32 %v975_v46, %v3040_v53  ;;  %v3208_v44 = vadd.f32 %v976_v18, %v3043_v5  ;;  %v1743_v46 = vld [vmem:[%s1870_s23 + $0x92] sm:$0xff]  ;;  %v1744_v18 = vld [vmem:[%s1870_s23 + $0x9a] sm:$0xff] }
  0x9c   : > { %v3211_v7 = vadd.f32 %v977_v6, %v3046_v51  ;;  %v3214_v57 = vadd.f32 %v978_v12, %v3049_v52  ;;  %v3217_v40 = vadd.f32 %v979_v13, %v3052_v56  ;;  %v3220_v11 = vadd.f32 %v980_v58, %v3055_v23  ;;  %v1735_v52 = vld [vmem:[%s1870_s23 + $0x32] sm:$0xff]  ;;  %v3235_v56 = vld [vmem:[%s3810_s1 + $0x8] ss:$0 sm:$0xff] }
  0x9d   : > { %v3223_v53 = vadd.f32 %v981_v48, %v3058_v0  ;;  %v3226_v5 = vadd.f32 %v982_v60, %v3061_v14  ;;  %v3229_v51 = vadd.f32 %v983_v36, %v3064_v26  ;;  %v3238_v23 = vadd.f32 %v984_v62, %v3073_v22  ;;  %v1738_v36 = vld [vmem:[%s1870_s23 + $0x52] sm:$0xff]  ;;  %v4226_v6 = vld [vmem:[#allocation43_spill] sm:$0xff]  ;;  %v4232_v48 = vld [vmem:[#allocation30_spill] sm:$0xff] }
  0x9e   : > { %v3241_v0 = vadd.f32 %v985_v50, %v3076_v61  ;;  %v3244_v14 = vadd.f32 %v986_v27, %v3079_v35  ;;  %v3247_v26 = vadd.f32 %v987_v8, %v3082_v37  ;;  %v3253_v60 = vadd.f32 %v988_v55, %v3088_v19  ;;  %v1739_v37 = vld [vmem:[%s1870_s23 + $0x62] sm:$0xff]  ;;  %v1740_v8 = vld [vmem:[%s1870_s23 + $0x6a] sm:$0xff]  ;;  %v1741_v50 = vld [vmem:[%s1870_s23 + $0x7a] sm:$0xff] }
  0x9f   : > { %v3256_v22 = vadd.f32 %v989_v10, %v3091_v34  ;;  %v3259_v61 = vadd.f32 %v990_v63, %v3094_v17  ;;  %v3262_v35 = vadd.f32 %v991_v59, %v3097_v24  ;;  %v3268_v32 = vadd.f32 %v992_v15, %v3103_v9  ;;  %v4220_v19 = vld [vmem:[#allocation29_spill] sm:$0xff]  ;;  %v4222_v34 = vld [vmem:[#allocation32_spill] sm:$0xff]  ;;  %v4224_v17 = vld [vmem:[#allocation39_spill] sm:$0xff] }
  0xa0   : > { %v3271_v20 = vadd.f32 %v993_v30, %v4220_v19  ;;  %v3274_v4 = vadd.f32 %v994_v25, %v4222_v34  ;;  %v3277_v2 = vadd.f32 %v995_v28, %v4224_v17  ;;  %v1742_v24 = vld [vmem:[%s1870_s23 + $0x82] sm:$0xff]  ;;  %v3283_v9 = vadd.f32 %v996_v3, %v4226_v6  ;;  %v4228_v15 = vld [vmem:[#allocation44_spill] sm:$0xff]  ;;  %v4236_v59 = vld [vmem:[#allocation33_spill] sm:$0xff] }
  0xa1   : > { %4219 = vst [vmem:[#allocation35_spill] sm:$0xff] %v3268_v32  ;;  %v3286_v12 = vadd.f32 %v997_v38, %v4228_v15  ;;  %v4230_v13 = vld [vmem:[#allocation28_spill] sm:$0xff]  ;;  %v3292_v42 = vadd.f32 %v999_v41, %v4232_v48  ;;  %v1747_v55 = vld [vmem:[%s1870_s23 + $0xc2] sm:$0xff]  ;;  %v3301_v30 = vadd.f32 %v1001_v39, %v4236_v59  ;;  %v1749_v3 = vld [vmem:[%s1870_s23 + $0xda] sm:$0xff]  ;;  %v1072_v41 = vmul.f32 %v3235_v56, %v1735_v52 }
  0xa2   : > { %4221 = vst [vmem:[#allocation36_spill] sm:$0xff] %v3271_v20  ;;  %4223 = vst [vmem:[#allocation37_spill] sm:$0xff] %v3274_v4  ;;  %v3289_v58 = vadd.f32 %v998_v45, %v4230_v13  ;;  %v1745_v62 = vld [vmem:[%s1870_s23 + $0xaa] sm:$0xff]  ;;  %v1746_v27 = vld [vmem:[%s1870_s23 + $0xb2] sm:$0xff]  ;;  %v1074_v17 = vmul.f32 %v3235_v56, %v1737_v1  ;;  %v1075_v39 = vmul.f32 %v3235_v56, %v1738_v36 }
  0xa3   : > { %4225 = vst [vmem:[#allocation38_spill] sm:$0xff] %v3277_v2  ;;  %4227 = vst [vmem:[#allocation40_spill] sm:$0xff] %v3283_v9  ;;  %v4234_v10 = vld [vmem:[#allocation31_spill] sm:$0xff]  ;;  %v4238_v38 = vld [vmem:[#allocation34_spill] sm:$0xff]  ;;  %v1077_v52 = vmul.f32 %v3235_v56, %v1740_v8  ;;  %v1078_v48 = vmul.f32 %v3235_v56, %v1741_v50 }
  0xa4   : > { %4229 = vst [vmem:[#allocation41_spill] sm:$0xff] %v3286_v12  ;;  %4231 = vst [vmem:[#allocation42_spill] sm:$0xff] %v3289_v58  ;;  %v3298_v63 = vadd.f32 %v1000_v29, %v4234_v10  ;;  %v3304_v25 = vadd.f32 %v1002_v49, %v4238_v38  ;;  %v1748_v28 = vld [vmem:[%s1870_s23 + $0xca] sm:$0xff]  ;;  %v1750_v45 = vld [vmem:[%s1870_s23 + $0xe2] sm:$0xff]  ;;  %v1073_v29 = vmul.f32 %v3235_v56, %v1736_v31 }
  0xa5   : > { %4233 = vst [vmem:[#allocation45_spill] sm:$0xff] %v3292_v42  ;;  %4237 = vst [vmem:[#allocation47_spill] sm:$0xff] %v3301_v30  ;;  %v1752_v19 = vld [vmem:[%s1870_s23 + $0xfa] sm:$0xff]  ;;  %v1753_v34 = vld [vmem:[%s1870_s23 + $0x10a] sm:$0xff]  ;;  %v1076_v49 = vmul.f32 %v3235_v56, %v1739_v37  ;;  %v1079_v10 = vmul.f32 %v3235_v56, %v1742_v24  ;;  %v1080_v31 = vmul.f32 %v3235_v56, %v1743_v46 }
  0xa6   : > { %4235 = vst [vmem:[#allocation46_spill] sm:$0xff] %v3298_v63  ;;  %4239 = vst [vmem:[#allocation48_spill] sm:$0xff] %v3304_v25  ;;  %v1754_v6 = vld [vmem:[%s1870_s23 + $0x112] sm:$0xff]  ;;  %v1755_v15 = vld [vmem:[%s1870_s23 + $0x122] sm:$0xff]  ;;  %v1081_v37 = vmul.f32 %v3235_v56, %v1744_v18  ;;  %v1082_v38 = vmul.f32 %v3235_v56, %v1745_v62  ;;  %v1083_v25 = vmul.f32 %v3235_v56, %v1746_v27 }
  0xa7   : > { %v1756_v13 = vld [vmem:[%s1870_s23 + $0x12a] sm:$0xff]  ;;  %v1757_v1 = vld [vmem:[%s1870_s23 + $0x13a] sm:$0xff]  ;;  %v1758_v36 = vld [vmem:[%s1870_s23 + $0x142] sm:$0xff]  ;;  %v1084_v30 = vmul.f32 %v3235_v56, %v1747_v55  ;;  %v1085_v24 = vmul.f32 %v3235_v56, %v1748_v28  ;;  %v1086_v42 = vmul.f32 %v3235_v56, %v1749_v3  ;;  %v1087_v46 = vmul.f32 %v3235_v56, %v1750_v45 }
  0xa8   : > { %v1759_v59 = vld [vmem:[%s1870_s23 + $0x152] sm:$0xff]  ;;  %v1760_v8 = vld [vmem:[%s1870_s23 + $0x15a] sm:$0xff]  ;;  %v1761_v63 = vld [vmem:[%s1870_s23 + $0x16a] sm:$0xff]  ;;  %v1088_v58 = vmul.f32 %v3235_v56, %v1751_v54  ;;  %v1089_v18 = vmul.f32 %v3235_v56, %v1752_v19  ;;  %v1090_v62 = vmul.f32 %v3235_v56, %v1753_v34  ;;  %v1091_v27 = vmul.f32 %v3235_v56, %v1754_v6 }
  0xa9   : > { %v1762_v50 = vld [vmem:[%s1870_s23 + $0x172] sm:$0xff]  ;;  %v1765_v12 = vld [vmem:[%s1870_s23 + $0x19a] sm:$0xff]  ;;  %v1766_v9 = vld [vmem:[%s1870_s23 + $0x1a2] sm:$0xff]  ;;  %v1092_v55 = vmul.f32 %v3235_v56, %v1755_v15  ;;  %v1093_v2 = vmul.f32 %v3235_v56, %v1756_v13  ;;  %v1094_v28 = vmul.f32 %v3235_v56, %v1757_v1  ;;  %v1095_v3 = vmul.f32 %v3235_v56, %v1758_v36 }
  0xaa   : > { %v1096_v45 = vmul.f32 %v3235_v56, %v1759_v59  ;;  %v1097_v54 = vmul.f32 %v3235_v56, %v1760_v8  ;;  %v1098_v4 = vmul.f32 %v3235_v56, %v1761_v63  ;;  %v1099_v19 = vmul.f32 %v3235_v56, %v1762_v50  ;;  %v4240_v20 = vld [vmem:[#allocation21_spill] sm:$0xff]  ;;  %v4241_v6 = vld [vmem:[#allocation23_spill] sm:$0xff] }
  0xab   : > { %v1100_v34 = vmul.f32 %v3235_v56, %v4240_v20  ;;  %v1101_v15 = vmul.f32 %v3235_v56, %v4241_v6  ;;  %v1102_v13 = vmul.f32 %v3235_v56, %v1765_v12  ;;  %v1103_v1 = vmul.f32 %v3235_v56, %v1766_v9 }
  0xac   : > { %v1104_v36 = vadd.f32 %v1072_v41, %v3193_v16  ;;  %v1105_v59 = vadd.f32 %v1073_v29, %v3196_v43  ;;  %v1106_v8 = vadd.f32 %v1074_v17, %v3199_v33  ;;  %v1107_v63 = vadd.f32 %v1075_v39, %v3202_v47  ;;  %v4248_v41 = vld [vmem:[#allocation42_spill] sm:$0xff]  ;;  %v4249_v17 = vld [vmem:[#allocation45_spill] sm:$0xff] }
  0xad   : > { %v1108_v50 = vadd.f32 %v1076_v49, %v3205_v21  ;;  %v1109_v32 = vadd.f32 %v1077_v52, %v3208_v44  ;;  %v1110_v20 = vadd.f32 %v1078_v48, %v3211_v7  ;;  %v1111_v6 = vadd.f32 %v1079_v10, %v3214_v57  ;;  %v3377_v57 = vld [vmem:[%s3811_s2] ss:$0 sm:$0xff]  ;;  %v4251_v48 = vld [vmem:[#allocation47_spill] sm:$0xff] }
  0xae   : > { %v1112_v12 = vadd.f32 %v1080_v31, %v3217_v40  ;;  %v1113_v56 = vadd.f32 %v1081_v37, %v3220_v11  ;;  %v1114_v16 = vadd.f32 %v1082_v38, %v3223_v53  ;;  %v1115_v43 = vadd.f32 %v1083_v25, %v3226_v5  ;;  %v4250_v49 = vld [vmem:[#allocation46_spill] sm:$0xff]  ;;  %v4252_v31 = vld [vmem:[#allocation48_spill] sm:$0xff] }
  0xaf   : > { %v1116_v33 = vadd.f32 %v1084_v30, %v3229_v51  ;;  %v1117_v47 = vadd.f32 %v1085_v24, %v3238_v23  ;;  %v1118_v21 = vadd.f32 %v1086_v42, %v3241_v0  ;;  %v1119_v44 = vadd.f32 %v1087_v46, %v3244_v14  ;;  %v4242_v51 = vld [vmem:[#allocation35_spill] sm:$0xff]  ;;  %v4243_v0 = vld [vmem:[#allocation36_spill] sm:$0xff] }
  0xb0   : > { %v1120_v7 = vadd.f32 %v1088_v58, %v3247_v26  ;;  %v1121_v40 = vadd.f32 %v1089_v18, %v3253_v60  ;;  %v1122_v11 = vadd.f32 %v1090_v62, %v3256_v22  ;;  %v1123_v53 = vadd.f32 %v1091_v27, %v3259_v61  ;;  %v4244_v26 = vld [vmem:[#allocation37_spill] sm:$0xff]  ;;  %v4245_v58 = vld [vmem:[#allocation38_spill] sm:$0xff]  ;;  %v4246_v60 = vld [vmem:[#allocation40_spill] sm:$0xff] }
  0xb1   : > { %v3383_v5 = vadd.f32 %v1092_v55, %v3262_v35  ;;  %v3386_v23 = vadd.f32 %v1093_v2, %v4242_v51  ;;  %v3389_v14 = vadd.f32 %v1094_v28, %v4243_v0  ;;  %v3392_v9 = vadd.f32 %v1095_v3, %v4244_v26  ;;  %v4247_v2 = vld [vmem:[#allocation41_spill] sm:$0xff] }
  0xb2   : > { %v3395_v42 = vadd.f32 %v1096_v45, %v4245_v58  ;;  %v3398_v30 = vadd.f32 %v1097_v54, %v4246_v60  ;;  %v3401_v22 = vadd.f32 %v3377_v57, %v1104_v36  ;;  %v3404_v61 = vadd.f32 %v3377_v57, %v1106_v8  ;;  %v1281_v45 = vld [vmem:[%s3812_s3 + $0x8] sm:$0xff]  ;;  %v1282_v8 = vld [vmem:[%s3812_s3 + $0x10] sm:$0xff] }
  0xb3   : > { %v3407_v35 = vadd.f32 %v3377_v57, %v1108_v50  ;;  %v3410_v25 = vadd.f32 %v1098_v4, %v4247_v2  ;;  %v3413_v29 = vadd.f32 %v1099_v19, %v4248_v41  ;;  %v3416_v39 = vadd.f32 %v1100_v34, %v4249_v17 }
  0xb4   : > { %v3419_v52 = vadd.f32 %v1101_v15, %v4250_v49  ;;  %v3422_v10 = vadd.f32 %v1102_v13, %v4251_v48  ;;  %v3425_v37 = vadd.f32 %v1103_v1, %v4252_v31  ;;  %v3428_v38 = vadd.f32 %v3377_v57, %v1105_v59 }
  0xb5   : > { %v3431_v4 = vadd.f32 %v3377_v57, %v1110_v20  ;;  %v3434_v24 = vadd.f32 %v3377_v57, %v1107_v63  ;;  %v3437_v46 = vadd.f32 %v3377_v57, %v1109_v32  ;;  %v3440_v18 = vadd.f32 %v3377_v57, %v1111_v6  ;;  %v1280_v32 = vld [vmem:[%s3812_s3] sm:$0xff]  ;;  %v1283_v63 = vld [vmem:[%s3812_s3 + $0x18] sm:$0xff] }
  0xb6   : > { %v3443_v62 = vadd.f32 %v3377_v57, %v1112_v12  ;;  %v3446_v27 = vadd.f32 %v3377_v57, %v1113_v56  ;;  %v1175_v55 = vmax.f32 %v3401_v22, 0.0  ;;  %v1177_v28 = vmax.f32 %v3404_v61, 0.0 }
  0xb7   : > { %v1179_v3 = vmax.f32 %v3407_v35, 0.0  ;;  %v3458_v54 = vadd.f32 %v3377_v57, %v1114_v16  ;;  %v3461_v19 = vadd.f32 %v3377_v57, %v1115_v43  ;;  %v3464_v34 = vadd.f32 %v3377_v57, %v1116_v33 }
  0xb8   : > { %v3467_v15 = vadd.f32 %v3377_v57, %v1117_v47  ;;  %v3470_v13 = vadd.f32 %v3377_v57, %v1118_v21  ;;  %v3473_v1 = vadd.f32 %v3377_v57, %v1119_v44  ;;  %v1176_v36 = vmax.f32 %v3428_v38, 0.0 }
  0xb9   : > { %v1181_v59 = vmax.f32 %v3431_v4, 0.0  ;;  %v1178_v50 = vmax.f32 %v3434_v24, 0.0  ;;  %v1798_v20 = vpack.c.bf16 %v1281_v45, %v1280_v32  ;;  %v1183_v6 = vmax.f32 %v3443_v62, 0.0 }
  0xba   : > { %v1208_v12 = vsel %vm1207_vm0, %v1175_v55, 0.0  ;;  %v1209_v56 = vsel %vm1207_vm0, %v1177_v28, 0.0  ;;  %v1211_v16 = vsel %vm1207_vm0, %v1179_v3, 0.0  ;;  %v1823_v43 = vmov 0.0|0.0  }
  0xbb   : > { %1797 = vmatprep.subr.bf16.mxu0 %v1823_v43  ;;  %v3495_v33 = vadd.f32 %v3377_v57, %v1120_v7  ;;  %v1180_v47 = vmax.f32 %v3437_v46, 0.0  ;;  %v1210_v21 = vadd.f32 %v1209_v56, %v1208_v12  ;;  %v1801_v44 = vpack.c.bf16 %v1283_v63, %v1282_v8 }
  0xbc   : > { %1799 = vmatpush3.bf16.msra.mxu0 %v1798_v20  ;;  %v3499_v51 = vadd.f32 %v3377_v57, %v1121_v40  ;;  %v1182_v0 = vmax.f32 %v3440_v18, 0.0  ;;  %v1185_v26 = vmax.f32 %v3458_v54, 0.0  ;;  %v1213_v58 = vsel %vm1207_vm0, %v1181_v59, 0.0 }
  0xbd   : > { %1800 = vmatprep.subr.bf16.mxu0 %v1823_v43  ;;  %v3507_v7 = vadd.f32 %v3377_v57, %v1122_v11  ;;  %v3510_v60 = vadd.f32 %v3377_v57, %v1123_v53  ;;  %v1184_v2 = vmax.f32 %v3446_v27, 0.0  ;;  %v1212_v41 = vadd.f32 %v1211_v16, %v1210_v21 }
  0xbe   : > { %v3901_v40 = vmax.f32 %v3464_v34, 0.0  ;;  %v1215_v17 = vsel %vm1207_vm0, %v1183_v6, 0.0  ;;  %v1239_v49 = vsel %vm1207_vm0, %v1176_v36, 0.0  ;;  %v1240_v11 = vsel %vm1207_vm0, %v1178_v50, 0.0 }
  0xbf   : > { %v3525_v53 = vadd.f32 %v3377_v57, %v3383_v5  ;;  %v1214_v48 = vadd.f32 %v1213_v58, %v1212_v41  ;;  %v1241_v31 = vadd.f32 %v1240_v11, %v1239_v49  ;;  %v1242_v32 = vsel %vm1207_vm0, %v1180_v47, 0.0 }
  0xc0   : > { %1802 = vmatpush3.bf16.msra.mxu0 %v1801_v44  ;;  %v3913_v45 = vmax.f32 %v3461_v19, 0.0  ;;  %v3902_v8 = vmax.f32 %v3470_v13, 0.0  ;;  %v1217_v63 = vsel %vm1207_vm0, %v1185_v26, 0.0  ;;  %v1244_v5 = vsel %vm1207_vm0, %v1182_v0, 0.0 }
  0xc1   : > { %v3540_v20 = vadd.f32 %v3377_v57, %v3386_v23  ;;  %v3544_v12 = vadd.f32 %v3377_v57, %v3389_v14  ;;  %v1216_v56 = vadd.f32 %v1215_v17, %v1214_v48  ;;  %v1243_v16 = vadd.f32 %v1242_v32, %v1241_v31 }
  0xc2   : > { %v3908_v43 = vmax.f32 %v3467_v15, 0.0  ;;  %v3903_v21 = vmax.f32 %v3495_v33, 0.0  ;;  %v1219_v44 = vsel %vm1207_vm0, %v3901_v40, 0.0  ;;  %v1246_v58 = vsel %vm1207_vm0, %v1184_v2, 0.0 }
  0xc3   : > { %v3905_v23 = vmax.f32 %v3473_v1, 0.0  ;;  %v3904_v41 = vmax.f32 %v3507_v7, 0.0  ;;  %v1218_v14 = vadd.f32 %v1217_v63, %v1216_v56  ;;  %v1245_v49 = vadd.f32 %v1244_v5, %v1243_v16 }
  0xc4   : > { %v1221_v17 = vsel %vm1207_vm0, %v3902_v8, 0.0  ;;  %v1248_v11 = vsel %vm1207_vm0, %v3913_v45, 0.0  ;;  %v3564_v48 = vadd.f32 %v3377_v57, %v3395_v42  ;;  %v1825_v40 = vmov 0.0  }
  0xc5   : > { %v1220_v31 = vadd.f32 %v1219_v44, %v1218_v14  ;;  %v1247_v32 = vadd.f32 %v1246_v58, %v1245_v49  ;;  %1789 = vmatprep.mubr.msk.f32.mxu0 %vm1824_vm1, %v1825_v40  ;;  %1792 = vmatprep.subr.mxu1 %v1825_v40  ;;  %v3907_v63 = vmax.f32 %v3499_v51, 0.0  ;;  %v3906_v5 = vmax.f32 %v3525_v53, 0.0 }
  0xc6   : > { %v1223_v56 = vsel %vm1207_vm0, %v3903_v21, 0.0  ;;  %v1250_v16 = vsel %vm1207_vm0, %v3908_v43, 0.0  ;;  %1794 = vmatprep.mubr.msk.f32.mxu1 %vm1824_vm1, %v1825_v40  ;;  %v3576_v42 = vadd.f32 %v3377_v57, %v3392_v9  ;;  %v3580_v44 = vadd.f32 %v3377_v57, %v3410_v25 }
  0xc7   : > { %v1222_v58 = vadd.f32 %v1221_v17, %v1220_v31  ;;  %v1249_v14 = vadd.f32 %v1248_v11, %v1247_v32  ;;  %v3910_v49 = vmax.f32 %v3510_v60, 0.0  ;;  %v3909_v8 = vmax.f32 %v3544_v12, 0.0 }
  0xc8   : > { %v1225_v21 = vsel %vm1207_vm0, %v3904_v41, 0.0  ;;  %v1252_v40 = vsel %vm1207_vm0, %v3905_v23, 0.0  ;;  %v3592_v9 = vadd.f32 %v3377_v57, %v3398_v30  ;;  %v3596_v25 = vadd.f32 %v3377_v57, %v3416_v39 }
  0xc9   : > { %v1224_v17 = vadd.f32 %v1223_v56, %v1222_v58  ;;  %v1251_v11 = vadd.f32 %v1250_v16, %v1249_v14  ;;  %v3912_v31 = vmax.f32 %v3540_v20, 0.0  ;;  %v3911_v32 = vmax.f32 %v3564_v48, 0.0 }
  0xca   : > { %v1227_v41 = vsel %vm1207_vm0, %v3906_v5, 0.0  ;;  %v1254_v23 = vsel %vm1207_vm0, %v3907_v63, 0.0  ;;  %v3608_v30 = vadd.f32 %v3377_v57, %v3413_v29  ;;  %v3612_v39 = vadd.f32 %v3377_v57, %v3422_v10 }
  0xcb   : > { %v1226_v56 = vadd.f32 %v1225_v21, %v1224_v17  ;;  %v1253_v16 = vadd.f32 %v1252_v40, %v1251_v11  ;;  %v3919_v58 = vmax.f32 %v3576_v42, 0.0  ;;  %v3915_v14 = vmax.f32 %v3580_v44, 0.0 }
  0xcc   : > { %v1229_v5 = vsel %vm1207_vm0, %v3909_v8, 0.0  ;;  %v1256_v63 = vsel %vm1207_vm0, %v3910_v49, 0.0  ;;  %v3624_v29 = vadd.f32 %v3377_v57, %v3419_v52  ;;  %v3917_v21 = vmax.f32 %v3592_v9, 0.0 }
  0xcd   : > { %v1228_v10 = vadd.f32 %v1227_v41, %v1226_v56  ;;  %v1255_v43 = vadd.f32 %v1254_v23, %v1253_v16  ;;  %v3914_v40 = vmax.f32 %v3596_v25, 0.0  ;;  %v1231_v17 = vsel %vm1207_vm0, %v3911_v32, 0.0 }
  0xce   : > { %v1258_v11 = vsel %vm1207_vm0, %v3912_v31, 0.0  ;;  %v3636_v8 = vadd.f32 %v3377_v57, %v3425_v37  ;;  %v3918_v23 = vmax.f32 %v3608_v30, 0.0  ;;  %v3916_v41 = vmax.f32 %v3612_v39, 0.0 }
  0xcf   : > { %v1230_v52 = vadd.f32 %v1229_v5, %v1228_v10  ;;  %v1257_v49 = vadd.f32 %v1256_v63, %v1255_v43  ;;  %v1233_v56 = vsel %vm1207_vm0, %v3915_v14, 0.0  ;;  %v1260_v16 = vsel %vm1207_vm0, %v3919_v58, 0.0 }
  0xd0   : > { %v3920_v45 = vmax.f32 %v3624_v29, 0.0  ;;  %v1235_v57 = vsel %vm1207_vm0, %v3914_v40, 0.0  ;;  %v1262_v37 = vsel %vm1207_vm0, %v3917_v21, 0.0  ;;  %v1206_v5 = vmax.f32 %v3636_v8, 0.0 }
  0xd1   : > { %v1232_v32 = vadd.f32 %v1231_v17, %v1230_v52  ;;  %v1259_v31 = vadd.f32 %v1258_v11, %v1257_v49  ;;  %v1237_v10 = vsel %vm1207_vm0, %v3916_v41, 0.0  ;;  %v1264_v49 = vsel %vm1207_vm0, %v3918_v23, 0.0 }
  0xd2   : > { %v1266_v52 = vsel %vm1207_vm0, %v3920_v45, 0.0  ;;  %v4253_v46 = vmax.f32 %v3461_v19, 0.0  ;;  %v4254_v4 = vmax.f32 %v3464_v34, 0.0  ;;  %v4255_v62 = vmax.f32 %v3467_v15, 0.0 }
  0xd3   : > { %v1234_v43 = vadd.f32 %v1233_v56, %v1232_v32  ;;  %v1261_v63 = vadd.f32 %v1260_v16, %v1259_v31  ;;  %v1268_v31 = vsel %vm1207_vm0, %v1206_v5, 0.0  ;;  %v4257_v19 = vmax.f32 %v3473_v1, 0.0 }
  0xd4   : > { %v4258_v34 = vmax.f32 %v3495_v33, 0.0  ;;  %v4260_v1 = vmax.f32 %v3507_v7, 0.0  ;;  %v4262_v33 = vmax.f32 %v3525_v53, 0.0  ;;  %v4264_v7 = vmax.f32 %v3544_v12, 0.0 }
  0xd5   : > { %v1236_v17 = vadd.f32 %v1235_v57, %v1234_v43  ;;  %v1263_v11 = vadd.f32 %v1262_v37, %v1261_v63  ;;  %v4266_v53 = vmax.f32 %v3564_v48, 0.0  ;;  %v4267_v12 = vmax.f32 %v3592_v9, 0.0 }
  0xd6   : > { %v4270_v48 = vmax.f32 %v3596_v25, 0.0  ;;  %v4271_v9 = vmax.f32 %v3624_v29, 0.0 }
  0xd7   : > { %v1238_v40 = vadd.f32 %v1237_v10, %v1236_v17  ;;  %v1265_v14 = vadd.f32 %v1264_v49, %v1263_v11 }
  0xd9   : > { %v1267_v32 = vadd.f32 %v1266_v52, %v1265_v14  ;;  %v1270_v16 = vsel %vm1207_vm0, %v1238_v40, 0.0  ;;  %v1358_v14 = vld [vmem:[%s3813_s4] sm:$0xff] }
  0xda   : > { %1793 = vmatpush3.msra.mxu1 %v1358_v14  ;;  %v4268_v14 = vmax.f32 %v3580_v44, 0.0 }
  0xdb   : > { %v1269_v56 = vadd.f32 %v1268_v31, %v1267_v32 }
  0xdd   : > { %v1271_v41 = vsel %vm1207_vm0, %v1269_v56, 0.0 }
  0xde   : > { %v1272_v21 = vadd.f32 %v1271_v41, %v1270_v16  ;;  %v1436_v41 = vlaneseq }
  0xe0   : > { %v1273_v23 = vrot.slane %v1272_v21, 4  ;;  %v1437_v11 = vshrl.u32 %v1436_v41, 7  ;;  %v4272_v41 = vmax.f32 %v3612_v39, 0.0 }
  0xe2   : > { %v1274_v57 = vadd.f32 %v1273_v23, %v1272_v21  ;;  %v1438_v31 = vsub.s32 0, %v1437_v11 }
  0xe4   : > { %v1275_v37 = vrot.slane %v1274_v57, 2 }
  0xe6   : > { %v1276_v43 = vadd.f32 %v1275_v37, %v1274_v57 }
  0xe8   : > { %v1277_v63 = vrot.slane %v1276_v43, 1 }
  0xea   : > { %v1278_v58 = vadd.f32 %v1277_v63, %v1276_v43 }
  0xec   : > { %v1279_v45 = vmul.f32 0.00390625, %v1278_v58 }
  0xee   : > { %1790 = vmatmul.mubr.msk.f32.vlgmr.msra.gmra.mrb[0].mxu0 %vm1207_vm0, %v1279_v45 }
 0x1c1   : > { %v1353_v10 = vpop.f32.mrb[0].mxu0 }
 0x1c2   : > { %v1791_v40 = vpop.f32.mrb[1].mxu0  ;;  %v1357_v49 = vmax.f32 %v1353_v10, 0.0 }
 0x1c3   : > { %v4269_v40 = vmax.f32 %v3608_v30, 0.0 }
 0x1c4   : > { %1795 = vmatmul.mubr.msk.f32.vlgmr.msra.gmra.mrb[0].mxu1 %vm1359_vm2, %v1357_v49 }
 0x297   : > { %v1429_v21 = vpop.f32.mrb[0].mxu1 }
 0x298   : > { %v1796_v23 = vpop.f32.mrb[1].mxu1  ;;  %v1430_v17 = vadd.f32 3.0, %v1429_v21 }
 0x29a   : > { %v1433_v52 = vmax.f32 %v1430_v17, 0.0 }
 0x29c   : > { %v1434_v58 = vmin.f32 %v1433_v52, 6.0 }
 0x29e   : > { %v1435_v45 = vmul.f32 0.16666667, %v1434_v58 }
 0x2a0   : > { %v1439_v32 = vrot.slane %v1435_v45, %v1438_v31 }
 0x2a2   : > { %v1440_v56 = vmul.f32 %v1439_v32, %v1175_v55  ;;  %v1441_v16 = vmul.f32 %v1439_v32, %v1176_v36  ;;  %v1442_v57 = vmul.f32 %v1439_v32, %v1177_v28  ;;  %v1443_v37 = vmul.f32 %v1439_v32, %v1178_v50 }
 0x2a3   : > { %v1444_v43 = vmul.f32 %v1439_v32, %v1179_v3  ;;  %v1445_v22 = vmul.f32 %v1439_v32, %v1180_v47  ;;  %v1446_v55 = vmul.f32 %v1439_v32, %v1181_v59  ;;  %v1447_v38 = vmul.f32 %v1439_v32, %v1182_v0 }
 0x2a4   : > { %v1448_v61 = vmul.f32 %v1439_v32, %v1183_v6  ;;  %v1449_v35 = vmul.f32 %v1439_v32, %v1184_v2  ;;  %v1450_v24 = vmul.f32 %v1439_v32, %v1185_v26  ;;  %v1451_v28 = vmul.f32 %v1439_v32, %v4253_v46  ;;  %1472 = vst.msk [vmem:[%s3676_s9] sm:$0xff] %vm1207_vm0, %v1440_v56 }
 0x2a5   : > { %1473 = vst.msk [vmem:[%s3676_s9 + $0x8] sm:$0xff] %vm1207_vm0, %v1441_v16  ;;  %1474 = vst.msk [vmem:[%s3676_s9 + $0x10] sm:$0xff] %vm1207_vm0, %v1442_v57  ;;  %v1452_v18 = vmul.f32 %v1439_v32, %v4254_v4  ;;  %v1453_v27 = vmul.f32 %v1439_v32, %v4255_v62  ;;  %v4256_v3 = vmax.f32 %v3470_v13, 0.0  ;;  %v1455_v36 = vmul.f32 %v1439_v32, %v4257_v19 }
 0x2a6   : > { %1475 = vst.msk [vmem:[%s3676_s9 + $0x18] sm:$0xff] %vm1207_vm0, %v1443_v37  ;;  %1476 = vst.msk [vmem:[%s3676_s9 + $0x20] sm:$0xff] %vm1207_vm0, %v1444_v43  ;;  %v1456_v15 = vmul.f32 %v1439_v32, %v4258_v34  ;;  %v4259_v13 = vmax.f32 %v3499_v51, 0.0  ;;  %v1458_v50 = vmul.f32 %v1439_v32, %v4260_v1  ;;  %v4261_v6 = vmax.f32 %v3510_v60, 0.0 }
 0x2a7   : > { %v1454_v54 = vmul.f32 %v1439_v32, %v4256_v3  ;;  %1477 = vst.msk [vmem:[%s3676_s9 + $0x28] sm:$0xff] %vm1207_vm0, %v1445_v22  ;;  %1478 = vst.msk [vmem:[%s3676_s9 + $0x30] sm:$0xff] %vm1207_vm0, %v1446_v55  ;;  %v1460_v51 = vmul.f32 %v1439_v32, %v4262_v33  ;;  %v4263_v0 = vmax.f32 %v3540_v20, 0.0  ;;  %v1462_v60 = vmul.f32 %v1439_v32, %v4264_v7 }
 0x2a8   : > { %1479 = vst.msk [vmem:[%s3676_s9 + $0x38] sm:$0xff] %vm1207_vm0, %v1447_v38  ;;  %v1457_v59 = vmul.f32 %v1439_v32, %v4259_v13  ;;  %v1459_v47 = vmul.f32 %v1439_v32, %v4261_v6  ;;  %1480 = vst.msk [vmem:[%s3676_s9 + $0x40] sm:$0xff] %vm1207_vm0, %v1448_v61  ;;  %v4265_v2 = vmax.f32 %v3576_v42, 0.0  ;;  %v1464_v20 = vmul.f32 %v1439_v32, %v4266_v53 }
 0x2a9   : > { %1481 = vst.msk [vmem:[%s3676_s9 + $0x48] sm:$0xff] %vm1207_vm0, %v1449_v35  ;;  %1482 = vst.msk [vmem:[%s3676_s9 + $0x50] sm:$0xff] %vm1207_vm0, %v1450_v24  ;;  %v1461_v26 = vmul.f32 %v1439_v32, %v4263_v0  ;;  %v1465_v42 = vmul.f32 %v1439_v32, %v4267_v12  ;;  %v1466_v10 = vmul.f32 %v1439_v32, %v4268_v14 }
 0x2aa   : > { %1483 = vst.msk [vmem:[%s3676_s9 + $0x58] sm:$0xff] %vm1207_vm0, %v1451_v28  ;;  %v1463_v63 = vmul.f32 %v1439_v32, %v4265_v2  ;;  %1484 = vst.msk [vmem:[%s3676_s9 + $0x60] sm:$0xff] %vm1207_vm0, %v1452_v18  ;;  %v1467_v49 = vmul.f32 %v1439_v32, %v4269_v40  ;;  %v1468_v44 = vmul.f32 %v1439_v32, %v4270_v48 }
 0x2ab   : > { %1485 = vst.msk [vmem:[%s3676_s9 + $0x68] sm:$0xff] %vm1207_vm0, %v1453_v27  ;;  %1486 = vst.msk [vmem:[%s3676_s9 + $0x70] sm:$0xff] %vm1207_vm0, %v1454_v54  ;;  %v1469_v30 = vmul.f32 %v1439_v32, %v4271_v9  ;;  %v1470_v21 = vmul.f32 %v1439_v32, %v4272_v41  ;;  %v1471_v23 = vmul.f32 %v1439_v32, %v1206_v5 }
 0x2ac   : > { %1487 = vst.msk [vmem:[%s3676_s9 + $0x78] sm:$0xff] %vm1207_vm0, %v1455_v36  ;;  %1488 = vst.msk [vmem:[%s3676_s9 + $0x80] sm:$0xff] %vm1207_vm0, %v1456_v15 }
 0x2ad   : > { %1489 = vst.msk [vmem:[%s3676_s9 + $0x88] sm:$0xff] %vm1207_vm0, %v1457_v59  ;;  %1490 = vst.msk [vmem:[%s3676_s9 + $0x90] sm:$0xff] %vm1207_vm0, %v1458_v50 }
 0x2ae   : > { %1491 = vst.msk [vmem:[%s3676_s9 + $0x98] sm:$0xff] %vm1207_vm0, %v1459_v47  ;;  %1492 = vst.msk [vmem:[%s3676_s9 + $0xa0] sm:$0xff] %vm1207_vm0, %v1460_v51 }
 0x2af   : > { %1493 = vst.msk [vmem:[%s3676_s9 + $0xa8] sm:$0xff] %vm1207_vm0, %v1461_v26  ;;  %1494 = vst.msk [vmem:[%s3676_s9 + $0xb0] sm:$0xff] %vm1207_vm0, %v1462_v60 }
 0x2b0   : > { %1495 = vst.msk [vmem:[%s3676_s9 + $0xb8] sm:$0xff] %vm1207_vm0, %v1463_v63  ;;  %1496 = vst.msk [vmem:[%s3676_s9 + $0xc0] sm:$0xff] %vm1207_vm0, %v1464_v20 }
 0x2b1   : > { %1497 = vst.msk [vmem:[%s3676_s9 + $0xc8] sm:$0xff] %vm1207_vm0, %v1465_v42  ;;  %1498 = vst.msk [vmem:[%s3676_s9 + $0xd0] sm:$0xff] %vm1207_vm0, %v1466_v10 }
 0x2b2   : > { %1499 = vst.msk [vmem:[%s3676_s9 + $0xd8] sm:$0xff] %vm1207_vm0, %v1467_v49  ;;  %1500 = vst.msk [vmem:[%s3676_s9 + $0xe0] sm:$0xff] %vm1207_vm0, %v1468_v44 }
 0x2b3   : > { %1501 = vst.msk [vmem:[%s3676_s9 + $0xe8] sm:$0xff] %vm1207_vm0, %v1469_v30  ;;  %1502 = vst.msk [vmem:[%s3676_s9 + $0xf0] sm:$0xff] %vm1207_vm0, %v1470_v21 }
 0x2b4   : > { %1503 = vst.msk [vmem:[%s3676_s9 + $0xf8] sm:$0xff] %vm1207_vm0, %v1471_v23 }
 0x2b5 PF: > { %s15_s18 = sadd.s32 1, %s1821_s18  }
 0x2b6   : > { %p12_p4 = scmp.ge.s32.totalorder %s15_s18, 4  }
 0x2b8   :  { %14 = sbr.rel (!%p12_p4) target bundleno = 1 (0x1), region = 72 }

// kernel: reformer_forward_pallas.25
= control target key start
LH: loop header
LB: loop body
LE: loop exit
PB: predicated region body
PF: predicated region fallthrough
CT: control target
= control target key end

     0   :  { %vm45_vm0 = vcmask 523264   ;;  %vm239_vm1 = vcmask 261120   ;;  %s540_s1 = inlined_call_operand.vmem [shape: f32[64,32], index: 1, kind: input, shape index: {}]   ;;  %s541_s0 = inlined_call_operand.vmem [shape: f32[128,64], index: 0, kind: input, shape index: {}]   ;;  %s542_s2 = inlined_call_operand.vmem [shape: f32[1,32], index: 2, kind: input, shape index: {}]   ;;  %s543_s3 = inlined_call_operand.vmem [shape: f32[128,32], index: 3, kind: output, shape index: {}]  }
   0x1   :  { %v30_v0 = vld [vmem:[%s540_s1] sm:$0xff]  ;;  %v31_v1 = vld [vmem:[%s540_s1 + $0x8] sm:$0xff]  ;;  %v32_v2 = vld [vmem:[%s540_s1 + $0x10] sm:$0xff] }
   0x2   :  { %v341_v3 = vpack.c.bf16 %v31_v1, %v30_v0  ;;  %v33_v4 = vld [vmem:[%s540_s1 + $0x18] sm:$0xff]  ;;  %v34_v6 = vld [vmem:[%s540_s1 + $0x20] sm:$0xff]  ;;  %v35_v7 = vld [vmem:[%s540_s1 + $0x28] sm:$0xff] }
   0x3   :  { %v345_v5 = vpack.c.bf16 %v33_v4, %v32_v2  ;;  %v14_v8 = vld [vmem:[%s541_s0] sm:$0xff]  ;;  %v349_v10 = vpack.c.bf16 %v35_v7, %v34_v6  ;;  %v36_v11 = vld [vmem:[%s540_s1 + $0x30] sm:$0xff]  ;;  %v37_v12 = vld [vmem:[%s540_s1 + $0x38] sm:$0xff] }
   0x4   :  { %342 = vmatprep.subr.bf16.mxu0 %v341_v3  ;;  %357 = vmatprep.subr.bf16.mxu1 %v341_v3  ;;  %v22_v9 = vld [vmem:[%s541_s0 + $0x40] sm:$0xff]  ;;  %v353_v13 = vpack.c.bf16 %v37_v12, %v36_v11  ;;  %v15_v14 = vld [vmem:[%s541_s0 + $0x8] sm:$0xff]  ;;  %v16_v16 = vld [vmem:[%s541_s0 + $0x10] sm:$0xff] }
   0x5   :  { %344 = vmatpush3.bf16.msra.mxu0 %v341_v3  ;;  %361 = vmatpush3.bf16.msra.mxu1 %v341_v3  ;;  %v23_v15 = vld [vmem:[%s541_s0 + $0x48] sm:$0xff]  ;;  %v24_v17 = vld [vmem:[%s541_s0 + $0x50] sm:$0xff]  ;;  %v17_v18 = vld [vmem:[%s541_s0 + $0x18] sm:$0xff] }
   0x6   :  { %346 = vmatprep.subr.bf16.mxu0 %v345_v5  ;;  %358 = vmatprep.subr.bf16.mxu1 %v345_v5  ;;  %v25_v19 = vld [vmem:[%s541_s0 + $0x58] sm:$0xff]  ;;  %v18_v20 = vld [vmem:[%s541_s0 + $0x20] sm:$0xff]  ;;  %v19_v22 = vld [vmem:[%s541_s0 + $0x28] sm:$0xff] }
   0x7   :  { %317 = vmatprep.mubr.msk.f32.mxu0 %vm45_vm0, %v14_v8  ;;  %329 = vmatprep.mubr.msk.f32.mxu1 %vm45_vm0, %v22_v9  ;;  %v26_v21 = vld [vmem:[%s541_s0 + $0x60] sm:$0xff]  ;;  %v27_v23 = vld [vmem:[%s541_s0 + $0x68] sm:$0xff]  ;;  %v20_v24 = vld [vmem:[%s541_s0 + $0x30] sm:$0xff] }
   0x8   :  { %v28_v25 = vld [vmem:[%s541_s0 + $0x70] sm:$0xff]  ;;  %v21_v26 = vld [vmem:[%s541_s0 + $0x38] sm:$0xff]  ;;  %v260_v28 = vld [vmem:[%s542_s2] ss:$0 sm:$0xff] }
   0x9   :  { %348 = vmatpush3.bf16.msra.mxu0 %v345_v5  ;;  %362 = vmatpush3.bf16.msra.mxu1 %v345_v5  ;;  %v29_v27 = vld [vmem:[%s541_s0 + $0x78] sm:$0xff] }
   0xa   :  { %350 = vmatprep.subr.bf16.mxu0 %v349_v10  ;;  %359 = vmatprep.subr.bf16.mxu1 %v349_v10 }
   0xd   :  { %352 = vmatpush3.bf16.msra.mxu0 %v349_v10  ;;  %363 = vmatpush3.bf16.msra.mxu1 %v349_v10 }
   0xe   :  { %354 = vmatprep.subr.bf16.mxu0 %v353_v13  ;;  %360 = vmatprep.subr.bf16.mxu1 %v353_v13 }
  0x11   :  { %356 = vmatpush3.bf16.msra.mxu0 %v353_v13  ;;  %364 = vmatpush3.bf16.msra.mxu1 %v353_v13 }
  0x14   :  { %318 = vmatmul.mubr.msk.f32.vlgmr.msra.gmra.mrb[0].mxu0 %vm45_vm0, %v15_v14  ;;  %330 = vmatmul.mubr.msk.f32.vlgmr.msra.gmra.mrb[0].mxu1 %vm45_vm0, %v23_v15 }
  0x15   :  { %320 = vmatprep.mubr.msk.f32.mxu0 %vm45_vm0, %v16_v16  ;;  %332 = vmatprep.mubr.msk.f32.mxu1 %vm45_vm0, %v24_v17 }
  0x18   :  { %321 = vmatmul.mubr.msk.f32.gmra.mrb[2].mxu0 %vm45_vm0, %v17_v18  ;;  %333 = vmatmul.mubr.msk.f32.gmra.mrb[2].mxu1 %vm45_vm0, %v25_v19 }
  0x19   :  { %323 = vmatprep.mubr.msk.f32.mxu0 %vm45_vm0, %v18_v20  ;;  %335 = vmatprep.mubr.msk.f32.mxu1 %vm45_vm0, %v26_v21 }
  0x1c   :  { %324 = vmatmul.mubr.msk.f32.gmra.mrb[4].mxu0 %vm45_vm0, %v19_v22  ;;  %336 = vmatmul.mubr.msk.f32.gmra.mrb[4].mxu1 %vm45_vm0, %v27_v23 }
  0x1d   :  { %326 = vmatprep.mubr.msk.f32.mxu0 %vm45_vm0, %v20_v24  ;;  %338 = vmatprep.mubr.msk.f32.mxu1 %vm45_vm0, %v28_v25 }
  0x20   :  { %327 = vmatmul.mubr.msk.f32.gmra.mrb[6].mxu0 %vm45_vm0, %v21_v26  ;;  %339 = vmatmul.mubr.msk.f32.gmra.mrb[6].mxu1 %vm45_vm0, %v29_v27 }
  0xe7   :  { %v319_v29 = vpop.f32.mrb[0].mxu0  ;;  %v331_v30 = vpop.f32.mrb[0].mxu1 }
  0xe8   :  { %v166_v31 = vadd.f32 %v319_v29, %v260_v28  ;;  %v206_v32 = vadd.f32 %v331_v30, %v260_v28  ;;  %v160_v33 = vpop.f32.mrb[1].mxu0  ;;  %v200_v34 = vpop.f32.mrb[1].mxu1 }
  0xe9   :  { %v161_v35 = vadd.f32 %v260_v28, %v160_v33  ;;  %v201_v36 = vadd.f32 %v260_v28, %v200_v34 }
  0xea   :  { %241 = vst.msk [vmem:[%s543_s3 + $0x8] sm:$0xff] %vm239_vm1, %v166_v31  ;;  %249 = vst.msk [vmem:[%s543_s3 + $0x48] sm:$0xff] %vm239_vm1, %v206_v32 }
  0xeb   :  { %240 = vst.msk [vmem:[%s543_s3] sm:$0xff] %vm239_vm1, %v161_v35  ;;  %248 = vst.msk [vmem:[%s543_s3 + $0x40] sm:$0xff] %vm239_vm1, %v201_v36  ;;  %v322_v37 = vpop.f32.mrb[2].mxu0  ;;  %v334_v38 = vpop.f32.mrb[2].mxu1 }
  0xec   :  { %v176_v39 = vadd.f32 %v322_v37, %v260_v28  ;;  %v216_v40 = vadd.f32 %v334_v38, %v260_v28  ;;  %v170_v41 = vpop.f32.mrb[3].mxu0  ;;  %v210_v42 = vpop.f32.mrb[3].mxu1 }
  0xed   :  { %v171_v43 = vadd.f32 %v260_v28, %v170_v41  ;;  %v211_v44 = vadd.f32 %v260_v28, %v210_v42 }
  0xee   :  { %243 = vst.msk [vmem:[%s543_s3 + $0x18] sm:$0xff] %vm239_vm1, %v176_v39  ;;  %251 = vst.msk [vmem:[%s543_s3 + $0x58] sm:$0xff] %vm239_vm1, %v216_v40 }
  0xef   :  { %242 = vst.msk [vmem:[%s543_s3 + $0x10] sm:$0xff] %vm239_vm1, %v171_v43  ;;  %250 = vst.msk [vmem:[%s543_s3 + $0x50] sm:$0xff] %vm239_vm1, %v211_v44  ;;  %v325_v45 = vpop.f32.mrb[4].mxu0  ;;  %v337_v46 = vpop.f32.mrb[4].mxu1 }
  0xf0   :  { %v186_v47 = vadd.f32 %v325_v45, %v260_v28  ;;  %v226_v48 = vadd.f32 %v337_v46, %v260_v28  ;;  %v180_v49 = vpop.f32.mrb[5].mxu0  ;;  %v220_v50 = vpop.f32.mrb[5].mxu1 }
  0xf1   :  { %v181_v51 = vadd.f32 %v260_v28, %v180_v49  ;;  %v221_v52 = vadd.f32 %v260_v28, %v220_v50 }
  0xf2   :  { %245 = vst.msk [vmem:[%s543_s3 + $0x28] sm:$0xff] %vm239_vm1, %v186_v47  ;;  %253 = vst.msk [vmem:[%s543_s3 + $0x68] sm:$0xff] %vm239_vm1, %v226_v48 }
  0xf3   :  { %244 = vst.msk [vmem:[%s543_s3 + $0x20] sm:$0xff] %vm239_vm1, %v181_v51  ;;  %252 = vst.msk [vmem:[%s543_s3 + $0x60] sm:$0xff] %vm239_vm1, %v221_v52  ;;  %v328_v53 = vpop.f32.mrb[6].mxu0  ;;  %v340_v54 = vpop.f32.mrb[6].mxu1 }
  0xf4   :  { %v196_v55 = vadd.f32 %v328_v53, %v260_v28  ;;  %v236_v56 = vadd.f32 %v340_v54, %v260_v28  ;;  %v190_v57 = vpop.f32.mrb[7].mxu0  ;;  %v230_v58 = vpop.f32.mrb[7].mxu1 }
  0xf5   :  { %v191_v59 = vadd.f32 %v260_v28, %v190_v57  ;;  %v231_v60 = vadd.f32 %v260_v28, %v230_v58 }
  0xf6   :  { %247 = vst.msk [vmem:[%s543_s3 + $0x38] sm:$0xff] %vm239_vm1, %v196_v55  ;;  %255 = vst.msk [vmem:[%s543_s3 + $0x78] sm:$0xff] %vm239_vm1, %v236_v56 }
  0xf7   :  { %246 = vst.msk [vmem:[%s543_s3 + $0x30] sm:$0xff] %vm239_vm1, %v191_v59  ;;  %254 = vst.msk [vmem:[%s543_s3 + $0x70] sm:$0xff] %vm239_vm1, %v231_v60 }

// kernel: reformer_forward_pallas.24
= control target key start
LH: loop header
LB: loop body
LE: loop exit
PB: predicated region body
PF: predicated region fallthrough
CT: control target
= control target key end

     0   :  { %vm161_vm0 = vcmask 261120   ;;  %vm883_vm1 = vcmask 130048   ;;  %s4410_s2 = inlined_call_operand.vmem [shape: f32[32,16], index: 2, kind: input, shape index: {}]   ;;  %s4411_s0 = inlined_call_operand.vmem [shape: f32[512,32], index: 0, kind: input, shape index: {}]   ;;  %s4412_s4 = inlined_call_operand.vmem [shape: f32[16,32], index: 4, kind: input, shape index: {}]   ;;  %s4413_s1 = inlined_call_operand.vmem [shape: f32[512,16], index: 1, kind: input, shape index: {}]   ;;  %s4414_s3 = inlined_call_operand.vmem [shape: f32[1,16], index: 3, kind: input, shape index: {}]   ;;  %s4415_s6 = inlined_call_operand.vmem [shape: f32[32,16], index: 6, kind: input, shape index: {}]   ;;  %s4416_s5 = inlined_call_operand.vmem [shape: f32[1,32], index: 5, kind: input, shape index: {}]   ;;  %s4417_s7 = inlined_call_operand.vmem [shape: f32[1,16], index: 7, kind: input, shape index: {}]   ;;  %s4418_s8 = inlined_call_operand.vmem [shape: f32[512,16], index: 8, kind: output, shape index: {}]  }
   0x1   :  { %v157_v0 = vld [vmem:[%s4410_s2] sm:$0xff]  ;;  %v158_v1 = vld [vmem:[%s4410_s2 + $0x8] sm:$0xff]  ;;  %v159_v2 = vld [vmem:[%s4410_s2 + $0x10] sm:$0xff] }
   0x2   :  { %v3014_v3 = vpack.c.bf16 %v158_v1, %v157_v0  ;;  %v160_v4 = vld [vmem:[%s4410_s2 + $0x18] sm:$0xff]  ;;  %v93_v5 = vld [vmem:[%s4411_s0] sm:$0xff]  ;;  %v94_v7 = vld [vmem:[%s4411_s0 + $0x8] sm:$0xff] }
   0x3   :  { %v3018_v6 = vpack.c.bf16 %v160_v4, %v159_v2  ;;  %2714 = vmatprep.mubr.msk.f32.mxu0 %vm161_vm0, %v93_v5  ;;  %v95_v8 = vld [vmem:[%s4411_s0 + $0x10] sm:$0xff]  ;;  %v96_v9 = vld [vmem:[%s4411_s0 + $0x18] sm:$0xff]  ;;  %v97_v10 = vld [vmem:[%s4411_s0 + $0x20] sm:$0xff] }
   0x4   :  { %3015 = vmatprep.subr.bf16.mxu0 %v3014_v3  ;;  %v98_v11 = vld [vmem:[%s4411_s0 + $0x28] sm:$0xff]  ;;  %v874_v12 = vld [vmem:[%s4412_s4] sm:$0xff]  ;;  %v99_v13 = vld [vmem:[%s4411_s0 + $0x30] sm:$0xff] }
   0x5   :  { %3017 = vmatpush3.bf16.msra.mxu0 %v3014_v3  ;;  %v875_v14 = vld [vmem:[%s4412_s4 + $0x8] sm:$0xff]  ;;  %v100_v16 = vld [vmem:[%s4411_s0 + $0x38] sm:$0xff]  ;;  %v101_v17 = vld [vmem:[%s4411_s0 + $0x40] sm:$0xff] }
   0x6   :  { %3019 = vmatprep.subr.bf16.mxu0 %v3018_v6  ;;  %v3022_v15 = vpack.c.bf16 %v875_v14, %v874_v12  ;;  %v102_v18 = vld [vmem:[%s4411_s0 + $0x48] sm:$0xff]  ;;  %v103_v19 = vld [vmem:[%s4411_s0 + $0x50] sm:$0xff]  ;;  %v104_v20 = vld [vmem:[%s4411_s0 + $0x58] sm:$0xff] }
   0x7   :  { %v105_v21 = vld [vmem:[%s4411_s0 + $0x60] sm:$0xff]  ;;  %v106_v22 = vld [vmem:[%s4411_s0 + $0x68] sm:$0xff]  ;;  %v107_v23 = vld [vmem:[%s4411_s0 + $0x70] sm:$0xff] }
   0x8   :  { %3034 = vmatprep.subr.bf16.mxu1 %v3022_v15  ;;  %v108_v24 = vld [vmem:[%s4411_s0 + $0x78] sm:$0xff]  ;;  %v109_v25 = vld [vmem:[%s4411_s0 + $0x80] sm:$0xff]  ;;  %v110_v26 = vld [vmem:[%s4411_s0 + $0x88] sm:$0xff] }
   0x9   :  { %3021 = vmatpush3.bf16.msra.mxu0 %v3018_v6  ;;  %3035 = vmatpush3.bf16.msra.mxu1 %v3022_v15  ;;  %v111_v27 = vld [vmem:[%s4411_s0 + $0x90] sm:$0xff]  ;;  %v112_v28 = vld [vmem:[%s4411_s0 + $0x98] sm:$0xff]  ;;  %v113_v29 = vld [vmem:[%s4411_s0 + $0xa0] sm:$0xff] }
   0xa   :  { %3023 = vmatprep.subr.bf16.mxu0 %v3022_v15  ;;  %v114_v30 = vld [vmem:[%s4411_s0 + $0xa8] sm:$0xff]  ;;  %v115_v31 = vld [vmem:[%s4411_s0 + $0xb0] sm:$0xff]  ;;  %v116_v32 = vld [vmem:[%s4411_s0 + $0xb8] sm:$0xff] }
   0xb   :  { %v117_v33 = vld [vmem:[%s4411_s0 + $0xc0] sm:$0xff]  ;;  %v118_v34 = vld [vmem:[%s4411_s0 + $0xc8] sm:$0xff]  ;;  %v119_v35 = vld [vmem:[%s4411_s0 + $0xd0] sm:$0xff] }
   0xc   :  { %2715 = vmatmul.mubr.msk.f32.vlgmr.msra.gmra.mrb[0].mxu0 %vm161_vm0, %v94_v7  ;;  %v120_v36 = vld [vmem:[%s4411_s0 + $0xd8] sm:$0xff]  ;;  %v121_v37 = vld [vmem:[%s4411_s0 + $0xe0] sm:$0xff]  ;;  %v122_v38 = vld [vmem:[%s4411_s0 + $0xe8] sm:$0xff] }
   0xd   :  { %2717 = vmatprep.mubr.msk.f32.mxu0 %vm161_vm0, %v95_v8  ;;  %3025 = vmatpush3.bf16.msra.mxu0 %v3022_v15  ;;  %v123_v39 = vld [vmem:[%s4411_s0 + $0xf0] sm:$0xff]  ;;  %v124_v40 = vld [vmem:[%s4411_s0 + $0xf8] sm:$0xff]  ;;  %v125_v41 = vld [vmem:[%s4411_s0 + $0x100] sm:$0xff] }
   0xe   :  { %v126_v42 = vld [vmem:[%s4411_s0 + $0x108] sm:$0xff]  ;;  %v127_v43 = vld [vmem:[%s4411_s0 + $0x110] sm:$0xff]  ;;  %v128_v44 = vld [vmem:[%s4411_s0 + $0x118] sm:$0xff] }
   0xf   :  { %v129_v45 = vld [vmem:[%s4411_s0 + $0x120] sm:$0xff]  ;;  %v130_v46 = vld [vmem:[%s4411_s0 + $0x128] sm:$0xff]  ;;  %v131_v47 = vld [vmem:[%s4411_s0 + $0x130] sm:$0xff] }
  0x10   :  { %2718 = vmatmul.mubr.msk.f32.gmra.mrb[2].mxu0 %vm161_vm0, %v96_v9  ;;  %v132_v48 = vld [vmem:[%s4411_s0 + $0x138] sm:$0xff]  ;;  %v133_v49 = vld [vmem:[%s4411_s0 + $0x140] sm:$0xff]  ;;  %v134_v50 = vld [vmem:[%s4411_s0 + $0x148] sm:$0xff] }
  0x11   :  { %2720 = vmatprep.mubr.msk.f32.mxu0 %vm161_vm0, %v97_v10  ;;  %v135_v51 = vld [vmem:[%s4411_s0 + $0x150] sm:$0xff]  ;;  %v136_v52 = vld [vmem:[%s4411_s0 + $0x158] sm:$0xff]  ;;  %v137_v53 = vld [vmem:[%s4411_s0 + $0x160] sm:$0xff] }
  0x12   :  { %v138_v54 = vld [vmem:[%s4411_s0 + $0x168] sm:$0xff]  ;;  %v139_v55 = vld [vmem:[%s4411_s0 + $0x170] sm:$0xff]  ;;  %v140_v56 = vld [vmem:[%s4411_s0 + $0x178] sm:$0xff] }
  0x13   :  { %v141_v57 = vld [vmem:[%s4411_s0 + $0x180] sm:$0xff]  ;;  %v142_v58 = vld [vmem:[%s4411_s0 + $0x188] sm:$0xff]  ;;  %v143_v59 = vld [vmem:[%s4411_s0 + $0x190] sm:$0xff] }
  0x14   :  { %2721 = vmatmul.mubr.msk.f32.gmra.mrb[4].mxu0 %vm161_vm0, %v98_v11  ;;  %v144_v60 = vld [vmem:[%s4411_s0 + $0x198] sm:$0xff]  ;;  %v145_v61 = vld [vmem:[%s4411_s0 + $0x1a0] sm:$0xff]  ;;  %v146_v62 = vld [vmem:[%s4411_s0 + $0x1a8] sm:$0xff] }
  0x15   :  { %2723 = vmatprep.mubr.msk.f32.mxu0 %vm161_vm0, %v99_v13  ;;  %v147_v63 = vld [vmem:[%s4411_s0 + $0x1b0] sm:$0xff]  ;;  %v148_v0 = vld [vmem:[%s4411_s0 + $0x1b8] sm:$0xff]  ;;  %v149_v1 = vld [vmem:[%s4411_s0 + $0x1c0] sm:$0xff] }
  0x16   :  { %v150_v2 = vld [vmem:[%s4411_s0 + $0x1c8] sm:$0xff]  ;;  %v151_v3 = vld [vmem:[%s4411_s0 + $0x1d0] sm:$0xff]  ;;  %v152_v4 = vld [vmem:[%s4411_s0 + $0x1d8] sm:$0xff] }
  0x17   :  { %v153_v5 = vld [vmem:[%s4411_s0 + $0x1e0] sm:$0xff]  ;;  %v154_v6 = vld [vmem:[%s4411_s0 + $0x1e8] sm:$0xff]  ;;  %v155_v7 = vld [vmem:[%s4411_s0 + $0x1f0] sm:$0xff] }
  0x18   :  { %2724 = vmatmul.mubr.msk.f32.gmra.mrb[6].mxu0 %vm161_vm0, %v100_v16  ;;  %v156_v8 = vld [vmem:[%s4411_s0 + $0x1f8] sm:$0xff]  ;;  %v30_v9 = vld [vmem:[%s4413_s1 + $0x8] sm:$0xff]  ;;  %v29_v10 = vld [vmem:[%s4413_s1] sm:$0xff] }
  0x19   :  { %2726 = vmatprep.mubr.msk.f32.mxu0 %vm161_vm0, %v101_v17  ;;  %v3364_v13 = vld [vmem:[%s4414_s3] ss:$0 sm:$0xff]  ;;  %v32_v16 = vld [vmem:[%s4413_s1 + $0x18] sm:$0xff]  ;;  %v31_v17 = vld [vmem:[%s4413_s1 + $0x10] sm:$0xff] }
  0x1c   :  { %2727 = vmatmul.mubr.msk.f32.gmra.mrb[8].mxu0 %vm161_vm0, %v102_v18 }
  0x1d   :  { %2729 = vmatprep.mubr.msk.f32.mxu0 %vm161_vm0, %v103_v19 }
  0x20   :  { %2730 = vmatmul.mubr.msk.f32.gmra.mrb[10].mxu0 %vm161_vm0, %v104_v20  ;;  %v1525_v20 = vld [vmem:[%s4415_s6] sm:$0xff] }
  0x21   :  { %2732 = vmatprep.mubr.msk.f32.mxu0 %vm161_vm0, %v105_v21  ;;  %v1526_v21 = vld [vmem:[%s4415_s6 + $0x8] sm:$0xff] }
  0x24   :  { %2733 = vmatmul.mubr.msk.f32.gmra.mrb[12].mxu0 %vm161_vm0, %v106_v22 }
  0x25   :  { %2735 = vmatprep.mubr.msk.f32.mxu0 %vm161_vm0, %v107_v23 }
  0x28   :  { %2736 = vmatmul.mubr.msk.f32.gmra.mrb[14].mxu0 %vm161_vm0, %v108_v24 }
  0x29   :  { %2738 = vmatprep.mubr.msk.f32.mxu0 %vm161_vm0, %v109_v25  ;;  %v3384_v25 = vpack.c.bf16 %v1526_v21, %v1525_v20  ;;  %v48_v21 = vld [vmem:[%s4413_s1 + $0x98] sm:$0xff] }
  0x2b   :  { %3027 = vmatprep.subr.bf16.mxu1 %v3384_v25 }
  0x2c   :  { %2739 = vmatmul.mubr.msk.f32.gmra.mrb[16].mxu0 %vm161_vm0, %v110_v26 }
  0x2d   :  { %2741 = vmatprep.mubr.msk.f32.mxu0 %vm161_vm0, %v111_v27  ;;  %v34_v27 = vld [vmem:[%s4413_s1 + $0x28] sm:$0xff] }
  0x30   :  { %2742 = vmatmul.mubr.msk.f32.gmra.mrb[18].mxu0 %vm161_vm0, %v112_v28  ;;  %v33_v28 = vld [vmem:[%s4413_s1 + $0x20] sm:$0xff] }
  0x31   :  { %2744 = vmatprep.mubr.msk.f32.mxu0 %vm161_vm0, %v113_v29 }
  0x34   :  { %2745 = vmatmul.mubr.msk.f32.gmra.mrb[20].mxu0 %vm161_vm0, %v114_v30 }
  0x35   :  { %2747 = vmatprep.mubr.msk.f32.mxu0 %vm161_vm0, %v115_v31 }
  0x38   :  { %2748 = vmatmul.mubr.msk.f32.gmra.mrb[22].mxu0 %vm161_vm0, %v116_v32 }
  0x39   :  { %2750 = vmatprep.mubr.msk.f32.mxu0 %vm161_vm0, %v117_v33 }
  0x3c   :  { %2751 = vmatmul.mubr.msk.f32.gmra.mrb[24].mxu0 %vm161_vm0, %v118_v34 }
  0x3d   :  { %2753 = vmatprep.mubr.msk.f32.mxu0 %vm161_vm0, %v119_v35  ;;  %v36_v35 = vld [vmem:[%s4413_s1 + $0x38] sm:$0xff] }
  0x40   :  { %2754 = vmatmul.mubr.msk.f32.gmra.mrb[26].mxu0 %vm161_vm0, %v120_v36  ;;  %v35_v36 = vld [vmem:[%s4413_s1 + $0x30] sm:$0xff] }
  0x41   :  { %2756 = vmatprep.mubr.msk.f32.mxu0 %vm161_vm0, %v121_v37 }
  0x44   :  { %2757 = vmatmul.mubr.msk.f32.gmra.mrb[28].mxu0 %vm161_vm0, %v122_v38 }
  0x45   :  { %2759 = vmatprep.mubr.msk.f32.mxu0 %vm161_vm0, %v123_v39 }
  0x48   :  { %2760 = vmatmul.mubr.msk.f32.gmra.mrb[30].mxu0 %vm161_vm0, %v124_v40 }
  0x49   :  { %2762 = vmatprep.mubr.msk.f32.mxu0 %vm161_vm0, %v125_v41 }
  0x4c   :  { %2763 = vmatmul.mubr.msk.f32.gmra.mrb[32].mxu0 %vm161_vm0, %v126_v42 }
  0x4d   :  { %2765 = vmatprep.mubr.msk.f32.mxu0 %vm161_vm0, %v127_v43  ;;  %v38_v43 = vld [vmem:[%s4413_s1 + $0x48] sm:$0xff] }
  0x50   :  { %2766 = vmatmul.mubr.msk.f32.gmra.mrb[34].mxu0 %vm161_vm0, %v128_v44  ;;  %v37_v44 = vld [vmem:[%s4413_s1 + $0x40] sm:$0xff] }
  0x51   :  { %2768 = vmatprep.mubr.msk.f32.mxu0 %vm161_vm0, %v129_v45 }
  0x54   :  { %2769 = vmatmul.mubr.msk.f32.gmra.mrb[36].mxu0 %vm161_vm0, %v130_v46 }
  0x55   :  { %2771 = vmatprep.mubr.msk.f32.mxu0 %vm161_vm0, %v131_v47 }
  0x58   :  { %2772 = vmatmul.mubr.msk.f32.gmra.mrb[38].mxu0 %vm161_vm0, %v132_v48 }
  0x59   :  { %2774 = vmatprep.mubr.msk.f32.mxu0 %vm161_vm0, %v133_v49 }
  0x5c   :  { %2775 = vmatmul.mubr.msk.f32.gmra.mrb[40].mxu0 %vm161_vm0, %v134_v50 }
  0x5d   :  { %2777 = vmatprep.mubr.msk.f32.mxu0 %vm161_vm0, %v135_v51  ;;  %v40_v51 = vld [vmem:[%s4413_s1 + $0x58] sm:$0xff] }
  0x60   :  { %2778 = vmatmul.mubr.msk.f32.gmra.mrb[42].mxu0 %vm161_vm0, %v136_v52  ;;  %v39_v52 = vld [vmem:[%s4413_s1 + $0x50] sm:$0xff] }
  0x61   :  { %2780 = vmatprep.mubr.msk.f32.mxu0 %vm161_vm0, %v137_v53 }
  0x64   :  { %2781 = vmatmul.mubr.msk.f32.gmra.mrb[44].mxu0 %vm161_vm0, %v138_v54 }
  0x65   :  { %2783 = vmatprep.mubr.msk.f32.mxu0 %vm161_vm0, %v139_v55 }
  0x68   :  { %2784 = vmatmul.mubr.msk.f32.gmra.mrb[46].mxu0 %vm161_vm0, %v140_v56 }
  0x69   :  { %2786 = vmatprep.mubr.msk.f32.mxu0 %vm161_vm0, %v141_v57 }
  0x6c   :  { %2787 = vmatmul.mubr.msk.f32.gmra.mrb[48].mxu0 %vm161_vm0, %v142_v58 }
  0x6d   :  { %2789 = vmatprep.mubr.msk.f32.mxu0 %vm161_vm0, %v143_v59  ;;  %v42_v59 = vld [vmem:[%s4413_s1 + $0x68] sm:$0xff] }
  0x70   :  { %2790 = vmatmul.mubr.msk.f32.gmra.mrb[50].mxu0 %vm161_vm0, %v144_v60  ;;  %v41_v60 = vld [vmem:[%s4413_s1 + $0x60] sm:$0xff] }
  0x71   :  { %2792 = vmatprep.mubr.msk.f32.mxu0 %vm161_vm0, %v145_v61 }
  0x74   :  { %2793 = vmatmul.mubr.msk.f32.gmra.mrb[52].mxu0 %vm161_vm0, %v146_v62 }
  0x75   :  { %2795 = vmatprep.mubr.msk.f32.mxu0 %vm161_vm0, %v147_v63 }
  0x78   :  { %2796 = vmatmul.mubr.msk.f32.gmra.mrb[54].mxu0 %vm161_vm0, %v148_v0 }
  0x79   :  { %2798 = vmatprep.mubr.msk.f32.mxu0 %vm161_vm0, %v149_v1 }
  0x7c   :  { %2799 = vmatmul.mubr.msk.f32.gmra.mrb[56].mxu0 %vm161_vm0, %v150_v2 }
  0x7d   :  { %2801 = vmatprep.mubr.msk.f32.mxu0 %vm161_vm0, %v151_v3  ;;  %v44_v3 = vld [vmem:[%s4413_s1 + $0x78] sm:$0xff] }
  0x80   :  { %2802 = vmatmul.mubr.msk.f32.gmra.mrb[58].mxu0 %vm161_vm0, %v152_v4  ;;  %v43_v4 = vld [vmem:[%s4413_s1 + $0x70] sm:$0xff] }
  0x81   :  { %2804 = vmatprep.mubr.msk.f32.mxu0 %vm161_vm0, %v153_v5 }
  0x84   :  { %2805 = vmatmul.mubr.msk.f32.gmra.mrb[60].mxu0 %vm161_vm0, %v154_v6 }
  0x85   :  { %2807 = vmatprep.mubr.msk.f32.mxu0 %vm161_vm0, %v155_v7 }
  0x88   :  { %2808 = vmatmul.mubr.msk.f32.gmra.mrb[62].mxu0 %vm161_vm0, %v156_v8 }
  0xdf   :  { %v2716_v11 = vpop.f32.mrb[0].mxu0 }
  0xe0   :  { %v740_v12 = vadd.f32 %v2716_v11, %v30_v9  ;;  %v420_v14 = vpop.f32.mrb[1].mxu0  ;;  %v46_v11 = vld [vmem:[%s4413_s1 + $0x88] sm:$0xff] }
  0xe1   :  { %v739_v15 = vadd.f32 %v420_v14, %v29_v10 }
  0xe2   :  { %v3382_v22 = vadd.f32 %v3364_v13, %v740_v12  ;;  %v45_v12 = vld [vmem:[%s4413_s1 + $0x80] sm:$0xff] }
  0xe3   :  { %v3373_v18 = vadd.f32 %v3364_v13, %v739_v15  ;;  %v2719_v19 = vpop.f32.mrb[2].mxu0 }
  0xe4   :  { %v742_v23 = vadd.f32 %v2719_v19, %v32_v16  ;;  %v430_v24 = vpop.f32.mrb[3].mxu0 }
  0xe5   :  { %v741_v26 = vadd.f32 %v430_v24, %v31_v17  ;;  %2814 = vmatprep.mubr.msk.f32.mxu0 %vm883_vm1, %v3373_v18 }
  0xe6   :  { %2815 = vmatmul.mubr.msk.f32.vlgmr.msra.gmra.mrb[64].mxu0 %vm883_vm1, %v3382_v22  ;;  %v3401_v31 = vadd.f32 %v3364_v13, %v742_v23  ;;  %v47_v23 = vld [vmem:[%s4413_s1 + $0x90] sm:$0xff] }
  0xe7   :  { %v3398_v29 = vadd.f32 %v3364_v13, %v741_v26  ;;  %v2722_v30 = vpop.f32.mrb[4].mxu0 }
  0xe8   :  { %v744_v32 = vadd.f32 %v2722_v30, %v34_v27  ;;  %v440_v33 = vpop.f32.mrb[5].mxu0 }
  0xe9   :  { %v743_v34 = vadd.f32 %v440_v33, %v33_v28  ;;  %2817 = vmatprep.mubr.msk.f32.mxu0 %vm883_vm1, %v3398_v29  ;;  %v50_v33 = vld [vmem:[%s4413_s1 + $0xa8] sm:$0xff] }
  0xea   :  { %2818 = vmatmul.mubr.msk.f32.gmra.mrb[66].mxu0 %vm883_vm1, %v3401_v31  ;;  %v3417_v39 = vadd.f32 %v3364_v13, %v744_v32 }
  0xeb   :  { %v3414_v37 = vadd.f32 %v3364_v13, %v743_v34  ;;  %v2725_v38 = vpop.f32.mrb[6].mxu0  ;;  %v49_v34 = vld [vmem:[%s4413_s1 + $0xa0] sm:$0xff] }
  0xec   :  { %v746_v40 = vadd.f32 %v2725_v38, %v36_v35  ;;  %v450_v41 = vpop.f32.mrb[7].mxu0 }
  0xed   :  { %v745_v42 = vadd.f32 %v450_v41, %v35_v36  ;;  %2820 = vmatprep.mubr.msk.f32.mxu0 %vm883_vm1, %v3414_v37 }
  0xee   :  { %2821 = vmatmul.mubr.msk.f32.gmra.mrb[68].mxu0 %vm883_vm1, %v3417_v39  ;;  %v3433_v47 = vadd.f32 %v3364_v13, %v746_v40 }
  0xef   :  { %v3430_v45 = vadd.f32 %v3364_v13, %v745_v42  ;;  %v2728_v46 = vpop.f32.mrb[8].mxu0 }
  0xf0   :  { %v748_v48 = vadd.f32 %v2728_v46, %v38_v43  ;;  %v460_v49 = vpop.f32.mrb[9].mxu0  ;;  %v52_v43 = vld [vmem:[%s4413_s1 + $0xb8] sm:$0xff] }
  0xf1   :  { %v747_v50 = vadd.f32 %v460_v49, %v37_v44  ;;  %2823 = vmatprep.mubr.msk.f32.mxu0 %vm883_vm1, %v3430_v45  ;;  %v51_v44 = vld [vmem:[%s4413_s1 + $0xb0] sm:$0xff] }
  0xf2   :  { %2824 = vmatmul.mubr.msk.f32.gmra.mrb[70].mxu0 %vm883_vm1, %v3433_v47  ;;  %v3449_v55 = vadd.f32 %v3364_v13, %v748_v48 }
  0xf3   :  { %v3446_v53 = vadd.f32 %v3364_v13, %v747_v50  ;;  %v2731_v54 = vpop.f32.mrb[10].mxu0 }
  0xf4   :  { %v750_v56 = vadd.f32 %v2731_v54, %v40_v51  ;;  %v470_v57 = vpop.f32.mrb[11].mxu0  ;;  %v54_v54 = vld [vmem:[%s4413_s1 + $0xc8] sm:$0xff] }
  0xf5   :  { %v749_v58 = vadd.f32 %v470_v57, %v39_v52  ;;  %2826 = vmatprep.mubr.msk.f32.mxu0 %vm883_vm1, %v3446_v53 }
  0xf6   :  { %2827 = vmatmul.mubr.msk.f32.gmra.mrb[72].mxu0 %vm883_vm1, %v3449_v55  ;;  %v3465_v63 = vadd.f32 %v3364_v13, %v750_v56  ;;  %v53_v56 = vld [vmem:[%s4413_s1 + $0xc0] sm:$0xff] }
  0xf7   :  { %v3462_v61 = vadd.f32 %v3364_v13, %v749_v58  ;;  %v2734_v62 = vpop.f32.mrb[12].mxu0 }
  0xf8   :  { %v752_v0 = vadd.f32 %v2734_v62, %v42_v59  ;;  %v480_v1 = vpop.f32.mrb[13].mxu0 }
  0xf9   :  { %v751_v2 = vadd.f32 %v480_v1, %v41_v60  ;;  %2829 = vmatprep.mubr.msk.f32.mxu0 %vm883_vm1, %v3462_v61  ;;  %v56_v1 = vld [vmem:[%s4413_s1 + $0xd8] sm:$0xff] }
  0xfa   :  { %2830 = vmatmul.mubr.msk.f32.gmra.mrb[74].mxu0 %vm883_vm1, %v3465_v63  ;;  %v3481_v7 = vadd.f32 %v3364_v13, %v752_v0 }
  0xfb   :  { %v3478_v5 = vadd.f32 %v3364_v13, %v751_v2  ;;  %v2737_v6 = vpop.f32.mrb[14].mxu0  ;;  %v55_v2 = vld [vmem:[%s4413_s1 + $0xd0] sm:$0xff] }
  0xfc   :  { %v754_v8 = vadd.f32 %v2737_v6, %v44_v3  ;;  %v490_v9 = vpop.f32.mrb[15].mxu0 }
  0xfd   :  { %v753_v10 = vadd.f32 %v490_v9, %v43_v4  ;;  %2832 = vmatprep.mubr.msk.f32.mxu0 %vm883_vm1, %v3478_v5 }
  0xfe   :  { %2833 = vmatmul.mubr.msk.f32.gmra.mrb[76].mxu0 %vm883_vm1, %v3481_v7  ;;  %v3497_v16 = vadd.f32 %v3364_v13, %v754_v8 }
  0xff   :  { %v3494_v14 = vadd.f32 %v3364_v13, %v753_v10  ;;  %v2740_v15 = vpop.f32.mrb[16].mxu0 }
 0x100   :  { %v756_v17 = vadd.f32 %v2740_v15, %v46_v11  ;;  %v500_v19 = vpop.f32.mrb[17].mxu0  ;;  %v58_v11 = vld [vmem:[%s4413_s1 + $0xe8] sm:$0xff] }
 0x101   :  { %v755_v20 = vadd.f32 %v500_v19, %v45_v12  ;;  %2835 = vmatprep.mubr.msk.f32.mxu0 %vm883_vm1, %v3494_v14  ;;  %v57_v12 = vld [vmem:[%s4413_s1 + $0xe0] sm:$0xff] }
 0x102   :  { %2836 = vmatmul.mubr.msk.f32.gmra.mrb[78].mxu0 %vm883_vm1, %v3497_v16  ;;  %v3513_v27 = vadd.f32 %v3364_v13, %v756_v17 }
 0x103   :  { %v3510_v24 = vadd.f32 %v3364_v13, %v755_v20  ;;  %v2743_v26 = vpop.f32.mrb[18].mxu0 }
 0x104   :  { %v758_v28 = vadd.f32 %v2743_v26, %v48_v21  ;;  %v510_v30 = vpop.f32.mrb[19].mxu0  ;;  %v60_v26 = vld [vmem:[%s4413_s1 + $0xf8] sm:$0xff] }
 0x105   :  { %v757_v32 = vadd.f32 %v510_v30, %v47_v23  ;;  %2838 = vmatprep.mubr.msk.f32.mxu0 %vm883_vm1, %v3510_v24 }
 0x106   :  { %2839 = vmatmul.mubr.msk.f32.gmra.mrb[80].mxu0 %vm883_vm1, %v3513_v27  ;;  %v3529_v38 = vadd.f32 %v3364_v13, %v758_v28  ;;  %v59_v28 = vld [vmem:[%s4413_s1 + $0xf0] sm:$0xff] }
 0x107   :  { %v3526_v35 = vadd.f32 %v3364_v13, %v757_v32  ;;  %v2746_v36 = vpop.f32.mrb[20].mxu0 }
 0x108   :  { %v760_v40 = vadd.f32 %v2746_v36, %v50_v33  ;;  %v520_v41 = vpop.f32.mrb[21].mxu0 }
 0x109   :  { %v759_v42 = vadd.f32 %v520_v41, %v49_v34  ;;  %2841 = vmatprep.mubr.msk.f32.mxu0 %vm883_vm1, %v3526_v35  ;;  %v62_v41 = vld [vmem:[%s4413_s1 + $0x108] sm:$0xff] }
 0x10a   :  { %2842 = vmatmul.mubr.msk.f32.gmra.mrb[82].mxu0 %vm883_vm1, %v3529_v38  ;;  %v3545_v49 = vadd.f32 %v3364_v13, %v760_v40 }
 0x10b   :  { %v3542_v46 = vadd.f32 %v3364_v13, %v759_v42  ;;  %v2749_v48 = vpop.f32.mrb[22].mxu0  ;;  %v1527_v42 = vld [vmem:[%s4415_s6 + $0x10] sm:$0xff] }
 0x10c   :  { %v762_v50 = vadd.f32 %v2749_v48, %v52_v43  ;;  %v530_v51 = vpop.f32.mrb[23].mxu0  ;;  %v1528_v43 = vld [vmem:[%s4415_s6 + $0x18] sm:$0xff] }
 0x10d   :  { %v761_v52 = vadd.f32 %v530_v51, %v51_v44  ;;  %2844 = vmatprep.mubr.msk.f32.mxu0 %vm883_vm1, %v3542_v46  ;;  %v61_v44 = vld [vmem:[%s4413_s1 + $0x100] sm:$0xff] }
 0x10e   :  { %2845 = vmatmul.mubr.msk.f32.gmra.mrb[84].mxu0 %vm883_vm1, %v3545_v49  ;;  %v3561_v59 = vadd.f32 %v3364_v13, %v762_v50 }
 0x10f   :  { %v3558_v57 = vadd.f32 %v3364_v13, %v761_v52  ;;  %v2752_v58 = vpop.f32.mrb[24].mxu0 }
 0x110   :  { %v764_v60 = vadd.f32 %v2752_v58, %v54_v54  ;;  %v540_v62 = vpop.f32.mrb[25].mxu0 }
 0x111   :  { %v763_v0 = vadd.f32 %v540_v62, %v53_v56  ;;  %2847 = vmatprep.mubr.msk.f32.mxu0 %vm883_vm1, %v3558_v57  ;;  %v3030_v56 = vpack.c.bf16 %v1528_v43, %v1527_v42  ;;  %v63_v62 = vld [vmem:[%s4413_s1 + $0x110] sm:$0xff]  ;;  %v70_v43 = vld [vmem:[%s4413_s1 + $0x148] sm:$0xff] }
 0x112   :  { %2848 = vmatmul.mubr.msk.f32.gmra.mrb[86].mxu0 %vm883_vm1, %v3561_v59  ;;  %v3577_v6 = vadd.f32 %v3364_v13, %v764_v60  ;;  %v64_v60 = vld [vmem:[%s4413_s1 + $0x118] sm:$0xff] }
 0x113   :  { %v3574_v3 = vadd.f32 %v3364_v13, %v763_v0  ;;  %v2755_v4 = vpop.f32.mrb[26].mxu0 }
 0x114   :  { %v766_v8 = vadd.f32 %v2755_v4, %v56_v1  ;;  %v550_v9 = vpop.f32.mrb[27].mxu0 }
 0x115   :  { %v765_v10 = vadd.f32 %v550_v9, %v55_v2  ;;  %2850 = vmatprep.mubr.msk.f32.mxu0 %vm883_vm1, %v3574_v3 }
 0x116   :  { %2851 = vmatmul.mubr.msk.f32.gmra.mrb[88].mxu0 %vm883_vm1, %v3577_v6  ;;  %v3593_v19 = vadd.f32 %v3364_v13, %v766_v8 }
 0x117   :  { %v3590_v15 = vadd.f32 %v3364_v13, %v765_v10  ;;  %v2758_v17 = vpop.f32.mrb[28].mxu0  ;;  %v66_v10 = vld [vmem:[%s4413_s1 + $0x128] sm:$0xff] }
 0x118   :  { %v768_v20 = vadd.f32 %v2758_v17, %v58_v11  ;;  %v560_v21 = vpop.f32.mrb[29].mxu0 }
 0x119   :  { %v767_v23 = vadd.f32 %v560_v21, %v57_v12  ;;  %2853 = vmatprep.mubr.msk.f32.mxu0 %vm883_vm1, %v3590_v15 }
 0x11a   :  { %2854 = vmatmul.mubr.msk.f32.gmra.mrb[90].mxu0 %vm883_vm1, %v3593_v19  ;;  %v3609_v33 = vadd.f32 %v3364_v13, %v768_v20 }
 0x11b   :  { %v3606_v30 = vadd.f32 %v3364_v13, %v767_v23  ;;  %v2761_v32 = vpop.f32.mrb[30].mxu0 }
 0x11c   :  { %v770_v34 = vadd.f32 %v2761_v32, %v60_v26  ;;  %v570_v36 = vpop.f32.mrb[31].mxu0  ;;  %v68_v26 = vld [vmem:[%s4413_s1 + $0x138] sm:$0xff] }
 0x11d   :  { %v769_v40 = vadd.f32 %v570_v36, %v59_v28  ;;  %2856 = vmatprep.mubr.msk.f32.mxu0 %vm883_vm1, %v3606_v30  ;;  %v67_v28 = vld [vmem:[%s4413_s1 + $0x130] sm:$0xff] }
 0x11e   :  { %2857 = vmatmul.mubr.msk.f32.gmra.mrb[92].mxu0 %vm883_vm1, %v3609_v33  ;;  %v3631_v51 = vadd.f32 %v3364_v13, %v770_v34 }
 0x11f   :  { %v2764_v48 = vpop.f32.mrb[32].mxu0  ;;  %v3628_v50 = vadd.f32 %v3364_v13, %v769_v40 }
 0x120   :  { %v772_v52 = vadd.f32 %v2764_v48, %v62_v41  ;;  %v580_v54 = vpop.f32.mrb[33].mxu0 }
 0x121   :  { %v771_v58 = vadd.f32 %v580_v54, %v61_v44  ;;  %2859 = vmatprep.mubr.msk.f32.mxu1 %vm883_vm1, %v3628_v50  ;;  %v69_v44 = vld [vmem:[%s4413_s1 + $0x140] sm:$0xff] }
 0x122   :  { %2860 = vmatmul.mubr.msk.f32.vlgmr.msra.gmra.mrb[0].mxu1 %vm883_vm1, %v3631_v51  ;;  %v3648_v2 = vadd.f32 %v3364_v13, %v772_v52 }
 0x123   :  { %v3644_v0 = vadd.f32 %v3364_v13, %v771_v58  ;;  %v2767_v1 = vpop.f32.mrb[34].mxu0  ;;  %3029 = vmatpush3.bf16.msra.mxu1 %v3384_v25  ;;  %v65_v25 = vld [vmem:[%s4413_s1 + $0x120] sm:$0xff] }
 0x124   :  { %v774_v4 = vadd.f32 %v2767_v1, %v64_v60  ;;  %v590_v8 = vpop.f32.mrb[35].mxu0  ;;  %3031 = vmatprep.subr.bf16.mxu1 %v3030_v56  ;;  %v71_v1 = vld [vmem:[%s4413_s1 + $0x150] sm:$0xff] }
 0x125   :  { %v773_v9 = vadd.f32 %v590_v8, %v63_v62  ;;  %2862 = vmatprep.mubr.msk.f32.mxu1 %vm883_vm1, %v3644_v0  ;;  %v72_v62 = vld [vmem:[%s4413_s1 + $0x158] sm:$0xff] }
 0x126   :  { %2863 = vmatmul.mubr.msk.f32.gmra.mrb[2].mxu1 %vm883_vm1, %v3648_v2  ;;  %v3664_v17 = vadd.f32 %v3364_v13, %v774_v4 }
 0x127   :  { %v3661_v11 = vadd.f32 %v3364_v13, %v773_v9  ;;  %v2770_v12 = vpop.f32.mrb[36].mxu0  ;;  %3033 = vmatpush3.bf16.msra.mxu1 %v3030_v56 }
 0x128   :  { %v776_v20 = vadd.f32 %v2770_v12, %v66_v10  ;;  %v600_v21 = vpop.f32.mrb[37].mxu0 }
 0x129   :  { %v775_v23 = vadd.f32 %v600_v21, %v65_v25  ;;  %2865 = vmatprep.mubr.msk.f32.mxu1 %vm883_vm1, %v3661_v11  ;;  %v73_v21 = vld [vmem:[%s4413_s1 + $0x160] sm:$0xff] }
 0x12a   :  { %2866 = vmatmul.mubr.msk.f32.gmra.mrb[4].mxu1 %vm883_vm1, %v3664_v17  ;;  %v3680_v36 = vadd.f32 %v3364_v13, %v776_v20  ;;  %v74_v20 = vld [vmem:[%s4413_s1 + $0x168] sm:$0xff] }
 0x12b   :  { %v3677_v32 = vadd.f32 %v3364_v13, %v775_v23  ;;  %v2773_v34 = vpop.f32.mrb[38].mxu0 }
 0x12c   :  { %v778_v40 = vadd.f32 %v2773_v34, %v68_v26  ;;  %v610_v41 = vpop.f32.mrb[39].mxu0 }
 0x12d   :  { %v777_v42 = vadd.f32 %v610_v41, %v67_v28  ;;  %2868 = vmatprep.mubr.msk.f32.mxu1 %vm883_vm1, %v3677_v32 }
 0x12e   :  { %2869 = vmatmul.mubr.msk.f32.gmra.mrb[6].mxu1 %vm883_vm1, %v3680_v36  ;;  %v3696_v54 = vadd.f32 %v3364_v13, %v778_v40 }
 0x12f   :  { %v3693_v48 = vadd.f32 %v3364_v13, %v777_v42  ;;  %v2776_v52 = vpop.f32.mrb[40].mxu0  ;;  %v76_v42 = vld [vmem:[%s4413_s1 + $0x178] sm:$0xff] }
 0x130   :  { %v780_v56 = vadd.f32 %v2776_v52, %v70_v43  ;;  %v620_v58 = vpop.f32.mrb[41].mxu0  ;;  %v75_v43 = vld [vmem:[%s4413_s1 + $0x170] sm:$0xff] }
 0x131   :  { %v779_v60 = vadd.f32 %v620_v58, %v69_v44  ;;  %2871 = vmatprep.mubr.msk.f32.mxu1 %vm883_vm1, %v3693_v48 }
 0x132   :  { %2872 = vmatmul.mubr.msk.f32.gmra.mrb[8].mxu1 %vm883_vm1, %v3696_v54  ;;  %v3712_v9 = vadd.f32 %v3364_v13, %v780_v56 }
 0x133   :  { %v3709_v4 = vadd.f32 %v3364_v13, %v779_v60  ;;  %v2779_v8 = vpop.f32.mrb[42].mxu0 }
 0x134   :  { %v782_v10 = vadd.f32 %v2779_v8, %v72_v62  ;;  %v630_v25 = vpop.f32.mrb[43].mxu0  ;;  %v77_v8 = vld [vmem:[%s4413_s1 + $0x180] sm:$0xff] }
 0x135   :  { %v781_v12 = vadd.f32 %v630_v25, %v71_v1  ;;  %2874 = vmatprep.mubr.msk.f32.mxu1 %vm883_vm1, %v3709_v4  ;;  %v78_v1 = vld [vmem:[%s4413_s1 + $0x188] sm:$0xff] }
 0x136   :  { %2875 = vmatmul.mubr.msk.f32.gmra.mrb[10].mxu1 %vm883_vm1, %v3712_v9  ;;  %v3728_v28 = vadd.f32 %v3364_v13, %v782_v10 }
 0x137   :  { %v3725_v23 = vadd.f32 %v3364_v13, %v781_v12  ;;  %v2782_v26 = vpop.f32.mrb[44].mxu0 }
 0x138   :  { %v784_v34 = vadd.f32 %v2782_v26, %v74_v20  ;;  %v640_v40 = vpop.f32.mrb[45].mxu0 }
 0x139   :  { %v783_v41 = vadd.f32 %v640_v40, %v73_v21  ;;  %2877 = vmatprep.mubr.msk.f32.mxu1 %vm883_vm1, %v3725_v23  ;;  %v79_v40 = vld [vmem:[%s4413_s1 + $0x190] sm:$0xff] }
 0x13a   :  { %2878 = vmatmul.mubr.msk.f32.gmra.mrb[12].mxu1 %vm883_vm1, %v3728_v28  ;;  %v3744_v56 = vadd.f32 %v3364_v13, %v784_v34  ;;  %v80_v34 = vld [vmem:[%s4413_s1 + $0x198] sm:$0xff] }
 0x13b   :  { %v3741_v44 = vadd.f32 %v3364_v13, %v783_v41  ;;  %v2785_v52 = vpop.f32.mrb[46].mxu0 }
 0x13c   :  { %v786_v58 = vadd.f32 %v2785_v52, %v76_v42  ;;  %v650_v60 = vpop.f32.mrb[47].mxu0 }
 0x13d   :  { %v785_v62 = vadd.f32 %v650_v60, %v75_v43  ;;  %2880 = vmatprep.mubr.msk.f32.mxu1 %vm883_vm1, %v3741_v44 }
 0x13e   :  { %2881 = vmatmul.mubr.msk.f32.gmra.mrb[14].mxu1 %vm883_vm1, %v3744_v56  ;;  %v3760_v12 = vadd.f32 %v3364_v13, %v786_v58 }
 0x13f   :  { %v3757_v10 = vadd.f32 %v3364_v13, %v785_v62  ;;  %v2788_v25 = vpop.f32.mrb[48].mxu0  ;;  %v82_v62 = vld [vmem:[%s4413_s1 + $0x1a8] sm:$0xff] }
 0x140   :  { %v788_v20 = vadd.f32 %v2788_v25, %v78_v1  ;;  %v660_v21 = vpop.f32.mrb[49].mxu0  ;;  %v81_v1 = vld [vmem:[%s4413_s1 + $0x1a0] sm:$0xff] }
 0x141   :  { %v787_v26 = vadd.f32 %v660_v21, %v77_v8  ;;  %2883 = vmatprep.mubr.msk.f32.mxu1 %vm883_vm1, %v3757_v10 }
 0x142   :  { %2884 = vmatmul.mubr.msk.f32.gmra.mrb[16].mxu1 %vm883_vm1, %v3760_v12  ;;  %v3776_v43 = vadd.f32 %v3364_v13, %v788_v20 }
 0x143   :  { %v3773_v41 = vadd.f32 %v3364_v13, %v787_v26  ;;  %v2791_v42 = vpop.f32.mrb[50].mxu0 }
 0x144   :  { %v790_v52 = vadd.f32 %v2791_v42, %v80_v34  ;;  %v670_v58 = vpop.f32.mrb[51].mxu0  ;;  %v83_v42 = vld [vmem:[%s4413_s1 + $0x1b0] sm:$0xff] }
 0x145   :  { %4434 = vst [vmem:[#allocation2_spill] sm:$0xff] %v3773_v41  ;;  %v789_v60 = vadd.f32 %v670_v58, %v79_v40  ;;  %2886 = vmatprep.mubr.msk.f32.mxu1 %vm883_vm1, %v3773_v41  ;;  %v84_v40 = vld [vmem:[%s4413_s1 + $0x1b8] sm:$0xff] }
 0x146   :  { %2887 = vmatmul.mubr.msk.f32.gmra.mrb[18].mxu1 %vm883_vm1, %v3776_v43  ;;  %v3792_v20 = vadd.f32 %v3364_v13, %v790_v52 }
 0x147   :  { %v3789_v8 = vadd.f32 %v3364_v13, %v789_v60  ;;  %v2794_v25 = vpop.f32.mrb[52].mxu0 }
 0x148   :  { %4436 = vst [vmem:[#allocation4_spill] sm:$0xff] %v3792_v20  ;;  %v792_v21 = vadd.f32 %v2794_v25, %v82_v62  ;;  %v680_v26 = vpop.f32.mrb[53].mxu0 }
 0x149   :  { %4435 = vst [vmem:[#allocation3_spill] sm:$0xff] %v3789_v8  ;;  %v791_v34 = vadd.f32 %v680_v26, %v81_v1  ;;  %2889 = vmatprep.mubr.msk.f32.mxu1 %vm883_vm1, %v3789_v8  ;;  %v86_v26 = vld [vmem:[%s4413_s1 + $0x1c8] sm:$0xff] }
 0x14a   :  { %2890 = vmatmul.mubr.msk.f32.gmra.mrb[20].mxu1 %vm883_vm1, %v3792_v20  ;;  %v3808_v60 = vadd.f32 %v3364_v13, %v792_v21 }
 0x14b   :  { %v3805_v52 = vadd.f32 %v3364_v13, %v791_v34  ;;  %v2797_v58 = vpop.f32.mrb[54].mxu0  ;;  %v85_v34 = vld [vmem:[%s4413_s1 + $0x1c0] sm:$0xff] }
 0x14c   :  { %4438 = vst [vmem:[#allocation6_spill] sm:$0xff] %v3808_v60  ;;  %v794_v62 = vadd.f32 %v2797_v58, %v84_v40  ;;  %v690_v1 = vpop.f32.mrb[55].mxu0 }
 0x14d   :  { %4437 = vst [vmem:[#allocation5_spill] sm:$0xff] %v3805_v52  ;;  %v793_v25 = vadd.f32 %v690_v1, %v83_v42  ;;  %2892 = vmatprep.mubr.msk.f32.mxu1 %vm883_vm1, %v3805_v52 }
 0x14e   :  { %2893 = vmatmul.mubr.msk.f32.gmra.mrb[22].mxu1 %vm883_vm1, %v3808_v60  ;;  %v3824_v42 = vadd.f32 %v3364_v13, %v794_v62  ;;  %v88_v60 = vld [vmem:[%s4413_s1 + $0x1d8] sm:$0xff] }
 0x14f   :  { %v3821_v21 = vadd.f32 %v3364_v13, %v793_v25  ;;  %v2800_v40 = vpop.f32.mrb[56].mxu0  ;;  %v87_v25 = vld [vmem:[%s4413_s1 + $0x1d0] sm:$0xff] }
 0x150   :  { %4440 = vst [vmem:[#allocation8_spill] sm:$0xff] %v3824_v42  ;;  %v796_v58 = vadd.f32 %v2800_v40, %v86_v26  ;;  %v700_v1 = vpop.f32.mrb[57].mxu0 }
 0x151   :  { %4439 = vst [vmem:[#allocation7_spill] sm:$0xff] %v3821_v21  ;;  %v795_v52 = vadd.f32 %v700_v1, %v85_v34  ;;  %2895 = vmatprep.mubr.msk.f32.mxu1 %vm883_vm1, %v3821_v21 }
 0x152   :  { %2896 = vmatmul.mubr.msk.f32.gmra.mrb[24].mxu1 %vm883_vm1, %v3824_v42  ;;  %v3840_v34 = vadd.f32 %v3364_v13, %v796_v58  ;;  %v90_v42 = vld [vmem:[%s4413_s1 + $0x1e8] sm:$0xff] }
 0x153   :  { %v3837_v62 = vadd.f32 %v3364_v13, %v795_v52  ;;  %v2803_v26 = vpop.f32.mrb[58].mxu0  ;;  %v89_v52 = vld [vmem:[%s4413_s1 + $0x1e0] sm:$0xff] }
 0x154   :  { %4442 = vst [vmem:[#allocation10_spill] sm:$0xff] %v3840_v34  ;;  %v798_v40 = vadd.f32 %v2803_v26, %v88_v60  ;;  %v710_v1 = vpop.f32.mrb[59].mxu0 }
 0x155   :  { %4441 = vst [vmem:[#allocation9_spill] sm:$0xff] %v3837_v62  ;;  %v797_v21 = vadd.f32 %v710_v1, %v87_v25  ;;  %2898 = vmatprep.mubr.msk.f32.mxu1 %vm883_vm1, %v3837_v62 }
 0x156   :  { %2899 = vmatmul.mubr.msk.f32.gmra.mrb[26].mxu1 %vm883_vm1, %v3840_v34  ;;  %v3856_v25 = vadd.f32 %v3364_v13, %v798_v40  ;;  %v92_v34 = vld [vmem:[%s4413_s1 + $0x1f8] sm:$0xff] }
 0x157   :  { %v3853_v58 = vadd.f32 %v3364_v13, %v797_v21  ;;  %v2806_v60 = vpop.f32.mrb[60].mxu0  ;;  %v91_v21 = vld [vmem:[%s4413_s1 + $0x1f0] sm:$0xff] }
 0x158   :  { %4444 = vst [vmem:[#allocation12_spill] sm:$0xff] %v3856_v25  ;;  %v800_v26 = vadd.f32 %v2806_v60, %v90_v42  ;;  %v720_v1 = vpop.f32.mrb[61].mxu0 }
 0x159   :  { %4443 = vst [vmem:[#allocation11_spill] sm:$0xff] %v3853_v58  ;;  %v799_v62 = vadd.f32 %v720_v1, %v89_v52  ;;  %2901 = vmatprep.mubr.msk.f32.mxu1 %vm883_vm1, %v3853_v58 }
 0x15a   :  { %2902 = vmatmul.mubr.msk.f32.gmra.mrb[28].mxu1 %vm883_vm1, %v3856_v25  ;;  %v3872_v52 = vadd.f32 %v3364_v13, %v800_v26 }
 0x15b   :  { %v3869_v40 = vadd.f32 %v3364_v13, %v799_v62  ;;  %v2809_v42 = vpop.f32.mrb[62].mxu0  ;;  %v3891_v62 = vld [vmem:[%s4416_s5] ss:$0 sm:$0xff] }
 0x15c   :  { %4446 = vst [vmem:[#allocation14_spill] sm:$0xff] %v3872_v52  ;;  %v802_v60 = vadd.f32 %v2809_v42, %v92_v34  ;;  %v730_v1 = vpop.f32.mrb[63].mxu0 }
 0x15d   :  { %4445 = vst [vmem:[#allocation13_spill] sm:$0xff] %v3869_v40  ;;  %v801_v58 = vadd.f32 %v730_v1, %v91_v21  ;;  %2904 = vmatprep.mubr.msk.f32.mxu1 %vm883_vm1, %v3869_v40 }
 0x15e   :  { %2905 = vmatmul.mubr.msk.f32.gmra.mrb[30].mxu1 %vm883_vm1, %v3872_v52  ;;  %v3882_v8 = vadd.f32 %v3364_v13, %v802_v60 }
 0x15f   :  { %v3879_v25 = vadd.f32 %v3364_v13, %v801_v58 }
 0x160   :  { %4448 = vst [vmem:[#allocation16_spill] sm:$0xff] %v3882_v8 }
 0x161   :  { %4447 = vst [vmem:[#allocation15_spill] sm:$0xff] %v3879_v25  ;;  %2907 = vmatprep.mubr.msk.f32.mxu1 %vm883_vm1, %v3879_v25 }
 0x162   :  { %2908 = vmatmul.mubr.msk.f32.gmra.mrb[32].mxu1 %vm883_vm1, %v3882_v8 }
 0x1b9   :  { %v2816_v34 = vpop.f32.mrb[64].mxu0 }
 0x1ba   :  { %v1148_v26 = vadd.f32 %v2816_v34, %v3891_v62  ;;  %v1142_v21 = vpop.f32.mrb[65].mxu0 }
 0x1bb   :  { %v1143_v58 = vadd.f32 %v3891_v62, %v1142_v21 }
 0x1bc   :  { %v1462_v60 = vmax.f32 %v1148_v26, 0.0 }
 0x1bd   :  { %v1461_v42 = vmax.f32 %v1143_v58, 0.0  ;;  %v2819_v13 = vpop.f32.mrb[66].mxu0 }
 0x1be   :  { %v1158_v1 = vadd.f32 %v2819_v13, %v3891_v62  ;;  %v1152_v25 = vpop.f32.mrb[67].mxu0 }
 0x1bf   :  { %v1153_v40 = vadd.f32 %v3891_v62, %v1152_v25  ;;  %2918 = vmatprep.mubr.msk.f32.mxu1 %vm161_vm0, %v1461_v42 }
 0x1c0   :  { %2919 = vmatmul.mubr.msk.f32.vlgmr.msra.gmra.mrb[34].mxu1 %vm161_vm0, %v1462_v60  ;;  %v1464_v20 = vmax.f32 %v1158_v1, 0.0 }
 0x1c1   :  { %v1463_v8 = vmax.f32 %v1153_v40, 0.0  ;;  %v2822_v52 = vpop.f32.mrb[68].mxu0 }
 0x1c2   :  { %v1168_v34 = vadd.f32 %v2822_v52, %v3891_v62  ;;  %v1162_v41 = vpop.f32.mrb[69].mxu0 }
 0x1c3   :  { %v1163_v21 = vadd.f32 %v3891_v62, %v1162_v41  ;;  %2921 = vmatprep.mubr.msk.f32.mxu1 %vm161_vm0, %v1463_v8 }
 0x1c4   :  { %2922 = vmatmul.mubr.msk.f32.gmra.mrb[36].mxu1 %vm161_vm0, %v1464_v20  ;;  %v1466_v13 = vmax.f32 %v1168_v34, 0.0 }
 0x1c5   :  { %v1465_v26 = vmax.f32 %v1163_v21, 0.0  ;;  %v2825_v58 = vpop.f32.mrb[70].mxu0 }
 0x1c6   :  { %v1178_v25 = vadd.f32 %v2825_v58, %v3891_v62  ;;  %v1172_v42 = vpop.f32.mrb[71].mxu0 }
 0x1c7   :  { %v1173_v60 = vadd.f32 %v3891_v62, %v1172_v42  ;;  %2924 = vmatprep.mubr.msk.f32.mxu1 %vm161_vm0, %v1465_v26 }
 0x1c8   :  { %2925 = vmatmul.mubr.msk.f32.gmra.mrb[38].mxu1 %vm161_vm0, %v1466_v13  ;;  %v1468_v1 = vmax.f32 %v1178_v25, 0.0 }
 0x1c9   :  { %v1467_v40 = vmax.f32 %v1173_v60, 0.0  ;;  %v2828_v52 = vpop.f32.mrb[72].mxu0 }
 0x1ca   :  { %v1188_v41 = vadd.f32 %v2828_v52, %v3891_v62  ;;  %v1182_v8 = vpop.f32.mrb[73].mxu0 }
 0x1cb   :  { %v1183_v20 = vadd.f32 %v3891_v62, %v1182_v8  ;;  %2927 = vmatprep.mubr.msk.f32.mxu1 %vm161_vm0, %v1467_v40 }
 0x1cc   :  { %2928 = vmatmul.mubr.msk.f32.gmra.mrb[40].mxu1 %vm161_vm0, %v1468_v1  ;;  %v1470_v58 = vmax.f32 %v1188_v41, 0.0 }
 0x1cd   :  { %v1469_v34 = vmax.f32 %v1183_v20, 0.0  ;;  %v2831_v21 = vpop.f32.mrb[74].mxu0 }
 0x1ce   :  { %v1198_v42 = vadd.f32 %v2831_v21, %v3891_v62  ;;  %v1192_v26 = vpop.f32.mrb[75].mxu0 }
 0x1cf   :  { %v1193_v13 = vadd.f32 %v3891_v62, %v1192_v26  ;;  %2930 = vmatprep.mubr.msk.f32.mxu1 %vm161_vm0, %v1469_v34 }
 0x1d0   :  { %2931 = vmatmul.mubr.msk.f32.gmra.mrb[42].mxu1 %vm161_vm0, %v1470_v58  ;;  %v1472_v52 = vmax.f32 %v1198_v42, 0.0 }
 0x1d1   :  { %v1471_v25 = vmax.f32 %v1193_v13, 0.0  ;;  %v2834_v60 = vpop.f32.mrb[76].mxu0 }
 0x1d2   :  { %v1208_v8 = vadd.f32 %v2834_v60, %v3891_v62  ;;  %v1202_v40 = vpop.f32.mrb[77].mxu0 }
 0x1d3   :  { %v1203_v1 = vadd.f32 %v3891_v62, %v1202_v40  ;;  %2933 = vmatprep.mubr.msk.f32.mxu1 %vm161_vm0, %v1471_v25 }
 0x1d4   :  { %2934 = vmatmul.mubr.msk.f32.gmra.mrb[44].mxu1 %vm161_vm0, %v1472_v52  ;;  %v1474_v21 = vmax.f32 %v1208_v8, 0.0 }
 0x1d5   :  { %v1473_v41 = vmax.f32 %v1203_v1, 0.0  ;;  %v2837_v20 = vpop.f32.mrb[78].mxu0 }
 0x1d6   :  { %v1218_v26 = vadd.f32 %v2837_v20, %v3891_v62  ;;  %v1212_v34 = vpop.f32.mrb[79].mxu0 }
 0x1d7   :  { %v1213_v58 = vadd.f32 %v3891_v62, %v1212_v34  ;;  %2936 = vmatprep.mubr.msk.f32.mxu1 %vm161_vm0, %v1473_v41 }
 0x1d8   :  { %2937 = vmatmul.mubr.msk.f32.gmra.mrb[46].mxu1 %vm161_vm0, %v1474_v21  ;;  %v1476_v60 = vmax.f32 %v1218_v26, 0.0 }
 0x1d9   :  { %v1475_v42 = vmax.f32 %v1213_v58, 0.0  ;;  %v2840_v13 = vpop.f32.mrb[80].mxu0 }
 0x1da   :  { %v1228_v40 = vadd.f32 %v2840_v13, %v3891_v62  ;;  %v1222_v25 = vpop.f32.mrb[81].mxu0 }
 0x1db   :  { %v1223_v52 = vadd.f32 %v3891_v62, %v1222_v25  ;;  %2939 = vmatprep.mubr.msk.f32.mxu1 %vm161_vm0, %v1475_v42 }
 0x1dc   :  { %2940 = vmatmul.mubr.msk.f32.gmra.mrb[48].mxu1 %vm161_vm0, %v1476_v60  ;;  %v1478_v20 = vmax.f32 %v1228_v40, 0.0 }
 0x1dd   :  { %v1477_v8 = vmax.f32 %v1223_v52, 0.0  ;;  %v2843_v1 = vpop.f32.mrb[82].mxu0 }
 0x1de   :  { %v1238_v34 = vadd.f32 %v2843_v1, %v3891_v62  ;;  %v1232_v41 = vpop.f32.mrb[83].mxu0 }
 0x1df   :  { %v1233_v21 = vadd.f32 %v3891_v62, %v1232_v41  ;;  %2942 = vmatprep.mubr.msk.f32.mxu1 %vm161_vm0, %v1477_v8 }
 0x1e0   :  { %2943 = vmatmul.mubr.msk.f32.gmra.mrb[50].mxu1 %vm161_vm0, %v1478_v20  ;;  %v1480_v13 = vmax.f32 %v1238_v34, 0.0 }
 0x1e1   :  { %v1479_v26 = vmax.f32 %v1233_v21, 0.0  ;;  %v2846_v58 = vpop.f32.mrb[84].mxu0 }
 0x1e2   :  { %v1248_v25 = vadd.f32 %v2846_v58, %v3891_v62  ;;  %v1242_v42 = vpop.f32.mrb[85].mxu0 }
 0x1e3   :  { %v1243_v60 = vadd.f32 %v3891_v62, %v1242_v42  ;;  %2945 = vmatprep.mubr.msk.f32.mxu1 %vm161_vm0, %v1479_v26 }
 0x1e4   :  { %2946 = vmatmul.mubr.msk.f32.gmra.mrb[52].mxu1 %vm161_vm0, %v1480_v13  ;;  %v1482_v1 = vmax.f32 %v1248_v25, 0.0 }
 0x1e5   :  { %v1481_v40 = vmax.f32 %v1243_v60, 0.0  ;;  %v2849_v52 = vpop.f32.mrb[86].mxu0 }
 0x1e6   :  { %v1258_v41 = vadd.f32 %v2849_v52, %v3891_v62  ;;  %v1252_v8 = vpop.f32.mrb[87].mxu0 }
 0x1e7   :  { %v1253_v20 = vadd.f32 %v3891_v62, %v1252_v8  ;;  %2948 = vmatprep.mubr.msk.f32.mxu1 %vm161_vm0, %v1481_v40 }
 0x1e8   :  { %2949 = vmatmul.mubr.msk.f32.gmra.mrb[54].mxu1 %vm161_vm0, %v1482_v1  ;;  %v1484_v58 = vmax.f32 %v1258_v41, 0.0 }
 0x1e9   :  { %v1483_v34 = vmax.f32 %v1253_v20, 0.0  ;;  %v2852_v21 = vpop.f32.mrb[88].mxu0 }
 0x1ea   :  { %v1268_v42 = vadd.f32 %v2852_v21, %v3891_v62  ;;  %v1262_v26 = vpop.f32.mrb[89].mxu0 }
 0x1eb   :  { %v1263_v13 = vadd.f32 %v3891_v62, %v1262_v26  ;;  %2951 = vmatprep.mubr.msk.f32.mxu1 %vm161_vm0, %v1483_v34 }
 0x1ec   :  { %2952 = vmatmul.mubr.msk.f32.gmra.mrb[56].mxu1 %vm161_vm0, %v1484_v58  ;;  %v1486_v52 = vmax.f32 %v1268_v42, 0.0 }
 0x1ed   :  { %v1485_v25 = vmax.f32 %v1263_v13, 0.0  ;;  %v2855_v60 = vpop.f32.mrb[90].mxu0 }
 0x1ee   :  { %v1278_v8 = vadd.f32 %v2855_v60, %v3891_v62  ;;  %v1272_v40 = vpop.f32.mrb[91].mxu0 }
 0x1ef   :  { %v1273_v1 = vadd.f32 %v3891_v62, %v1272_v40  ;;  %2954 = vmatprep.mubr.msk.f32.mxu1 %vm161_vm0, %v1485_v25 }
 0x1f0   :  { %2955 = vmatmul.mubr.msk.f32.gmra.mrb[58].mxu1 %vm161_vm0, %v1486_v52  ;;  %v1488_v21 = vmax.f32 %v1278_v8, 0.0 }
 0x1f1   :  { %v1487_v41 = vmax.f32 %v1273_v1, 0.0  ;;  %v2858_v20 = vpop.f32.mrb[92].mxu0 }
 0x1f2   :  { %v1288_v26 = vadd.f32 %v2858_v20, %v3891_v62  ;;  %v1282_v34 = vpop.f32.mrb[93].mxu0 }
 0x1f3   :  { %v1283_v58 = vadd.f32 %v3891_v62, %v1282_v34  ;;  %2957 = vmatprep.mubr.msk.f32.mxu1 %vm161_vm0, %v1487_v41 }
 0x1f4   :  { %2958 = vmatmul.mubr.msk.f32.gmra.mrb[60].mxu1 %vm161_vm0, %v1488_v21  ;;  %v1490_v60 = vmax.f32 %v1288_v26, 0.0 }
 0x1f5   :  { %v1489_v42 = vmax.f32 %v1283_v58, 0.0  ;;  %v2861_v13 = vpop.f32.mrb[0].mxu1 }
 0x1f6   :  { %v1298_v40 = vadd.f32 %v2861_v13, %v3891_v62  ;;  %v1292_v25 = vpop.f32.mrb[1].mxu1 }
 0x1f7   :  { %v1293_v52 = vadd.f32 %v3891_v62, %v1292_v25  ;;  %2960 = vmatprep.mubr.msk.f32.mxu1 %vm161_vm0, %v1489_v42 }
 0x1f8   :  { %2961 = vmatmul.mubr.msk.f32.gmra.mrb[62].mxu1 %vm161_vm0, %v1490_v60  ;;  %v1492_v20 = vmax.f32 %v1298_v40, 0.0 }
 0x1f9   :  { %v1491_v8 = vmax.f32 %v1293_v52, 0.0  ;;  %v2864_v1 = vpop.f32.mrb[2].mxu1 }
 0x1fa   :  { %v1308_v34 = vadd.f32 %v2864_v1, %v3891_v62  ;;  %v1302_v41 = vpop.f32.mrb[3].mxu1 }
 0x1fb   :  { %v1303_v21 = vadd.f32 %v3891_v62, %v1302_v41  ;;  %2963 = vmatprep.mubr.msk.f32.mxu1 %vm161_vm0, %v1491_v8 }
 0x1fc   :  { %2964 = vmatmul.mubr.msk.f32.gmra.mrb[64].mxu1 %vm161_vm0, %v1492_v20  ;;  %v1494_v13 = vmax.f32 %v1308_v34, 0.0 }
 0x1fd   :  { %v1493_v26 = vmax.f32 %v1303_v21, 0.0  ;;  %v2867_v58 = vpop.f32.mrb[4].mxu1 }
 0x1fe   :  { %v1318_v25 = vadd.f32 %v2867_v58, %v3891_v62  ;;  %v1312_v42 = vpop.f32.mrb[5].mxu1 }
 0x1ff   :  { %v1313_v60 = vadd.f32 %v3891_v62, %v1312_v42  ;;  %2966 = vmatprep.mubr.msk.f32.mxu1 %vm161_vm0, %v1493_v26 }
 0x200   :  { %2967 = vmatmul.mubr.msk.f32.gmra.mrb[66].mxu1 %vm161_vm0, %v1494_v13  ;;  %v1496_v1 = vmax.f32 %v1318_v25, 0.0 }
 0x201   :  { %v1495_v40 = vmax.f32 %v1313_v60, 0.0  ;;  %v2870_v52 = vpop.f32.mrb[6].mxu1 }
 0x202   :  { %v1328_v41 = vadd.f32 %v2870_v52, %v3891_v62  ;;  %v1322_v8 = vpop.f32.mrb[7].mxu1 }
 0x203   :  { %v1323_v20 = vadd.f32 %v3891_v62, %v1322_v8  ;;  %2969 = vmatprep.mubr.msk.f32.mxu1 %vm161_vm0, %v1495_v40 }
 0x204   :  { %2970 = vmatmul.mubr.msk.f32.gmra.mrb[68].mxu1 %vm161_vm0, %v1496_v1  ;;  %v1498_v58 = vmax.f32 %v1328_v41, 0.0 }
 0x205   :  { %v1497_v34 = vmax.f32 %v1323_v20, 0.0  ;;  %v2873_v21 = vpop.f32.mrb[8].mxu1 }
 0x206   :  { %v1338_v42 = vadd.f32 %v2873_v21, %v3891_v62  ;;  %v1332_v26 = vpop.f32.mrb[9].mxu1 }
 0x207   :  { %v1333_v13 = vadd.f32 %v3891_v62, %v1332_v26  ;;  %2972 = vmatprep.mubr.msk.f32.mxu1 %vm161_vm0, %v1497_v34 }
 0x208   :  { %2973 = vmatmul.mubr.msk.f32.gmra.mrb[70].mxu1 %vm161_vm0, %v1498_v58  ;;  %v1500_v52 = vmax.f32 %v1338_v42, 0.0 }
 0x209   :  { %v1499_v25 = vmax.f32 %v1333_v13, 0.0  ;;  %v2876_v60 = vpop.f32.mrb[10].mxu1 }
 0x20a   :  { %v1348_v8 = vadd.f32 %v2876_v60, %v3891_v62  ;;  %v1342_v40 = vpop.f32.mrb[11].mxu1 }
 0x20b   :  { %v1343_v1 = vadd.f32 %v3891_v62, %v1342_v40  ;;  %2975 = vmatprep.mubr.msk.f32.mxu1 %vm161_vm0, %v1499_v25 }
 0x20c   :  { %2976 = vmatmul.mubr.msk.f32.gmra.mrb[72].mxu1 %vm161_vm0, %v1500_v52  ;;  %v1502_v21 = vmax.f32 %v1348_v8, 0.0 }
 0x20d   :  { %v1501_v41 = vmax.f32 %v1343_v1, 0.0  ;;  %v2879_v20 = vpop.f32.mrb[12].mxu1 }
 0x20e   :  { %v1358_v26 = vadd.f32 %v2879_v20, %v3891_v62  ;;  %v1352_v34 = vpop.f32.mrb[13].mxu1 }
 0x20f   :  { %v1353_v58 = vadd.f32 %v3891_v62, %v1352_v34  ;;  %2978 = vmatprep.mubr.msk.f32.mxu1 %vm161_vm0, %v1501_v41 }
 0x210   :  { %2979 = vmatmul.mubr.msk.f32.gmra.mrb[74].mxu1 %vm161_vm0, %v1502_v21  ;;  %v1504_v60 = vmax.f32 %v1358_v26, 0.0 }
 0x211   :  { %v1503_v42 = vmax.f32 %v1353_v58, 0.0  ;;  %v2882_v13 = vpop.f32.mrb[14].mxu1 }
 0x212   :  { %v1368_v40 = vadd.f32 %v2882_v13, %v3891_v62  ;;  %v1362_v25 = vpop.f32.mrb[15].mxu1 }
 0x213   :  { %v1363_v52 = vadd.f32 %v3891_v62, %v1362_v25  ;;  %2981 = vmatprep.mubr.msk.f32.mxu1 %vm161_vm0, %v1503_v42 }
 0x214   :  { %2982 = vmatmul.mubr.msk.f32.gmra.mrb[76].mxu1 %vm161_vm0, %v1504_v60  ;;  %v1506_v20 = vmax.f32 %v1368_v40, 0.0 }
 0x215   :  { %v1505_v8 = vmax.f32 %v1363_v52, 0.0  ;;  %v2885_v1 = vpop.f32.mrb[16].mxu1 }
 0x216   :  { %v1378_v34 = vadd.f32 %v2885_v1, %v3891_v62  ;;  %v1372_v41 = vpop.f32.mrb[17].mxu1 }
 0x217   :  { %v1373_v21 = vadd.f32 %v3891_v62, %v1372_v41  ;;  %2984 = vmatprep.mubr.msk.f32.mxu1 %vm161_vm0, %v1505_v8 }
 0x218   :  { %2985 = vmatmul.mubr.msk.f32.gmra.mrb[78].mxu1 %vm161_vm0, %v1506_v20  ;;  %v1508_v13 = vmax.f32 %v1378_v34, 0.0 }
 0x219   :  { %v1507_v26 = vmax.f32 %v1373_v21, 0.0  ;;  %v2888_v58 = vpop.f32.mrb[18].mxu1 }
 0x21a   :  { %v1388_v25 = vadd.f32 %v2888_v58, %v3891_v62  ;;  %v1382_v42 = vpop.f32.mrb[19].mxu1 }
 0x21b   :  { %v1383_v60 = vadd.f32 %v3891_v62, %v1382_v42  ;;  %2987 = vmatprep.mubr.msk.f32.mxu1 %vm161_vm0, %v1507_v26 }
 0x21c   :  { %2988 = vmatmul.mubr.msk.f32.gmra.mrb[80].mxu1 %vm161_vm0, %v1508_v13  ;;  %v1510_v1 = vmax.f32 %v1388_v25, 0.0 }
 0x21d   :  { %v1509_v40 = vmax.f32 %v1383_v60, 0.0  ;;  %v2891_v52 = vpop.f32.mrb[20].mxu1 }
 0x21e   :  { %v1398_v41 = vadd.f32 %v2891_v52, %v3891_v62  ;;  %v1392_v8 = vpop.f32.mrb[21].mxu1 }
 0x21f   :  { %v1393_v20 = vadd.f32 %v3891_v62, %v1392_v8  ;;  %2990 = vmatprep.mubr.msk.f32.mxu1 %vm161_vm0, %v1509_v40 }
 0x220   :  { %2991 = vmatmul.mubr.msk.f32.gmra.mrb[82].mxu1 %vm161_vm0, %v1510_v1  ;;  %v1512_v58 = vmax.f32 %v1398_v41, 0.0 }
 0x221   :  { %v1511_v34 = vmax.f32 %v1393_v20, 0.0  ;;  %v2894_v21 = vpop.f32.mrb[22].mxu1 }
 0x222   :  { %v1408_v42 = vadd.f32 %v2894_v21, %v3891_v62  ;;  %v1402_v26 = vpop.f32.mrb[23].mxu1 }
 0x223   :  { %v1403_v13 = vadd.f32 %v3891_v62, %v1402_v26  ;;  %2993 = vmatprep.mubr.msk.f32.mxu1 %vm161_vm0, %v1511_v34 }
 0x224   :  { %2994 = vmatmul.mubr.msk.f32.gmra.mrb[84].mxu1 %vm161_vm0, %v1512_v58  ;;  %v1514_v52 = vmax.f32 %v1408_v42, 0.0 }
 0x225   :  { %v1513_v25 = vmax.f32 %v1403_v13, 0.0  ;;  %v2897_v60 = vpop.f32.mrb[24].mxu1 }
 0x226   :  { %v1418_v8 = vadd.f32 %v2897_v60, %v3891_v62  ;;  %v1412_v40 = vpop.f32.mrb[25].mxu1 }
 0x227   :  { %v1413_v1 = vadd.f32 %v3891_v62, %v1412_v40  ;;  %2996 = vmatprep.mubr.msk.f32.mxu1 %vm161_vm0, %v1513_v25 }
 0x228   :  { %2997 = vmatmul.mubr.msk.f32.gmra.mrb[86].mxu1 %vm161_vm0, %v1514_v52  ;;  %v1516_v21 = vmax.f32 %v1418_v8, 0.0 }
 0x229   :  { %v1515_v41 = vmax.f32 %v1413_v1, 0.0  ;;  %v2900_v20 = vpop.f32.mrb[26].mxu1 }
 0x22a   :  { %v1428_v26 = vadd.f32 %v2900_v20, %v3891_v62  ;;  %v1422_v34 = vpop.f32.mrb[27].mxu1 }
 0x22b   :  { %v1423_v58 = vadd.f32 %v3891_v62, %v1422_v34  ;;  %2999 = vmatprep.mubr.msk.f32.mxu1 %vm161_vm0, %v1515_v41 }
 0x22c   :  { %3000 = vmatmul.mubr.msk.f32.gmra.mrb[88].mxu1 %vm161_vm0, %v1516_v21  ;;  %v1518_v60 = vmax.f32 %v1428_v26, 0.0 }
 0x22d   :  { %v1517_v42 = vmax.f32 %v1423_v58, 0.0  ;;  %v2903_v13 = vpop.f32.mrb[28].mxu1 }
 0x22e   :  { %v1438_v40 = vadd.f32 %v2903_v13, %v3891_v62  ;;  %v1432_v25 = vpop.f32.mrb[29].mxu1 }
 0x22f   :  { %v1433_v52 = vadd.f32 %v3891_v62, %v1432_v25  ;;  %3002 = vmatprep.mubr.msk.f32.mxu1 %vm161_vm0, %v1517_v42 }
 0x230   :  { %3003 = vmatmul.mubr.msk.f32.gmra.mrb[90].mxu1 %vm161_vm0, %v1518_v60  ;;  %v1520_v20 = vmax.f32 %v1438_v40, 0.0 }
 0x231   :  { %v1519_v8 = vmax.f32 %v1433_v52, 0.0  ;;  %v2906_v1 = vpop.f32.mrb[30].mxu1 }
 0x232   :  { %v1448_v34 = vadd.f32 %v2906_v1, %v3891_v62  ;;  %v1442_v41 = vpop.f32.mrb[31].mxu1  ;;  %v4024_v1 = vld [vmem:[%s4417_s7] ss:$0 sm:$0xff] }
 0x233   :  { %v1443_v21 = vadd.f32 %v3891_v62, %v1442_v41  ;;  %3005 = vmatprep.mubr.msk.f32.mxu1 %vm161_vm0, %v1519_v8 }
 0x234   :  { %3006 = vmatmul.mubr.msk.f32.gmra.mrb[92].mxu1 %vm161_vm0, %v1520_v20  ;;  %v1522_v13 = vmax.f32 %v1448_v34, 0.0 }
 0x235   :  { %v1521_v26 = vmax.f32 %v1443_v21, 0.0  ;;  %v2909_v58 = vpop.f32.mrb[32].mxu1 }
 0x236   :  { %v1458_v25 = vadd.f32 %v2909_v58, %v3891_v62  ;;  %v1452_v42 = vpop.f32.mrb[33].mxu1 }
 0x237   :  { %v1453_v60 = vadd.f32 %v3891_v62, %v1452_v42  ;;  %3008 = vmatprep.mubr.msk.f32.mxu1 %vm161_vm0, %v1521_v26 }
 0x238   :  { %3009 = vmatmul.mubr.msk.f32.gmra.mrb[94].mxu1 %vm161_vm0, %v1522_v13  ;;  %v1524_v52 = vmax.f32 %v1458_v25, 0.0 }
 0x239   :  { %v1523_v40 = vmax.f32 %v1453_v60, 0.0 }
 0x23b   :  { %3011 = vmatprep.mubr.msk.f32.mxu1 %vm161_vm0, %v1523_v40 }
 0x23c   :  { %3012 = vmatmul.mubr.msk.f32.gmra.mrb[96].mxu1 %vm161_vm0, %v1524_v52 }
 0x293   :  { %v2920_v8 = vpop.f32.mrb[34].mxu1 }
 0x294   :  { %v2107_v20 = vadd.f32 %v2920_v8, %v3382_v22  ;;  %v1787_v34 = vpop.f32.mrb[35].mxu1 }
 0x295   :  { %v2106_v62 = vadd.f32 %v1787_v34, %v3373_v18 }
 0x296   :  { %v2178_v41 = vadd.f32 %v4024_v1, %v2107_v20 }
 0x297   :  { %v2177_v21 = vadd.f32 %v4024_v1, %v2106_v62  ;;  %v2923_v26 = vpop.f32.mrb[36].mxu1 }
 0x298   :  { %2242 = vst.msk [vmem:[%s4418_s8 + $0x8] sm:$0xff] %vm883_vm1, %v2178_v41  ;;  %v2109_v58 = vadd.f32 %v2923_v26, %v3401_v31  ;;  %v1797_v13 = vpop.f32.mrb[37].mxu1 }
 0x299   :  { %2241 = vst.msk [vmem:[%s4418_s8] sm:$0xff] %vm883_vm1, %v2177_v21  ;;  %v2108_v18 = vadd.f32 %v1797_v13, %v3398_v29 }
 0x29a   :  { %v2180_v22 = vadd.f32 %v4024_v1, %v2109_v58 }
 0x29b   :  { %v2179_v25 = vadd.f32 %v4024_v1, %v2108_v18  ;;  %v2926_v42 = vpop.f32.mrb[38].mxu1 }
 0x29c   :  { %2244 = vst.msk [vmem:[%s4418_s8 + $0x18] sm:$0xff] %vm883_vm1, %v2180_v22  ;;  %v2111_v31 = vadd.f32 %v2926_v42, %v3417_v39  ;;  %v1807_v60 = vpop.f32.mrb[39].mxu1 }
 0x29d   :  { %2243 = vst.msk [vmem:[%s4418_s8 + $0x10] sm:$0xff] %vm883_vm1, %v2179_v25  ;;  %v2110_v29 = vadd.f32 %v1807_v60, %v3414_v37 }
 0x29e   :  { %v2182_v40 = vadd.f32 %v4024_v1, %v2111_v31 }
 0x29f   :  { %v2181_v52 = vadd.f32 %v4024_v1, %v2110_v29  ;;  %v2929_v8 = vpop.f32.mrb[40].mxu1 }
 0x2a0   :  { %2246 = vst.msk [vmem:[%s4418_s8 + $0x28] sm:$0xff] %vm883_vm1, %v2182_v40  ;;  %v2113_v39 = vadd.f32 %v2929_v8, %v3433_v47  ;;  %v1817_v20 = vpop.f32.mrb[41].mxu1 }
 0x2a1   :  { %2245 = vst.msk [vmem:[%s4418_s8 + $0x20] sm:$0xff] %vm883_vm1, %v2181_v52  ;;  %v2112_v37 = vadd.f32 %v1817_v20, %v3430_v45 }
 0x2a2   :  { %v2184_v34 = vadd.f32 %v4024_v1, %v2113_v39 }
 0x2a3   :  { %v2183_v62 = vadd.f32 %v4024_v1, %v2112_v37  ;;  %v2932_v41 = vpop.f32.mrb[42].mxu1 }
 0x2a4   :  { %2248 = vst.msk [vmem:[%s4418_s8 + $0x38] sm:$0xff] %vm883_vm1, %v2184_v34  ;;  %v2115_v47 = vadd.f32 %v2932_v41, %v3449_v55  ;;  %v1827_v21 = vpop.f32.mrb[43].mxu1 }
 0x2a5   :  { %2247 = vst.msk [vmem:[%s4418_s8 + $0x30] sm:$0xff] %vm883_vm1, %v2183_v62  ;;  %v2114_v45 = vadd.f32 %v1827_v21, %v3446_v53 }
 0x2a6   :  { %v2186_v26 = vadd.f32 %v4024_v1, %v2115_v47 }
 0x2a7   :  { %v2185_v58 = vadd.f32 %v4024_v1, %v2114_v45  ;;  %v2935_v13 = vpop.f32.mrb[44].mxu1 }
 0x2a8   :  { %2250 = vst.msk [vmem:[%s4418_s8 + $0x48] sm:$0xff] %vm883_vm1, %v2186_v26  ;;  %v2117_v55 = vadd.f32 %v2935_v13, %v3465_v63  ;;  %v1837_v18 = vpop.f32.mrb[45].mxu1 }
 0x2a9   :  { %2249 = vst.msk [vmem:[%s4418_s8 + $0x40] sm:$0xff] %vm883_vm1, %v2185_v58  ;;  %v2116_v53 = vadd.f32 %v1837_v18, %v3462_v61 }
 0x2aa   :  { %v2188_v22 = vadd.f32 %v4024_v1, %v2117_v55 }
 0x2ab   :  { %v2187_v25 = vadd.f32 %v4024_v1, %v2116_v53  ;;  %v2938_v42 = vpop.f32.mrb[46].mxu1 }
 0x2ac   :  { %2252 = vst.msk [vmem:[%s4418_s8 + $0x58] sm:$0xff] %vm883_vm1, %v2188_v22  ;;  %v2119_v63 = vadd.f32 %v2938_v42, %v3481_v7  ;;  %v1847_v31 = vpop.f32.mrb[47].mxu1 }
 0x2ad   :  { %2251 = vst.msk [vmem:[%s4418_s8 + $0x50] sm:$0xff] %vm883_vm1, %v2187_v25  ;;  %v2118_v61 = vadd.f32 %v1847_v31, %v3478_v5 }
 0x2ae   :  { %v2190_v60 = vadd.f32 %v4024_v1, %v2119_v63 }
 0x2af   :  { %v2189_v29 = vadd.f32 %v4024_v1, %v2118_v61  ;;  %v2941_v40 = vpop.f32.mrb[48].mxu1 }
 0x2b0   :  { %2254 = vst.msk [vmem:[%s4418_s8 + $0x68] sm:$0xff] %vm883_vm1, %v2190_v60  ;;  %v2121_v7 = vadd.f32 %v2941_v40, %v3497_v16  ;;  %v1857_v52 = vpop.f32.mrb[49].mxu1 }
 0x2b1   :  { %2253 = vst.msk [vmem:[%s4418_s8 + $0x60] sm:$0xff] %vm883_vm1, %v2189_v29  ;;  %v2120_v5 = vadd.f32 %v1857_v52, %v3494_v14 }
 0x2b2   :  { %v2192_v8 = vadd.f32 %v4024_v1, %v2121_v7 }
 0x2b3   :  { %v2191_v39 = vadd.f32 %v4024_v1, %v2120_v5  ;;  %v2944_v20 = vpop.f32.mrb[50].mxu1 }
 0x2b4   :  { %2256 = vst.msk [vmem:[%s4418_s8 + $0x78] sm:$0xff] %vm883_vm1, %v2192_v8  ;;  %v2123_v16 = vadd.f32 %v2944_v20, %v3513_v27  ;;  %v1867_v37 = vpop.f32.mrb[51].mxu1 }
 0x2b5   :  { %2255 = vst.msk [vmem:[%s4418_s8 + $0x70] sm:$0xff] %vm883_vm1, %v2191_v39  ;;  %v2122_v14 = vadd.f32 %v1867_v37, %v3510_v24 }
 0x2b6   :  { %v2194_v34 = vadd.f32 %v4024_v1, %v2123_v16 }
 0x2b7   :  { %v2193_v62 = vadd.f32 %v4024_v1, %v2122_v14  ;;  %v2947_v41 = vpop.f32.mrb[52].mxu1 }
 0x2b8   :  { %2258 = vst.msk [vmem:[%s4418_s8 + $0x88] sm:$0xff] %vm883_vm1, %v2194_v34  ;;  %v2125_v27 = vadd.f32 %v2947_v41, %v3529_v38  ;;  %v1877_v47 = vpop.f32.mrb[53].mxu1 }
 0x2b9   :  { %2257 = vst.msk [vmem:[%s4418_s8 + $0x80] sm:$0xff] %vm883_vm1, %v2193_v62  ;;  %v2124_v24 = vadd.f32 %v1877_v47, %v3526_v35 }
 0x2ba   :  { %v2196_v21 = vadd.f32 %v4024_v1, %v2125_v27 }
 0x2bb   :  { %v2195_v45 = vadd.f32 %v4024_v1, %v2124_v24  ;;  %v2950_v26 = vpop.f32.mrb[54].mxu1 }
 0x2bc   :  { %2260 = vst.msk [vmem:[%s4418_s8 + $0x98] sm:$0xff] %vm883_vm1, %v2196_v21  ;;  %v2127_v38 = vadd.f32 %v2950_v26, %v3545_v49  ;;  %v1887_v58 = vpop.f32.mrb[55].mxu1 }
 0x2bd   :  { %2259 = vst.msk [vmem:[%s4418_s8 + $0x90] sm:$0xff] %vm883_vm1, %v2195_v45  ;;  %v2126_v35 = vadd.f32 %v1887_v58, %v3542_v46 }
 0x2be   :  { %v2198_v13 = vadd.f32 %v4024_v1, %v2127_v38 }
 0x2bf   :  { %v2197_v55 = vadd.f32 %v4024_v1, %v2126_v35  ;;  %v2953_v18 = vpop.f32.mrb[56].mxu1 }
 0x2c0   :  { %2262 = vst.msk [vmem:[%s4418_s8 + $0xa8] sm:$0xff] %vm883_vm1, %v2198_v13  ;;  %v2129_v49 = vadd.f32 %v2953_v18, %v3561_v59  ;;  %v1897_v53 = vpop.f32.mrb[57].mxu1 }
 0x2c1   :  { %2261 = vst.msk [vmem:[%s4418_s8 + $0xa0] sm:$0xff] %vm883_vm1, %v2197_v55  ;;  %v2128_v46 = vadd.f32 %v1897_v53, %v3558_v57 }
 0x2c2   :  { %v2200_v22 = vadd.f32 %v4024_v1, %v2129_v49 }
 0x2c3   :  { %v2199_v25 = vadd.f32 %v4024_v1, %v2128_v46  ;;  %v2956_v42 = vpop.f32.mrb[58].mxu1 }
 0x2c4   :  { %2264 = vst.msk [vmem:[%s4418_s8 + $0xb8] sm:$0xff] %vm883_vm1, %v2200_v22  ;;  %v2131_v59 = vadd.f32 %v2956_v42, %v3577_v6  ;;  %v1907_v63 = vpop.f32.mrb[59].mxu1 }
 0x2c5   :  { %2263 = vst.msk [vmem:[%s4418_s8 + $0xb0] sm:$0xff] %vm883_vm1, %v2199_v25  ;;  %v2130_v57 = vadd.f32 %v1907_v63, %v3574_v3 }
 0x2c6   :  { %v2202_v31 = vadd.f32 %v4024_v1, %v2131_v59 }
 0x2c7   :  { %v2201_v61 = vadd.f32 %v4024_v1, %v2130_v57  ;;  %v2959_v60 = vpop.f32.mrb[60].mxu1 }
 0x2c8   :  { %2266 = vst.msk [vmem:[%s4418_s8 + $0xc8] sm:$0xff] %vm883_vm1, %v2202_v31  ;;  %v2133_v6 = vadd.f32 %v2959_v60, %v3593_v19  ;;  %v1917_v29 = vpop.f32.mrb[61].mxu1 }
 0x2c9   :  { %2265 = vst.msk [vmem:[%s4418_s8 + $0xc0] sm:$0xff] %vm883_vm1, %v2201_v61  ;;  %v2132_v3 = vadd.f32 %v1917_v29, %v3590_v15 }
 0x2ca   :  { %v2204_v40 = vadd.f32 %v4024_v1, %v2133_v6 }
 0x2cb   :  { %v2203_v7 = vadd.f32 %v4024_v1, %v2132_v3  ;;  %v2962_v52 = vpop.f32.mrb[62].mxu1 }
 0x2cc   :  { %2268 = vst.msk [vmem:[%s4418_s8 + $0xd8] sm:$0xff] %vm883_vm1, %v2204_v40  ;;  %v2135_v19 = vadd.f32 %v2962_v52, %v3609_v33  ;;  %v1927_v5 = vpop.f32.mrb[63].mxu1 }
 0x2cd   :  { %2267 = vst.msk [vmem:[%s4418_s8 + $0xd0] sm:$0xff] %vm883_vm1, %v2203_v7  ;;  %v2134_v15 = vadd.f32 %v1927_v5, %v3606_v30  ;;  %v4449_v5 = vld [vmem:[#allocation2_spill] sm:$0xff] }
 0x2ce   :  { %v2206_v8 = vadd.f32 %v4024_v1, %v2135_v19 }
 0x2cf   :  { %v2205_v39 = vadd.f32 %v4024_v1, %v2134_v15  ;;  %v2965_v20 = vpop.f32.mrb[64].mxu1 }
 0x2d0   :  { %2270 = vst.msk [vmem:[%s4418_s8 + $0xe8] sm:$0xff] %vm883_vm1, %v2206_v8  ;;  %v2137_v33 = vadd.f32 %v2965_v20, %v3631_v51  ;;  %v1937_v16 = vpop.f32.mrb[65].mxu1  ;;  %v4450_v20 = vld [vmem:[#allocation4_spill] sm:$0xff] }
 0x2d1   :  { %2269 = vst.msk [vmem:[%s4418_s8 + $0xe0] sm:$0xff] %vm883_vm1, %v2205_v39  ;;  %v2136_v30 = vadd.f32 %v1937_v16, %v3628_v50  ;;  %v4451_v16 = vld [vmem:[#allocation3_spill] sm:$0xff] }
 0x2d2   :  { %v2208_v37 = vadd.f32 %v4024_v1, %v2137_v33 }
 0x2d3   :  { %v2207_v14 = vadd.f32 %v4024_v1, %v2136_v30  ;;  %v2968_v34 = vpop.f32.mrb[66].mxu1 }
 0x2d4   :  { %2272 = vst.msk [vmem:[%s4418_s8 + $0xf8] sm:$0xff] %vm883_vm1, %v2208_v37  ;;  %v2139_v51 = vadd.f32 %v2968_v34, %v3648_v2  ;;  %v1947_v62 = vpop.f32.mrb[67].mxu1 }
 0x2d5   :  { %2271 = vst.msk [vmem:[%s4418_s8 + $0xf0] sm:$0xff] %vm883_vm1, %v2207_v14  ;;  %v2138_v50 = vadd.f32 %v1947_v62, %v3644_v0 }
 0x2d6   :  { %v2210_v41 = vadd.f32 %v4024_v1, %v2139_v51  ;;  %v4452_v51 = vld [vmem:[#allocation6_spill] sm:$0xff] }
 0x2d7   :  { %v2209_v27 = vadd.f32 %v4024_v1, %v2138_v50  ;;  %v2971_v47 = vpop.f32.mrb[68].mxu1 }
 0x2d8   :  { %2274 = vst.msk [vmem:[%s4418_s8 + $0x108] sm:$0xff] %vm883_vm1, %v2210_v41  ;;  %v2141_v2 = vadd.f32 %v2971_v47, %v3664_v17  ;;  %v1957_v24 = vpop.f32.mrb[69].mxu1  ;;  %v4453_v41 = vld [vmem:[#allocation5_spill] sm:$0xff] }
 0x2d9   :  { %2273 = vst.msk [vmem:[%s4418_s8 + $0x100] sm:$0xff] %vm883_vm1, %v2209_v27  ;;  %v2140_v0 = vadd.f32 %v1957_v24, %v3661_v11 }
 0x2da   :  { %v2212_v21 = vadd.f32 %v4024_v1, %v2141_v2 }
 0x2db   :  { %v2211_v45 = vadd.f32 %v4024_v1, %v2140_v0  ;;  %v2974_v26 = vpop.f32.mrb[70].mxu1  ;;  %v4454_v0 = vld [vmem:[#allocation8_spill] sm:$0xff] }
 0x2dc   :  { %2276 = vst.msk [vmem:[%s4418_s8 + $0x118] sm:$0xff] %vm883_vm1, %v2212_v21  ;;  %v2143_v17 = vadd.f32 %v2974_v26, %v3680_v36  ;;  %v1967_v38 = vpop.f32.mrb[71].mxu1  ;;  %v4455_v26 = vld [vmem:[#allocation7_spill] sm:$0xff] }
 0x2dd   :  { %2275 = vst.msk [vmem:[%s4418_s8 + $0x110] sm:$0xff] %vm883_vm1, %v2211_v45  ;;  %v2142_v11 = vadd.f32 %v1967_v38, %v3677_v32 }
 0x2de   :  { %v2214_v58 = vadd.f32 %v4024_v1, %v2143_v17 }
 0x2df   :  { %v2213_v35 = vadd.f32 %v4024_v1, %v2142_v11  ;;  %v2977_v13 = vpop.f32.mrb[72].mxu1 }
 0x2e0   :  { %2278 = vst.msk [vmem:[%s4418_s8 + $0x128] sm:$0xff] %vm883_vm1, %v2214_v58  ;;  %v2145_v36 = vadd.f32 %v2977_v13, %v3696_v54  ;;  %v1977_v55 = vpop.f32.mrb[73].mxu1 }
 0x2e1   :  { %2277 = vst.msk [vmem:[%s4418_s8 + $0x120] sm:$0xff] %vm883_vm1, %v2213_v35  ;;  %v2144_v32 = vadd.f32 %v1977_v55, %v3693_v48  ;;  %v4456_v35 = vld [vmem:[#allocation10_spill] sm:$0xff]  ;;  %v4457_v55 = vld [vmem:[#allocation9_spill] sm:$0xff] }
 0x2e2   :  { %v2216_v18 = vadd.f32 %v4024_v1, %v2145_v36 }
 0x2e3   :  { %v2215_v49 = vadd.f32 %v4024_v1, %v2144_v32  ;;  %v2980_v53 = vpop.f32.mrb[74].mxu1 }
 0x2e4   :  { %2280 = vst.msk [vmem:[%s4418_s8 + $0x138] sm:$0xff] %vm883_vm1, %v2216_v18  ;;  %v2147_v54 = vadd.f32 %v2980_v53, %v3712_v9  ;;  %v1987_v46 = vpop.f32.mrb[75].mxu1 }
 0x2e5   :  { %2279 = vst.msk [vmem:[%s4418_s8 + $0x130] sm:$0xff] %vm883_vm1, %v2215_v49  ;;  %v2146_v48 = vadd.f32 %v1987_v46, %v3709_v4 }
 0x2e6   :  { %v2218_v22 = vadd.f32 %v4024_v1, %v2147_v54  ;;  %v4458_v54 = vld [vmem:[#allocation12_spill] sm:$0xff] }
 0x2e7   :  { %v2217_v25 = vadd.f32 %v4024_v1, %v2146_v48  ;;  %v2983_v42 = vpop.f32.mrb[76].mxu1 }
 0x2e8   :  { %2282 = vst.msk [vmem:[%s4418_s8 + $0x148] sm:$0xff] %vm883_vm1, %v2218_v22  ;;  %v2149_v9 = vadd.f32 %v2983_v42, %v3728_v28  ;;  %v1997_v59 = vpop.f32.mrb[77].mxu1  ;;  %v4459_v22 = vld [vmem:[#allocation11_spill] sm:$0xff] }
 0x2e9   :  { %2281 = vst.msk [vmem:[%s4418_s8 + $0x140] sm:$0xff] %vm883_vm1, %v2217_v25  ;;  %v2148_v4 = vadd.f32 %v1997_v59, %v3725_v23 }
 0x2ea   :  { %v2220_v63 = vadd.f32 %v4024_v1, %v2149_v9 }
 0x2eb   :  { %v2219_v57 = vadd.f32 %v4024_v1, %v2148_v4  ;;  %v2986_v31 = vpop.f32.mrb[78].mxu1  ;;  %v4460_v4 = vld [vmem:[#allocation14_spill] sm:$0xff] }
 0x2ec   :  { %2284 = vst.msk [vmem:[%s4418_s8 + $0x158] sm:$0xff] %vm883_vm1, %v2220_v63  ;;  %v2151_v28 = vadd.f32 %v2986_v31, %v3744_v56  ;;  %v2007_v61 = vpop.f32.mrb[79].mxu1  ;;  %v4461_v31 = vld [vmem:[#allocation13_spill] sm:$0xff] }
 0x2ed   :  { %2283 = vst.msk [vmem:[%s4418_s8 + $0x150] sm:$0xff] %vm883_vm1, %v2219_v57  ;;  %v2150_v23 = vadd.f32 %v2007_v61, %v3741_v44 }
 0x2ee   :  { %v2222_v60 = vadd.f32 %v4024_v1, %v2151_v28 }
 0x2ef   :  { %v2221_v6 = vadd.f32 %v4024_v1, %v2150_v23  ;;  %v2989_v29 = vpop.f32.mrb[80].mxu1 }
 0x2f0   :  { %2286 = vst.msk [vmem:[%s4418_s8 + $0x168] sm:$0xff] %vm883_vm1, %v2222_v60  ;;  %v2153_v56 = vadd.f32 %v2989_v29, %v3760_v12  ;;  %v2017_v3 = vpop.f32.mrb[81].mxu1 }
 0x2f1   :  { %2285 = vst.msk [vmem:[%s4418_s8 + $0x160] sm:$0xff] %vm883_vm1, %v2221_v6  ;;  %v2152_v44 = vadd.f32 %v2017_v3, %v3757_v10  ;;  %v4462_v6 = vld [vmem:[#allocation16_spill] sm:$0xff]  ;;  %v4463_v3 = vld [vmem:[#allocation15_spill] sm:$0xff] }
 0x2f2   :  { %v2224_v40 = vadd.f32 %v4024_v1, %v2153_v56 }
 0x2f3   :  { %v2223_v7 = vadd.f32 %v4024_v1, %v2152_v44  ;;  %v2992_v52 = vpop.f32.mrb[82].mxu1 }
 0x2f4   :  { %2288 = vst.msk [vmem:[%s4418_s8 + $0x178] sm:$0xff] %vm883_vm1, %v2224_v40  ;;  %v2155_v12 = vadd.f32 %v2992_v52, %v3776_v43  ;;  %v2027_v19 = vpop.f32.mrb[83].mxu1 }
 0x2f5   :  { %2287 = vst.msk [vmem:[%s4418_s8 + $0x170] sm:$0xff] %vm883_vm1, %v2223_v7  ;;  %v2154_v10 = vadd.f32 %v2027_v19, %v4449_v5 }
 0x2f6   :  { %v2226_v15 = vadd.f32 %v4024_v1, %v2155_v12 }
 0x2f7   :  { %v2225_v8 = vadd.f32 %v4024_v1, %v2154_v10  ;;  %v2995_v39 = vpop.f32.mrb[84].mxu1 }
 0x2f8   :  { %2290 = vst.msk [vmem:[%s4418_s8 + $0x188] sm:$0xff] %vm883_vm1, %v2226_v15  ;;  %v2157_v43 = vadd.f32 %v2995_v39, %v4450_v20  ;;  %v2037_v33 = vpop.f32.mrb[85].mxu1 }
 0x2f9   :  { %2289 = vst.msk [vmem:[%s4418_s8 + $0x180] sm:$0xff] %vm883_vm1, %v2225_v8  ;;  %v2156_v30 = vadd.f32 %v2037_v33, %v4451_v16 }
 0x2fa   :  { %v2228_v37 = vadd.f32 %v4024_v1, %v2157_v43 }
 0x2fb   :  { %v2227_v14 = vadd.f32 %v4024_v1, %v2156_v30  ;;  %v2998_v34 = vpop.f32.mrb[86].mxu1 }
 0x2fc   :  { %2292 = vst.msk [vmem:[%s4418_s8 + $0x198] sm:$0xff] %vm883_vm1, %v2228_v37  ;;  %v2159_v62 = vadd.f32 %v2998_v34, %v4452_v51  ;;  %v2047_v50 = vpop.f32.mrb[87].mxu1 }
 0x2fd   :  { %2291 = vst.msk [vmem:[%s4418_s8 + $0x190] sm:$0xff] %vm883_vm1, %v2227_v14  ;;  %v2158_v27 = vadd.f32 %v2047_v50, %v4453_v41 }
 0x2fe   :  { %v2230_v47 = vadd.f32 %v4024_v1, %v2159_v62 }
 0x2ff   :  { %v2229_v2 = vadd.f32 %v4024_v1, %v2158_v27  ;;  %v3001_v24 = vpop.f32.mrb[88].mxu1 }
 0x300   :  { %2294 = vst.msk [vmem:[%s4418_s8 + $0x1a8] sm:$0xff] %vm883_vm1, %v2230_v47  ;;  %v2161_v21 = vadd.f32 %v3001_v24, %v4454_v0  ;;  %v2057_v45 = vpop.f32.mrb[89].mxu1 }
 0x301   :  { %2293 = vst.msk [vmem:[%s4418_s8 + $0x1a0] sm:$0xff] %vm883_vm1, %v2229_v2  ;;  %v2160_v17 = vadd.f32 %v2057_v45, %v4455_v26 }
 0x302   :  { %v2232_v38 = vadd.f32 %v4024_v1, %v2161_v21 }
 0x303   :  { %v2231_v11 = vadd.f32 %v4024_v1, %v2160_v17  ;;  %v3004_v58 = vpop.f32.mrb[90].mxu1 }
 0x304   :  { %2296 = vst.msk [vmem:[%s4418_s8 + $0x1b8] sm:$0xff] %vm883_vm1, %v2232_v38  ;;  %v2163_v13 = vadd.f32 %v3004_v58, %v4456_v35  ;;  %v2067_v36 = vpop.f32.mrb[91].mxu1 }
 0x305   :  { %2295 = vst.msk [vmem:[%s4418_s8 + $0x1b0] sm:$0xff] %vm883_vm1, %v2231_v11  ;;  %v2162_v32 = vadd.f32 %v2067_v36, %v4457_v55 }
 0x306   :  { %v2234_v18 = vadd.f32 %v4024_v1, %v2163_v13 }
 0x307   :  { %v2233_v49 = vadd.f32 %v4024_v1, %v2162_v32  ;;  %v3007_v53 = vpop.f32.mrb[92].mxu1 }
 0x308   :  { %2298 = vst.msk [vmem:[%s4418_s8 + $0x1c8] sm:$0xff] %vm883_vm1, %v2234_v18  ;;  %v2165_v46 = vadd.f32 %v3007_v53, %v4458_v54  ;;  %v2077_v48 = vpop.f32.mrb[93].mxu1 }
 0x309   :  { %2297 = vst.msk [vmem:[%s4418_s8 + $0x1c0] sm:$0xff] %vm883_vm1, %v2233_v49  ;;  %v2164_v25 = vadd.f32 %v2077_v48, %v4459_v22 }
 0x30a   :  { %v2236_v42 = vadd.f32 %v4024_v1, %v2165_v46 }
 0x30b   :  { %v2235_v9 = vadd.f32 %v4024_v1, %v2164_v25  ;;  %v3010_v59 = vpop.f32.mrb[94].mxu1 }
 0x30c   :  { %2300 = vst.msk [vmem:[%s4418_s8 + $0x1d8] sm:$0xff] %vm883_vm1, %v2236_v42  ;;  %v2167_v63 = vadd.f32 %v3010_v59, %v4460_v4  ;;  %v2087_v57 = vpop.f32.mrb[95].mxu1 }
 0x30d   :  { %2299 = vst.msk [vmem:[%s4418_s8 + $0x1d0] sm:$0xff] %vm883_vm1, %v2235_v9  ;;  %v2166_v28 = vadd.f32 %v2087_v57, %v4461_v31 }
 0x30e   :  { %v2238_v61 = vadd.f32 %v4024_v1, %v2167_v63 }
 0x30f   :  { %v2237_v23 = vadd.f32 %v4024_v1, %v2166_v28  ;;  %v3013_v60 = vpop.f32.mrb[96].mxu1 }
 0x310   :  { %2302 = vst.msk [vmem:[%s4418_s8 + $0x1e8] sm:$0xff] %vm883_vm1, %v2238_v61  ;;  %v2169_v29 = vadd.f32 %v3013_v60, %v4462_v6  ;;  %v2097_v56 = vpop.f32.mrb[97].mxu1 }
 0x311   :  { %2301 = vst.msk [vmem:[%s4418_s8 + $0x1e0] sm:$0xff] %vm883_vm1, %v2237_v23  ;;  %v2168_v44 = vadd.f32 %v2097_v56, %v4463_v3 }
 0x312   :  { %v2240_v40 = vadd.f32 %v4024_v1, %v2169_v29 }
 0x313   :  { %v2239_v7 = vadd.f32 %v4024_v1, %v2168_v44 }
 0x314   :  { %2304 = vst.msk [vmem:[%s4418_s8 + $0x1f8] sm:$0xff] %vm883_vm1, %v2240_v40 }
 0x315   :  { %2303 = vst.msk [vmem:[%s4418_s8 + $0x1f0] sm:$0xff] %vm883_vm1, %v2239_v7 }

// kernel: reformer_forward_pallas.26
= control target key start
LH: loop header
LB: loop body
LE: loop exit
PB: predicated region body
PF: predicated region fallthrough
CT: control target
= control target key end

     0   :  { %vm41_vm0 = vcmask 261120   ;;  %vm251_vm1 = vcmask 523264   ;;  %s516_s1 = inlined_call_operand.vmem [shape: f32[32,64], index: 1, kind: input, shape index: {}]   ;;  %s517_s0 = inlined_call_operand.vmem [shape: f32[128,32], index: 0, kind: input, shape index: {}]   ;;  %s518_s2 = inlined_call_operand.vmem [shape: f32[1,64], index: 2, kind: input, shape index: {}]   ;;  %s519_s3 = inlined_call_operand.vmem [shape: f32[128,64], index: 3, kind: output, shape index: {}]  }
   0x1   :  { %v30_v0 = vld [vmem:[%s516_s1] sm:$0xff]  ;;  %v31_v1 = vld [vmem:[%s516_s1 + $0x8] sm:$0xff]  ;;  %v32_v2 = vld [vmem:[%s516_s1 + $0x10] sm:$0xff] }
   0x2   :  { %v341_v3 = vpack.c.bf16 %v31_v1, %v30_v0  ;;  %v33_v4 = vld [vmem:[%s516_s1 + $0x18] sm:$0xff]  ;;  %v14_v5 = vld [vmem:[%s517_s0] sm:$0xff]  ;;  %v15_v8 = vld [vmem:[%s517_s0 + $0x8] sm:$0xff] }
   0x3   :  { %v22_v6 = vld [vmem:[%s517_s0 + $0x40] sm:$0xff]  ;;  %v345_v7 = vpack.c.bf16 %v33_v4, %v32_v2  ;;  %317 = vmatprep.mubr.msk.f32.mxu0 %vm41_vm0, %v14_v5  ;;  %v23_v9 = vld [vmem:[%s517_s0 + $0x48] sm:$0xff]  ;;  %v16_v10 = vld [vmem:[%s517_s0 + $0x10] sm:$0xff] }
   0x4   :  { %329 = vmatprep.mubr.msk.f32.mxu1 %vm41_vm0, %v22_v6  ;;  %342 = vmatprep.subr.bf16.mxu0 %v341_v3  ;;  %v24_v11 = vld [vmem:[%s517_s0 + $0x50] sm:$0xff]  ;;  %v17_v12 = vld [vmem:[%s517_s0 + $0x18] sm:$0xff]  ;;  %v18_v14 = vld [vmem:[%s517_s0 + $0x20] sm:$0xff] }
   0x5   :  { %349 = vmatprep.subr.bf16.mxu1 %v341_v3  ;;  %344 = vmatpush3.bf16.msra.mxu0 %v341_v3  ;;  %v25_v13 = vld [vmem:[%s517_s0 + $0x58] sm:$0xff]  ;;  %v26_v15 = vld [vmem:[%s517_s0 + $0x60] sm:$0xff]  ;;  %v19_v16 = vld [vmem:[%s517_s0 + $0x28] sm:$0xff] }
   0x6   :  { %351 = vmatpush3.bf16.msra.mxu1 %v341_v3  ;;  %346 = vmatprep.subr.bf16.mxu0 %v345_v7  ;;  %v27_v17 = vld [vmem:[%s517_s0 + $0x68] sm:$0xff]  ;;  %v20_v18 = vld [vmem:[%s517_s0 + $0x30] sm:$0xff]  ;;  %v21_v20 = vld [vmem:[%s517_s0 + $0x38] sm:$0xff] }
   0x7   :  { %350 = vmatprep.subr.bf16.mxu1 %v345_v7  ;;  %v28_v19 = vld [vmem:[%s517_s0 + $0x70] sm:$0xff]  ;;  %v29_v21 = vld [vmem:[%s517_s0 + $0x78] sm:$0xff]  ;;  %v272_v22 = vld [vmem:[%s518_s2] ss:$0 sm:$0xff] }
   0x9   :  { %348 = vmatpush3.bf16.msra.mxu0 %v345_v7 }
   0xa   :  { %352 = vmatpush3.bf16.msra.mxu1 %v345_v7 }
   0xc   :  { %318 = vmatmul.mubr.msk.f32.vlgmr.msra.gmra.mrb[0].mxu0 %vm41_vm0, %v15_v8 }
   0xd   :  { %330 = vmatmul.mubr.msk.f32.vlgmr.msra.gmra.mrb[0].mxu1 %vm41_vm0, %v23_v9  ;;  %320 = vmatprep.mubr.msk.f32.mxu0 %vm41_vm0, %v16_v10 }
   0xe   :  { %332 = vmatprep.mubr.msk.f32.mxu1 %vm41_vm0, %v24_v11 }
  0x10   :  { %321 = vmatmul.mubr.msk.f32.gmra.mrb[2].mxu0 %vm41_vm0, %v17_v12 }
  0x11   :  { %333 = vmatmul.mubr.msk.f32.gmra.mrb[2].mxu1 %vm41_vm0, %v25_v13  ;;  %323 = vmatprep.mubr.msk.f32.mxu0 %vm41_vm0, %v18_v14 }
  0x12   :  { %335 = vmatprep.mubr.msk.f32.mxu1 %vm41_vm0, %v26_v15 }
  0x14   :  { %324 = vmatmul.mubr.msk.f32.gmra.mrb[4].mxu0 %vm41_vm0, %v19_v16 }
  0x15   :  { %336 = vmatmul.mubr.msk.f32.gmra.mrb[4].mxu1 %vm41_vm0, %v27_v17  ;;  %326 = vmatprep.mubr.msk.f32.mxu0 %vm41_vm0, %v20_v18 }
  0x16   :  { %338 = vmatprep.mubr.msk.f32.mxu1 %vm41_vm0, %v28_v19 }
  0x18   :  { %327 = vmatmul.mubr.msk.f32.gmra.mrb[6].mxu0 %vm41_vm0, %v21_v20 }
  0x19   :  { %339 = vmatmul.mubr.msk.f32.gmra.mrb[6].mxu1 %vm41_vm0, %v29_v21 }
  0xdf   :  { %v319_v23 = vpop.f32.mrb[0].mxu0 }
  0xe0   :  { %v331_v24 = vpop.f32.mrb[0].mxu1  ;;  %v162_v25 = vadd.f32 %v319_v23, %v272_v22  ;;  %v156_v27 = vpop.f32.mrb[1].mxu0 }
  0xe1   :  { %v202_v26 = vadd.f32 %v331_v24, %v272_v22  ;;  %v196_v28 = vpop.f32.mrb[1].mxu1  ;;  %v157_v29 = vadd.f32 %v272_v22, %v156_v27 }
  0xe2   :  { %v197_v30 = vadd.f32 %v272_v22, %v196_v28  ;;  %v236_v31 = vmax.f32 %v162_v25, 0.0 }
  0xe3   :  { %v244_v32 = vmax.f32 %v202_v26, 0.0  ;;  %v235_v33 = vmax.f32 %v157_v29, 0.0  ;;  %v322_v35 = vpop.f32.mrb[2].mxu0 }
  0xe4   :  { %v243_v34 = vmax.f32 %v197_v30, 0.0  ;;  %v334_v36 = vpop.f32.mrb[2].mxu1  ;;  %253 = vst.msk [vmem:[%s519_s3 + $0x8] sm:$0xff] %vm251_vm1, %v236_v31  ;;  %v172_v37 = vadd.f32 %v322_v35, %v272_v22  ;;  %v166_v39 = vpop.f32.mrb[3].mxu0 }
  0xe5   :  { %261 = vst.msk [vmem:[%s519_s3 + $0x48] sm:$0xff] %vm251_vm1, %v244_v32  ;;  %v212_v38 = vadd.f32 %v334_v36, %v272_v22  ;;  %v206_v40 = vpop.f32.mrb[3].mxu1  ;;  %252 = vst.msk [vmem:[%s519_s3] sm:$0xff] %vm251_vm1, %v235_v33  ;;  %v167_v41 = vadd.f32 %v272_v22, %v166_v39 }
  0xe6   :  { %260 = vst.msk [vmem:[%s519_s3 + $0x40] sm:$0xff] %vm251_vm1, %v243_v34  ;;  %v207_v42 = vadd.f32 %v272_v22, %v206_v40  ;;  %v238_v43 = vmax.f32 %v172_v37, 0.0 }
  0xe7   :  { %v246_v44 = vmax.f32 %v212_v38, 0.0  ;;  %v237_v45 = vmax.f32 %v167_v41, 0.0  ;;  %v325_v47 = vpop.f32.mrb[4].mxu0 }
  0xe8   :  { %v245_v46 = vmax.f32 %v207_v42, 0.0  ;;  %v337_v48 = vpop.f32.mrb[4].mxu1  ;;  %255 = vst.msk [vmem:[%s519_s3 + $0x18] sm:$0xff] %vm251_vm1, %v238_v43  ;;  %v182_v49 = vadd.f32 %v325_v47, %v272_v22  ;;  %v176_v51 = vpop.f32.mrb[5].mxu0 }
  0xe9   :  { %263 = vst.msk [vmem:[%s519_s3 + $0x58] sm:$0xff] %vm251_vm1, %v246_v44  ;;  %v222_v50 = vadd.f32 %v337_v48, %v272_v22  ;;  %v216_v52 = vpop.f32.mrb[5].mxu1  ;;  %254 = vst.msk [vmem:[%s519_s3 + $0x10] sm:$0xff] %vm251_vm1, %v237_v45  ;;  %v177_v53 = vadd.f32 %v272_v22, %v176_v51 }
  0xea   :  { %262 = vst.msk [vmem:[%s519_s3 + $0x50] sm:$0xff] %vm251_vm1, %v245_v46  ;;  %v217_v54 = vadd.f32 %v272_v22, %v216_v52  ;;  %v240_v55 = vmax.f32 %v182_v49, 0.0 }
  0xeb   :  { %v248_v56 = vmax.f32 %v222_v50, 0.0  ;;  %v239_v57 = vmax.f32 %v177_v53, 0.0  ;;  %v328_v59 = vpop.f32.mrb[6].mxu0 }
  0xec   :  { %v247_v58 = vmax.f32 %v217_v54, 0.0  ;;  %v340_v60 = vpop.f32.mrb[6].mxu1  ;;  %257 = vst.msk [vmem:[%s519_s3 + $0x28] sm:$0xff] %vm251_vm1, %v240_v55  ;;  %v192_v61 = vadd.f32 %v328_v59, %v272_v22  ;;  %v186_v63 = vpop.f32.mrb[7].mxu0 }
  0xed   :  { %265 = vst.msk [vmem:[%s519_s3 + $0x68] sm:$0xff] %vm251_vm1, %v248_v56  ;;  %v232_v62 = vadd.f32 %v340_v60, %v272_v22  ;;  %v226_v0 = vpop.f32.mrb[7].mxu1  ;;  %256 = vst.msk [vmem:[%s519_s3 + $0x20] sm:$0xff] %vm251_vm1, %v239_v57  ;;  %v187_v1 = vadd.f32 %v272_v22, %v186_v63 }
  0xee   :  { %264 = vst.msk [vmem:[%s519_s3 + $0x60] sm:$0xff] %vm251_vm1, %v247_v58  ;;  %v227_v2 = vadd.f32 %v272_v22, %v226_v0  ;;  %v242_v3 = vmax.f32 %v192_v61, 0.0 }
  0xef   :  { %v250_v4 = vmax.f32 %v232_v62, 0.0  ;;  %v241_v5 = vmax.f32 %v187_v1, 0.0 }
  0xf0   :  { %v249_v6 = vmax.f32 %v227_v2, 0.0  ;;  %259 = vst.msk [vmem:[%s519_s3 + $0x38] sm:$0xff] %vm251_vm1, %v242_v3 }
  0xf1   :  { %267 = vst.msk [vmem:[%s519_s3 + $0x78] sm:$0xff] %vm251_vm1, %v250_v4  ;;  %258 = vst.msk [vmem:[%s519_s3 + $0x30] sm:$0xff] %vm251_vm1, %v241_v5 }
  0xf2   :  { %266 = vst.msk [vmem:[%s519_s3 + $0x70] sm:$0xff] %vm251_vm1, %v249_v6 }

// kernel: reformer_forward_pallas.27
= control target key start
LH: loop header
LB: loop body
LE: loop exit
PB: predicated region body
PF: predicated region fallthrough
CT: control target
= control target key end

     0   :  { %s948_s18 = smov 0   ;;  %s1220_s0 = inlined_call_operand.vmem [shape: f32[2,10,10,64], index: 0, kind: input, shape index: {}]   ;;  %s1221_s1 = inlined_call_operand.vmem [shape: f32[9,64], index: 1, kind: input, shape index: {}]   ;;  %s1222_s2 = inlined_call_operand.vmem [shape: f32[1,64], index: 2, kind: input, shape index: {}]   ;;  %s1223_s3 = inlined_call_operand.vmem [shape: f32[64,16], index: 3, kind: input, shape index: {}]   ;;  %s1224_s4 = inlined_call_operand.vmem [shape: f32[16,64], index: 4, kind: input, shape index: {}]   ;;  %s1225_s5 = inlined_call_operand.vmem [shape: f32[2,8,8,64], index: 5, kind: output, shape index: {}]  }
   0x1 LB: > { %s771_s19 = sadd.s32 4294967295, %s913_s18   ;;  %p775_p0 = scmp.ge.s32.totalorder %s913_s18, 1  ;;  %s913_s18 = sphi %s948_s18, %s15_s18  }
   0x2   : > { %p187_p1 = scmp.lt.s32.totalorder %s913_s18, 3 }
   0x4   : > { %p188_p2 = pnand %p775_p0, %p187_p1 }
   0x5   : > { %v535_v0 = vld [vmem:[%s1223_s3] sm:$0xff] (!%p188_p2)  ;;  %v536_v1 = vld [vmem:[%s1223_s3 + $0x8] sm:$0xff] (!%p188_p2)  ;;  %v537_v2 = vld [vmem:[%s1223_s3 + $0x10] sm:$0xff] (!%p188_p2)  ;;  %v915_v3 = vmov (!%p188_p2), 0.0|0.0   ;;  %vm916_vm0 = vmmov (!%p188_p2), 0   ;;  %v917_v6 = vmov (!%p188_p2), 0.0  }
   0x6   : > { %191 = sbr.rel (%p188_p2) target bundleno = 530 (0x212), region = 40  ;;  %880 = vmatprep.subr.bf16.mxu0 (!%p188_p2), %v915_v3  ;;  %v881_v4 = vpack.c.bf16 (!%p188_p2), %v536_v1, %v535_v0  ;;  %v538_v5 = vld [vmem:[%s1223_s3 + $0x18] sm:$0xff] (!%p188_p2)  ;;  %870 = vmatprep.mubr.msk.f32.mxu0 (!%p188_p2), %vm916_vm0, %v917_v6  ;;  %p215_p3 = scmp.lt.s32.totalorder (!%p188_p2), %s771_s19, 1  ;;  %v539_v8 = vld [vmem:[%s1223_s3 + $0x20] sm:$0xff] (!%p188_p2)  ;;  %v540_v9 = vld [vmem:[%s1223_s3 + $0x28] sm:$0xff] (!%p188_p2)  ;;  %vm511_vm1 = vcmask (!%p188_p2), 523264  }
   0x7   : > { %892 = vmatprep.subr.bf16.mxu1 (!%p188_p2), %v915_v3  ;;  %877 = vmatprep.mubr.msk.f32.mxu1 (!%p188_p2), %vm916_vm0, %v917_v6  ;;  %v884_v7 = vpack.c.bf16 (!%p188_p2), %v538_v5, %v537_v2  ;;  %v541_v10 = vld [vmem:[%s1223_s3 + $0x30] sm:$0xff] (!%p188_p2)  ;;  %v542_v11 = vld [vmem:[%s1223_s3 + $0x38] sm:$0xff] (!%p188_p2)  ;;  %v779_v12 = vld [vmem:[%s1221_s1] ss:$0 sm:$0xff] (!%p188_p2)  ;;  %v887_v14 = vpack.c.bf16 (!%p188_p2), %v540_v9, %v539_v8  ;;  %vm619_vm2 = vcmask (!%p188_p2), 130048  }
   0x8   : > { %882 = vmatpush3.bf16.msra.mxu0 (!%p188_p2), %v881_v4  ;;  %v989_v13 = vld [vmem:[%s1221_s1 + $0x3] ss:$0 sm:$0xff] (!%p188_p2)  ;;  %v780_v15 = vld [vmem:[%s1221_s1 + $0x1] ss:$0 sm:$0xff] (!%p188_p2)  ;;  %v890_v16 = vpack.c.bf16 (!%p188_p2), %v542_v11, %v541_v10  ;;  %v781_v33 = vld [vmem:[%s1221_s1 + $0x2] ss:$0 sm:$0xff] (!%p188_p2) }
   0x9   : > { %883 = vmatprep.subr.bf16.mxu0 (!%p188_p2), %v915_v3 }
   0xc   : > { %885 = vmatpush3.bf16.msra.mxu0 (!%p188_p2), %v884_v7 }
   0xd   : > { %s1227_s19 = smov (!%p215_p3, %s771_s19), 1  ;;  %886 = vmatprep.subr.bf16.mxu0 %v915_v3 }
   0xe   : > { %s895_s11 = smul.u32 160, %s1227_s19  ;;  %s841_s16 = sshll.u32 %s1227_s19, 6 }
   0xf   : > { %s224_s21 = scalar_lea.vmem %s1225_s5, %s841_s16 }
  0x10   : > { %s994_s20 = scalar_lea.vmem %s1220_s0, %s895_s11  ;;  %888 = vmatpush3.bf16.msra.mxu0 %v887_v14 }
  0x11   : > { %v225_v17 = vld [vmem:[%s994_s20] sm:$0xff]  ;;  %v226_v18 = vld [vmem:[%s994_s20 + $0x10] sm:$0xff]  ;;  %889 = vmatprep.subr.bf16.mxu0 %v915_v3 }
  0x12   : > { %v1002_v19 = vld [vmem:[%s994_s20 + $0x20] sm:$0xff]  ;;  %v1005_v20 = vld [vmem:[%s994_s20 + $0x30] sm:$0xff]  ;;  %v238_v23 = vmul.f32 %v779_v12, %v225_v17  ;;  %v239_v24 = vmul.f32 %v779_v12, %v226_v18  ;;  %v1015_v26 = vmul.f32 %v989_v13, %v226_v18 }
  0x13   : > { %v1008_v21 = vld [vmem:[%s994_s20 + $0x40] sm:$0xff]  ;;  %v1011_v22 = vld [vmem:[%s994_s20 + $0x50] sm:$0xff]  ;;  %v240_v25 = vmul.f32 %v779_v12, %v1002_v19  ;;  %v241_v29 = vmul.f32 %v779_v12, %v1005_v20  ;;  %v327_v34 = vmul.f32 %v989_v13, %v1002_v19  ;;  %v328_v41 = vmul.f32 %v989_v13, %v1005_v20 }
  0x14   : > { %v1018_v27 = vld [vmem:[%s994_s20 + $0x60] sm:$0xff]  ;;  %v1021_v28 = vld [vmem:[%s994_s20 + $0x70] sm:$0xff]  ;;  %v242_v30 = vmul.f32 %v779_v12, %v1008_v21  ;;  %v243_v31 = vmul.f32 %v779_v12, %v1011_v22  ;;  %v329_v48 = vmul.f32 %v989_v13, %v1008_v21  ;;  %891 = vmatpush3.bf16.msra.mxu0 %v890_v16 }
  0x15   : > { %v254_v32 = vld [vmem:[%s994_s20 + $0x1] sm:$0xff]  ;;  %v244_v35 = vmul.f32 %v779_v12, %v1018_v27  ;;  %v245_v36 = vmul.f32 %v779_v12, %v1021_v28  ;;  %v1035_v37 = vld [vmem:[%s994_s20 + $0x11] sm:$0xff] }
  0x16   : > { %v1038_v38 = vld [vmem:[%s994_s20 + $0x21] sm:$0xff]  ;;  %v1041_v39 = vld [vmem:[%s994_s20 + $0x31] sm:$0xff]  ;;  %v267_v40 = vmul.f32 %v780_v15, %v254_v32  ;;  %v268_v45 = vmul.f32 %v780_v15, %v1035_v37  ;;  %v331_v32 = vmul.f32 %v989_v13, %v1018_v27 }
  0x17   : > { %v1046_v42 = vld [vmem:[%s994_s20 + $0x41] sm:$0xff]  ;;  %v1049_v43 = vld [vmem:[%s994_s20 + $0x51] sm:$0xff]  ;;  %v269_v46 = vmul.f32 %v780_v15, %v1038_v38  ;;  %v270_v47 = vmul.f32 %v780_v15, %v1041_v39 }
  0x18   : > { %v1052_v44 = vld [vmem:[%s994_s20 + $0x61] sm:$0xff]  ;;  %v1060_v49 = vld [vmem:[%s994_s20 + $0x71] sm:$0xff]  ;;  %v271_v50 = vmul.f32 %v780_v15, %v1046_v42  ;;  %v272_v51 = vmul.f32 %v780_v15, %v1049_v43  ;;  %v275_v53 = vadd.f32 %v267_v40, %v238_v23  ;;  %v276_v57 = vadd.f32 %v268_v45, %v239_v24 }
  0x19   : > { %v273_v52 = vmul.f32 %v780_v15, %v1052_v44  ;;  %v283_v54 = vld [vmem:[%s994_s20 + $0x2] sm:$0xff]  ;;  %v1067_v55 = vld [vmem:[%s994_s20 + $0x12] sm:$0xff]  ;;  %v274_v56 = vmul.f32 %v780_v15, %v1060_v49  ;;  %v277_v58 = vadd.f32 %v269_v46, %v240_v25  ;;  %v278_v59 = vadd.f32 %v270_v47, %v241_v29 }
  0x1a   : > { %v1071_v60 = vld [vmem:[%s994_s20 + $0x22] sm:$0xff]  ;;  %v1074_v61 = vld [vmem:[%s994_s20 + $0x32] sm:$0xff]  ;;  %v279_v63 = vadd.f32 %v271_v50, %v242_v30  ;;  %v280_v0 = vadd.f32 %v272_v51, %v243_v31  ;;  %v296_v5 = vmul.f32 %v781_v33, %v283_v54  ;;  %v297_v7 = vmul.f32 %v781_v33, %v1067_v55 }
  0x1b   : > { %v1077_v62 = vld [vmem:[%s994_s20 + $0x42] sm:$0xff]  ;;  %v281_v1 = vadd.f32 %v273_v52, %v244_v35  ;;  %v1080_v2 = vld [vmem:[%s994_s20 + $0x52] sm:$0xff]  ;;  %v282_v6 = vadd.f32 %v274_v56, %v245_v36  ;;  %v298_v8 = vmul.f32 %v781_v33, %v1071_v60  ;;  %v299_v9 = vmul.f32 %v781_v33, %v1074_v61 }
  0x1c   : > { %v1083_v3 = vld [vmem:[%s994_s20 + $0x62] sm:$0xff]  ;;  %v1086_v4 = vld [vmem:[%s994_s20 + $0x72] sm:$0xff]  ;;  %v300_v10 = vmul.f32 %v781_v33, %v1077_v62  ;;  %v301_v11 = vmul.f32 %v781_v33, %v1080_v2  ;;  %v304_v16 = vadd.f32 %v296_v5, %v275_v53  ;;  %v305_v17 = vadd.f32 %v297_v7, %v276_v57 }
  0x1d   : > { %v302_v12 = vmul.f32 %v781_v33, %v1083_v3  ;;  %v303_v14 = vmul.f32 %v781_v33, %v1086_v4  ;;  %v1096_v15 = vld [vmem:[%s994_s20 + $0x80] sm:$0xff]  ;;  %v306_v18 = vadd.f32 %v298_v8, %v277_v58  ;;  %v307_v23 = vadd.f32 %v299_v9, %v278_v59 }
  0x1e   : > { %v308_v24 = vadd.f32 %v300_v10, %v279_v63  ;;  %v309_v25 = vadd.f32 %v301_v11, %v280_v0  ;;  %v330_v31 = vmul.f32 %v989_v13, %v1011_v22  ;;  %v332_v33 = vmul.f32 %v989_v13, %v1021_v28  ;;  %v799_v36 = vld [vmem:[%s1221_s1 + $0x4] ss:$0 sm:$0xff]  ;;  %v808_v59 = vld [vmem:[%s1221_s1 + $0x5] ss:$0 sm:$0xff] }
  0x1f   : > { %v310_v29 = vadd.f32 %v302_v12, %v281_v1  ;;  %v311_v30 = vadd.f32 %v303_v14, %v282_v6  ;;  %v333_v35 = vmul.f32 %v989_v13, %v1096_v15  ;;  %v334_v40 = vadd.f32 %v1015_v26, %v304_v16  ;;  %v1111_v50 = vld [vmem:[%s994_s20 + $0x81] sm:$0xff] }
  0x20   : > { %v335_v45 = vadd.f32 %v327_v34, %v305_v17  ;;  %v336_v46 = vadd.f32 %v328_v41, %v306_v18  ;;  %v337_v47 = vadd.f32 %v329_v48, %v307_v23  ;;  %v338_v51 = vadd.f32 %v330_v31, %v308_v24  ;;  %v1125_v5 = vld [vmem:[%s994_s20 + $0x82] sm:$0xff]  ;;  %v816_v31 = vld [vmem:[%s994_s20 + $0x90] sm:$0xff] }
  0x21   : > { %v339_v52 = vadd.f32 %v331_v32, %v309_v25  ;;  %v340_v53 = vadd.f32 %v332_v33, %v310_v29  ;;  %v341_v54 = vadd.f32 %v333_v35, %v311_v30  ;;  %v355_v56 = vmul.f32 %v799_v36, %v1035_v37  ;;  %v817_v24 = vld [vmem:[%s1221_s1 + $0x6] ss:$0 sm:$0xff] }
  0x22   : > { %v356_v13 = vmul.f32 %v799_v36, %v1038_v38  ;;  %v357_v57 = vmul.f32 %v799_v36, %v1041_v39  ;;  %v358_v58 = vmul.f32 %v799_v36, %v1046_v42  ;;  %v359_v26 = vmul.f32 %v799_v36, %v1049_v43 }
  0x23   : > { %v360_v34 = vmul.f32 %v799_v36, %v1052_v44  ;;  %v361_v41 = vmul.f32 %v799_v36, %v1060_v49  ;;  %v362_v48 = vmul.f32 %v799_v36, %v1111_v50  ;;  %v363_v63 = vadd.f32 %v355_v56, %v334_v40  ;;  %v826_v56 = vld [vmem:[%s1221_s1 + $0x7] ss:$0 sm:$0xff] }
  0x24   : > { %v364_v37 = vadd.f32 %v356_v13, %v335_v45  ;;  %v365_v0 = vadd.f32 %v357_v57, %v336_v46  ;;  %v366_v1 = vadd.f32 %v358_v58, %v337_v47  ;;  %v367_v6 = vadd.f32 %v359_v26, %v338_v51 }
  0x25   : > { %v368_v7 = vadd.f32 %v360_v34, %v339_v52  ;;  %v369_v8 = vadd.f32 %v361_v41, %v340_v53  ;;  %v370_v9 = vadd.f32 %v362_v48, %v341_v54  ;;  %v384_v10 = vmul.f32 %v808_v59, %v1067_v55 }
  0x26   : > { %v385_v11 = vmul.f32 %v808_v59, %v1071_v60  ;;  %v386_v12 = vmul.f32 %v808_v59, %v1074_v61  ;;  %v387_v14 = vmul.f32 %v808_v59, %v1077_v62  ;;  %v388_v16 = vmul.f32 %v808_v59, %v1080_v2 }
  0x27   : > { %v389_v17 = vmul.f32 %v808_v59, %v1083_v3  ;;  %v390_v18 = vmul.f32 %v808_v59, %v1086_v4  ;;  %v391_v23 = vmul.f32 %v808_v59, %v1125_v5  ;;  %v392_v25 = vadd.f32 %v384_v10, %v363_v63 }
  0x28   : > { %v393_v55 = vadd.f32 %v385_v11, %v364_v37  ;;  %v394_v29 = vadd.f32 %v386_v12, %v365_v0  ;;  %v395_v30 = vadd.f32 %v387_v14, %v366_v1  ;;  %v396_v32 = vadd.f32 %v388_v16, %v367_v6  ;;  %v835_v0 = vld [vmem:[%s1221_s1 + $0x8] ss:$0 sm:$0xff] }
  0x29   : > { %v397_v33 = vadd.f32 %v389_v17, %v368_v7  ;;  %v398_v35 = vadd.f32 %v390_v18, %v369_v8  ;;  %v399_v36 = vadd.f32 %v391_v23, %v370_v9  ;;  %v414_v40 = vmul.f32 %v817_v24, %v1002_v19  ;;  %v836_v17 = vld [vmem:[%s1222_s2] ss:$0 sm:$0xff] }
  0x2a   : > { %v415_v45 = vmul.f32 %v817_v24, %v1005_v20  ;;  %v416_v46 = vmul.f32 %v817_v24, %v1008_v21  ;;  %v417_v47 = vmul.f32 %v817_v24, %v1011_v22  ;;  %v418_v51 = vmul.f32 %v817_v24, %v1018_v27  ;;  %v825_v20 = vld [vmem:[%s994_s20 + $0x91] sm:$0xff] }
  0x2b   : > { %v419_v52 = vmul.f32 %v817_v24, %v1021_v28  ;;  %v420_v53 = vmul.f32 %v817_v24, %v1096_v15  ;;  %v421_v54 = vmul.f32 %v817_v24, %v816_v31  ;;  %v422_v13 = vadd.f32 %v414_v40, %v392_v25 }
  0x2c   : > { %v423_v57 = vadd.f32 %v415_v45, %v393_v55  ;;  %v424_v19 = vadd.f32 %v416_v46, %v394_v29  ;;  %v425_v58 = vadd.f32 %v417_v47, %v395_v30  ;;  %v426_v26 = vadd.f32 %v418_v51, %v396_v32 }
  0x2d   : > { %v427_v21 = vadd.f32 %v419_v52, %v397_v33  ;;  %v428_v22 = vadd.f32 %v420_v53, %v398_v35  ;;  %v429_v34 = vadd.f32 %v421_v54, %v399_v36  ;;  %v443_v27 = vmul.f32 %v826_v56, %v1038_v38 }
  0x2e   : > { %v444_v28 = vmul.f32 %v826_v56, %v1041_v39  ;;  %v445_v15 = vmul.f32 %v826_v56, %v1046_v42  ;;  %v446_v41 = vmul.f32 %v826_v56, %v1049_v43  ;;  %v447_v48 = vmul.f32 %v826_v56, %v1052_v44  ;;  %v834_v39 = vld [vmem:[%s994_s20 + $0x92] sm:$0xff] }
  0x2f   : > { %v448_v59 = vmul.f32 %v826_v56, %v1060_v49  ;;  %v449_v63 = vmul.f32 %v826_v56, %v1111_v50  ;;  %v450_v37 = vmul.f32 %v826_v56, %v825_v20  ;;  %v451_v1 = vadd.f32 %v443_v27, %v422_v13 }
  0x30   : > { %v452_v6 = vadd.f32 %v444_v28, %v423_v57  ;;  %v453_v38 = vadd.f32 %v445_v15, %v424_v19  ;;  %v454_v7 = vadd.f32 %v446_v41, %v425_v58  ;;  %v455_v8 = vadd.f32 %v447_v48, %v426_v26 }
  0x31   : > { %v456_v42 = vadd.f32 %v448_v59, %v427_v21  ;;  %v457_v9 = vadd.f32 %v449_v63, %v428_v22  ;;  %v458_v43 = vadd.f32 %v450_v37, %v429_v34  ;;  %v472_v44 = vmul.f32 %v835_v0, %v1071_v60 }
  0x32   : > { %v473_v49 = vmul.f32 %v835_v0, %v1074_v61  ;;  %v474_v50 = vmul.f32 %v835_v0, %v1077_v62  ;;  %v475_v10 = vmul.f32 %v835_v0, %v1080_v2  ;;  %v476_v11 = vmul.f32 %v835_v0, %v1083_v3 }
  0x33   : > { %v477_v12 = vmul.f32 %v835_v0, %v1086_v4  ;;  %v478_v14 = vmul.f32 %v835_v0, %v1125_v5  ;;  %v479_v16 = vmul.f32 %v835_v0, %v834_v39  ;;  %v480_v18 = vadd.f32 %v472_v44, %v451_v1 }
  0x34   : > { %v481_v23 = vadd.f32 %v473_v49, %v452_v6  ;;  %v482_v60 = vadd.f32 %v474_v50, %v453_v38  ;;  %v483_v24 = vadd.f32 %v475_v10, %v454_v7  ;;  %v484_v61 = vadd.f32 %v476_v11, %v455_v8  ;;  %v617_v6 = vld [vmem:[%s1224_s4] sm:$0xff]  ;;  %v618_v38 = vld [vmem:[%s1224_s4 + $0x8] sm:$0xff] }
  0x35   : > { %v485_v25 = vadd.f32 %v477_v12, %v456_v42  ;;  %v486_v62 = vadd.f32 %v478_v14, %v457_v9  ;;  %v1171_v55 = vadd.f32 %v836_v17, %v480_v18  ;;  %v487_v5 = vadd.f32 %v479_v16, %v458_v43 }
  0x36   : > { %v1173_v2 = vadd.f32 %v836_v17, %v481_v23  ;;  %v1175_v3 = vadd.f32 %v836_v17, %v482_v60  ;;  %v1177_v4 = vadd.f32 %v836_v17, %v483_v24  ;;  %v1179_v29 = vadd.f32 %v836_v17, %v484_v61 }
  0x37   : > { %v1181_v30 = vadd.f32 %v836_v17, %v485_v25  ;;  %v503_v31 = vmax.f32 %v1171_v55, 0.0  ;;  %v501_v36 = vadd.f32 %v836_v17, %v486_v62  ;;  %v502_v52 = vadd.f32 %v836_v17, %v487_v5 }
  0x38   : > { %v504_v32 = vmax.f32 %v1173_v2, 0.0  ;;  %v505_v33 = vmax.f32 %v1175_v3, 0.0  ;;  %v506_v35 = vmax.f32 %v1177_v4, 0.0  ;;  %v507_v40 = vmax.f32 %v1179_v29, 0.0 }
  0x39   : > { %v512_v45 = vsel %vm511_vm1, %v503_v31, 0.0  ;;  %v508_v53 = vmax.f32 %v1181_v30, 0.0  ;;  %v509_v13 = vmax.f32 %v501_v36, 0.0  ;;  %v510_v58 = vmax.f32 %v502_v52, 0.0 }
  0x3a   : > { %v513_v46 = vsel %vm511_vm1, %v504_v32, 0.0  ;;  %v515_v47 = vsel %vm511_vm1, %v505_v33, 0.0  ;;  %v517_v54 = vsel %vm511_vm1, %v506_v35, 0.0  ;;  %v519_v57 = vsel %vm511_vm1, %v507_v40, 0.0 }
  0x3b   : > { %v514_v51 = vadd.f32 %v513_v46, %v512_v45  ;;  %v521_v20 = vsel %vm511_vm1, %v508_v53, 0.0  ;;  %v523_v21 = vsel %vm511_vm1, %v509_v13, 0.0  ;;  %v525_v34 = vsel %vm511_vm1, %v510_v58, 0.0 }
  0x3c   : > { %v893_v7 = vpack.c.bf16 %v618_v38, %v617_v6  ;;  %v696_v9 = vlaneseq }
  0x3d   : > { %v516_v56 = vadd.f32 %v515_v47, %v514_v51 }
  0x3e   : > { %894 = vmatpush3.bf16.msra.mxu1 %v893_v7  ;;  %v697_v49 = vshrl.u32 %v696_v9, 7 }
  0x3f   : > { %v518_v19 = vadd.f32 %v517_v54, %v516_v56 }
  0x40   : > { %v698_v12 = vsub.s32 0, %v697_v49 }
  0x41   : > { %v520_v26 = vadd.f32 %v519_v57, %v518_v19 }
  0x43   : > { %v522_v22 = vadd.f32 %v521_v20, %v520_v26 }
  0x45   : > { %v524_v27 = vadd.f32 %v523_v21, %v522_v22 }
  0x47   : > { %v526_v28 = vadd.f32 %v525_v34, %v524_v27 }
  0x49   : > { %v527_v15 = vsel %vm511_vm1, %v526_v28, 0.0 }
  0x4a   : > { %v528_v41 = vrot.slane %v527_v15, 4 }
  0x4c   : > { %v529_v48 = vadd.f32 %v528_v41, %v527_v15 }
  0x4e   : > { %v530_v59 = vrot.slane %v529_v48, 2 }
  0x50   : > { %v531_v63 = vadd.f32 %v530_v59, %v529_v48 }
  0x52   : > { %v532_v37 = vrot.slane %v531_v63, 1 }
  0x54   : > { %v533_v0 = vadd.f32 %v532_v37, %v531_v63 }
  0x56   : > { %v534_v1 = vmul.f32 0.015625, %v533_v0 }
  0x58   : > { %871 = vmatmul.mubr.msk.f32.vlgmr.msra.gmra.mrb[0].mxu0 %vm511_vm1, %v534_v1 }
 0x12b   : > { %v612_v39 = vpop.f32.mrb[0].mxu0 }
 0x12c   : > { %v616_v8 = vmax.f32 %v612_v39, 0.0  ;;  %v872_v42 = vpop.f32.mrb[1].mxu0 }
 0x12e   : > { %878 = vmatmul.mubr.msk.f32.vlgmr.msra.gmra.mrb[0].mxu1 %vm619_vm2, %v616_v8 }
 0x201   : > { %v689_v43 = vpop.f32.mrb[0].mxu1 }
 0x202   : > { %v690_v44 = vadd.f32 3.0, %v689_v43  ;;  %v879_v50 = vpop.f32.mrb[1].mxu1 }
 0x204   : > { %v693_v10 = vmax.f32 %v690_v44, 0.0 }
 0x206   : > { %v694_v11 = vmin.f32 %v693_v10, 6.0 }
 0x208   : > { %v695_v14 = vmul.f32 0.16666667, %v694_v11 }
 0x20a   : > { %v699_v16 = vrot.slane %v695_v14, %v698_v12 }
 0x20c   : > { %v700_v17 = vmul.f32 %v699_v16, %v503_v31  ;;  %v701_v18 = vmul.f32 %v699_v16, %v504_v32  ;;  %v702_v23 = vmul.f32 %v699_v16, %v505_v33  ;;  %v703_v60 = vmul.f32 %v699_v16, %v506_v35 }
 0x20d   : > { %v704_v24 = vmul.f32 %v699_v16, %v507_v40  ;;  %v705_v61 = vmul.f32 %v699_v16, %v508_v53  ;;  %v706_v25 = vmul.f32 %v699_v16, %v509_v13  ;;  %v707_v62 = vmul.f32 %v699_v16, %v510_v58 }
 0x20e   : > { %708 = vst.msk [vmem:[%s224_s21] sm:$0xff] %vm511_vm1, %v700_v17  ;;  %709 = vst.msk [vmem:[%s224_s21 + $0x8] sm:$0xff] %vm511_vm1, %v701_v18 }
 0x20f   : > { %710 = vst.msk [vmem:[%s224_s21 + $0x10] sm:$0xff] %vm511_vm1, %v702_v23  ;;  %711 = vst.msk [vmem:[%s224_s21 + $0x18] sm:$0xff] %vm511_vm1, %v703_v60 }
 0x210   : > { %712 = vst.msk [vmem:[%s224_s21 + $0x20] sm:$0xff] %vm511_vm1, %v704_v24  ;;  %713 = vst.msk [vmem:[%s224_s21 + $0x28] sm:$0xff] %vm511_vm1, %v705_v61 }
 0x211   : > { %714 = vst.msk [vmem:[%s224_s21 + $0x30] sm:$0xff] %vm511_vm1, %v706_v25  ;;  %715 = vst.msk [vmem:[%s224_s21 + $0x38] sm:$0xff] %vm511_vm1, %v707_v62 }
 0x212 PF: > { %s15_s18 = sadd.s32 1, %s913_s18  }
 0x213   : > { %p12_p4 = scmp.ge.s32.totalorder %s15_s18, 4  }
 0x215   :  { %14 = sbr.rel (!%p12_p4) target bundleno = 1 (0x1), region = 72 }

// kernel: reformer_forward_pallas.28
= control target key start
LH: loop header
LB: loop body
LE: loop exit
PB: predicated region body
PF: predicated region fallthrough
CT: control target
= control target key end

     0   :  { %vm69_vm0 = vcmask 523264   ;;  %vm313_vm1 = vcmask 261120   ;;  %s1462_s2 = inlined_call_operand.vmem [shape: f32[64,32], index: 2, kind: input, shape index: {}]   ;;  %s1463_s0 = inlined_call_operand.vmem [shape: f32[128,64], index: 0, kind: input, shape index: {}]   ;;  %s1464_s4 = inlined_call_operand.vmem [shape: f32[32,64], index: 4, kind: input, shape index: {}]   ;;  %s1465_s6 = inlined_call_operand.vmem [shape: f32[64,32], index: 6, kind: input, shape index: {}]   ;;  %s1466_s1 = inlined_call_operand.vmem [shape: f32[128,32], index: 1, kind: input, shape index: {}]   ;;  %s1467_s3 = inlined_call_operand.vmem [shape: f32[1,32], index: 3, kind: input, shape index: {}]   ;;  %s1468_s5 = inlined_call_operand.vmem [shape: f32[1,64], index: 5, kind: input, shape index: {}]   ;;  %s1469_s7 = inlined_call_operand.vmem [shape: f32[1,32], index: 7, kind: input, shape index: {}]   ;;  %s1470_s8 = inlined_call_operand.vmem [shape: f32[128,32], index: 8, kind: output, shape index: {}]  }
   0x1   :  { %v61_v0 = vld [vmem:[%s1462_s2] sm:$0xff]  ;;  %v62_v1 = vld [vmem:[%s1462_s2 + $0x8] sm:$0xff]  ;;  %v63_v2 = vld [vmem:[%s1462_s2 + $0x10] sm:$0xff] }
   0x2   :  { %v1014_v3 = vpack.c.bf16 %v62_v1, %v61_v0  ;;  %v64_v4 = vld [vmem:[%s1462_s2 + $0x18] sm:$0xff]  ;;  %v65_v6 = vld [vmem:[%s1462_s2 + $0x20] sm:$0xff]  ;;  %v66_v7 = vld [vmem:[%s1462_s2 + $0x28] sm:$0xff] }
   0x3   :  { %v1018_v5 = vpack.c.bf16 %v64_v4, %v63_v2  ;;  %v45_v8 = vld [vmem:[%s1463_s0] sm:$0xff]  ;;  %v1022_v9 = vpack.c.bf16 %v66_v7, %v65_v6  ;;  %v67_v10 = vld [vmem:[%s1462_s2 + $0x30] sm:$0xff]  ;;  %v68_v11 = vld [vmem:[%s1462_s2 + $0x38] sm:$0xff] }
   0x4   :  { %1015 = vmatprep.subr.bf16.mxu0 %v1014_v3  ;;  %918 = vmatprep.mubr.msk.f32.mxu0 %vm69_vm0, %v45_v8  ;;  %v302_v12 = vld [vmem:[%s1464_s4] sm:$0xff]  ;;  %v303_v13 = vld [vmem:[%s1464_s4 + $0x8] sm:$0xff]  ;;  %v304_v14 = vld [vmem:[%s1464_s4 + $0x10] sm:$0xff]  ;;  %v1026_v15 = vpack.c.bf16 %v68_v11, %v67_v10 }
   0x5   :  { %1017 = vmatpush3.bf16.msra.mxu0 %v1014_v3  ;;  %v1030_v16 = vpack.c.bf16 %v303_v13, %v302_v12  ;;  %v305_v17 = vld [vmem:[%s1464_s4 + $0x18] sm:$0xff]  ;;  %v46_v19 = vld [vmem:[%s1463_s0 + $0x8] sm:$0xff]  ;;  %v47_v20 = vld [vmem:[%s1463_s0 + $0x10] sm:$0xff] }
   0x6   :  { %1019 = vmatprep.subr.bf16.mxu0 %v1018_v5  ;;  %v1034_v18 = vpack.c.bf16 %v305_v17, %v304_v14  ;;  %v48_v21 = vld [vmem:[%s1463_s0 + $0x18] sm:$0xff]  ;;  %v49_v22 = vld [vmem:[%s1463_s0 + $0x20] sm:$0xff]  ;;  %v50_v23 = vld [vmem:[%s1463_s0 + $0x28] sm:$0xff] }
   0x7   :  { %1054 = vmatprep.subr.bf16.mxu1 %v1030_v16  ;;  %v51_v24 = vld [vmem:[%s1463_s0 + $0x30] sm:$0xff]  ;;  %v52_v25 = vld [vmem:[%s1463_s0 + $0x38] sm:$0xff]  ;;  %v53_v26 = vld [vmem:[%s1463_s0 + $0x40] sm:$0xff] }
   0x8   :  { %1056 = vmatpush3.bf16.msra.mxu1 %v1030_v16  ;;  %v54_v27 = vld [vmem:[%s1463_s0 + $0x48] sm:$0xff]  ;;  %v55_v28 = vld [vmem:[%s1463_s0 + $0x50] sm:$0xff]  ;;  %v56_v29 = vld [vmem:[%s1463_s0 + $0x58] sm:$0xff] }
   0x9   :  { %1021 = vmatpush3.bf16.msra.mxu0 %v1018_v5  ;;  %1055 = vmatprep.subr.bf16.mxu1 %v1034_v18  ;;  %v57_v30 = vld [vmem:[%s1463_s0 + $0x60] sm:$0xff]  ;;  %v58_v31 = vld [vmem:[%s1463_s0 + $0x68] sm:$0xff]  ;;  %v59_v32 = vld [vmem:[%s1463_s0 + $0x70] sm:$0xff] }
   0xa   :  { %1023 = vmatprep.subr.bf16.mxu0 %v1022_v9  ;;  %v60_v33 = vld [vmem:[%s1463_s0 + $0x78] sm:$0xff]  ;;  %v523_v34 = vld [vmem:[%s1465_s6] sm:$0xff]  ;;  %v524_v35 = vld [vmem:[%s1465_s6 + $0x8] sm:$0xff] }
   0xb   :  { %v1038_v36 = vpack.c.bf16 %v524_v35, %v523_v34  ;;  %v30_v37 = vld [vmem:[%s1466_s1 + $0x8] sm:$0xff]  ;;  %v29_v38 = vld [vmem:[%s1466_s1] sm:$0xff]  ;;  %v32_v44 = vld [vmem:[%s1466_s1 + $0x18] sm:$0xff] }
   0xc   :  { %1057 = vmatpush3.bf16.msra.mxu1 %v1034_v18  ;;  %v1218_v41 = vld [vmem:[%s1467_s3] ss:$0 sm:$0xff]  ;;  %v31_v45 = vld [vmem:[%s1466_s1 + $0x10] sm:$0xff]  ;;  %v34_v52 = vld [vmem:[%s1466_s1 + $0x28] sm:$0xff] }
   0xd   :  { %1025 = vmatpush3.bf16.msra.mxu0 %v1022_v9  ;;  %1039 = vmatprep.subr.bf16.mxu1 %v1038_v36  ;;  %v33_v53 = vld [vmem:[%s1466_s1 + $0x20] sm:$0xff]  ;;  %v36_v60 = vld [vmem:[%s1466_s1 + $0x38] sm:$0xff]  ;;  %v35_v61 = vld [vmem:[%s1466_s1 + $0x30] sm:$0xff] }
   0xe   :  { %1027 = vmatprep.subr.bf16.mxu0 %v1026_v15  ;;  %v38_v4 = vld [vmem:[%s1466_s1 + $0x48] sm:$0xff]  ;;  %v525_v5 = vld [vmem:[%s1465_s6 + $0x10] sm:$0xff]  ;;  %v526_v6 = vld [vmem:[%s1465_s6 + $0x18] sm:$0xff] }
   0xf   :  { %v37_v7 = vld [vmem:[%s1466_s1 + $0x40] sm:$0xff]  ;;  %v1042_v13 = vpack.c.bf16 %v526_v6, %v525_v5  ;;  %v528_v17 = vld [vmem:[%s1465_s6 + $0x28] sm:$0xff]  ;;  %v44_v34 = vld [vmem:[%s1466_s1 + $0x78] sm:$0xff] }
  0x10   :  { %v43_v35 = vld [vmem:[%s1466_s1 + $0x70] sm:$0xff] }
  0x11   :  { %1029 = vmatpush3.bf16.msra.mxu0 %v1026_v15  ;;  %v40_v15 = vld [vmem:[%s1466_s1 + $0x58] sm:$0xff] }
  0x12   :  { %1031 = vmatprep.subr.bf16.mxu0 %v1030_v16 }
  0x14   :  { %919 = vmatmul.mubr.msk.f32.vlgmr.msra.gmra.mrb[0].mxu0 %vm69_vm0, %v46_v19 }
  0x15   :  { %921 = vmatprep.mubr.msk.f32.mxu0 %vm69_vm0, %v47_v20  ;;  %1033 = vmatpush3.bf16.msra.mxu0 %v1030_v16  ;;  %v527_v16 = vld [vmem:[%s1465_s6 + $0x20] sm:$0xff] }
  0x16   :  { %1035 = vmatprep.subr.bf16.mxu0 %v1034_v18 }
  0x18   :  { %922 = vmatmul.mubr.msk.f32.gmra.mrb[2].mxu0 %vm69_vm0, %v48_v21 }
  0x19   :  { %924 = vmatprep.mubr.msk.f32.mxu0 %vm69_vm0, %v49_v22  ;;  %1037 = vmatpush3.bf16.msra.mxu0 %v1034_v18  ;;  %v39_v18 = vld [vmem:[%s1466_s1 + $0x50] sm:$0xff] }
  0x1c   :  { %925 = vmatmul.mubr.msk.f32.gmra.mrb[4].mxu0 %vm69_vm0, %v50_v23 }
  0x1d   :  { %927 = vmatprep.mubr.msk.f32.mxu0 %vm69_vm0, %v51_v24  ;;  %v1046_v24 = vpack.c.bf16 %v528_v17, %v527_v16 }
  0x20   :  { %928 = vmatmul.mubr.msk.f32.gmra.mrb[6].mxu0 %vm69_vm0, %v52_v25 }
  0x21   :  { %930 = vmatprep.mubr.msk.f32.mxu0 %vm69_vm0, %v53_v26  ;;  %v42_v26 = vld [vmem:[%s1466_s1 + $0x68] sm:$0xff] }
  0x24   :  { %931 = vmatmul.mubr.msk.f32.gmra.mrb[8].mxu0 %vm69_vm0, %v54_v27  ;;  %v41_v27 = vld [vmem:[%s1466_s1 + $0x60] sm:$0xff] }
  0x25   :  { %933 = vmatprep.mubr.msk.f32.mxu0 %vm69_vm0, %v55_v28 }
  0x28   :  { %934 = vmatmul.mubr.msk.f32.gmra.mrb[10].mxu0 %vm69_vm0, %v56_v29 }
  0x29   :  { %936 = vmatprep.mubr.msk.f32.mxu0 %vm69_vm0, %v57_v30 }
  0x2c   :  { %937 = vmatmul.mubr.msk.f32.gmra.mrb[12].mxu0 %vm69_vm0, %v58_v31 }
  0x2d   :  { %939 = vmatprep.mubr.msk.f32.mxu0 %vm69_vm0, %v59_v32 }
  0x30   :  { %940 = vmatmul.mubr.msk.f32.gmra.mrb[14].mxu0 %vm69_vm0, %v60_v33 }
  0xe7   :  { %v920_v39 = vpop.f32.mrb[0].mxu0 }
  0xe8   :  { %v264_v40 = vadd.f32 %v920_v39, %v30_v37  ;;  %v184_v42 = vpop.f32.mrb[1].mxu0 }
  0xe9   :  { %v263_v43 = vadd.f32 %v184_v42, %v29_v38 }
  0xea   :  { %v1230_v48 = vadd.f32 %v1218_v41, %v264_v40 }
  0xeb   :  { %v1227_v46 = vadd.f32 %v1218_v41, %v263_v43  ;;  %v923_v47 = vpop.f32.mrb[2].mxu0 }
  0xec   :  { %v266_v49 = vadd.f32 %v923_v47, %v32_v44  ;;  %v194_v50 = vpop.f32.mrb[3].mxu0  ;;  %v530_v47 = vld [vmem:[%s1465_s6 + $0x38] sm:$0xff] }
  0xed   :  { %v265_v51 = vadd.f32 %v194_v50, %v31_v45  ;;  %950 = vmatprep.mubr.msk.f32.mxu0 %vm313_vm1, %v1227_v46  ;;  %v529_v45 = vld [vmem:[%s1465_s6 + $0x30] sm:$0xff] }
  0xee   :  { %951 = vmatmul.mubr.msk.f32.vlgmr.msra.gmra.mrb[16].mxu0 %vm313_vm1, %v1230_v48  ;;  %v1246_v56 = vadd.f32 %v1218_v41, %v266_v49  ;;  %v1050_v49 = vpack.c.bf16 %v530_v47, %v529_v45 }
  0xef   :  { %v1243_v54 = vadd.f32 %v1218_v41, %v265_v51  ;;  %v926_v55 = vpop.f32.mrb[4].mxu0 }
  0xf0   :  { %v268_v57 = vadd.f32 %v926_v55, %v34_v52  ;;  %v204_v58 = vpop.f32.mrb[5].mxu0 }
  0xf1   :  { %v267_v59 = vadd.f32 %v204_v58, %v33_v53  ;;  %953 = vmatprep.mubr.msk.f32.mxu0 %vm313_vm1, %v1243_v54 }
  0xf2   :  { %954 = vmatmul.mubr.msk.f32.gmra.mrb[18].mxu0 %vm313_vm1, %v1246_v56  ;;  %v1262_v0 = vadd.f32 %v1218_v41, %v268_v57 }
  0xf3   :  { %v1259_v62 = vadd.f32 %v1218_v41, %v267_v59  ;;  %v929_v63 = vpop.f32.mrb[6].mxu0 }
  0xf4   :  { %v270_v1 = vadd.f32 %v929_v63, %v36_v60  ;;  %v214_v2 = vpop.f32.mrb[7].mxu0 }
  0xf5   :  { %v269_v3 = vadd.f32 %v214_v2, %v35_v61  ;;  %956 = vmatprep.mubr.msk.f32.mxu0 %vm313_vm1, %v1259_v62 }
  0xf6   :  { %957 = vmatmul.mubr.msk.f32.gmra.mrb[20].mxu0 %vm313_vm1, %v1262_v0  ;;  %v1284_v10 = vadd.f32 %v1218_v41, %v270_v1 }
  0xf7   :  { %v932_v8 = vpop.f32.mrb[8].mxu0  ;;  %v1281_v9 = vadd.f32 %v1218_v41, %v269_v3 }
  0xf8   :  { %v272_v11 = vadd.f32 %v932_v8, %v38_v4  ;;  %v224_v12 = vpop.f32.mrb[9].mxu0 }
  0xf9   :  { %v271_v14 = vadd.f32 %v224_v12, %v37_v7  ;;  %959 = vmatprep.mubr.msk.f32.mxu1 %vm313_vm1, %v1281_v9 }
  0xfa   :  { %960 = vmatmul.mubr.msk.f32.vlgmr.msra.gmra.mrb[0].mxu1 %vm313_vm1, %v1284_v10  ;;  %v1306_v21 = vadd.f32 %v1218_v41, %v272_v11 }
  0xfb   :  { %v1303_v19 = vadd.f32 %v1218_v41, %v271_v14  ;;  %v935_v20 = vpop.f32.mrb[10].mxu0  ;;  %1041 = vmatpush3.bf16.msra.mxu1 %v1038_v36 }
  0xfc   :  { %v274_v22 = vadd.f32 %v935_v20, %v40_v15  ;;  %v234_v23 = vpop.f32.mrb[11].mxu0  ;;  %1043 = vmatprep.subr.bf16.mxu1 %v1042_v13 }
  0xfd   :  { %v273_v25 = vadd.f32 %v234_v23, %v39_v18  ;;  %962 = vmatprep.mubr.msk.f32.mxu1 %vm313_vm1, %v1303_v19 }
  0xfe   :  { %963 = vmatmul.mubr.msk.f32.gmra.mrb[2].mxu1 %vm313_vm1, %v1306_v21  ;;  %v1322_v30 = vadd.f32 %v1218_v41, %v274_v22 }
  0xff   :  { %v1319_v28 = vadd.f32 %v1218_v41, %v273_v25  ;;  %v938_v29 = vpop.f32.mrb[12].mxu0  ;;  %1045 = vmatpush3.bf16.msra.mxu1 %v1042_v13 }
 0x100   :  { %v276_v31 = vadd.f32 %v938_v29, %v42_v26  ;;  %v244_v32 = vpop.f32.mrb[13].mxu0  ;;  %1047 = vmatprep.subr.bf16.mxu1 %v1046_v24 }
 0x101   :  { %v275_v33 = vadd.f32 %v244_v32, %v41_v27  ;;  %965 = vmatprep.mubr.msk.f32.mxu1 %vm313_vm1, %v1319_v28 }
 0x102   :  { %966 = vmatmul.mubr.msk.f32.gmra.mrb[4].mxu1 %vm313_vm1, %v1322_v30  ;;  %v1338_v38 = vadd.f32 %v1218_v41, %v276_v31 }
 0x103   :  { %v1335_v36 = vadd.f32 %v1218_v41, %v275_v33  ;;  %v941_v37 = vpop.f32.mrb[14].mxu0  ;;  %1049 = vmatpush3.bf16.msra.mxu1 %v1046_v24 }
 0x104   :  { %v278_v39 = vadd.f32 %v941_v37, %v44_v34  ;;  %v254_v40 = vpop.f32.mrb[15].mxu0  ;;  %1051 = vmatprep.subr.bf16.mxu1 %v1050_v49 }
 0x105   :  { %v277_v42 = vadd.f32 %v254_v40, %v43_v35  ;;  %968 = vmatprep.mubr.msk.f32.mxu1 %vm313_vm1, %v1335_v36 }
 0x106   :  { %969 = vmatmul.mubr.msk.f32.gmra.mrb[6].mxu1 %vm313_vm1, %v1338_v38  ;;  %v1348_v44 = vadd.f32 %v1218_v41, %v278_v39 }
 0x107   :  { %v1345_v43 = vadd.f32 %v1218_v41, %v277_v42  ;;  %1053 = vmatpush3.bf16.msra.mxu1 %v1050_v49  ;;  %v800_v41 = vld [vmem:[%s1468_s5] ss:$0 sm:$0xff] }
 0x109   :  { %971 = vmatprep.mubr.msk.f32.mxu1 %vm313_vm1, %v1345_v43 }
 0x10a   :  { %972 = vmatmul.mubr.msk.f32.gmra.mrb[8].mxu1 %vm313_vm1, %v1348_v44 }
 0x1c1   :  { %v952_v50 = vpop.f32.mrb[16].mxu0 }
 0x1c2   :  { %v434_v51 = vadd.f32 %v952_v50, %v800_v41  ;;  %v428_v52 = vpop.f32.mrb[17].mxu0 }
 0x1c3   :  { %v429_v53 = vadd.f32 %v800_v41, %v428_v52  ;;  %v833_v52 = vld [vmem:[%s1469_s7] ss:$0 sm:$0xff] }
 0x1c4   :  { %v508_v58 = vmax.f32 %v434_v51, 0.0 }
 0x1c5   :  { %v507_v55 = vmax.f32 %v429_v53, 0.0  ;;  %v955_v57 = vpop.f32.mrb[18].mxu0 }
 0x1c6   :  { %v444_v59 = vadd.f32 %v955_v57, %v800_v41  ;;  %v438_v60 = vpop.f32.mrb[19].mxu0 }
 0x1c7   :  { %v439_v61 = vadd.f32 %v800_v41, %v438_v60  ;;  %990 = vmatprep.mubr.msk.f32.mxu1 %vm69_vm0, %v507_v55 }
 0x1c8   :  { %991 = vmatmul.mubr.msk.f32.vlgmr.msra.gmra.mrb[10].mxu1 %vm69_vm0, %v508_v58  ;;  %v510_v2 = vmax.f32 %v444_v59, 0.0 }
 0x1c9   :  { %v509_v63 = vmax.f32 %v439_v61, 0.0  ;;  %v958_v1 = vpop.f32.mrb[20].mxu0 }
 0x1ca   :  { %v454_v3 = vadd.f32 %v958_v1, %v800_v41  ;;  %v448_v4 = vpop.f32.mrb[21].mxu0 }
 0x1cb   :  { %v449_v5 = vadd.f32 %v800_v41, %v448_v4  ;;  %993 = vmatprep.mubr.msk.f32.mxu1 %vm69_vm0, %v509_v63 }
 0x1cc   :  { %994 = vmatmul.mubr.msk.f32.gmra.mrb[12].mxu1 %vm69_vm0, %v510_v2  ;;  %v512_v8 = vmax.f32 %v454_v3, 0.0 }
 0x1cd   :  { %v511_v6 = vmax.f32 %v449_v5, 0.0  ;;  %v961_v7 = vpop.f32.mrb[0].mxu1 }
 0x1ce   :  { %v464_v11 = vadd.f32 %v961_v7, %v800_v41  ;;  %v458_v12 = vpop.f32.mrb[1].mxu1 }
 0x1cf   :  { %v459_v13 = vadd.f32 %v800_v41, %v458_v12  ;;  %996 = vmatprep.mubr.msk.f32.mxu1 %vm69_vm0, %v511_v6 }
 0x1d0   :  { %997 = vmatmul.mubr.msk.f32.gmra.mrb[14].mxu1 %vm69_vm0, %v512_v8  ;;  %v514_v16 = vmax.f32 %v464_v11, 0.0 }
 0x1d1   :  { %v513_v14 = vmax.f32 %v459_v13, 0.0  ;;  %v964_v15 = vpop.f32.mrb[2].mxu1 }
 0x1d2   :  { %v474_v17 = vadd.f32 %v964_v15, %v800_v41  ;;  %v468_v18 = vpop.f32.mrb[3].mxu1 }
 0x1d3   :  { %v469_v20 = vadd.f32 %v800_v41, %v468_v18  ;;  %999 = vmatprep.mubr.msk.f32.mxu1 %vm69_vm0, %v513_v14 }
 0x1d4   :  { %1000 = vmatmul.mubr.msk.f32.gmra.mrb[16].mxu1 %vm69_vm0, %v514_v16  ;;  %v516_v24 = vmax.f32 %v474_v17, 0.0 }
 0x1d5   :  { %v515_v22 = vmax.f32 %v469_v20, 0.0  ;;  %v967_v23 = vpop.f32.mrb[4].mxu1 }
 0x1d6   :  { %v484_v25 = vadd.f32 %v967_v23, %v800_v41  ;;  %v478_v26 = vpop.f32.mrb[5].mxu1 }
 0x1d7   :  { %v479_v27 = vadd.f32 %v800_v41, %v478_v26  ;;  %1002 = vmatprep.mubr.msk.f32.mxu1 %vm69_vm0, %v515_v22 }
 0x1d8   :  { %1003 = vmatmul.mubr.msk.f32.gmra.mrb[18].mxu1 %vm69_vm0, %v516_v24  ;;  %v518_v32 = vmax.f32 %v484_v25, 0.0 }
 0x1d9   :  { %v517_v29 = vmax.f32 %v479_v27, 0.0  ;;  %v970_v31 = vpop.f32.mrb[6].mxu1 }
 0x1da   :  { %v494_v33 = vadd.f32 %v970_v31, %v800_v41  ;;  %v488_v34 = vpop.f32.mrb[7].mxu1 }
 0x1db   :  { %v489_v35 = vadd.f32 %v800_v41, %v488_v34  ;;  %1005 = vmatprep.mubr.msk.f32.mxu1 %vm69_vm0, %v517_v29 }
 0x1dc   :  { %1006 = vmatmul.mubr.msk.f32.gmra.mrb[20].mxu1 %vm69_vm0, %v518_v32  ;;  %v520_v40 = vmax.f32 %v494_v33, 0.0 }
 0x1dd   :  { %v519_v37 = vmax.f32 %v489_v35, 0.0  ;;  %v973_v39 = vpop.f32.mrb[8].mxu1 }
 0x1de   :  { %v504_v42 = vadd.f32 %v973_v39, %v800_v41  ;;  %v498_v45 = vpop.f32.mrb[9].mxu1 }
 0x1df   :  { %v499_v47 = vadd.f32 %v800_v41, %v498_v45  ;;  %1008 = vmatprep.mubr.msk.f32.mxu1 %vm69_vm0, %v519_v37 }
 0x1e0   :  { %1009 = vmatmul.mubr.msk.f32.gmra.mrb[22].mxu1 %vm69_vm0, %v520_v40  ;;  %v522_v50 = vmax.f32 %v504_v42, 0.0 }
 0x1e1   :  { %v521_v49 = vmax.f32 %v499_v47, 0.0 }
 0x1e3   :  { %1011 = vmatprep.mubr.msk.f32.mxu1 %vm69_vm0, %v521_v49 }
 0x1e4   :  { %1012 = vmatmul.mubr.msk.f32.gmra.mrb[24].mxu1 %vm69_vm0, %v522_v50 }
 0x29b   :  { %v992_v51 = vpop.f32.mrb[10].mxu1 }
 0x29c   :  { %v725_v53 = vadd.f32 %v992_v51, %v1230_v48  ;;  %v645_v55 = vpop.f32.mrb[11].mxu1 }
 0x29d   :  { %v724_v41 = vadd.f32 %v645_v55, %v1227_v46 }
 0x29e   :  { %v748_v57 = vadd.f32 %v833_v52, %v725_v53 }
 0x29f   :  { %v747_v58 = vadd.f32 %v833_v52, %v724_v41  ;;  %v995_v59 = vpop.f32.mrb[12].mxu1 }
 0x2a0   :  { %764 = vst.msk [vmem:[%s1470_s8 + $0x8] sm:$0xff] %vm313_vm1, %v748_v57  ;;  %v727_v60 = vadd.f32 %v995_v59, %v1246_v56  ;;  %v655_v61 = vpop.f32.mrb[13].mxu1 }
 0x2a1   :  { %763 = vst.msk [vmem:[%s1470_s8] sm:$0xff] %vm313_vm1, %v747_v58  ;;  %v726_v48 = vadd.f32 %v655_v61, %v1243_v54 }
 0x2a2   :  { %v750_v63 = vadd.f32 %v833_v52, %v727_v60 }
 0x2a3   :  { %v749_v46 = vadd.f32 %v833_v52, %v726_v48  ;;  %v998_v1 = vpop.f32.mrb[14].mxu1 }
 0x2a4   :  { %766 = vst.msk [vmem:[%s1470_s8 + $0x18] sm:$0xff] %vm313_vm1, %v750_v63  ;;  %v729_v2 = vadd.f32 %v998_v1, %v1262_v0  ;;  %v665_v3 = vpop.f32.mrb[15].mxu1 }
 0x2a5   :  { %765 = vst.msk [vmem:[%s1470_s8 + $0x10] sm:$0xff] %vm313_vm1, %v749_v46  ;;  %v728_v56 = vadd.f32 %v665_v3, %v1259_v62 }
 0x2a6   :  { %v752_v4 = vadd.f32 %v833_v52, %v729_v2 }
 0x2a7   :  { %v751_v54 = vadd.f32 %v833_v52, %v728_v56  ;;  %v1001_v5 = vpop.f32.mrb[16].mxu1 }
 0x2a8   :  { %768 = vst.msk [vmem:[%s1470_s8 + $0x28] sm:$0xff] %vm313_vm1, %v752_v4  ;;  %v731_v6 = vadd.f32 %v1001_v5, %v1284_v10  ;;  %v675_v7 = vpop.f32.mrb[17].mxu1 }
 0x2a9   :  { %767 = vst.msk [vmem:[%s1470_s8 + $0x20] sm:$0xff] %vm313_vm1, %v751_v54  ;;  %v730_v0 = vadd.f32 %v675_v7, %v1281_v9 }
 0x2aa   :  { %v754_v8 = vadd.f32 %v833_v52, %v731_v6 }
 0x2ab   :  { %v753_v62 = vadd.f32 %v833_v52, %v730_v0  ;;  %v1004_v11 = vpop.f32.mrb[18].mxu1 }
 0x2ac   :  { %770 = vst.msk [vmem:[%s1470_s8 + $0x38] sm:$0xff] %vm313_vm1, %v754_v8  ;;  %v733_v12 = vadd.f32 %v1004_v11, %v1306_v21  ;;  %v685_v13 = vpop.f32.mrb[19].mxu1 }
 0x2ad   :  { %769 = vst.msk [vmem:[%s1470_s8 + $0x30] sm:$0xff] %vm313_vm1, %v753_v62  ;;  %v732_v10 = vadd.f32 %v685_v13, %v1303_v19 }
 0x2ae   :  { %v756_v14 = vadd.f32 %v833_v52, %v733_v12 }
 0x2af   :  { %v755_v9 = vadd.f32 %v833_v52, %v732_v10  ;;  %v1007_v15 = vpop.f32.mrb[20].mxu1 }
 0x2b0   :  { %772 = vst.msk [vmem:[%s1470_s8 + $0x48] sm:$0xff] %vm313_vm1, %v756_v14  ;;  %v735_v16 = vadd.f32 %v1007_v15, %v1322_v30  ;;  %v695_v17 = vpop.f32.mrb[21].mxu1 }
 0x2b1   :  { %771 = vst.msk [vmem:[%s1470_s8 + $0x40] sm:$0xff] %vm313_vm1, %v755_v9  ;;  %v734_v21 = vadd.f32 %v695_v17, %v1319_v28 }
 0x2b2   :  { %v758_v18 = vadd.f32 %v833_v52, %v735_v16 }
 0x2b3   :  { %v757_v19 = vadd.f32 %v833_v52, %v734_v21  ;;  %v1010_v20 = vpop.f32.mrb[22].mxu1 }
 0x2b4   :  { %774 = vst.msk [vmem:[%s1470_s8 + $0x58] sm:$0xff] %vm313_vm1, %v758_v18  ;;  %v737_v22 = vadd.f32 %v1010_v20, %v1338_v38  ;;  %v705_v23 = vpop.f32.mrb[23].mxu1 }
 0x2b5   :  { %773 = vst.msk [vmem:[%s1470_s8 + $0x50] sm:$0xff] %vm313_vm1, %v757_v19  ;;  %v736_v30 = vadd.f32 %v705_v23, %v1335_v36 }
 0x2b6   :  { %v760_v24 = vadd.f32 %v833_v52, %v737_v22 }
 0x2b7   :  { %v759_v28 = vadd.f32 %v833_v52, %v736_v30  ;;  %v1013_v25 = vpop.f32.mrb[24].mxu1 }
 0x2b8   :  { %776 = vst.msk [vmem:[%s1470_s8 + $0x68] sm:$0xff] %vm313_vm1, %v760_v24  ;;  %v739_v26 = vadd.f32 %v1013_v25, %v1348_v44  ;;  %v715_v27 = vpop.f32.mrb[25].mxu1 }
 0x2b9   :  { %775 = vst.msk [vmem:[%s1470_s8 + $0x60] sm:$0xff] %vm313_vm1, %v759_v28  ;;  %v738_v38 = vadd.f32 %v715_v27, %v1345_v43 }
 0x2ba   :  { %v762_v29 = vadd.f32 %v833_v52, %v739_v26 }
 0x2bb   :  { %v761_v36 = vadd.f32 %v833_v52, %v738_v38 }
 0x2bc   :  { %778 = vst.msk [vmem:[%s1470_s8 + $0x78] sm:$0xff] %vm313_vm1, %v762_v29 }
 0x2bd   :  { %777 = vst.msk [vmem:[%s1470_s8 + $0x70] sm:$0xff] %vm313_vm1, %v761_v36 }

// kernel: reformer_forward_pallas.29
= control target key start
LH: loop header
LB: loop body
LE: loop exit
PB: predicated region body
PF: predicated region fallthrough
CT: control target
= control target key end

     0   :  { %vm126_vm0 = vcmask 523264   ;;  %s337_s1 = inlined_call_operand.vmem [shape: f32[128,64], index: 1, kind: input, shape index: {}]   ;;  %s338_s0 = inlined_call_operand.vmem [shape: f32[32,128], index: 0, kind: input, shape index: {}]   ;;  %s339_s2 = inlined_call_operand.vmem [shape: f32[1,64], index: 2, kind: input, shape index: {}]   ;;  %s340_s3 = inlined_call_operand.vmem [shape: f32[32,64], index: 3, kind: output, shape index: {}]  }
   0x1   :  { %v18_v0 = vld [vmem:[%s337_s1] sm:$0xff]  ;;  %v19_v1 = vld [vmem:[%s337_s1 + $0x8] sm:$0xff]  ;;  %v20_v2 = vld [vmem:[%s337_s1 + $0x10] sm:$0xff] }
   0x2   :  { %v194_v3 = vpack.c.bf16 %v19_v1, %v18_v0  ;;  %v21_v4 = vld [vmem:[%s337_s1 + $0x18] sm:$0xff]  ;;  %v22_v6 = vld [vmem:[%s337_s1 + $0x20] sm:$0xff]  ;;  %v23_v7 = vld [vmem:[%s337_s1 + $0x28] sm:$0xff] }
   0x3   :  { %v198_v5 = vpack.c.bf16 %v21_v4, %v20_v2  ;;  %v202_v8 = vpack.c.bf16 %v23_v7, %v22_v6  ;;  %v14_v9 = vld [vmem:[%s338_s0] sm:$0xff]  ;;  %v16_v10 = vld [vmem:[%s338_s0 + $0x10] sm:$0xff]  ;;  %v25_v12 = vld [vmem:[%s337_s1 + $0x38] sm:$0xff] }
   0x4   :  { %195 = vmatprep.subr.bf16.mxu0 %v194_v3  ;;  %226 = vmatprep.subr.bf16.mxu1 %v194_v3  ;;  %v24_v11 = vld [vmem:[%s337_s1 + $0x30] sm:$0xff]  ;;  %v26_v14 = vld [vmem:[%s337_s1 + $0x40] sm:$0xff]  ;;  %v27_v15 = vld [vmem:[%s337_s1 + $0x48] sm:$0xff] }
   0x5   :  { %197 = vmatpush3.bf16.msra.mxu0 %v194_v3  ;;  %234 = vmatpush3.bf16.msra.mxu1 %v194_v3  ;;  %v206_v13 = vpack.c.bf16 %v25_v12, %v24_v11  ;;  %v210_v16 = vpack.c.bf16 %v27_v15, %v26_v14  ;;  %v28_v17 = vld [vmem:[%s337_s1 + $0x50] sm:$0xff]  ;;  %v29_v18 = vld [vmem:[%s337_s1 + $0x58] sm:$0xff]  ;;  %v30_v20 = vld [vmem:[%s337_s1 + $0x60] sm:$0xff] }
   0x6   :  { %199 = vmatprep.subr.bf16.mxu0 %v198_v5  ;;  %227 = vmatprep.subr.bf16.mxu1 %v198_v5  ;;  %v214_v19 = vpack.c.bf16 %v29_v18, %v28_v17  ;;  %v31_v21 = vld [vmem:[%s337_s1 + $0x68] sm:$0xff]  ;;  %v32_v23 = vld [vmem:[%s337_s1 + $0x70] sm:$0xff]  ;;  %v33_v24 = vld [vmem:[%s337_s1 + $0x78] sm:$0xff] }
   0x7   :  { %188 = vmatprep.mubr.f32.mxu0 %v14_v9  ;;  %191 = vmatprep.mubr.f32.mxu1 %v16_v10  ;;  %v218_v22 = vpack.c.bf16 %v31_v21, %v30_v20  ;;  %v222_v25 = vpack.c.bf16 %v33_v24, %v32_v23  ;;  %v15_v26 = vld [vmem:[%s338_s0 + $0x8] sm:$0xff]  ;;  %v17_v27 = vld [vmem:[%s338_s0 + $0x18] sm:$0xff]  ;;  %v135_v28 = vld [vmem:[%s339_s2] ss:$0 sm:$0xff] }
   0x9   :  { %201 = vmatpush3.bf16.msra.mxu0 %v198_v5  ;;  %235 = vmatpush3.bf16.msra.mxu1 %v198_v5 }
   0xa   :  { %203 = vmatprep.subr.bf16.mxu0 %v202_v8  ;;  %228 = vmatprep.subr.bf16.mxu1 %v202_v8 }
   0xd   :  { %205 = vmatpush3.bf16.msra.mxu0 %v202_v8  ;;  %236 = vmatpush3.bf16.msra.mxu1 %v202_v8 }
   0xe   :  { %207 = vmatprep.subr.bf16.mxu0 %v206_v13  ;;  %229 = vmatprep.subr.bf16.mxu1 %v206_v13 }
  0x11   :  { %209 = vmatpush3.bf16.msra.mxu0 %v206_v13  ;;  %237 = vmatpush3.bf16.msra.mxu1 %v206_v13 }
  0x12   :  { %211 = vmatprep.subr.bf16.mxu0 %v210_v16  ;;  %230 = vmatprep.subr.bf16.mxu1 %v210_v16 }
  0x15   :  { %213 = vmatpush3.bf16.msra.mxu0 %v210_v16  ;;  %238 = vmatpush3.bf16.msra.mxu1 %v210_v16 }
  0x16   :  { %215 = vmatprep.subr.bf16.mxu0 %v214_v19  ;;  %231 = vmatprep.subr.bf16.mxu1 %v214_v19 }
  0x19   :  { %217 = vmatpush3.bf16.msra.mxu0 %v214_v19  ;;  %239 = vmatpush3.bf16.msra.mxu1 %v214_v19 }
  0x1a   :  { %219 = vmatprep.subr.bf16.mxu0 %v218_v22  ;;  %232 = vmatprep.subr.bf16.mxu1 %v218_v22 }
  0x1d   :  { %221 = vmatpush3.bf16.msra.mxu0 %v218_v22  ;;  %240 = vmatpush3.bf16.msra.mxu1 %v218_v22 }
  0x1e   :  { %223 = vmatprep.subr.bf16.mxu0 %v222_v25  ;;  %233 = vmatprep.subr.bf16.mxu1 %v222_v25 }
  0x21   :  { %225 = vmatpush3.bf16.msra.mxu0 %v222_v25  ;;  %241 = vmatpush3.bf16.msra.mxu1 %v222_v25 }
  0x24   :  { %189 = vmatmul.mubr.f32.vlgmr.msra.gmra.mrb[0].mxu0 %v15_v26  ;;  %192 = vmatmul.mubr.f32.vlgmr.msra.gmra.mrb[0].mxu1 %v17_v27 }
  0xf7   :  { %v190_v29 = vpop.f32.mrb[0].mxu0  ;;  %v193_v30 = vpop.f32.mrb[0].mxu1 }
  0xf8   :  { %v113_v31 = vadd.f32 %v190_v29, %v135_v28  ;;  %v123_v32 = vadd.f32 %v193_v30, %v135_v28  ;;  %v107_v33 = vpop.f32.mrb[1].mxu0  ;;  %v117_v34 = vpop.f32.mrb[1].mxu1 }
  0xf9   :  { %v108_v35 = vadd.f32 %v135_v28, %v107_v33  ;;  %v118_v36 = vadd.f32 %v135_v28, %v117_v34 }
  0xfa   :  { %128 = vst.msk [vmem:[%s340_s3 + $0x8] sm:$0xff] %vm126_vm0, %v113_v31  ;;  %130 = vst.msk [vmem:[%s340_s3 + $0x18] sm:$0xff] %vm126_vm0, %v123_v32 }
  0xfb   :  { %127 = vst.msk [vmem:[%s340_s3] sm:$0xff] %vm126_vm0, %v108_v35  ;;  %129 = vst.msk [vmem:[%s340_s3 + $0x10] sm:$0xff] %vm126_vm0, %v118_v36 }

// kernel: reformer_forward_pallas.30
= control target key start
LH: loop header
LB: loop body
LE: loop exit
PB: predicated region body
PF: predicated region fallthrough
CT: control target
= control target key end

     0   :  { %vm33_vm0 = vcmask 523264   ;;  %s281_s1 = inlined_call_operand.vmem [shape: f32[64,128], index: 1, kind: input, shape index: {}]   ;;  %s282_s0 = inlined_call_operand.vmem [shape: f32[32,64], index: 0, kind: input, shape index: {}]   ;;  %s283_s2 = inlined_call_operand.vmem [shape: f32[1,128], index: 2, kind: input, shape index: {}]   ;;  %s284_s3 = inlined_call_operand.vmem [shape: f32[32,128], index: 3, kind: output, shape index: {}]  }
   0x1   :  { %v18_v0 = vld [vmem:[%s281_s1] sm:$0xff]  ;;  %v19_v1 = vld [vmem:[%s281_s1 + $0x8] sm:$0xff]  ;;  %v20_v2 = vld [vmem:[%s281_s1 + $0x10] sm:$0xff] }
   0x2   :  { %v182_v3 = vpack.c.bf16 %v19_v1, %v18_v0  ;;  %v21_v4 = vld [vmem:[%s281_s1 + $0x18] sm:$0xff]  ;;  %v22_v6 = vld [vmem:[%s281_s1 + $0x20] sm:$0xff]  ;;  %v23_v7 = vld [vmem:[%s281_s1 + $0x28] sm:$0xff] }
   0x3   :  { %v186_v5 = vpack.c.bf16 %v21_v4, %v20_v2  ;;  %v14_v8 = vld [vmem:[%s282_s0] sm:$0xff]  ;;  %v16_v9 = vld [vmem:[%s282_s0 + $0x10] sm:$0xff]  ;;  %v190_v10 = vpack.c.bf16 %v23_v7, %v22_v6  ;;  %v25_v12 = vld [vmem:[%s281_s1 + $0x38] sm:$0xff] }
   0x4   :  { %183 = vmatprep.subr.bf16.mxu0 %v182_v3  ;;  %198 = vmatprep.subr.bf16.mxu1 %v182_v3  ;;  %v24_v11 = vld [vmem:[%s281_s1 + $0x30] sm:$0xff]  ;;  %v15_v14 = vld [vmem:[%s282_s0 + $0x8] sm:$0xff]  ;;  %v17_v15 = vld [vmem:[%s282_s0 + $0x18] sm:$0xff] }
   0x5   :  { %185 = vmatpush3.bf16.msra.mxu0 %v182_v3  ;;  %202 = vmatpush3.bf16.msra.mxu1 %v182_v3  ;;  %v194_v13 = vpack.c.bf16 %v25_v12, %v24_v11  ;;  %v143_v16 = vld [vmem:[%s283_s2] ss:$0 sm:$0xff] }
   0x6   :  { %187 = vmatprep.subr.bf16.mxu0 %v186_v5  ;;  %199 = vmatprep.subr.bf16.mxu1 %v186_v5 }
   0x7   :  { %176 = vmatprep.mubr.msk.f32.mxu0 %vm33_vm0, %v14_v8  ;;  %179 = vmatprep.mubr.msk.f32.mxu1 %vm33_vm0, %v16_v9 }
   0x9   :  { %189 = vmatpush3.bf16.msra.mxu0 %v186_v5  ;;  %203 = vmatpush3.bf16.msra.mxu1 %v186_v5 }
   0xa   :  { %191 = vmatprep.subr.bf16.mxu0 %v190_v10  ;;  %200 = vmatprep.subr.bf16.mxu1 %v190_v10 }
   0xd   :  { %193 = vmatpush3.bf16.msra.mxu0 %v190_v10  ;;  %204 = vmatpush3.bf16.msra.mxu1 %v190_v10 }
   0xe   :  { %195 = vmatprep.subr.bf16.mxu0 %v194_v13  ;;  %201 = vmatprep.subr.bf16.mxu1 %v194_v13 }
  0x11   :  { %197 = vmatpush3.bf16.msra.mxu0 %v194_v13  ;;  %205 = vmatpush3.bf16.msra.mxu1 %v194_v13 }
  0x14   :  { %177 = vmatmul.mubr.msk.f32.vlgmr.msra.gmra.mrb[0].mxu0 %vm33_vm0, %v15_v14  ;;  %180 = vmatmul.mubr.msk.f32.vlgmr.msra.gmra.mrb[0].mxu1 %vm33_vm0, %v17_v15 }
  0xe7   :  { %v178_v17 = vpop.f32.mrb[0].mxu0  ;;  %v181_v18 = vpop.f32.mrb[0].mxu1 }
  0xe8   :  { %v118_v19 = vadd.f32 %v178_v17, %v143_v16  ;;  %v128_v20 = vadd.f32 %v181_v18, %v143_v16  ;;  %v112_v21 = vpop.f32.mrb[1].mxu0  ;;  %v122_v22 = vpop.f32.mrb[1].mxu1 }
  0xe9   :  { %v113_v23 = vadd.f32 %v143_v16, %v112_v21  ;;  %v123_v24 = vadd.f32 %v143_v16, %v122_v22 }
  0xea   :  { %v132_v25 = vmax.f32 %v118_v19, 0.0  ;;  %v134_v26 = vmax.f32 %v128_v20, 0.0 }
  0xeb   :  { %v131_v27 = vmax.f32 %v113_v23, 0.0  ;;  %v133_v28 = vmax.f32 %v123_v24, 0.0 }
  0xec   :  { %136 = vst [vmem:[%s284_s3 + $0x8] sm:$0xff] %v132_v25  ;;  %138 = vst [vmem:[%s284_s3 + $0x18] sm:$0xff] %v134_v26 }
  0xed   :  { %135 = vst [vmem:[%s284_s3] sm:$0xff] %v131_v27  ;;  %137 = vst [vmem:[%s284_s3 + $0x10] sm:$0xff] %v133_v28 }

// kernel: reformer_forward_pallas.32
= control target key start
LH: loop header
LB: loop body
LE: loop exit
PB: predicated region body
PF: predicated region fallthrough
CT: control target
= control target key end

     0   :  { %vm168_vm0 = vcmask 523264   ;;  %s861_s2 = inlined_call_operand.vmem [shape: f32[128,64], index: 2, kind: input, shape index: {}]   ;;  %s862_s0 = inlined_call_operand.vmem [shape: f32[32,128], index: 0, kind: input, shape index: {}]   ;;  %s863_s4 = inlined_call_operand.vmem [shape: f32[64,128], index: 4, kind: input, shape index: {}]   ;;  %s864_s6 = inlined_call_operand.vmem [shape: f32[128,64], index: 6, kind: input, shape index: {}]   ;;  %s865_s1 = inlined_call_operand.vmem [shape: f32[32,64], index: 1, kind: input, shape index: {}]   ;;  %s866_s3 = inlined_call_operand.vmem [shape: f32[1,64], index: 3, kind: input, shape index: {}]   ;;  %s867_s5 = inlined_call_operand.vmem [shape: f32[1,128], index: 5, kind: input, shape index: {}]   ;;  %s868_s7 = inlined_call_operand.vmem [shape: f32[1,64], index: 7, kind: input, shape index: {}]   ;;  %s869_s8 = inlined_call_operand.vmem [shape: f32[32,64], index: 8, kind: output, shape index: {}]  }
   0x1   :  { %v37_v0 = vld [vmem:[%s861_s2] sm:$0xff]  ;;  %v38_v1 = vld [vmem:[%s861_s2 + $0x8] sm:$0xff]  ;;  %v39_v2 = vld [vmem:[%s861_s2 + $0x10] sm:$0xff] }
   0x2   :  { %v551_v3 = vpack.c.bf16 %v38_v1, %v37_v0  ;;  %v40_v4 = vld [vmem:[%s861_s2 + $0x18] sm:$0xff]  ;;  %v41_v6 = vld [vmem:[%s861_s2 + $0x20] sm:$0xff]  ;;  %v42_v7 = vld [vmem:[%s861_s2 + $0x28] sm:$0xff] }
   0x3   :  { %v555_v5 = vpack.c.bf16 %v40_v4, %v39_v2  ;;  %v559_v8 = vpack.c.bf16 %v42_v7, %v41_v6  ;;  %v33_v9 = vld [vmem:[%s862_s0] sm:$0xff]  ;;  %v43_v10 = vld [vmem:[%s861_s2 + $0x30] sm:$0xff]  ;;  %v44_v11 = vld [vmem:[%s861_s2 + $0x38] sm:$0xff] }
   0x4   :  { %552 = vmatprep.subr.bf16.mxu0 %v551_v3  ;;  %485 = vmatprep.mubr.f32.mxu0 %v33_v9  ;;  %v153_v12 = vld [vmem:[%s863_s4] sm:$0xff]  ;;  %v154_v13 = vld [vmem:[%s863_s4 + $0x8] sm:$0xff]  ;;  %v155_v14 = vld [vmem:[%s863_s4 + $0x10] sm:$0xff]  ;;  %v563_v18 = vpack.c.bf16 %v44_v11, %v43_v10 }
   0x5   :  { %554 = vmatpush3.bf16.msra.mxu0 %v551_v3  ;;  %v156_v15 = vld [vmem:[%s863_s4 + $0x18] sm:$0xff]  ;;  %v583_v16 = vpack.c.bf16 %v154_v13, %v153_v12  ;;  %v157_v19 = vld [vmem:[%s863_s4 + $0x20] sm:$0xff]  ;;  %v158_v20 = vld [vmem:[%s863_s4 + $0x28] sm:$0xff] }
   0x6   :  { %556 = vmatprep.subr.bf16.mxu0 %v555_v5  ;;  %v587_v17 = vpack.c.bf16 %v156_v15, %v155_v14  ;;  %v45_v21 = vld [vmem:[%s861_s2 + $0x40] sm:$0xff]  ;;  %v46_v22 = vld [vmem:[%s861_s2 + $0x48] sm:$0xff]  ;;  %v591_v23 = vpack.c.bf16 %v158_v20, %v157_v19  ;;  %v47_v25 = vld [vmem:[%s861_s2 + $0x50] sm:$0xff] }
   0x7   :  { %584 = vmatprep.subr.bf16.mxu1 %v583_v16  ;;  %v567_v24 = vpack.c.bf16 %v46_v22, %v45_v21  ;;  %v48_v26 = vld [vmem:[%s861_s2 + $0x58] sm:$0xff]  ;;  %v49_v28 = vld [vmem:[%s861_s2 + $0x60] sm:$0xff]  ;;  %v50_v29 = vld [vmem:[%s861_s2 + $0x68] sm:$0xff] }
   0x8   :  { %586 = vmatpush3.bf16.msra.mxu1 %v583_v16  ;;  %v571_v27 = vpack.c.bf16 %v48_v26, %v47_v25  ;;  %v575_v30 = vpack.c.bf16 %v50_v29, %v49_v28  ;;  %v51_v31 = vld [vmem:[%s861_s2 + $0x70] sm:$0xff]  ;;  %v52_v32 = vld [vmem:[%s861_s2 + $0x78] sm:$0xff]  ;;  %v34_v34 = vld [vmem:[%s862_s0 + $0x8] sm:$0xff] }
   0x9   :  { %558 = vmatpush3.bf16.msra.mxu0 %v555_v5  ;;  %588 = vmatprep.subr.bf16.mxu1 %v587_v17  ;;  %v579_v33 = vpack.c.bf16 %v52_v32, %v51_v31  ;;  %v35_v35 = vld [vmem:[%s862_s0 + $0x10] sm:$0xff]  ;;  %v36_v36 = vld [vmem:[%s862_s0 + $0x18] sm:$0xff]  ;;  %v270_v40 = vld [vmem:[%s864_s6] sm:$0xff] }
   0xa   :  { %560 = vmatprep.subr.bf16.mxu0 %v559_v8  ;;  %v159_v37 = vld [vmem:[%s863_s4 + $0x30] sm:$0xff]  ;;  %v160_v38 = vld [vmem:[%s863_s4 + $0x38] sm:$0xff]  ;;  %v271_v41 = vld [vmem:[%s864_s6 + $0x8] sm:$0xff] }
   0xb   :  { %v595_v39 = vpack.c.bf16 %v160_v38, %v159_v37  ;;  %v599_v42 = vpack.c.bf16 %v271_v41, %v270_v40  ;;  %v30_v43 = vld [vmem:[%s865_s1 + $0x8] sm:$0xff]  ;;  %v29_v44 = vld [vmem:[%s865_s1] sm:$0xff]  ;;  %v32_v50 = vld [vmem:[%s865_s1 + $0x18] sm:$0xff] }
   0xc   :  { %590 = vmatpush3.bf16.msra.mxu1 %v587_v17  ;;  %v394_v47 = vld [vmem:[%s866_s3] ss:$0 sm:$0xff]  ;;  %v272_v51 = vld [vmem:[%s864_s6 + $0x10] sm:$0xff]  ;;  %v273_v52 = vld [vmem:[%s864_s6 + $0x18] sm:$0xff] }
   0xd   :  { %562 = vmatpush3.bf16.msra.mxu0 %v559_v8  ;;  %592 = vmatprep.subr.bf16.mxu1 %v591_v23  ;;  %v31_v53 = vld [vmem:[%s865_s1 + $0x10] sm:$0xff]  ;;  %v603_v59 = vpack.c.bf16 %v273_v52, %v272_v51  ;;  %v274_v61 = vld [vmem:[%s864_s6 + $0x20] sm:$0xff]  ;;  %v275_v62 = vld [vmem:[%s864_s6 + $0x28] sm:$0xff] }
   0xe   :  { %564 = vmatprep.subr.bf16.mxu0 %v563_v18  ;;  %v607_v1 = vpack.c.bf16 %v275_v62, %v274_v61  ;;  %v276_v2 = vld [vmem:[%s864_s6 + $0x30] sm:$0xff]  ;;  %v277_v3 = vld [vmem:[%s864_s6 + $0x38] sm:$0xff]  ;;  %v278_v5 = vld [vmem:[%s864_s6 + $0x40] sm:$0xff] }
   0xf   :  { %v611_v4 = vpack.c.bf16 %v277_v3, %v276_v2  ;;  %v279_v6 = vld [vmem:[%s864_s6 + $0x48] sm:$0xff]  ;;  %v280_v8 = vld [vmem:[%s864_s6 + $0x50] sm:$0xff]  ;;  %v281_v9 = vld [vmem:[%s864_s6 + $0x58] sm:$0xff] }
  0x10   :  { %594 = vmatpush3.bf16.msra.mxu1 %v591_v23  ;;  %v615_v7 = vpack.c.bf16 %v279_v6, %v278_v5  ;;  %v619_v10 = vpack.c.bf16 %v281_v9, %v280_v8  ;;  %v282_v11 = vld [vmem:[%s864_s6 + $0x60] sm:$0xff]  ;;  %v283_v12 = vld [vmem:[%s864_s6 + $0x68] sm:$0xff]  ;;  %v284_v14 = vld [vmem:[%s864_s6 + $0x70] sm:$0xff] }
  0x11   :  { %566 = vmatpush3.bf16.msra.mxu0 %v563_v18  ;;  %596 = vmatprep.subr.bf16.mxu1 %v595_v39  ;;  %v623_v13 = vpack.c.bf16 %v283_v12, %v282_v11  ;;  %v285_v15 = vld [vmem:[%s864_s6 + $0x78] sm:$0xff]  ;;  %v395_v17 = vld [vmem:[%s867_s5] ss:$0 sm:$0xff] }
  0x12   :  { %568 = vmatprep.subr.bf16.mxu0 %v567_v24  ;;  %v627_v16 = vpack.c.bf16 %v285_v15, %v284_v14  ;;  %v400_v31 = vld [vmem:[%s868_s7] ss:$0 sm:$0xff] }
  0x14   :  { %598 = vmatpush3.bf16.msra.mxu1 %v595_v39 }
  0x15   :  { %570 = vmatpush3.bf16.msra.mxu0 %v567_v24  ;;  %600 = vmatprep.subr.bf16.mxu1 %v599_v42 }
  0x16   :  { %572 = vmatprep.subr.bf16.mxu0 %v571_v27 }
  0x19   :  { %574 = vmatpush3.bf16.msra.mxu0 %v571_v27 }
  0x1a   :  { %576 = vmatprep.subr.bf16.mxu0 %v575_v30 }
  0x1d   :  { %578 = vmatpush3.bf16.msra.mxu0 %v575_v30 }
  0x1e   :  { %580 = vmatprep.subr.bf16.mxu0 %v579_v33 }
  0x21   :  { %582 = vmatpush3.bf16.msra.mxu0 %v579_v33 }
  0x24   :  { %486 = vmatmul.mubr.f32.vlgmr.msra.gmra.mrb[0].mxu0 %v34_v34 }
  0x25   :  { %488 = vmatprep.mubr.f32.mxu0 %v35_v35 }
  0x28   :  { %489 = vmatmul.mubr.f32.gmra.mrb[2].mxu0 %v36_v36 }
  0xf7   :  { %v487_v45 = vpop.f32.mrb[0].mxu0 }
  0xf8   :  { %v139_v46 = vadd.f32 %v487_v45, %v30_v43  ;;  %v119_v48 = vpop.f32.mrb[1].mxu0 }
  0xf9   :  { %v138_v49 = vadd.f32 %v119_v48, %v29_v44 }
  0xfa   :  { %v789_v56 = vadd.f32 %v394_v47, %v139_v46 }
  0xfb   :  { %v490_v54 = vpop.f32.mrb[2].mxu0  ;;  %v787_v55 = vadd.f32 %v394_v47, %v138_v49 }
  0xfc   :  { %v141_v57 = vadd.f32 %v490_v54, %v32_v50  ;;  %v129_v58 = vpop.f32.mrb[3].mxu0 }
  0xfd   :  { %v140_v60 = vadd.f32 %v129_v58, %v31_v53  ;;  %507 = vmatprep.mubr.msk.f32.mxu1 %vm168_vm0, %v787_v55 }
  0xfe   :  { %508 = vmatmul.mubr.msk.f32.vlgmr.msra.gmra.mrb[0].mxu1 %vm168_vm0, %v789_v56  ;;  %v152_v0 = vadd.f32 %v394_v47, %v141_v57 }
  0xff   :  { %v801_v63 = vadd.f32 %v394_v47, %v140_v60  ;;  %602 = vmatpush3.bf16.msra.mxu1 %v599_v42 }
 0x100   :  { %604 = vmatprep.subr.bf16.mxu1 %v603_v59 }
 0x101   :  { %510 = vmatprep.mubr.msk.f32.mxu1 %vm168_vm0, %v801_v63 }
 0x102   :  { %511 = vmatmul.mubr.msk.f32.gmra.mrb[2].mxu1 %vm168_vm0, %v152_v0 }
 0x103   :  { %606 = vmatpush3.bf16.msra.mxu1 %v603_v59 }
 0x104   :  { %608 = vmatprep.subr.bf16.mxu1 %v607_v1 }
 0x107   :  { %610 = vmatpush3.bf16.msra.mxu1 %v607_v1 }
 0x108   :  { %612 = vmatprep.subr.bf16.mxu1 %v611_v4 }
 0x10b   :  { %614 = vmatpush3.bf16.msra.mxu1 %v611_v4 }
 0x10c   :  { %616 = vmatprep.subr.bf16.mxu1 %v615_v7 }
 0x10f   :  { %618 = vmatpush3.bf16.msra.mxu1 %v615_v7 }
 0x110   :  { %620 = vmatprep.subr.bf16.mxu1 %v619_v10 }
 0x113   :  { %622 = vmatpush3.bf16.msra.mxu1 %v619_v10 }
 0x114   :  { %624 = vmatprep.subr.bf16.mxu1 %v623_v13 }
 0x117   :  { %626 = vmatpush3.bf16.msra.mxu1 %v623_v13 }
 0x118   :  { %628 = vmatprep.subr.bf16.mxu1 %v627_v16 }
 0x11b   :  { %630 = vmatpush3.bf16.msra.mxu1 %v627_v16 }
 0x1d1   :  { %v509_v18 = vpop.f32.mrb[0].mxu1 }
 0x1d2   :  { %v253_v19 = vadd.f32 %v509_v18, %v395_v17  ;;  %v247_v20 = vpop.f32.mrb[1].mxu1 }
 0x1d3   :  { %v248_v21 = vadd.f32 %v395_v17, %v247_v20 }
 0x1d4   :  { %v267_v24 = vmax.f32 %v253_v19, 0.0 }
 0x1d5   :  { %v266_v22 = vmax.f32 %v248_v21, 0.0  ;;  %v512_v23 = vpop.f32.mrb[2].mxu1 }
 0x1d6   :  { %v263_v25 = vadd.f32 %v512_v23, %v395_v17  ;;  %v257_v26 = vpop.f32.mrb[3].mxu1 }
 0x1d7   :  { %v258_v27 = vadd.f32 %v395_v17, %v257_v26  ;;  %545 = vmatprep.mubr.f32.mxu1 %v266_v22 }
 0x1d8   :  { %546 = vmatmul.mubr.f32.vlgmr.msra.gmra.mrb[4].mxu1 %v267_v24  ;;  %v269_v29 = vmax.f32 %v263_v25, 0.0 }
 0x1d9   :  { %v268_v28 = vmax.f32 %v258_v27, 0.0 }
 0x1db   :  { %548 = vmatprep.mubr.f32.mxu1 %v268_v28 }
 0x1dc   :  { %549 = vmatmul.mubr.f32.gmra.mrb[6].mxu1 %v269_v29 }
 0x2ab   :  { %v547_v30 = vpop.f32.mrb[4].mxu1 }
 0x2ac   :  { %v372_v32 = vadd.f32 %v547_v30, %v789_v56  ;;  %v352_v33 = vpop.f32.mrb[5].mxu1 }
 0x2ad   :  { %v371_v34 = vadd.f32 %v352_v33, %v787_v55 }
 0x2ae   :  { %v383_v35 = vadd.f32 %v400_v31, %v372_v32 }
 0x2af   :  { %v382_v36 = vadd.f32 %v400_v31, %v371_v34  ;;  %v550_v37 = vpop.f32.mrb[6].mxu1 }
 0x2b0   :  { %387 = vst.msk [vmem:[%s869_s8 + $0x8] sm:$0xff] %vm168_vm0, %v383_v35  ;;  %v374_v38 = vadd.f32 %v550_v37, %v152_v0  ;;  %v362_v39 = vpop.f32.mrb[7].mxu1 }
 0x2b1   :  { %386 = vst.msk [vmem:[%s869_s8] sm:$0xff] %vm168_vm0, %v382_v36  ;;  %v373_v40 = vadd.f32 %v362_v39, %v801_v63 }
 0x2b2   :  { %v385_v41 = vadd.f32 %v400_v31, %v374_v38 }
 0x2b3   :  { %v384_v42 = vadd.f32 %v400_v31, %v373_v40 }
 0x2b4   :  { %389 = vst.msk [vmem:[%s869_s8 + $0x18] sm:$0xff] %vm168_vm0, %v385_v41 }
 0x2b5   :  { %388 = vst.msk [vmem:[%s869_s8 + $0x10] sm:$0xff] %vm168_vm0, %v384_v42 }

// kernel: reformer_forward_pallas.33
= control target key start
LH: loop header
LB: loop body
LE: loop exit
PB: predicated region body
PF: predicated region fallthrough
CT: control target
= control target key end

     0   :  { %vm33_vm0 = vcmask 523264   ;;  %s277_s1 = inlined_call_operand.vmem [shape: f32[64,128], index: 1, kind: input, shape index: {}]   ;;  %s278_s0 = inlined_call_operand.vmem [shape: f32[32,64], index: 0, kind: input, shape index: {}]   ;;  %s279_s2 = inlined_call_operand.vmem [shape: f32[1,128], index: 2, kind: input, shape index: {}]   ;;  %s280_s3 = inlined_call_operand.vmem [shape: f32[32,128], index: 3, kind: output, shape index: {}]  }
   0x1   :  { %v18_v0 = vld [vmem:[%s277_s1] sm:$0xff]  ;;  %v19_v1 = vld [vmem:[%s277_s1 + $0x8] sm:$0xff]  ;;  %v20_v2 = vld [vmem:[%s277_s1 + $0x10] sm:$0xff] }
   0x2   :  { %v178_v3 = vpack.c.bf16 %v19_v1, %v18_v0  ;;  %v21_v4 = vld [vmem:[%s277_s1 + $0x18] sm:$0xff]  ;;  %v22_v6 = vld [vmem:[%s277_s1 + $0x20] sm:$0xff]  ;;  %v23_v7 = vld [vmem:[%s277_s1 + $0x28] sm:$0xff] }
   0x3   :  { %v182_v5 = vpack.c.bf16 %v21_v4, %v20_v2  ;;  %v14_v8 = vld [vmem:[%s278_s0] sm:$0xff]  ;;  %v16_v9 = vld [vmem:[%s278_s0 + $0x10] sm:$0xff]  ;;  %v186_v10 = vpack.c.bf16 %v23_v7, %v22_v6  ;;  %v25_v12 = vld [vmem:[%s277_s1 + $0x38] sm:$0xff] }
   0x4   :  { %179 = vmatprep.subr.bf16.mxu0 %v178_v3  ;;  %194 = vmatprep.subr.bf16.mxu1 %v178_v3  ;;  %v24_v11 = vld [vmem:[%s277_s1 + $0x30] sm:$0xff]  ;;  %v15_v14 = vld [vmem:[%s278_s0 + $0x8] sm:$0xff]  ;;  %v17_v15 = vld [vmem:[%s278_s0 + $0x18] sm:$0xff] }
   0x5   :  { %181 = vmatpush3.bf16.msra.mxu0 %v178_v3  ;;  %198 = vmatpush3.bf16.msra.mxu1 %v178_v3  ;;  %v190_v13 = vpack.c.bf16 %v25_v12, %v24_v11  ;;  %v139_v16 = vld [vmem:[%s279_s2] ss:$0 sm:$0xff] }
   0x6   :  { %183 = vmatprep.subr.bf16.mxu0 %v182_v5  ;;  %195 = vmatprep.subr.bf16.mxu1 %v182_v5 }
   0x7   :  { %172 = vmatprep.mubr.msk.f32.mxu0 %vm33_vm0, %v14_v8  ;;  %175 = vmatprep.mubr.msk.f32.mxu1 %vm33_vm0, %v16_v9 }
   0x9   :  { %185 = vmatpush3.bf16.msra.mxu0 %v182_v5  ;;  %199 = vmatpush3.bf16.msra.mxu1 %v182_v5 }
   0xa   :  { %187 = vmatprep.subr.bf16.mxu0 %v186_v10  ;;  %196 = vmatprep.subr.bf16.mxu1 %v186_v10 }
   0xd   :  { %189 = vmatpush3.bf16.msra.mxu0 %v186_v10  ;;  %200 = vmatpush3.bf16.msra.mxu1 %v186_v10 }
   0xe   :  { %191 = vmatprep.subr.bf16.mxu0 %v190_v13  ;;  %197 = vmatprep.subr.bf16.mxu1 %v190_v13 }
  0x11   :  { %193 = vmatpush3.bf16.msra.mxu0 %v190_v13  ;;  %201 = vmatpush3.bf16.msra.mxu1 %v190_v13 }
  0x14   :  { %173 = vmatmul.mubr.msk.f32.vlgmr.msra.gmra.mrb[0].mxu0 %vm33_vm0, %v15_v14  ;;  %176 = vmatmul.mubr.msk.f32.vlgmr.msra.gmra.mrb[0].mxu1 %vm33_vm0, %v17_v15 }
  0xe7   :  { %v174_v17 = vpop.f32.mrb[0].mxu0  ;;  %v177_v18 = vpop.f32.mrb[0].mxu1 }
  0xe8   :  { %v118_v19 = vadd.f32 %v174_v17, %v139_v16  ;;  %v128_v20 = vadd.f32 %v177_v18, %v139_v16  ;;  %v112_v21 = vpop.f32.mrb[1].mxu0  ;;  %v122_v22 = vpop.f32.mrb[1].mxu1 }
  0xe9   :  { %v113_v23 = vadd.f32 %v139_v16, %v112_v21  ;;  %v123_v24 = vadd.f32 %v139_v16, %v122_v22 }
  0xea   :  { %132 = vst [vmem:[%s280_s3 + $0x8] sm:$0xff] %v118_v19  ;;  %134 = vst [vmem:[%s280_s3 + $0x18] sm:$0xff] %v128_v20 }
  0xeb   :  { %131 = vst [vmem:[%s280_s3] sm:$0xff] %v113_v23  ;;  %133 = vst [vmem:[%s280_s3 + $0x10] sm:$0xff] %v123_v24 }

// kernel: reformer_forward_pallas.31
= control target key start
LH: loop header
LB: loop body
LE: loop exit
PB: predicated region body
PF: predicated region fallthrough
CT: control target
= control target key end

     0   :  { %s843_s18 = smov 0   ;;  %s1035_s0 = inlined_call_operand.vmem [shape: f32[2,6,6,128], index: 0, kind: input, shape index: {}]   ;;  %s1036_s1 = inlined_call_operand.vmem [shape: f32[9,128], index: 1, kind: input, shape index: {}]   ;;  %s1037_s2 = inlined_call_operand.vmem [shape: f32[1,128], index: 2, kind: input, shape index: {}]   ;;  %s1038_s3 = inlined_call_operand.vmem [shape: f32[128,32], index: 3, kind: input, shape index: {}]   ;;  %s1039_s4 = inlined_call_operand.vmem [shape: f32[32,128], index: 4, kind: input, shape index: {}]   ;;  %s1040_s5 = inlined_call_operand.vmem [shape: f32[2,4,4,128], index: 5, kind: output, shape index: {}]  }
   0x1 LB: > { %s646_s19 = sadd.s32 4294967295, %s808_s18   ;;  %p650_p0 = scmp.ge.s32.totalorder %s808_s18, 1  ;;  %s808_s18 = sphi %s843_s18, %s15_s18  }
   0x2   : > { %p187_p1 = scmp.lt.s32.totalorder %s808_s18, 3 }
   0x4   : > { %p188_p2 = pnand %p650_p0, %p187_p1 }
   0x5   : > { %v411_v0 = vld [vmem:[%s1038_s3] sm:$0xff] (!%p188_p2)  ;;  %v412_v1 = vld [vmem:[%s1038_s3 + $0x8] sm:$0xff] (!%p188_p2)  ;;  %v413_v2 = vld [vmem:[%s1038_s3 + $0x10] sm:$0xff] (!%p188_p2)  ;;  %v810_v3 = vmov (!%p188_p2), 0.0|0.0   ;;  %vm811_vm0 = vmmov (!%p188_p2), 0   ;;  %v812_v6 = vmov (!%p188_p2), 0.0  }
   0x6   : > { %191 = sbr.rel (%p188_p2) target bundleno = 503 (0x1f7), region = 40  ;;  %760 = vmatprep.subr.bf16.mxu0 (!%p188_p2), %v810_v3  ;;  %v761_v4 = vpack.c.bf16 (!%p188_p2), %v412_v1, %v411_v0  ;;  %v414_v5 = vld [vmem:[%s1038_s3 + $0x18] sm:$0xff] (!%p188_p2)  ;;  %746 = vmatprep.mubr.msk.f32.mxu0 (!%p188_p2), %vm811_vm0, %v812_v6  ;;  %p215_p3 = scmp.lt.s32.totalorder (!%p188_p2), %s646_s19, 1  ;;  %v415_v8 = vld [vmem:[%s1038_s3 + $0x20] sm:$0xff] (!%p188_p2)  ;;  %v416_v9 = vld [vmem:[%s1038_s3 + $0x28] sm:$0xff] (!%p188_p2)  ;;  %vm395_vm1 = vcmask (!%p188_p2), 1043456  }
   0x7   : > { %784 = vmatprep.subr.bf16.mxu1 (!%p188_p2), %v810_v3  ;;  %757 = vmatprep.mubr.msk.f32.mxu1 (!%p188_p2), %vm811_vm0, %v812_v6  ;;  %v764_v7 = vpack.c.bf16 (!%p188_p2), %v414_v5, %v413_v2  ;;  %v877_v10 = vld [vmem:[%s1038_s3 + $0x30] sm:$0xff] (!%p188_p2)  ;;  %v882_v11 = vld [vmem:[%s1038_s3 + $0x38] sm:$0xff] (!%p188_p2)  ;;  %v887_v12 = vld [vmem:[%s1038_s3 + $0x40] sm:$0xff] (!%p188_p2)  ;;  %v767_v18 = vpack.c.bf16 (!%p188_p2), %v416_v9, %v415_v8  ;;  %vm502_vm2 = vcmask (!%p188_p2), 261120  }
   0x8   : > { %762 = vmatpush3.bf16.msra.mxu0 (!%p188_p2), %v761_v4  ;;  %v892_v13 = vld [vmem:[%s1038_s3 + $0x48] sm:$0xff] (!%p188_p2)  ;;  %v897_v14 = vld [vmem:[%s1038_s3 + $0x50] sm:$0xff] (!%p188_p2)  ;;  %v903_v15 = vld [vmem:[%s1038_s3 + $0x58] sm:$0xff] (!%p188_p2)  ;;  %v770_v22 = vpack.c.bf16 (!%p188_p2), %v882_v11, %v877_v10 }
   0x9   : > { %763 = vmatprep.subr.bf16.mxu0 (!%p188_p2), %v810_v3  ;;  %v908_v16 = vld [vmem:[%s1038_s3 + $0x60] sm:$0xff] (!%p188_p2)  ;;  %v916_v19 = vld [vmem:[%s1038_s3 + $0x68] sm:$0xff] (!%p188_p2)  ;;  %v773_v27 = vpack.c.bf16 (!%p188_p2), %v892_v13, %v887_v12  ;;  %v776_v34 = vpack.c.bf16 (!%p188_p2), %v903_v15, %v897_v14 }
   0xa   : > { %v654_v17 = vld [vmem:[%s1036_s1] ss:$0 sm:$0xff] (!%p188_p2)  ;;  %v655_v20 = vld [vmem:[%s1036_s1 + $0x1] ss:$0 sm:$0xff] (!%p188_p2)  ;;  %v656_v21 = vld [vmem:[%s1036_s1 + $0x2] ss:$0 sm:$0xff] (!%p188_p2)  ;;  %v779_v42 = vpack.c.bf16 (!%p188_p2), %v916_v19, %v908_v16 }
   0xb   : > { %v661_v26 = vld [vmem:[%s1036_s1 + $0x3] ss:$0 sm:$0xff] (!%p188_p2)  ;;  %v666_v41 = vld [vmem:[%s1036_s1 + $0x4] ss:$0 sm:$0xff] (!%p188_p2)  ;;  %v671_v56 = vld [vmem:[%s1036_s1 + $0x5] ss:$0 sm:$0xff] (!%p188_p2) }
   0xc   : > { %765 = vmatpush3.bf16.msra.mxu0 (!%p188_p2), %v764_v7  ;;  %v686_v12 = vld [vmem:[%s1036_s1 + $0x8] ss:$0 sm:$0xff] (!%p188_p2) }
   0xd   : > { %s1042_s19 = smov (!%p215_p3, %s646_s19), 1  ;;  %766 = vmatprep.subr.bf16.mxu0 %v810_v3 }
   0xe   : > { %s790_s17 = smul.u32 48, %s1042_s19  ;;  %s691_s13 = sshll.u32 %s1042_s19, 4 }
   0xf   : > { %s224_s16 = scalar_lea.vmem %s1040_s5, %s691_s13 }
  0x10   : > { %s921_s30 = scalar_lea.vmem %s1035_s0, %s790_s17  ;;  %768 = vmatpush3.bf16.msra.mxu0 %v767_v18 }
  0x11   : > { %v225_v23 = vld [vmem:[%s921_s30] sm:$0xf]  ;;  %v226_v24 = vld [vmem:[%s921_s30 + $0x8] sm:$0xf]  ;;  %v227_v25 = vld [vmem:[%s921_s30 + $0x10] sm:$0xf]  ;;  %769 = vmatprep.subr.bf16.mxu0 %v810_v3 }
  0x12   : > { %v228_v28 = vld [vmem:[%s921_s30 + $0x18] sm:$0xf]  ;;  %v234_v29 = vmul.f32 %v654_v17, %v225_v23  ;;  %v235_v30 = vmul.f32 %v654_v17, %v226_v24  ;;  %v236_v31 = vmul.f32 %v654_v17, %v227_v25  ;;  %v242_v32 = vld [vmem:[%s921_s30 + $0x1] sm:$0xf]  ;;  %v243_v33 = vld [vmem:[%s921_s30 + $0x9] sm:$0xf] }
  0x13   : > { %v237_v35 = vmul.f32 %v654_v17, %v228_v28  ;;  %v244_v36 = vld [vmem:[%s921_s30 + $0x11] sm:$0xf]  ;;  %v245_v37 = vld [vmem:[%s921_s30 + $0x19] sm:$0xf]  ;;  %v251_v38 = vmul.f32 %v655_v20, %v242_v32  ;;  %v252_v39 = vmul.f32 %v655_v20, %v243_v33  ;;  %v259_v40 = vld [vmem:[%s921_s30 + $0x2] sm:$0xf] }
  0x14   : > { %v253_v43 = vmul.f32 %v655_v20, %v244_v36  ;;  %v254_v44 = vmul.f32 %v655_v20, %v245_v37  ;;  %v260_v45 = vld [vmem:[%s921_s30 + $0xa] sm:$0xf]  ;;  %v261_v46 = vld [vmem:[%s921_s30 + $0x12] sm:$0xf]  ;;  %v262_v47 = vld [vmem:[%s921_s30 + $0x1a] sm:$0xf]  ;;  %v268_v48 = vmul.f32 %v656_v21, %v259_v40  ;;  %771 = vmatpush3.bf16.msra.mxu0 %v770_v22 }
  0x15   : > { %v255_v49 = vadd.f32 %v251_v38, %v234_v29  ;;  %v256_v50 = vadd.f32 %v252_v39, %v235_v30  ;;  %v269_v51 = vmul.f32 %v656_v21, %v260_v45  ;;  %v270_v52 = vmul.f32 %v656_v21, %v261_v46  ;;  %v657_v53 = vld [vmem:[%s921_s30 + $0x8] sm:$0xf]  ;;  %v658_v54 = vld [vmem:[%s921_s30 + $0x10] sm:$0xf]  ;;  %v659_v55 = vld [vmem:[%s921_s30 + $0x18] sm:$0xf]  ;;  %772 = vmatprep.subr.bf16.mxu0 %v810_v3 }
  0x16   : > { %v257_v57 = vadd.f32 %v253_v43, %v236_v31  ;;  %v258_v58 = vadd.f32 %v254_v44, %v237_v35  ;;  %v271_v59 = vmul.f32 %v656_v21, %v262_v47  ;;  %v660_v60 = vld [vmem:[%s921_s30 + $0x20] sm:$0xf]  ;;  %v286_v61 = vmul.f32 %v661_v26, %v657_v53  ;;  %v662_v62 = vld [vmem:[%s921_s30 + $0x9] sm:$0xf]  ;;  %v663_v63 = vld [vmem:[%s921_s30 + $0x11] sm:$0xf] }
  0x17   : > { %v272_v0 = vadd.f32 %v268_v48, %v255_v49  ;;  %v273_v1 = vadd.f32 %v269_v51, %v256_v50  ;;  %v287_v2 = vmul.f32 %v661_v26, %v658_v54  ;;  %v288_v4 = vmul.f32 %v661_v26, %v659_v55  ;;  %v664_v5 = vld [vmem:[%s921_s30 + $0x19] sm:$0xf]  ;;  %v665_v6 = vld [vmem:[%s921_s30 + $0x21] sm:$0xf]  ;;  %v667_v7 = vld [vmem:[%s921_s30 + $0xa] sm:$0xf] }
  0x18   : > { %v274_v8 = vadd.f32 %v270_v52, %v257_v57  ;;  %v275_v9 = vadd.f32 %v271_v59, %v258_v58  ;;  %v289_v10 = vmul.f32 %v661_v26, %v660_v60  ;;  %v303_v11 = vmul.f32 %v666_v41, %v662_v62  ;;  %v668_v17 = vld [vmem:[%s921_s30 + $0x12] sm:$0xf]  ;;  %v669_v18 = vld [vmem:[%s921_s30 + $0x1a] sm:$0xf]  ;;  %v670_v25 = vld [vmem:[%s921_s30 + $0x22] sm:$0xf]  ;;  %774 = vmatpush3.bf16.msra.mxu0 %v773_v27 }
  0x19   : > { %v290_v20 = vadd.f32 %v286_v61, %v272_v0  ;;  %v291_v21 = vadd.f32 %v287_v2, %v273_v1  ;;  %v304_v23 = vmul.f32 %v666_v41, %v663_v63  ;;  %v305_v24 = vmul.f32 %v666_v41, %v664_v5  ;;  %v672_v28 = vld [vmem:[%s921_s30 + $0x10] sm:$0xf]  ;;  %v676_v22 = vld [vmem:[%s1036_s1 + $0x6] ss:$0 sm:$0xff]  ;;  %v673_v32 = vld [vmem:[%s921_s30 + $0x18] sm:$0xf]  ;;  %775 = vmatprep.subr.bf16.mxu0 %v810_v3 }
  0x1a   : > { %v292_v26 = vadd.f32 %v288_v4, %v274_v8  ;;  %v293_v29 = vadd.f32 %v289_v10, %v275_v9  ;;  %v306_v30 = vmul.f32 %v666_v41, %v665_v6  ;;  %v320_v31 = vmul.f32 %v671_v56, %v667_v7  ;;  %v674_v33 = vld [vmem:[%s921_s30 + $0x20] sm:$0xf]  ;;  %v675_v39 = vld [vmem:[%s921_s30 + $0x28] sm:$0xf]  ;;  %v677_v40 = vld [vmem:[%s921_s30 + $0x11] sm:$0xf] }
  0x1b   : > { %v307_v35 = vadd.f32 %v303_v11, %v290_v20  ;;  %v308_v36 = vadd.f32 %v304_v23, %v291_v21  ;;  %v321_v37 = vmul.f32 %v671_v56, %v668_v17  ;;  %v322_v38 = vmul.f32 %v671_v56, %v669_v18  ;;  %v681_v43 = vld [vmem:[%s1036_s1 + $0x7] ss:$0 sm:$0xff]  ;;  %v678_v47 = vld [vmem:[%s921_s30 + $0x19] sm:$0xf]  ;;  %v679_v48 = vld [vmem:[%s921_s30 + $0x21] sm:$0xf] }
  0x1c   : > { %v309_v41 = vadd.f32 %v305_v24, %v292_v26  ;;  %v310_v44 = vadd.f32 %v306_v30, %v293_v29  ;;  %v323_v45 = vmul.f32 %v671_v56, %v670_v25  ;;  %v338_v46 = vmul.f32 %v676_v22, %v672_v28  ;;  %v680_v53 = vld [vmem:[%s921_s30 + $0x29] sm:$0xf]  ;;  %v682_v54 = vld [vmem:[%s921_s30 + $0x12] sm:$0xf]  ;;  %v683_v57 = vld [vmem:[%s921_s30 + $0x1a] sm:$0xf]  ;;  %777 = vmatpush3.bf16.msra.mxu0 %v776_v34 }
  0x1d   : > { %v324_v49 = vadd.f32 %v320_v31, %v307_v35  ;;  %v325_v50 = vadd.f32 %v321_v37, %v308_v36  ;;  %v339_v51 = vmul.f32 %v676_v22, %v673_v32  ;;  %v340_v52 = vmul.f32 %v676_v22, %v674_v33  ;;  %v684_v58 = vld [vmem:[%s921_s30 + $0x22] sm:$0xf]  ;;  %v685_v63 = vld [vmem:[%s921_s30 + $0x2a] sm:$0xf]  ;;  %778 = vmatprep.subr.bf16.mxu0 %v810_v3  ;;  %v425_v7 = vld [vmem:[%s1038_s3 + $0x70] sm:$0xff] }
  0x1e   : > { %v326_v13 = vadd.f32 %v322_v38, %v309_v41  ;;  %v327_v27 = vadd.f32 %v323_v45, %v310_v44  ;;  %v341_v55 = vmul.f32 %v676_v22, %v675_v39  ;;  %v355_v56 = vmul.f32 %v681_v43, %v677_v40  ;;  %v498_v0 = vld [vmem:[%s1039_s4] sm:$0xff]  ;;  %v499_v1 = vld [vmem:[%s1039_s4 + $0x8] sm:$0xff]  ;;  %v426_v8 = vld [vmem:[%s1038_s3 + $0x78] sm:$0xff] }
  0x1f   : > { %v342_v59 = vadd.f32 %v338_v46, %v324_v49  ;;  %v343_v60 = vadd.f32 %v339_v51, %v325_v50  ;;  %v356_v61 = vmul.f32 %v681_v43, %v678_v47  ;;  %v357_v62 = vmul.f32 %v681_v43, %v679_v48  ;;  %v687_v18 = vld [vmem:[%s1037_s2] ss:$0 sm:$0xff]  ;;  %v500_v48 = vld [vmem:[%s1039_s4 + $0x10] sm:$0xff]  ;;  %v501_v49 = vld [vmem:[%s1039_s4 + $0x18] sm:$0xff] }
  0x20   : > { %v344_v2 = vadd.f32 %v340_v52, %v326_v13  ;;  %v345_v4 = vadd.f32 %v341_v55, %v327_v27  ;;  %v358_v5 = vmul.f32 %v681_v43, %v680_v53  ;;  %v372_v6 = vmul.f32 %v686_v12, %v682_v54  ;;  %780 = vmatpush3.bf16.msra.mxu0 %v779_v42 }
  0x21   : > { %v359_v9 = vadd.f32 %v355_v56, %v342_v59  ;;  %v360_v10 = vadd.f32 %v356_v61, %v343_v60  ;;  %v373_v11 = vmul.f32 %v686_v12, %v683_v57  ;;  %v374_v17 = vmul.f32 %v686_v12, %v684_v58  ;;  %781 = vmatprep.subr.bf16.mxu0 %v810_v3 }
  0x22   : > { %v361_v14 = vadd.f32 %v357_v62, %v344_v2  ;;  %v362_v15 = vadd.f32 %v358_v5, %v345_v4  ;;  %v375_v34 = vmul.f32 %v686_v12, %v685_v63  ;;  %v785_v20 = vpack.c.bf16 %v499_v1, %v498_v0 }
  0x23   : > { %v376_v21 = vadd.f32 %v372_v6, %v359_v9  ;;  %v377_v23 = vadd.f32 %v373_v11, %v360_v10  ;;  %v782_v24 = vpack.c.bf16 %v426_v8, %v425_v7  ;;  %v788_v50 = vpack.c.bf16 %v501_v49, %v500_v48 }
  0x24   : > { %v378_v25 = vadd.f32 %v374_v17, %v361_v14  ;;  %v379_v28 = vadd.f32 %v375_v34, %v362_v15  ;;  %786 = vmatpush3.bf16.msra.mxu1 %v785_v20  ;;  %v579_v54 = vlaneseq }
  0x25   : > { %v387_v22 = vadd.f32 %v687_v18, %v376_v21  ;;  %v388_v26 = vadd.f32 %v687_v18, %v377_v23  ;;  %787 = vmatprep.subr.bf16.mxu1 %v810_v3  ;;  %783 = vmatpush3.bf16.msra.mxu0 %v782_v24 }
  0x26   : > { %v389_v29 = vadd.f32 %v687_v18, %v378_v25  ;;  %v390_v30 = vadd.f32 %v687_v18, %v379_v28  ;;  %v580_v27 = vshrl.u32 %v579_v54, 7 }
  0x27   : > { %v391_v31 = vmax.f32 %v387_v22, 0.0  ;;  %v392_v32 = vmax.f32 %v388_v26, 0.0 }
  0x28   : > { %v393_v33 = vmax.f32 %v389_v29, 0.0  ;;  %v394_v35 = vmax.f32 %v390_v30, 0.0  ;;  %789 = vmatpush3.bf16.msra.mxu1 %v788_v50  ;;  %v581_v58 = vsub.s32 0, %v580_v27 }
  0x29   : > { %v396_v16 = vsel %vm395_vm1, %v391_v31, 0.0  ;;  %v397_v19 = vsel %vm395_vm1, %v392_v32, 0.0 }
  0x2a   : > { %v398_v42 = vadd.f32 %v397_v19, %v396_v16  ;;  %v399_v36 = vsel %vm395_vm1, %v393_v33, 0.0  ;;  %v401_v37 = vsel %vm395_vm1, %v394_v35, 0.0 }
  0x2c   : > { %v400_v38 = vadd.f32 %v399_v36, %v398_v42 }
  0x2e   : > { %v402_v39 = vadd.f32 %v401_v37, %v400_v38 }
  0x30   : > { %v403_v40 = vsel %vm395_vm1, %v402_v39, 0.0 }
  0x31   : > { %v404_v43 = vrot.slane %v403_v40, 4 }
  0x33   : > { %v405_v41 = vadd.f32 %v404_v43, %v403_v40 }
  0x35   : > { %v406_v44 = vrot.slane %v405_v41, 2 }
  0x37   : > { %v407_v3 = vadd.f32 %v406_v44, %v405_v41 }
  0x39   : > { %v408_v45 = vrot.slane %v407_v3, 1 }
  0x3b   : > { %v409_v46 = vadd.f32 %v408_v45, %v407_v3 }
  0x3d   : > { %v410_v47 = vmul.f32 0.0625, %v409_v46 }
  0x3f   : > { %747 = vmatmul.mubr.f32.vlgmr.msra.gmra.mrb[0].mxu0 %v410_v47 }
 0x112   : > { %v493_v51 = vpop.f32.mrb[0].mxu0 }
 0x113   : > { %v497_v52 = vmax.f32 %v493_v51, 0.0  ;;  %v748_v53 = vpop.f32.mrb[1].mxu0 }
 0x115   : > { %758 = vmatmul.mubr.msk.f32.vlgmr.msra.gmra.mrb[0].mxu1 %vm502_vm2, %v497_v52 }
 0x1e8   : > { %v572_v12 = vpop.f32.mrb[0].mxu1 }
 0x1e9   : > { %v573_v13 = vadd.f32 3.0, %v572_v12  ;;  %v759_v55 = vpop.f32.mrb[1].mxu1 }
 0x1eb   : > { %v576_v56 = vmax.f32 %v573_v13, 0.0 }
 0x1ed   : > { %v577_v57 = vmin.f32 %v576_v56, 6.0 }
 0x1ef   : > { %v578_v59 = vmul.f32 0.16666667, %v577_v57 }
 0x1f1   : > { %v582_v60 = vrot.slane %v578_v59, %v581_v58 }
 0x1f3   : > { %v583_v61 = vmul.f32 %v582_v60, %v391_v31  ;;  %v584_v62 = vmul.f32 %v582_v60, %v392_v32  ;;  %v585_v63 = vmul.f32 %v582_v60, %v393_v33  ;;  %v586_v0 = vmul.f32 %v582_v60, %v394_v35 }
 0x1f5   : > { %587 = vst [vmem:[%s224_s16] sm:$0xf] %v583_v61  ;;  %588 = vst [vmem:[%s224_s16 + $0x4] sm:$0xf] %v584_v62 }
 0x1f6   : > { %589 = vst [vmem:[%s224_s16 + $0x8] sm:$0xf] %v585_v63  ;;  %590 = vst [vmem:[%s224_s16 + $0xc] sm:$0xf] %v586_v0 }
 0x1f7 PF: > { %s15_s18 = sadd.s32 1, %s808_s18  }
 0x1f8   : > { %p12_p4 = scmp.ge.s32.totalorder %s15_s18, 4  }
 0x1fa   :  { %14 = sbr.rel (!%p12_p4) target bundleno = 1 (0x1), region = 72 }

// kernel: reformer_forward_pallas.37
= control target key start
LH: loop header
LB: loop body
LE: loop exit
PB: predicated region body
PF: predicated region fallthrough
CT: control target
= control target key end

     0   :  { %vm41_vm0 = vcmask 261120   ;;  %vm235_vm1 = vcmask 523264   ;;  %s500_s1 = inlined_call_operand.vmem [shape: f32[32,64], index: 1, kind: input, shape index: {}]   ;;  %s501_s0 = inlined_call_operand.vmem [shape: f32[128,32], index: 0, kind: input, shape index: {}]   ;;  %s502_s2 = inlined_call_operand.vmem [shape: f32[1,64], index: 2, kind: input, shape index: {}]   ;;  %s503_s3 = inlined_call_operand.vmem [shape: f32[128,64], index: 3, kind: output, shape index: {}]  }
   0x1   :  { %v30_v0 = vld [vmem:[%s500_s1] sm:$0xff]  ;;  %v31_v1 = vld [vmem:[%s500_s1 + $0x8] sm:$0xff]  ;;  %v32_v2 = vld [vmem:[%s500_s1 + $0x10] sm:$0xff] }
   0x2   :  { %v325_v3 = vpack.c.bf16 %v31_v1, %v30_v0  ;;  %v33_v4 = vld [vmem:[%s500_s1 + $0x18] sm:$0xff]  ;;  %v14_v5 = vld [vmem:[%s501_s0] sm:$0xff]  ;;  %v15_v8 = vld [vmem:[%s501_s0 + $0x8] sm:$0xff] }
   0x3   :  { %v22_v6 = vld [vmem:[%s501_s0 + $0x40] sm:$0xff]  ;;  %v329_v7 = vpack.c.bf16 %v33_v4, %v32_v2  ;;  %301 = vmatprep.mubr.msk.f32.mxu0 %vm41_vm0, %v14_v5  ;;  %v23_v9 = vld [vmem:[%s501_s0 + $0x48] sm:$0xff]  ;;  %v16_v10 = vld [vmem:[%s501_s0 + $0x10] sm:$0xff] }
   0x4   :  { %313 = vmatprep.mubr.msk.f32.mxu1 %vm41_vm0, %v22_v6  ;;  %326 = vmatprep.subr.bf16.mxu0 %v325_v3  ;;  %v24_v11 = vld [vmem:[%s501_s0 + $0x50] sm:$0xff]  ;;  %v17_v12 = vld [vmem:[%s501_s0 + $0x18] sm:$0xff]  ;;  %v18_v14 = vld [vmem:[%s501_s0 + $0x20] sm:$0xff] }
   0x5   :  { %333 = vmatprep.subr.bf16.mxu1 %v325_v3  ;;  %328 = vmatpush3.bf16.msra.mxu0 %v325_v3  ;;  %v25_v13 = vld [vmem:[%s501_s0 + $0x58] sm:$0xff]  ;;  %v26_v15 = vld [vmem:[%s501_s0 + $0x60] sm:$0xff]  ;;  %v19_v16 = vld [vmem:[%s501_s0 + $0x28] sm:$0xff] }
   0x6   :  { %335 = vmatpush3.bf16.msra.mxu1 %v325_v3  ;;  %330 = vmatprep.subr.bf16.mxu0 %v329_v7  ;;  %v27_v17 = vld [vmem:[%s501_s0 + $0x68] sm:$0xff]  ;;  %v20_v18 = vld [vmem:[%s501_s0 + $0x30] sm:$0xff]  ;;  %v21_v20 = vld [vmem:[%s501_s0 + $0x38] sm:$0xff] }
   0x7   :  { %334 = vmatprep.subr.bf16.mxu1 %v329_v7  ;;  %v28_v19 = vld [vmem:[%s501_s0 + $0x70] sm:$0xff]  ;;  %v29_v21 = vld [vmem:[%s501_s0 + $0x78] sm:$0xff]  ;;  %v256_v22 = vld [vmem:[%s502_s2] ss:$0 sm:$0xff] }
   0x9   :  { %332 = vmatpush3.bf16.msra.mxu0 %v329_v7 }
   0xa   :  { %336 = vmatpush3.bf16.msra.mxu1 %v329_v7 }
   0xc   :  { %302 = vmatmul.mubr.msk.f32.vlgmr.msra.gmra.mrb[0].mxu0 %vm41_vm0, %v15_v8 }
   0xd   :  { %314 = vmatmul.mubr.msk.f32.vlgmr.msra.gmra.mrb[0].mxu1 %vm41_vm0, %v23_v9  ;;  %304 = vmatprep.mubr.msk.f32.mxu0 %vm41_vm0, %v16_v10 }
   0xe   :  { %316 = vmatprep.mubr.msk.f32.mxu1 %vm41_vm0, %v24_v11 }
  0x10   :  { %305 = vmatmul.mubr.msk.f32.gmra.mrb[2].mxu0 %vm41_vm0, %v17_v12 }
  0x11   :  { %317 = vmatmul.mubr.msk.f32.gmra.mrb[2].mxu1 %vm41_vm0, %v25_v13  ;;  %307 = vmatprep.mubr.msk.f32.mxu0 %vm41_vm0, %v18_v14 }
  0x12   :  { %319 = vmatprep.mubr.msk.f32.mxu1 %vm41_vm0, %v26_v15 }
  0x14   :  { %308 = vmatmul.mubr.msk.f32.gmra.mrb[4].mxu0 %vm41_vm0, %v19_v16 }
  0x15   :  { %320 = vmatmul.mubr.msk.f32.gmra.mrb[4].mxu1 %vm41_vm0, %v27_v17  ;;  %310 = vmatprep.mubr.msk.f32.mxu0 %vm41_vm0, %v20_v18 }
  0x16   :  { %322 = vmatprep.mubr.msk.f32.mxu1 %vm41_vm0, %v28_v19 }
  0x18   :  { %311 = vmatmul.mubr.msk.f32.gmra.mrb[6].mxu0 %vm41_vm0, %v21_v20 }
  0x19   :  { %323 = vmatmul.mubr.msk.f32.gmra.mrb[6].mxu1 %vm41_vm0, %v29_v21 }
  0xdf   :  { %v303_v23 = vpop.f32.mrb[0].mxu0 }
  0xe0   :  { %v315_v24 = vpop.f32.mrb[0].mxu1  ;;  %v162_v25 = vadd.f32 %v303_v23, %v256_v22  ;;  %v156_v27 = vpop.f32.mrb[1].mxu0 }
  0xe1   :  { %v202_v26 = vadd.f32 %v315_v24, %v256_v22  ;;  %v196_v28 = vpop.f32.mrb[1].mxu1  ;;  %v157_v29 = vadd.f32 %v256_v22, %v156_v27 }
  0xe2   :  { %v197_v30 = vadd.f32 %v256_v22, %v196_v28  ;;  %237 = vst.msk [vmem:[%s503_s3 + $0x8] sm:$0xff] %vm235_vm1, %v162_v25 }
  0xe3   :  { %245 = vst.msk [vmem:[%s503_s3 + $0x48] sm:$0xff] %vm235_vm1, %v202_v26  ;;  %236 = vst.msk [vmem:[%s503_s3] sm:$0xff] %vm235_vm1, %v157_v29  ;;  %v306_v31 = vpop.f32.mrb[2].mxu0 }
  0xe4   :  { %244 = vst.msk [vmem:[%s503_s3 + $0x40] sm:$0xff] %vm235_vm1, %v197_v30  ;;  %v318_v32 = vpop.f32.mrb[2].mxu1  ;;  %v172_v33 = vadd.f32 %v306_v31, %v256_v22  ;;  %v166_v35 = vpop.f32.mrb[3].mxu0 }
  0xe5   :  { %v212_v34 = vadd.f32 %v318_v32, %v256_v22  ;;  %v206_v36 = vpop.f32.mrb[3].mxu1  ;;  %v167_v37 = vadd.f32 %v256_v22, %v166_v35 }
  0xe6   :  { %v207_v38 = vadd.f32 %v256_v22, %v206_v36  ;;  %239 = vst.msk [vmem:[%s503_s3 + $0x18] sm:$0xff] %vm235_vm1, %v172_v33 }
  0xe7   :  { %247 = vst.msk [vmem:[%s503_s3 + $0x58] sm:$0xff] %vm235_vm1, %v212_v34  ;;  %238 = vst.msk [vmem:[%s503_s3 + $0x10] sm:$0xff] %vm235_vm1, %v167_v37  ;;  %v309_v39 = vpop.f32.mrb[4].mxu0 }
  0xe8   :  { %246 = vst.msk [vmem:[%s503_s3 + $0x50] sm:$0xff] %vm235_vm1, %v207_v38  ;;  %v321_v40 = vpop.f32.mrb[4].mxu1  ;;  %v182_v41 = vadd.f32 %v309_v39, %v256_v22  ;;  %v176_v43 = vpop.f32.mrb[5].mxu0 }
  0xe9   :  { %v222_v42 = vadd.f32 %v321_v40, %v256_v22  ;;  %v216_v44 = vpop.f32.mrb[5].mxu1  ;;  %v177_v45 = vadd.f32 %v256_v22, %v176_v43 }
  0xea   :  { %v217_v46 = vadd.f32 %v256_v22, %v216_v44  ;;  %241 = vst.msk [vmem:[%s503_s3 + $0x28] sm:$0xff] %vm235_vm1, %v182_v41 }
  0xeb   :  { %249 = vst.msk [vmem:[%s503_s3 + $0x68] sm:$0xff] %vm235_vm1, %v222_v42  ;;  %240 = vst.msk [vmem:[%s503_s3 + $0x20] sm:$0xff] %vm235_vm1, %v177_v45  ;;  %v312_v47 = vpop.f32.mrb[6].mxu0 }
  0xec   :  { %248 = vst.msk [vmem:[%s503_s3 + $0x60] sm:$0xff] %vm235_vm1, %v217_v46  ;;  %v324_v48 = vpop.f32.mrb[6].mxu1  ;;  %v192_v49 = vadd.f32 %v312_v47, %v256_v22  ;;  %v186_v51 = vpop.f32.mrb[7].mxu0 }
  0xed   :  { %v232_v50 = vadd.f32 %v324_v48, %v256_v22  ;;  %v226_v52 = vpop.f32.mrb[7].mxu1  ;;  %v187_v53 = vadd.f32 %v256_v22, %v186_v51 }
  0xee   :  { %v227_v54 = vadd.f32 %v256_v22, %v226_v52  ;;  %243 = vst.msk [vmem:[%s503_s3 + $0x38] sm:$0xff] %vm235_vm1, %v192_v49 }
  0xef   :  { %251 = vst.msk [vmem:[%s503_s3 + $0x78] sm:$0xff] %vm235_vm1, %v232_v50  ;;  %242 = vst.msk [vmem:[%s503_s3 + $0x30] sm:$0xff] %vm235_vm1, %v187_v53 }
  0xf0   :  { %250 = vst.msk [vmem:[%s503_s3 + $0x70] sm:$0xff] %vm235_vm1, %v227_v54 }

// kernel: reformer_forward_pallas.41
= control target key start
LH: loop header
LB: loop body
LE: loop exit
PB: predicated region body
PF: predicated region fallthrough
CT: control target
= control target key end

     0   :  { %v1056_v0 = vmov 0.0|0.0   ;;  %vm170_vm0 = vcmask 130048   ;;  %vm876_vm1 = vcmask 23552   ;;  %s2119_s1 = inlined_call_operand.vmem [shape: f32[144,3], index: 1, kind: input, shape index: {}]   ;;  %s2120_s0 = inlined_call_operand.vmem [shape: f32[512,144], index: 0, kind: input, shape index: {}]   ;;  %s2121_s2 = inlined_call_operand.vmem [shape: f32[1,3], index: 2, kind: input, shape index: {}]   ;;  %s2122_s3 = inlined_call_operand.vmem [shape: f32[512,3], index: 3, kind: input, shape index: {}]   ;;  %s2123_s4 = inlined_call_operand.vmem [shape: f32[512,3], index: 4, kind: output, shape index: {}]  }
   0x1   :  { %1010 = vmatprep.subr.bf16.mxu0 %v1056_v0  ;;  %1037 = vmatprep.subr.bf16.mxu1 %v1056_v0  ;;  %v145_v1 = vld [vmem:[%s2119_s1] sm:$0xff]  ;;  %v146_v2 = vld [vmem:[%s2119_s1 + $0x8] sm:$0xff]  ;;  %v147_v3 = vld [vmem:[%s2119_s1 + $0x10] sm:$0xff] }
   0x2   :  { %v1011_v4 = vpack.c.bf16 %v146_v2, %v145_v1  ;;  %v148_v5 = vld [vmem:[%s2119_s1 + $0x18] sm:$0xff]  ;;  %v149_v7 = vld [vmem:[%s2119_s1 + $0x20] sm:$0xff]  ;;  %v150_v8 = vld [vmem:[%s2119_s1 + $0x28] sm:$0xff] }
   0x3   :  { %v1014_v6 = vpack.c.bf16 %v148_v5, %v147_v3  ;;  %v18_v9 = vld [vmem:[%s2120_s0 + $0x8] sm:$0xff]  ;;  %v1017_v11 = vpack.c.bf16 %v150_v8, %v149_v7  ;;  %v151_v12 = vld [vmem:[%s2119_s1 + $0x30] sm:$0xff]  ;;  %v152_v13 = vld [vmem:[%s2119_s1 + $0x38] sm:$0xff] }
   0x4   :  { %1012 = vmatpush1.bf16.msra.mxu0 %v1011_v4  ;;  %1046 = vmatpush1.bf16.msra.mxu1 %v1011_v4  ;;  %v82_v10 = vld [vmem:[%s2120_s0 + $0x208] sm:$0xff]  ;;  %v1020_v14 = vpack.c.bf16 %v152_v13, %v151_v12  ;;  %v153_v15 = vld [vmem:[%s2119_s1 + $0x40] sm:$0xff]  ;;  %v155_v18 = vld [vmem:[%s2119_s1 + $0x50] sm:$0xff] }
   0x5   :  { %1013 = vmatprep.subr.bf16.mxu0 %v1056_v0  ;;  %1038 = vmatprep.subr.bf16.mxu1 %v1056_v0  ;;  %v154_v16 = vld [vmem:[%s2119_s1 + $0x48] sm:$0xff]  ;;  %v156_v19 = vld [vmem:[%s2119_s1 + $0x58] sm:$0xff]  ;;  %v157_v21 = vld [vmem:[%s2119_s1 + $0x60] sm:$0xff] }
   0x6   :  { %946 = vmatprep.mubr.msk.f32.mxu0 %vm170_vm0, %v18_v9  ;;  %978 = vmatprep.mubr.msk.f32.mxu1 %vm170_vm0, %v82_v10  ;;  %v1023_v17 = vpack.c.bf16 %v154_v16, %v153_v15  ;;  %v1026_v20 = vpack.c.bf16 %v156_v19, %v155_v18  ;;  %v158_v22 = vld [vmem:[%s2119_s1 + $0x68] sm:$0xff]  ;;  %v159_v24 = vld [vmem:[%s2119_s1 + $0x70] sm:$0xff]  ;;  %v160_v25 = vld [vmem:[%s2119_s1 + $0x78] sm:$0xff] }
   0x7   :  { %v1029_v23 = vpack.c.bf16 %v158_v22, %v157_v21  ;;  %v1032_v26 = vpack.c.bf16 %v160_v25, %v159_v24  ;;  %v161_v27 = vld [vmem:[%s2119_s1 + $0x80] sm:$0xff]  ;;  %v162_v28 = vld [vmem:[%s2119_s1 + $0x88] sm:$0xff]  ;;  %v20_v32 = vld [vmem:[%s2120_s0 + $0x18] sm:$0xff] }
   0x8   :  { %1015 = vmatpush1.bf16.msra.mxu0 %v1014_v6  ;;  %1047 = vmatpush1.bf16.msra.mxu1 %v1014_v6  ;;  %v1035_v29 = vpack.c.bf16 %v162_v28, %v161_v27  ;;  %v17_v30 = vld [vmem:[%s2120_s0] sm:$0xff]  ;;  %v84_v33 = vld [vmem:[%s2120_s0 + $0x218] sm:$0xff]  ;;  %v19_v34 = vld [vmem:[%s2120_s0 + $0x10] sm:$0xff] }
   0x9   :  { %1016 = vmatprep.subr.bf16.mxu0 %v1056_v0  ;;  %1039 = vmatprep.subr.bf16.mxu1 %v1056_v0  ;;  %v81_v31 = vld [vmem:[%s2120_s0 + $0x200] sm:$0xff]  ;;  %v83_v35 = vld [vmem:[%s2120_s0 + $0x210] sm:$0xff]  ;;  %v22_v36 = vld [vmem:[%s2120_s0 + $0x28] sm:$0xff] }
   0xa   :  { %v86_v37 = vld [vmem:[%s2120_s0 + $0x228] sm:$0xff]  ;;  %v21_v38 = vld [vmem:[%s2120_s0 + $0x20] sm:$0xff]  ;;  %v24_v40 = vld [vmem:[%s2120_s0 + $0x38] sm:$0xff] }
   0xb   :  { %v85_v39 = vld [vmem:[%s2120_s0 + $0x220] sm:$0xff]  ;;  %v88_v41 = vld [vmem:[%s2120_s0 + $0x238] sm:$0xff]  ;;  %v23_v42 = vld [vmem:[%s2120_s0 + $0x30] sm:$0xff] }
   0xc   :  { %1018 = vmatpush1.bf16.msra.mxu0 %v1017_v11  ;;  %1048 = vmatpush1.bf16.msra.mxu1 %v1017_v11  ;;  %v87_v43 = vld [vmem:[%s2120_s0 + $0x230] sm:$0xff]  ;;  %v26_v44 = vld [vmem:[%s2120_s0 + $0x48] sm:$0xff]  ;;  %v25_v46 = vld [vmem:[%s2120_s0 + $0x40] sm:$0xff] }
   0xd   :  { %1019 = vmatprep.subr.bf16.mxu0 %v1056_v0  ;;  %1040 = vmatprep.subr.bf16.mxu1 %v1056_v0  ;;  %v90_v45 = vld [vmem:[%s2120_s0 + $0x248] sm:$0xff]  ;;  %v89_v47 = vld [vmem:[%s2120_s0 + $0x240] sm:$0xff]  ;;  %v28_v48 = vld [vmem:[%s2120_s0 + $0x58] sm:$0xff] }
   0xe   :  { %v92_v49 = vld [vmem:[%s2120_s0 + $0x258] sm:$0xff]  ;;  %v27_v50 = vld [vmem:[%s2120_s0 + $0x50] sm:$0xff]  ;;  %v30_v52 = vld [vmem:[%s2120_s0 + $0x68] sm:$0xff] }
   0xf   :  { %v91_v51 = vld [vmem:[%s2120_s0 + $0x250] sm:$0xff]  ;;  %v94_v53 = vld [vmem:[%s2120_s0 + $0x268] sm:$0xff]  ;;  %v29_v54 = vld [vmem:[%s2120_s0 + $0x60] sm:$0xff] }
  0x10   :  { %1021 = vmatpush1.bf16.msra.mxu0 %v1020_v14  ;;  %1049 = vmatpush1.bf16.msra.mxu1 %v1020_v14  ;;  %v93_v55 = vld [vmem:[%s2120_s0 + $0x260] sm:$0xff]  ;;  %v32_v56 = vld [vmem:[%s2120_s0 + $0x78] sm:$0xff]  ;;  %v31_v58 = vld [vmem:[%s2120_s0 + $0x70] sm:$0xff] }
  0x11   :  { %1022 = vmatprep.subr.bf16.mxu0 %v1056_v0  ;;  %1041 = vmatprep.subr.bf16.mxu1 %v1056_v0  ;;  %v96_v57 = vld [vmem:[%s2120_s0 + $0x278] sm:$0xff]  ;;  %v95_v59 = vld [vmem:[%s2120_s0 + $0x270] sm:$0xff]  ;;  %v34_v60 = vld [vmem:[%s2120_s0 + $0x88] sm:$0xff] }
  0x12   :  { %v98_v61 = vld [vmem:[%s2120_s0 + $0x288] sm:$0xff]  ;;  %v33_v62 = vld [vmem:[%s2120_s0 + $0x80] sm:$0xff]  ;;  %v100_v1 = vld [vmem:[%s2120_s0 + $0x298] sm:$0xff] }
  0x13   :  { %v97_v63 = vld [vmem:[%s2120_s0 + $0x280] sm:$0xff]  ;;  %v35_v2 = vld [vmem:[%s2120_s0 + $0x90] sm:$0xff]  ;;  %v38_v4 = vld [vmem:[%s2120_s0 + $0xa8] sm:$0xff] }
  0x14   :  { %1024 = vmatpush1.bf16.msra.mxu0 %v1023_v17  ;;  %1050 = vmatpush1.bf16.msra.mxu1 %v1023_v17  ;;  %v99_v3 = vld [vmem:[%s2120_s0 + $0x290] sm:$0xff]  ;;  %v102_v5 = vld [vmem:[%s2120_s0 + $0x2a8] sm:$0xff]  ;;  %v37_v6 = vld [vmem:[%s2120_s0 + $0xa0] sm:$0xff] }
  0x15   :  { %1025 = vmatprep.subr.bf16.mxu0 %v1056_v0  ;;  %1042 = vmatprep.subr.bf16.mxu1 %v1056_v0  ;;  %v101_v7 = vld [vmem:[%s2120_s0 + $0x2a0] sm:$0xff]  ;;  %v40_v8 = vld [vmem:[%s2120_s0 + $0xb8] sm:$0xff]  ;;  %v39_v10 = vld [vmem:[%s2120_s0 + $0xb0] sm:$0xff] }
  0x16   :  { %v104_v9 = vld [vmem:[%s2120_s0 + $0x2b8] sm:$0xff]  ;;  %v103_v11 = vld [vmem:[%s2120_s0 + $0x2b0] sm:$0xff]  ;;  %v42_v12 = vld [vmem:[%s2120_s0 + $0xc8] sm:$0xff] }
  0x17   :  { %v106_v13 = vld [vmem:[%s2120_s0 + $0x2c8] sm:$0xff]  ;;  %v41_v14 = vld [vmem:[%s2120_s0 + $0xc0] sm:$0xff]  ;;  %v44_v16 = vld [vmem:[%s2120_s0 + $0xd8] sm:$0xff] }
  0x18   :  { %1027 = vmatpush1.bf16.msra.mxu0 %v1026_v20  ;;  %1051 = vmatpush1.bf16.msra.mxu1 %v1026_v20  ;;  %v105_v15 = vld [vmem:[%s2120_s0 + $0x2c0] sm:$0xff]  ;;  %v108_v17 = vld [vmem:[%s2120_s0 + $0x2d8] sm:$0xff]  ;;  %v43_v18 = vld [vmem:[%s2120_s0 + $0xd0] sm:$0xff] }
  0x19   :  { %1028 = vmatprep.subr.bf16.mxu0 %v1056_v0  ;;  %1043 = vmatprep.subr.bf16.mxu1 %v1056_v0  ;;  %v107_v19 = vld [vmem:[%s2120_s0 + $0x2d0] sm:$0xff]  ;;  %v46_v20 = vld [vmem:[%s2120_s0 + $0xe8] sm:$0xff]  ;;  %v45_v22 = vld [vmem:[%s2120_s0 + $0xe0] sm:$0xff] }
  0x1a   :  { %v110_v21 = vld [vmem:[%s2120_s0 + $0x2e8] sm:$0xff]  ;;  %v48_v24 = vld [vmem:[%s2120_s0 + $0xf8] sm:$0xff]  ;;  %v111_v27 = vld [vmem:[%s2120_s0 + $0x2f0] sm:$0xff] }
  0x1b   :  { %v112_v25 = vld [vmem:[%s2120_s0 + $0x2f8] sm:$0xff]  ;;  %v50_v28 = vld [vmem:[%s2120_s0 + $0x108] sm:$0xff] }
  0x1c   :  { %1030 = vmatpush1.bf16.msra.mxu0 %v1029_v23  ;;  %1052 = vmatpush1.bf16.msra.mxu1 %v1029_v23  ;;  %v109_v23 = vld [vmem:[%s2120_s0 + $0x2e0] sm:$0xff] }
  0x1d   :  { %1031 = vmatprep.subr.bf16.mxu0 %v1056_v0  ;;  %1044 = vmatprep.subr.bf16.mxu1 %v1056_v0 }
  0x20   :  { %1033 = vmatpush1.bf16.msra.mxu0 %v1032_v26  ;;  %1053 = vmatpush1.bf16.msra.mxu1 %v1032_v26  ;;  %v47_v26 = vld [vmem:[%s2120_s0 + $0xf0] sm:$0xff] }
  0x21   :  { %1034 = vmatprep.subr.bf16.mxu0 %v1056_v0  ;;  %1045 = vmatprep.subr.bf16.mxu1 %v1056_v0  ;;  %v36_v0 = vld [vmem:[%s2120_s0 + $0x98] sm:$0xff] }
  0x24   :  { %1036 = vmatpush1.bf16.msra.mxu0 %v1035_v29  ;;  %1054 = vmatpush1.bf16.msra.mxu1 %v1035_v29  ;;  %v114_v29 = vld [vmem:[%s2120_s0 + $0x308] sm:$0xff] }
  0x27   :  { %428 = vmatmul.mubr.f32.vlgmr.msra.gmra.mrb[0].mxu0 %v17_v30  ;;  %588 = vmatmul.mubr.f32.vlgmr.msra.gmra.mrb[0].mxu1 %v81_v31  ;;  %v49_v30 = vld [vmem:[%s2120_s0 + $0x100] sm:$0xff] }
  0x28   :  { %947 = vmatprep.mubr.msk.f32.mxu0 %vm170_vm0, %v20_v32  ;;  %979 = vmatprep.mubr.msk.f32.mxu1 %vm170_vm0, %v84_v33  ;;  %v113_v31 = vld [vmem:[%s2120_s0 + $0x300] sm:$0xff]  ;;  %v52_v32 = vld [vmem:[%s2120_s0 + $0x118] sm:$0xff] }
  0x29   :  { %v116_v33 = vld [vmem:[%s2120_s0 + $0x318] sm:$0xff] }
  0x2b   :  { %433 = vmatmul.mubr.f32.gmra.mrb[2].mxu0 %v19_v34  ;;  %593 = vmatmul.mubr.f32.gmra.mrb[2].mxu1 %v83_v35  ;;  %v51_v34 = vld [vmem:[%s2120_s0 + $0x110] sm:$0xff] }
  0x2c   :  { %948 = vmatprep.mubr.msk.f32.mxu0 %vm170_vm0, %v22_v36  ;;  %980 = vmatprep.mubr.msk.f32.mxu1 %vm170_vm0, %v86_v37  ;;  %v115_v35 = vld [vmem:[%s2120_s0 + $0x310] sm:$0xff]  ;;  %v54_v36 = vld [vmem:[%s2120_s0 + $0x128] sm:$0xff] }
  0x2d   :  { %v118_v37 = vld [vmem:[%s2120_s0 + $0x328] sm:$0xff] }
  0x2f   :  { %438 = vmatmul.mubr.f32.gmra.mrb[4].mxu0 %v21_v38  ;;  %598 = vmatmul.mubr.f32.gmra.mrb[4].mxu1 %v85_v39  ;;  %v53_v38 = vld [vmem:[%s2120_s0 + $0x120] sm:$0xff] }
  0x30   :  { %949 = vmatprep.mubr.msk.f32.mxu0 %vm170_vm0, %v24_v40  ;;  %981 = vmatprep.mubr.msk.f32.mxu1 %vm170_vm0, %v88_v41  ;;  %v117_v39 = vld [vmem:[%s2120_s0 + $0x320] sm:$0xff]  ;;  %v56_v40 = vld [vmem:[%s2120_s0 + $0x138] sm:$0xff] }
  0x31   :  { %v120_v41 = vld [vmem:[%s2120_s0 + $0x338] sm:$0xff] }
  0x33   :  { %443 = vmatmul.mubr.f32.gmra.mrb[6].mxu0 %v23_v42  ;;  %603 = vmatmul.mubr.f32.gmra.mrb[6].mxu1 %v87_v43  ;;  %v55_v42 = vld [vmem:[%s2120_s0 + $0x130] sm:$0xff] }
  0x34   :  { %950 = vmatprep.mubr.msk.f32.mxu0 %vm170_vm0, %v26_v44  ;;  %982 = vmatprep.mubr.msk.f32.mxu1 %vm170_vm0, %v90_v45  ;;  %v119_v43 = vld [vmem:[%s2120_s0 + $0x330] sm:$0xff]  ;;  %v58_v44 = vld [vmem:[%s2120_s0 + $0x148] sm:$0xff] }
  0x35   :  { %v122_v45 = vld [vmem:[%s2120_s0 + $0x348] sm:$0xff] }
  0x37   :  { %448 = vmatmul.mubr.f32.gmra.mrb[8].mxu0 %v25_v46  ;;  %608 = vmatmul.mubr.f32.gmra.mrb[8].mxu1 %v89_v47  ;;  %v57_v46 = vld [vmem:[%s2120_s0 + $0x140] sm:$0xff] }
  0x38   :  { %951 = vmatprep.mubr.msk.f32.mxu0 %vm170_vm0, %v28_v48  ;;  %983 = vmatprep.mubr.msk.f32.mxu1 %vm170_vm0, %v92_v49  ;;  %v121_v47 = vld [vmem:[%s2120_s0 + $0x340] sm:$0xff]  ;;  %v60_v48 = vld [vmem:[%s2120_s0 + $0x158] sm:$0xff] }
  0x39   :  { %v124_v49 = vld [vmem:[%s2120_s0 + $0x358] sm:$0xff] }
  0x3b   :  { %453 = vmatmul.mubr.f32.gmra.mrb[10].mxu0 %v27_v50  ;;  %613 = vmatmul.mubr.f32.gmra.mrb[10].mxu1 %v91_v51  ;;  %v59_v50 = vld [vmem:[%s2120_s0 + $0x150] sm:$0xff] }
  0x3c   :  { %952 = vmatprep.mubr.msk.f32.mxu0 %vm170_vm0, %v30_v52  ;;  %984 = vmatprep.mubr.msk.f32.mxu1 %vm170_vm0, %v94_v53  ;;  %v123_v51 = vld [vmem:[%s2120_s0 + $0x350] sm:$0xff]  ;;  %v62_v52 = vld [vmem:[%s2120_s0 + $0x168] sm:$0xff] }
  0x3d   :  { %v126_v53 = vld [vmem:[%s2120_s0 + $0x368] sm:$0xff] }
  0x3f   :  { %458 = vmatmul.mubr.f32.gmra.mrb[12].mxu0 %v29_v54  ;;  %618 = vmatmul.mubr.f32.gmra.mrb[12].mxu1 %v93_v55  ;;  %v61_v54 = vld [vmem:[%s2120_s0 + $0x160] sm:$0xff] }
  0x40   :  { %953 = vmatprep.mubr.msk.f32.mxu0 %vm170_vm0, %v32_v56  ;;  %985 = vmatprep.mubr.msk.f32.mxu1 %vm170_vm0, %v96_v57  ;;  %v125_v55 = vld [vmem:[%s2120_s0 + $0x360] sm:$0xff]  ;;  %v64_v56 = vld [vmem:[%s2120_s0 + $0x178] sm:$0xff] }
  0x41   :  { %v128_v57 = vld [vmem:[%s2120_s0 + $0x378] sm:$0xff] }
  0x43   :  { %463 = vmatmul.mubr.f32.gmra.mrb[14].mxu0 %v31_v58  ;;  %623 = vmatmul.mubr.f32.gmra.mrb[14].mxu1 %v95_v59  ;;  %v63_v58 = vld [vmem:[%s2120_s0 + $0x170] sm:$0xff] }
  0x44   :  { %954 = vmatprep.mubr.msk.f32.mxu0 %vm170_vm0, %v34_v60  ;;  %986 = vmatprep.mubr.msk.f32.mxu1 %vm170_vm0, %v98_v61  ;;  %v127_v59 = vld [vmem:[%s2120_s0 + $0x370] sm:$0xff]  ;;  %v66_v60 = vld [vmem:[%s2120_s0 + $0x188] sm:$0xff] }
  0x45   :  { %v130_v61 = vld [vmem:[%s2120_s0 + $0x388] sm:$0xff] }
  0x47   :  { %468 = vmatmul.mubr.f32.gmra.mrb[16].mxu0 %v33_v62  ;;  %628 = vmatmul.mubr.f32.gmra.mrb[16].mxu1 %v97_v63  ;;  %v65_v62 = vld [vmem:[%s2120_s0 + $0x180] sm:$0xff] }
  0x48   :  { %955 = vmatprep.mubr.msk.f32.mxu0 %vm170_vm0, %v36_v0  ;;  %987 = vmatprep.mubr.msk.f32.mxu1 %vm170_vm0, %v100_v1  ;;  %v129_v63 = vld [vmem:[%s2120_s0 + $0x380] sm:$0xff]  ;;  %v68_v0 = vld [vmem:[%s2120_s0 + $0x198] sm:$0xff] }
  0x49   :  { %v132_v1 = vld [vmem:[%s2120_s0 + $0x398] sm:$0xff] }
  0x4b   :  { %473 = vmatmul.mubr.f32.gmra.mrb[18].mxu0 %v35_v2  ;;  %633 = vmatmul.mubr.f32.gmra.mrb[18].mxu1 %v99_v3  ;;  %v67_v2 = vld [vmem:[%s2120_s0 + $0x190] sm:$0xff] }
  0x4c   :  { %956 = vmatprep.mubr.msk.f32.mxu0 %vm170_vm0, %v38_v4  ;;  %988 = vmatprep.mubr.msk.f32.mxu1 %vm170_vm0, %v102_v5  ;;  %v131_v3 = vld [vmem:[%s2120_s0 + $0x390] sm:$0xff]  ;;  %v70_v4 = vld [vmem:[%s2120_s0 + $0x1a8] sm:$0xff] }
  0x4d   :  { %v134_v5 = vld [vmem:[%s2120_s0 + $0x3a8] sm:$0xff] }
  0x4f   :  { %478 = vmatmul.mubr.f32.gmra.mrb[20].mxu0 %v37_v6  ;;  %638 = vmatmul.mubr.f32.gmra.mrb[20].mxu1 %v101_v7  ;;  %v69_v6 = vld [vmem:[%s2120_s0 + $0x1a0] sm:$0xff] }
  0x50   :  { %957 = vmatprep.mubr.msk.f32.mxu0 %vm170_vm0, %v40_v8  ;;  %989 = vmatprep.mubr.msk.f32.mxu1 %vm170_vm0, %v104_v9  ;;  %v133_v7 = vld [vmem:[%s2120_s0 + $0x3a0] sm:$0xff]  ;;  %v72_v8 = vld [vmem:[%s2120_s0 + $0x1b8] sm:$0xff] }
  0x51   :  { %v136_v9 = vld [vmem:[%s2120_s0 + $0x3b8] sm:$0xff] }
  0x53   :  { %483 = vmatmul.mubr.f32.gmra.mrb[22].mxu0 %v39_v10  ;;  %643 = vmatmul.mubr.f32.gmra.mrb[22].mxu1 %v103_v11  ;;  %v71_v10 = vld [vmem:[%s2120_s0 + $0x1b0] sm:$0xff] }
  0x54   :  { %958 = vmatprep.mubr.msk.f32.mxu0 %vm170_vm0, %v42_v12  ;;  %990 = vmatprep.mubr.msk.f32.mxu1 %vm170_vm0, %v106_v13  ;;  %v135_v11 = vld [vmem:[%s2120_s0 + $0x3b0] sm:$0xff]  ;;  %v74_v12 = vld [vmem:[%s2120_s0 + $0x1c8] sm:$0xff] }
  0x55   :  { %v138_v13 = vld [vmem:[%s2120_s0 + $0x3c8] sm:$0xff] }
  0x57   :  { %488 = vmatmul.mubr.f32.gmra.mrb[24].mxu0 %v41_v14  ;;  %648 = vmatmul.mubr.f32.gmra.mrb[24].mxu1 %v105_v15  ;;  %v73_v14 = vld [vmem:[%s2120_s0 + $0x1c0] sm:$0xff] }
  0x58   :  { %959 = vmatprep.mubr.msk.f32.mxu0 %vm170_vm0, %v44_v16  ;;  %991 = vmatprep.mubr.msk.f32.mxu1 %vm170_vm0, %v108_v17  ;;  %v137_v15 = vld [vmem:[%s2120_s0 + $0x3c0] sm:$0xff]  ;;  %v76_v16 = vld [vmem:[%s2120_s0 + $0x1d8] sm:$0xff] }
  0x59   :  { %v140_v17 = vld [vmem:[%s2120_s0 + $0x3d8] sm:$0xff] }
  0x5b   :  { %493 = vmatmul.mubr.f32.gmra.mrb[26].mxu0 %v43_v18  ;;  %653 = vmatmul.mubr.f32.gmra.mrb[26].mxu1 %v107_v19  ;;  %v75_v18 = vld [vmem:[%s2120_s0 + $0x1d0] sm:$0xff] }
  0x5c   :  { %960 = vmatprep.mubr.msk.f32.mxu0 %vm170_vm0, %v46_v20  ;;  %992 = vmatprep.mubr.msk.f32.mxu1 %vm170_vm0, %v110_v21  ;;  %v139_v19 = vld [vmem:[%s2120_s0 + $0x3d0] sm:$0xff]  ;;  %v78_v20 = vld [vmem:[%s2120_s0 + $0x1e8] sm:$0xff] }
  0x5d   :  { %v142_v21 = vld [vmem:[%s2120_s0 + $0x3e8] sm:$0xff] }
  0x5f   :  { %498 = vmatmul.mubr.f32.gmra.mrb[28].mxu0 %v45_v22  ;;  %658 = vmatmul.mubr.f32.gmra.mrb[28].mxu1 %v109_v23  ;;  %v77_v22 = vld [vmem:[%s2120_s0 + $0x1e0] sm:$0xff] }
  0x60   :  { %961 = vmatprep.mubr.msk.f32.mxu0 %vm170_vm0, %v48_v24  ;;  %993 = vmatprep.mubr.msk.f32.mxu1 %vm170_vm0, %v112_v25  ;;  %v141_v23 = vld [vmem:[%s2120_s0 + $0x3e0] sm:$0xff]  ;;  %v80_v24 = vld [vmem:[%s2120_s0 + $0x1f8] sm:$0xff] }
  0x61   :  { %v144_v25 = vld [vmem:[%s2120_s0 + $0x3f8] sm:$0xff] }
  0x63   :  { %503 = vmatmul.mubr.f32.gmra.mrb[30].mxu0 %v47_v26  ;;  %663 = vmatmul.mubr.f32.gmra.mrb[30].mxu1 %v111_v27  ;;  %v79_v26 = vld [vmem:[%s2120_s0 + $0x1f0] sm:$0xff] }
  0x64   :  { %962 = vmatprep.mubr.msk.f32.mxu0 %vm170_vm0, %v50_v28  ;;  %994 = vmatprep.mubr.msk.f32.mxu1 %vm170_vm0, %v114_v29  ;;  %v143_v27 = vld [vmem:[%s2120_s0 + $0x3f0] sm:$0xff]  ;;  %v1605_v28 = vld [vmem:[%s2121_s2] ss:$0 sm:$0xff] }
  0x67   :  { %508 = vmatmul.mubr.f32.gmra.mrb[32].mxu0 %v49_v30  ;;  %668 = vmatmul.mubr.f32.gmra.mrb[32].mxu1 %v113_v31  ;;  %v748_v30 = vld [vmem:[%s2122_s3] sm:$0xff] }
  0x68   :  { %963 = vmatprep.mubr.msk.f32.mxu0 %vm170_vm0, %v52_v32  ;;  %995 = vmatprep.mubr.msk.f32.mxu1 %vm170_vm0, %v116_v33  ;;  %v780_v32 = vld [vmem:[%s2122_s3 + $0x100] sm:$0xff] }
  0x6b   :  { %513 = vmatmul.mubr.f32.gmra.mrb[34].mxu0 %v51_v34  ;;  %673 = vmatmul.mubr.f32.gmra.mrb[34].mxu1 %v115_v35 }
  0x6c   :  { %964 = vmatprep.mubr.msk.f32.mxu0 %vm170_vm0, %v54_v36  ;;  %996 = vmatprep.mubr.msk.f32.mxu1 %vm170_vm0, %v118_v37 }
  0x6f   :  { %518 = vmatmul.mubr.f32.gmra.mrb[36].mxu0 %v53_v38  ;;  %678 = vmatmul.mubr.f32.gmra.mrb[36].mxu1 %v117_v39 }
  0x70   :  { %965 = vmatprep.mubr.msk.f32.mxu0 %vm170_vm0, %v56_v40  ;;  %997 = vmatprep.mubr.msk.f32.mxu1 %vm170_vm0, %v120_v41  ;;  %v749_v40 = vld [vmem:[%s2122_s3 + $0x8] sm:$0xff] }
  0x73   :  { %523 = vmatmul.mubr.f32.gmra.mrb[38].mxu0 %v55_v42  ;;  %683 = vmatmul.mubr.f32.gmra.mrb[38].mxu1 %v119_v43  ;;  %v781_v42 = vld [vmem:[%s2122_s3 + $0x108] sm:$0xff] }
  0x74   :  { %966 = vmatprep.mubr.msk.f32.mxu0 %vm170_vm0, %v58_v44  ;;  %998 = vmatprep.mubr.msk.f32.mxu1 %vm170_vm0, %v122_v45 }
  0x77   :  { %528 = vmatmul.mubr.f32.gmra.mrb[40].mxu0 %v57_v46  ;;  %688 = vmatmul.mubr.f32.gmra.mrb[40].mxu1 %v121_v47 }
  0x78   :  { %967 = vmatprep.mubr.msk.f32.mxu0 %vm170_vm0, %v60_v48  ;;  %999 = vmatprep.mubr.msk.f32.mxu1 %vm170_vm0, %v124_v49 }
  0x7b   :  { %533 = vmatmul.mubr.f32.gmra.mrb[42].mxu0 %v59_v50  ;;  %693 = vmatmul.mubr.f32.gmra.mrb[42].mxu1 %v123_v51  ;;  %v750_v50 = vld [vmem:[%s2122_s3 + $0x10] sm:$0xff] }
  0x7c   :  { %968 = vmatprep.mubr.msk.f32.mxu0 %vm170_vm0, %v62_v52  ;;  %1000 = vmatprep.mubr.msk.f32.mxu1 %vm170_vm0, %v126_v53  ;;  %v782_v52 = vld [vmem:[%s2122_s3 + $0x110] sm:$0xff] }
  0x7f   :  { %538 = vmatmul.mubr.f32.gmra.mrb[44].mxu0 %v61_v54  ;;  %698 = vmatmul.mubr.f32.gmra.mrb[44].mxu1 %v125_v55 }
  0x80   :  { %969 = vmatprep.mubr.msk.f32.mxu0 %vm170_vm0, %v64_v56  ;;  %1001 = vmatprep.mubr.msk.f32.mxu1 %vm170_vm0, %v128_v57 }
  0x83   :  { %543 = vmatmul.mubr.f32.gmra.mrb[46].mxu0 %v63_v58  ;;  %703 = vmatmul.mubr.f32.gmra.mrb[46].mxu1 %v127_v59 }
  0x84   :  { %970 = vmatprep.mubr.msk.f32.mxu0 %vm170_vm0, %v66_v60  ;;  %1002 = vmatprep.mubr.msk.f32.mxu1 %vm170_vm0, %v130_v61  ;;  %v751_v60 = vld [vmem:[%s2122_s3 + $0x18] sm:$0xff] }
  0x87   :  { %548 = vmatmul.mubr.f32.gmra.mrb[48].mxu0 %v65_v62  ;;  %708 = vmatmul.mubr.f32.gmra.mrb[48].mxu1 %v129_v63  ;;  %v783_v62 = vld [vmem:[%s2122_s3 + $0x118] sm:$0xff] }
  0x88   :  { %971 = vmatprep.mubr.msk.f32.mxu0 %vm170_vm0, %v68_v0  ;;  %1003 = vmatprep.mubr.msk.f32.mxu1 %vm170_vm0, %v132_v1 }
  0x8b   :  { %553 = vmatmul.mubr.f32.gmra.mrb[50].mxu0 %v67_v2  ;;  %713 = vmatmul.mubr.f32.gmra.mrb[50].mxu1 %v131_v3 }
  0x8c   :  { %972 = vmatprep.mubr.msk.f32.mxu0 %vm170_vm0, %v70_v4  ;;  %1004 = vmatprep.mubr.msk.f32.mxu1 %vm170_vm0, %v134_v5 }
  0x8f   :  { %558 = vmatmul.mubr.f32.gmra.mrb[52].mxu0 %v69_v6  ;;  %718 = vmatmul.mubr.f32.gmra.mrb[52].mxu1 %v133_v7  ;;  %v752_v6 = vld [vmem:[%s2122_s3 + $0x20] sm:$0xff] }
  0x90   :  { %973 = vmatprep.mubr.msk.f32.mxu0 %vm170_vm0, %v72_v8  ;;  %1005 = vmatprep.mubr.msk.f32.mxu1 %vm170_vm0, %v136_v9  ;;  %v784_v8 = vld [vmem:[%s2122_s3 + $0x120] sm:$0xff] }
  0x93   :  { %563 = vmatmul.mubr.f32.gmra.mrb[54].mxu0 %v71_v10  ;;  %723 = vmatmul.mubr.f32.gmra.mrb[54].mxu1 %v135_v11 }
  0x94   :  { %974 = vmatprep.mubr.msk.f32.mxu0 %vm170_vm0, %v74_v12  ;;  %1006 = vmatprep.mubr.msk.f32.mxu1 %vm170_vm0, %v138_v13 }
  0x97   :  { %568 = vmatmul.mubr.f32.gmra.mrb[56].mxu0 %v73_v14  ;;  %728 = vmatmul.mubr.f32.gmra.mrb[56].mxu1 %v137_v15 }
  0x98   :  { %975 = vmatprep.mubr.msk.f32.mxu0 %vm170_vm0, %v76_v16  ;;  %1007 = vmatprep.mubr.msk.f32.mxu1 %vm170_vm0, %v140_v17  ;;  %v753_v16 = vld [vmem:[%s2122_s3 + $0x28] sm:$0xff] }
  0x9b   :  { %573 = vmatmul.mubr.f32.gmra.mrb[58].mxu0 %v75_v18  ;;  %733 = vmatmul.mubr.f32.gmra.mrb[58].mxu1 %v139_v19  ;;  %v785_v18 = vld [vmem:[%s2122_s3 + $0x128] sm:$0xff] }
  0x9c   :  { %976 = vmatprep.mubr.msk.f32.mxu0 %vm170_vm0, %v78_v20  ;;  %1008 = vmatprep.mubr.msk.f32.mxu1 %vm170_vm0, %v142_v21 }
  0x9f   :  { %578 = vmatmul.mubr.f32.gmra.mrb[60].mxu0 %v77_v22  ;;  %738 = vmatmul.mubr.f32.gmra.mrb[60].mxu1 %v141_v23 }
  0xa0   :  { %977 = vmatprep.mubr.msk.f32.mxu0 %vm170_vm0, %v80_v24  ;;  %1009 = vmatprep.mubr.msk.f32.mxu1 %vm170_vm0, %v144_v25 }
  0xa3   :  { %583 = vmatmul.mubr.f32.gmra.mrb[62].mxu0 %v79_v26  ;;  %743 = vmatmul.mubr.f32.gmra.mrb[62].mxu1 %v143_v27  ;;  %v754_v26 = vld [vmem:[%s2122_s3 + $0x30] sm:$0xff] }
  0xfa   :  { %v429_v29 = vpop.f32.mrb[0].mxu0  ;;  %v589_v31 = vpop.f32.mrb[0].mxu1 }
  0xfb   :  { %v430_v33 = vadd.f32 %v1605_v28, %v429_v29  ;;  %v590_v34 = vadd.f32 %v1605_v28, %v589_v31  ;;  %v431_v35 = vpop.f32.mrb[1].mxu0  ;;  %v591_v36 = vpop.f32.mrb[1].mxu1  ;;  %v786_v29 = vld [vmem:[%s2122_s3 + $0x130] sm:$0xff] }
  0xfd   :  { %v812_v37 = vadd.f32 %v748_v30, %v430_v33  ;;  %v844_v38 = vadd.f32 %v780_v32, %v590_v34 }
  0xfe   :  { %v434_v39 = vpop.f32.mrb[2].mxu0  ;;  %v594_v41 = vpop.f32.mrb[2].mxu1 }
  0xff   :  { %877 = vst.msk [vmem:[%s2123_s4] sm:$0xff] %vm876_vm1, %v812_v37  ;;  %909 = vst.msk [vmem:[%s2123_s4 + $0x100] sm:$0xff] %vm876_vm1, %v844_v38  ;;  %v435_v43 = vadd.f32 %v1605_v28, %v434_v39  ;;  %v595_v44 = vadd.f32 %v1605_v28, %v594_v41  ;;  %v436_v45 = vpop.f32.mrb[3].mxu0  ;;  %v596_v46 = vpop.f32.mrb[3].mxu1  ;;  %v755_v37 = vld [vmem:[%s2122_s3 + $0x38] sm:$0xff] }
 0x100   :  { %v787_v39 = vld [vmem:[%s2122_s3 + $0x138] sm:$0xff] }
 0x101   :  { %v813_v47 = vadd.f32 %v749_v40, %v435_v43  ;;  %v845_v48 = vadd.f32 %v781_v42, %v595_v44 }
 0x102   :  { %v439_v49 = vpop.f32.mrb[4].mxu0  ;;  %v599_v51 = vpop.f32.mrb[4].mxu1 }
 0x103   :  { %878 = vst.msk [vmem:[%s2123_s4 + $0x8] sm:$0xff] %vm876_vm1, %v813_v47  ;;  %910 = vst.msk [vmem:[%s2123_s4 + $0x108] sm:$0xff] %vm876_vm1, %v845_v48  ;;  %v440_v53 = vadd.f32 %v1605_v28, %v439_v49  ;;  %v600_v54 = vadd.f32 %v1605_v28, %v599_v51  ;;  %v441_v55 = vpop.f32.mrb[5].mxu0  ;;  %v601_v56 = vpop.f32.mrb[5].mxu1  ;;  %v756_v47 = vld [vmem:[%s2122_s3 + $0x40] sm:$0xff] }
 0x104   :  { %v788_v49 = vld [vmem:[%s2122_s3 + $0x140] sm:$0xff] }
 0x105   :  { %v814_v57 = vadd.f32 %v750_v50, %v440_v53  ;;  %v846_v58 = vadd.f32 %v782_v52, %v600_v54 }
 0x106   :  { %v444_v59 = vpop.f32.mrb[6].mxu0  ;;  %v604_v61 = vpop.f32.mrb[6].mxu1 }
 0x107   :  { %879 = vst.msk [vmem:[%s2123_s4 + $0x10] sm:$0xff] %vm876_vm1, %v814_v57  ;;  %911 = vst.msk [vmem:[%s2123_s4 + $0x110] sm:$0xff] %vm876_vm1, %v846_v58  ;;  %v445_v63 = vadd.f32 %v1605_v28, %v444_v59  ;;  %v605_v0 = vadd.f32 %v1605_v28, %v604_v61  ;;  %v446_v1 = vpop.f32.mrb[7].mxu0  ;;  %v606_v2 = vpop.f32.mrb[7].mxu1  ;;  %v757_v57 = vld [vmem:[%s2122_s3 + $0x48] sm:$0xff] }
 0x108   :  { %v789_v59 = vld [vmem:[%s2122_s3 + $0x148] sm:$0xff] }
 0x109   :  { %v815_v3 = vadd.f32 %v751_v60, %v445_v63  ;;  %v847_v4 = vadd.f32 %v783_v62, %v605_v0 }
 0x10a   :  { %v449_v5 = vpop.f32.mrb[8].mxu0  ;;  %v609_v7 = vpop.f32.mrb[8].mxu1 }
 0x10b   :  { %880 = vst.msk [vmem:[%s2123_s4 + $0x18] sm:$0xff] %vm876_vm1, %v815_v3  ;;  %912 = vst.msk [vmem:[%s2123_s4 + $0x118] sm:$0xff] %vm876_vm1, %v847_v4  ;;  %v450_v9 = vadd.f32 %v1605_v28, %v449_v5  ;;  %v610_v10 = vadd.f32 %v1605_v28, %v609_v7  ;;  %v451_v11 = vpop.f32.mrb[9].mxu0  ;;  %v611_v12 = vpop.f32.mrb[9].mxu1  ;;  %v758_v3 = vld [vmem:[%s2122_s3 + $0x50] sm:$0xff] }
 0x10c   :  { %v790_v5 = vld [vmem:[%s2122_s3 + $0x150] sm:$0xff] }
 0x10d   :  { %v816_v13 = vadd.f32 %v752_v6, %v450_v9  ;;  %v848_v14 = vadd.f32 %v784_v8, %v610_v10 }
 0x10e   :  { %v454_v15 = vpop.f32.mrb[10].mxu0  ;;  %v614_v17 = vpop.f32.mrb[10].mxu1 }
 0x10f   :  { %881 = vst.msk [vmem:[%s2123_s4 + $0x20] sm:$0xff] %vm876_vm1, %v816_v13  ;;  %913 = vst.msk [vmem:[%s2123_s4 + $0x120] sm:$0xff] %vm876_vm1, %v848_v14  ;;  %v455_v19 = vadd.f32 %v1605_v28, %v454_v15  ;;  %v615_v20 = vadd.f32 %v1605_v28, %v614_v17  ;;  %v456_v21 = vpop.f32.mrb[11].mxu0  ;;  %v616_v22 = vpop.f32.mrb[11].mxu1  ;;  %v759_v13 = vld [vmem:[%s2122_s3 + $0x58] sm:$0xff] }
 0x110   :  { %v791_v15 = vld [vmem:[%s2122_s3 + $0x158] sm:$0xff] }
 0x111   :  { %v817_v23 = vadd.f32 %v753_v16, %v455_v19  ;;  %v849_v24 = vadd.f32 %v785_v18, %v615_v20 }
 0x112   :  { %v459_v25 = vpop.f32.mrb[12].mxu0  ;;  %v619_v27 = vpop.f32.mrb[12].mxu1 }
 0x113   :  { %882 = vst.msk [vmem:[%s2123_s4 + $0x28] sm:$0xff] %vm876_vm1, %v817_v23  ;;  %914 = vst.msk [vmem:[%s2123_s4 + $0x128] sm:$0xff] %vm876_vm1, %v849_v24  ;;  %v460_v30 = vadd.f32 %v1605_v28, %v459_v25  ;;  %v620_v31 = vadd.f32 %v1605_v28, %v619_v27  ;;  %v461_v32 = vpop.f32.mrb[13].mxu0  ;;  %v621_v33 = vpop.f32.mrb[13].mxu1  ;;  %v760_v23 = vld [vmem:[%s2122_s3 + $0x60] sm:$0xff] }
 0x114   :  { %v792_v25 = vld [vmem:[%s2122_s3 + $0x160] sm:$0xff] }
 0x115   :  { %v818_v34 = vadd.f32 %v754_v26, %v460_v30  ;;  %v850_v35 = vadd.f32 %v786_v29, %v620_v31 }
 0x116   :  { %v464_v36 = vpop.f32.mrb[14].mxu0  ;;  %v624_v38 = vpop.f32.mrb[14].mxu1 }
 0x117   :  { %883 = vst.msk [vmem:[%s2123_s4 + $0x30] sm:$0xff] %vm876_vm1, %v818_v34  ;;  %915 = vst.msk [vmem:[%s2123_s4 + $0x130] sm:$0xff] %vm876_vm1, %v850_v35  ;;  %v465_v40 = vadd.f32 %v1605_v28, %v464_v36  ;;  %v625_v41 = vadd.f32 %v1605_v28, %v624_v38  ;;  %v466_v42 = vpop.f32.mrb[15].mxu0  ;;  %v626_v43 = vpop.f32.mrb[15].mxu1  ;;  %v761_v34 = vld [vmem:[%s2122_s3 + $0x68] sm:$0xff] }
 0x118   :  { %v793_v36 = vld [vmem:[%s2122_s3 + $0x168] sm:$0xff] }
 0x119   :  { %v819_v44 = vadd.f32 %v755_v37, %v465_v40  ;;  %v851_v45 = vadd.f32 %v787_v39, %v625_v41 }
 0x11a   :  { %v469_v46 = vpop.f32.mrb[16].mxu0  ;;  %v629_v48 = vpop.f32.mrb[16].mxu1 }
 0x11b   :  { %884 = vst.msk [vmem:[%s2123_s4 + $0x38] sm:$0xff] %vm876_vm1, %v819_v44  ;;  %916 = vst.msk [vmem:[%s2123_s4 + $0x138] sm:$0xff] %vm876_vm1, %v851_v45  ;;  %v470_v50 = vadd.f32 %v1605_v28, %v469_v46  ;;  %v630_v51 = vadd.f32 %v1605_v28, %v629_v48  ;;  %v471_v52 = vpop.f32.mrb[17].mxu0  ;;  %v631_v53 = vpop.f32.mrb[17].mxu1  ;;  %v762_v44 = vld [vmem:[%s2122_s3 + $0x70] sm:$0xff] }
 0x11c   :  { %v794_v46 = vld [vmem:[%s2122_s3 + $0x170] sm:$0xff] }
 0x11d   :  { %v820_v54 = vadd.f32 %v756_v47, %v470_v50  ;;  %v852_v55 = vadd.f32 %v788_v49, %v630_v51 }
 0x11e   :  { %v474_v56 = vpop.f32.mrb[18].mxu0  ;;  %v634_v58 = vpop.f32.mrb[18].mxu1 }
 0x11f   :  { %885 = vst.msk [vmem:[%s2123_s4 + $0x40] sm:$0xff] %vm876_vm1, %v820_v54  ;;  %917 = vst.msk [vmem:[%s2123_s4 + $0x140] sm:$0xff] %vm876_vm1, %v852_v55  ;;  %v475_v60 = vadd.f32 %v1605_v28, %v474_v56  ;;  %v635_v61 = vadd.f32 %v1605_v28, %v634_v58  ;;  %v476_v62 = vpop.f32.mrb[19].mxu0  ;;  %v636_v63 = vpop.f32.mrb[19].mxu1  ;;  %v763_v54 = vld [vmem:[%s2122_s3 + $0x78] sm:$0xff] }
 0x120   :  { %v795_v56 = vld [vmem:[%s2122_s3 + $0x178] sm:$0xff] }
 0x121   :  { %v821_v0 = vadd.f32 %v757_v57, %v475_v60  ;;  %v853_v1 = vadd.f32 %v789_v59, %v635_v61 }
 0x122   :  { %v479_v2 = vpop.f32.mrb[20].mxu0  ;;  %v639_v4 = vpop.f32.mrb[20].mxu1 }
 0x123   :  { %886 = vst.msk [vmem:[%s2123_s4 + $0x48] sm:$0xff] %vm876_vm1, %v821_v0  ;;  %918 = vst.msk [vmem:[%s2123_s4 + $0x148] sm:$0xff] %vm876_vm1, %v853_v1  ;;  %v480_v6 = vadd.f32 %v1605_v28, %v479_v2  ;;  %v640_v7 = vadd.f32 %v1605_v28, %v639_v4  ;;  %v481_v8 = vpop.f32.mrb[21].mxu0  ;;  %v641_v9 = vpop.f32.mrb[21].mxu1  ;;  %v764_v0 = vld [vmem:[%s2122_s3 + $0x80] sm:$0xff] }
 0x124   :  { %v796_v2 = vld [vmem:[%s2122_s3 + $0x180] sm:$0xff] }
 0x125   :  { %v822_v10 = vadd.f32 %v758_v3, %v480_v6  ;;  %v854_v11 = vadd.f32 %v790_v5, %v640_v7 }
 0x126   :  { %v484_v12 = vpop.f32.mrb[22].mxu0  ;;  %v644_v14 = vpop.f32.mrb[22].mxu1 }
 0x127   :  { %887 = vst.msk [vmem:[%s2123_s4 + $0x50] sm:$0xff] %vm876_vm1, %v822_v10  ;;  %919 = vst.msk [vmem:[%s2123_s4 + $0x150] sm:$0xff] %vm876_vm1, %v854_v11  ;;  %v485_v16 = vadd.f32 %v1605_v28, %v484_v12  ;;  %v645_v17 = vadd.f32 %v1605_v28, %v644_v14  ;;  %v486_v18 = vpop.f32.mrb[23].mxu0  ;;  %v646_v19 = vpop.f32.mrb[23].mxu1  ;;  %v765_v10 = vld [vmem:[%s2122_s3 + $0x88] sm:$0xff] }
 0x128   :  { %v797_v12 = vld [vmem:[%s2122_s3 + $0x188] sm:$0xff] }
 0x129   :  { %v823_v20 = vadd.f32 %v759_v13, %v485_v16  ;;  %v855_v21 = vadd.f32 %v791_v15, %v645_v17 }
 0x12a   :  { %v489_v22 = vpop.f32.mrb[24].mxu0  ;;  %v649_v24 = vpop.f32.mrb[24].mxu1 }
 0x12b   :  { %888 = vst.msk [vmem:[%s2123_s4 + $0x58] sm:$0xff] %vm876_vm1, %v823_v20  ;;  %920 = vst.msk [vmem:[%s2123_s4 + $0x158] sm:$0xff] %vm876_vm1, %v855_v21  ;;  %v490_v26 = vadd.f32 %v1605_v28, %v489_v22  ;;  %v650_v27 = vadd.f32 %v1605_v28, %v649_v24  ;;  %v491_v29 = vpop.f32.mrb[25].mxu0  ;;  %v651_v30 = vpop.f32.mrb[25].mxu1  ;;  %v766_v20 = vld [vmem:[%s2122_s3 + $0x90] sm:$0xff] }
 0x12c   :  { %v798_v22 = vld [vmem:[%s2122_s3 + $0x190] sm:$0xff] }
 0x12d   :  { %v824_v31 = vadd.f32 %v760_v23, %v490_v26  ;;  %v856_v32 = vadd.f32 %v792_v25, %v650_v27 }
 0x12e   :  { %v494_v33 = vpop.f32.mrb[26].mxu0  ;;  %v654_v35 = vpop.f32.mrb[26].mxu1 }
 0x12f   :  { %889 = vst.msk [vmem:[%s2123_s4 + $0x60] sm:$0xff] %vm876_vm1, %v824_v31  ;;  %921 = vst.msk [vmem:[%s2123_s4 + $0x160] sm:$0xff] %vm876_vm1, %v856_v32  ;;  %v495_v37 = vadd.f32 %v1605_v28, %v494_v33  ;;  %v655_v38 = vadd.f32 %v1605_v28, %v654_v35  ;;  %v496_v39 = vpop.f32.mrb[27].mxu0  ;;  %v656_v40 = vpop.f32.mrb[27].mxu1  ;;  %v767_v31 = vld [vmem:[%s2122_s3 + $0x98] sm:$0xff] }
 0x130   :  { %v799_v33 = vld [vmem:[%s2122_s3 + $0x198] sm:$0xff] }
 0x131   :  { %v825_v41 = vadd.f32 %v761_v34, %v495_v37  ;;  %v857_v42 = vadd.f32 %v793_v36, %v655_v38 }
 0x132   :  { %v499_v43 = vpop.f32.mrb[28].mxu0  ;;  %v659_v45 = vpop.f32.mrb[28].mxu1 }
 0x133   :  { %890 = vst.msk [vmem:[%s2123_s4 + $0x68] sm:$0xff] %vm876_vm1, %v825_v41  ;;  %922 = vst.msk [vmem:[%s2123_s4 + $0x168] sm:$0xff] %vm876_vm1, %v857_v42  ;;  %v500_v47 = vadd.f32 %v1605_v28, %v499_v43  ;;  %v660_v48 = vadd.f32 %v1605_v28, %v659_v45  ;;  %v501_v49 = vpop.f32.mrb[29].mxu0  ;;  %v661_v50 = vpop.f32.mrb[29].mxu1  ;;  %v768_v41 = vld [vmem:[%s2122_s3 + $0xa0] sm:$0xff] }
 0x134   :  { %v800_v43 = vld [vmem:[%s2122_s3 + $0x1a0] sm:$0xff] }
 0x135   :  { %v826_v51 = vadd.f32 %v762_v44, %v500_v47  ;;  %v858_v52 = vadd.f32 %v794_v46, %v660_v48 }
 0x136   :  { %v504_v53 = vpop.f32.mrb[30].mxu0  ;;  %v664_v55 = vpop.f32.mrb[30].mxu1 }
 0x137   :  { %891 = vst.msk [vmem:[%s2123_s4 + $0x70] sm:$0xff] %vm876_vm1, %v826_v51  ;;  %923 = vst.msk [vmem:[%s2123_s4 + $0x170] sm:$0xff] %vm876_vm1, %v858_v52  ;;  %v505_v57 = vadd.f32 %v1605_v28, %v504_v53  ;;  %v665_v58 = vadd.f32 %v1605_v28, %v664_v55  ;;  %v506_v59 = vpop.f32.mrb[31].mxu0  ;;  %v666_v60 = vpop.f32.mrb[31].mxu1  ;;  %v769_v51 = vld [vmem:[%s2122_s3 + $0xa8] sm:$0xff] }
 0x138   :  { %v801_v53 = vld [vmem:[%s2122_s3 + $0x1a8] sm:$0xff] }
 0x139   :  { %v827_v61 = vadd.f32 %v763_v54, %v505_v57  ;;  %v859_v62 = vadd.f32 %v795_v56, %v665_v58 }
 0x13a   :  { %v509_v63 = vpop.f32.mrb[32].mxu0  ;;  %v669_v1 = vpop.f32.mrb[32].mxu1 }
 0x13b   :  { %892 = vst.msk [vmem:[%s2123_s4 + $0x78] sm:$0xff] %vm876_vm1, %v827_v61  ;;  %924 = vst.msk [vmem:[%s2123_s4 + $0x178] sm:$0xff] %vm876_vm1, %v859_v62  ;;  %v510_v3 = vadd.f32 %v1605_v28, %v509_v63  ;;  %v670_v4 = vadd.f32 %v1605_v28, %v669_v1  ;;  %v511_v5 = vpop.f32.mrb[33].mxu0  ;;  %v671_v6 = vpop.f32.mrb[33].mxu1  ;;  %v770_v61 = vld [vmem:[%s2122_s3 + $0xb0] sm:$0xff] }
 0x13c   :  { %v802_v63 = vld [vmem:[%s2122_s3 + $0x1b0] sm:$0xff] }
 0x13d   :  { %v828_v7 = vadd.f32 %v764_v0, %v510_v3  ;;  %v860_v8 = vadd.f32 %v796_v2, %v670_v4 }
 0x13e   :  { %v514_v9 = vpop.f32.mrb[34].mxu0  ;;  %v674_v11 = vpop.f32.mrb[34].mxu1 }
 0x13f   :  { %893 = vst.msk [vmem:[%s2123_s4 + $0x80] sm:$0xff] %vm876_vm1, %v828_v7  ;;  %925 = vst.msk [vmem:[%s2123_s4 + $0x180] sm:$0xff] %vm876_vm1, %v860_v8  ;;  %v515_v13 = vadd.f32 %v1605_v28, %v514_v9  ;;  %v675_v14 = vadd.f32 %v1605_v28, %v674_v11  ;;  %v516_v15 = vpop.f32.mrb[35].mxu0  ;;  %v676_v16 = vpop.f32.mrb[35].mxu1  ;;  %v771_v7 = vld [vmem:[%s2122_s3 + $0xb8] sm:$0xff] }
 0x140   :  { %v803_v9 = vld [vmem:[%s2122_s3 + $0x1b8] sm:$0xff] }
 0x141   :  { %v829_v17 = vadd.f32 %v765_v10, %v515_v13  ;;  %v861_v18 = vadd.f32 %v797_v12, %v675_v14 }
 0x142   :  { %v519_v19 = vpop.f32.mrb[36].mxu0  ;;  %v679_v21 = vpop.f32.mrb[36].mxu1 }
 0x143   :  { %894 = vst.msk [vmem:[%s2123_s4 + $0x88] sm:$0xff] %vm876_vm1, %v829_v17  ;;  %926 = vst.msk [vmem:[%s2123_s4 + $0x188] sm:$0xff] %vm876_vm1, %v861_v18  ;;  %v520_v23 = vadd.f32 %v1605_v28, %v519_v19  ;;  %v680_v24 = vadd.f32 %v1605_v28, %v679_v21  ;;  %v521_v25 = vpop.f32.mrb[37].mxu0  ;;  %v681_v26 = vpop.f32.mrb[37].mxu1  ;;  %v772_v17 = vld [vmem:[%s2122_s3 + $0xc0] sm:$0xff] }
 0x144   :  { %v804_v19 = vld [vmem:[%s2122_s3 + $0x1c0] sm:$0xff] }
 0x145   :  { %v830_v27 = vadd.f32 %v766_v20, %v520_v23  ;;  %v862_v29 = vadd.f32 %v798_v22, %v680_v24 }
 0x146   :  { %v524_v30 = vpop.f32.mrb[38].mxu0  ;;  %v684_v32 = vpop.f32.mrb[38].mxu1 }
 0x147   :  { %895 = vst.msk [vmem:[%s2123_s4 + $0x90] sm:$0xff] %vm876_vm1, %v830_v27  ;;  %927 = vst.msk [vmem:[%s2123_s4 + $0x190] sm:$0xff] %vm876_vm1, %v862_v29  ;;  %v525_v34 = vadd.f32 %v1605_v28, %v524_v30  ;;  %v685_v35 = vadd.f32 %v1605_v28, %v684_v32  ;;  %v526_v36 = vpop.f32.mrb[39].mxu0  ;;  %v686_v37 = vpop.f32.mrb[39].mxu1  ;;  %v773_v27 = vld [vmem:[%s2122_s3 + $0xc8] sm:$0xff] }
 0x148   :  { %v805_v30 = vld [vmem:[%s2122_s3 + $0x1c8] sm:$0xff] }
 0x149   :  { %v831_v38 = vadd.f32 %v767_v31, %v525_v34  ;;  %v863_v39 = vadd.f32 %v799_v33, %v685_v35 }
 0x14a   :  { %v529_v40 = vpop.f32.mrb[40].mxu0  ;;  %v689_v42 = vpop.f32.mrb[40].mxu1 }
 0x14b   :  { %896 = vst.msk [vmem:[%s2123_s4 + $0x98] sm:$0xff] %vm876_vm1, %v831_v38  ;;  %928 = vst.msk [vmem:[%s2123_s4 + $0x198] sm:$0xff] %vm876_vm1, %v863_v39  ;;  %v530_v44 = vadd.f32 %v1605_v28, %v529_v40  ;;  %v690_v45 = vadd.f32 %v1605_v28, %v689_v42  ;;  %v531_v46 = vpop.f32.mrb[41].mxu0  ;;  %v691_v47 = vpop.f32.mrb[41].mxu1  ;;  %v774_v38 = vld [vmem:[%s2122_s3 + $0xd0] sm:$0xff] }
 0x14c   :  { %v806_v40 = vld [vmem:[%s2122_s3 + $0x1d0] sm:$0xff] }
 0x14d   :  { %v832_v48 = vadd.f32 %v768_v41, %v530_v44  ;;  %v864_v49 = vadd.f32 %v800_v43, %v690_v45 }
 0x14e   :  { %v534_v50 = vpop.f32.mrb[42].mxu0  ;;  %v694_v52 = vpop.f32.mrb[42].mxu1 }
 0x14f   :  { %897 = vst.msk [vmem:[%s2123_s4 + $0xa0] sm:$0xff] %vm876_vm1, %v832_v48  ;;  %929 = vst.msk [vmem:[%s2123_s4 + $0x1a0] sm:$0xff] %vm876_vm1, %v864_v49  ;;  %v535_v54 = vadd.f32 %v1605_v28, %v534_v50  ;;  %v695_v55 = vadd.f32 %v1605_v28, %v694_v52  ;;  %v536_v56 = vpop.f32.mrb[43].mxu0  ;;  %v696_v57 = vpop.f32.mrb[43].mxu1  ;;  %v775_v48 = vld [vmem:[%s2122_s3 + $0xd8] sm:$0xff] }
 0x150   :  { %v807_v50 = vld [vmem:[%s2122_s3 + $0x1d8] sm:$0xff] }
 0x151   :  { %v833_v58 = vadd.f32 %v769_v51, %v535_v54  ;;  %v865_v59 = vadd.f32 %v801_v53, %v695_v55 }
 0x152   :  { %v539_v60 = vpop.f32.mrb[44].mxu0  ;;  %v699_v62 = vpop.f32.mrb[44].mxu1 }
 0x153   :  { %898 = vst.msk [vmem:[%s2123_s4 + $0xa8] sm:$0xff] %vm876_vm1, %v833_v58  ;;  %930 = vst.msk [vmem:[%s2123_s4 + $0x1a8] sm:$0xff] %vm876_vm1, %v865_v59  ;;  %v540_v0 = vadd.f32 %v1605_v28, %v539_v60  ;;  %v700_v1 = vadd.f32 %v1605_v28, %v699_v62  ;;  %v541_v2 = vpop.f32.mrb[45].mxu0  ;;  %v701_v3 = vpop.f32.mrb[45].mxu1  ;;  %v776_v58 = vld [vmem:[%s2122_s3 + $0xe0] sm:$0xff] }
 0x154   :  { %v808_v60 = vld [vmem:[%s2122_s3 + $0x1e0] sm:$0xff] }
 0x155   :  { %v834_v4 = vadd.f32 %v770_v61, %v540_v0  ;;  %v866_v5 = vadd.f32 %v802_v63, %v700_v1 }
 0x156   :  { %v544_v6 = vpop.f32.mrb[46].mxu0  ;;  %v704_v8 = vpop.f32.mrb[46].mxu1 }
 0x157   :  { %899 = vst.msk [vmem:[%s2123_s4 + $0xb0] sm:$0xff] %vm876_vm1, %v834_v4  ;;  %931 = vst.msk [vmem:[%s2123_s4 + $0x1b0] sm:$0xff] %vm876_vm1, %v866_v5  ;;  %v545_v10 = vadd.f32 %v1605_v28, %v544_v6  ;;  %v705_v11 = vadd.f32 %v1605_v28, %v704_v8  ;;  %v546_v12 = vpop.f32.mrb[47].mxu0  ;;  %v706_v13 = vpop.f32.mrb[47].mxu1  ;;  %v777_v4 = vld [vmem:[%s2122_s3 + $0xe8] sm:$0xff] }
 0x158   :  { %v809_v6 = vld [vmem:[%s2122_s3 + $0x1e8] sm:$0xff] }
 0x159   :  { %v835_v14 = vadd.f32 %v771_v7, %v545_v10  ;;  %v867_v15 = vadd.f32 %v803_v9, %v705_v11 }
 0x15a   :  { %v549_v16 = vpop.f32.mrb[48].mxu0  ;;  %v709_v18 = vpop.f32.mrb[48].mxu1 }
 0x15b   :  { %900 = vst.msk [vmem:[%s2123_s4 + $0xb8] sm:$0xff] %vm876_vm1, %v835_v14  ;;  %932 = vst.msk [vmem:[%s2123_s4 + $0x1b8] sm:$0xff] %vm876_vm1, %v867_v15  ;;  %v550_v20 = vadd.f32 %v1605_v28, %v549_v16  ;;  %v710_v21 = vadd.f32 %v1605_v28, %v709_v18  ;;  %v551_v22 = vpop.f32.mrb[49].mxu0  ;;  %v711_v23 = vpop.f32.mrb[49].mxu1  ;;  %v778_v14 = vld [vmem:[%s2122_s3 + $0xf0] sm:$0xff] }
 0x15c   :  { %v810_v16 = vld [vmem:[%s2122_s3 + $0x1f0] sm:$0xff] }
 0x15d   :  { %v836_v24 = vadd.f32 %v772_v17, %v550_v20  ;;  %v868_v25 = vadd.f32 %v804_v19, %v710_v21 }
 0x15e   :  { %v554_v26 = vpop.f32.mrb[50].mxu0  ;;  %v714_v29 = vpop.f32.mrb[50].mxu1 }
 0x15f   :  { %901 = vst.msk [vmem:[%s2123_s4 + $0xc0] sm:$0xff] %vm876_vm1, %v836_v24  ;;  %933 = vst.msk [vmem:[%s2123_s4 + $0x1c0] sm:$0xff] %vm876_vm1, %v868_v25  ;;  %v555_v31 = vadd.f32 %v1605_v28, %v554_v26  ;;  %v715_v32 = vadd.f32 %v1605_v28, %v714_v29  ;;  %v556_v33 = vpop.f32.mrb[51].mxu0  ;;  %v716_v34 = vpop.f32.mrb[51].mxu1  ;;  %v779_v24 = vld [vmem:[%s2122_s3 + $0xf8] sm:$0xff] }
 0x160   :  { %v811_v26 = vld [vmem:[%s2122_s3 + $0x1f8] sm:$0xff] }
 0x161   :  { %v837_v35 = vadd.f32 %v773_v27, %v555_v31  ;;  %v869_v36 = vadd.f32 %v805_v30, %v715_v32 }
 0x162   :  { %v559_v37 = vpop.f32.mrb[52].mxu0  ;;  %v719_v39 = vpop.f32.mrb[52].mxu1 }
 0x163   :  { %902 = vst.msk [vmem:[%s2123_s4 + $0xc8] sm:$0xff] %vm876_vm1, %v837_v35  ;;  %934 = vst.msk [vmem:[%s2123_s4 + $0x1c8] sm:$0xff] %vm876_vm1, %v869_v36  ;;  %v560_v41 = vadd.f32 %v1605_v28, %v559_v37  ;;  %v720_v42 = vadd.f32 %v1605_v28, %v719_v39  ;;  %v561_v43 = vpop.f32.mrb[53].mxu0  ;;  %v721_v44 = vpop.f32.mrb[53].mxu1 }
 0x165   :  { %v838_v45 = vadd.f32 %v774_v38, %v560_v41  ;;  %v870_v46 = vadd.f32 %v806_v40, %v720_v42 }
 0x166   :  { %v564_v47 = vpop.f32.mrb[54].mxu0  ;;  %v724_v49 = vpop.f32.mrb[54].mxu1 }
 0x167   :  { %903 = vst.msk [vmem:[%s2123_s4 + $0xd0] sm:$0xff] %vm876_vm1, %v838_v45  ;;  %935 = vst.msk [vmem:[%s2123_s4 + $0x1d0] sm:$0xff] %vm876_vm1, %v870_v46  ;;  %v565_v51 = vadd.f32 %v1605_v28, %v564_v47  ;;  %v725_v52 = vadd.f32 %v1605_v28, %v724_v49  ;;  %v566_v53 = vpop.f32.mrb[55].mxu0  ;;  %v726_v54 = vpop.f32.mrb[55].mxu1 }
 0x169   :  { %v839_v55 = vadd.f32 %v775_v48, %v565_v51  ;;  %v871_v56 = vadd.f32 %v807_v50, %v725_v52 }
 0x16a   :  { %v569_v57 = vpop.f32.mrb[56].mxu0  ;;  %v729_v59 = vpop.f32.mrb[56].mxu1 }
 0x16b   :  { %904 = vst.msk [vmem:[%s2123_s4 + $0xd8] sm:$0xff] %vm876_vm1, %v839_v55  ;;  %936 = vst.msk [vmem:[%s2123_s4 + $0x1d8] sm:$0xff] %vm876_vm1, %v871_v56  ;;  %v570_v61 = vadd.f32 %v1605_v28, %v569_v57  ;;  %v730_v62 = vadd.f32 %v1605_v28, %v729_v59  ;;  %v571_v63 = vpop.f32.mrb[57].mxu0  ;;  %v731_v0 = vpop.f32.mrb[57].mxu1 }
 0x16d   :  { %v840_v1 = vadd.f32 %v776_v58, %v570_v61  ;;  %v872_v2 = vadd.f32 %v808_v60, %v730_v62 }
 0x16e   :  { %v574_v3 = vpop.f32.mrb[58].mxu0  ;;  %v734_v5 = vpop.f32.mrb[58].mxu1 }
 0x16f   :  { %905 = vst.msk [vmem:[%s2123_s4 + $0xe0] sm:$0xff] %vm876_vm1, %v840_v1  ;;  %937 = vst.msk [vmem:[%s2123_s4 + $0x1e0] sm:$0xff] %vm876_vm1, %v872_v2  ;;  %v575_v7 = vadd.f32 %v1605_v28, %v574_v3  ;;  %v735_v8 = vadd.f32 %v1605_v28, %v734_v5  ;;  %v576_v9 = vpop.f32.mrb[59].mxu0  ;;  %v736_v10 = vpop.f32.mrb[59].mxu1 }
 0x171   :  { %v841_v11 = vadd.f32 %v777_v4, %v575_v7  ;;  %v873_v12 = vadd.f32 %v809_v6, %v735_v8 }
 0x172   :  { %v579_v13 = vpop.f32.mrb[60].mxu0  ;;  %v739_v15 = vpop.f32.mrb[60].mxu1 }
 0x173   :  { %906 = vst.msk [vmem:[%s2123_s4 + $0xe8] sm:$0xff] %vm876_vm1, %v841_v11  ;;  %938 = vst.msk [vmem:[%s2123_s4 + $0x1e8] sm:$0xff] %vm876_vm1, %v873_v12  ;;  %v580_v17 = vadd.f32 %v1605_v28, %v579_v13  ;;  %v740_v18 = vadd.f32 %v1605_v28, %v739_v15  ;;  %v581_v19 = vpop.f32.mrb[61].mxu0  ;;  %v741_v20 = vpop.f32.mrb[61].mxu1 }
 0x175   :  { %v842_v21 = vadd.f32 %v778_v14, %v580_v17  ;;  %v874_v22 = vadd.f32 %v810_v16, %v740_v18 }
 0x176   :  { %v584_v23 = vpop.f32.mrb[62].mxu0  ;;  %v744_v25 = vpop.f32.mrb[62].mxu1 }
 0x177   :  { %907 = vst.msk [vmem:[%s2123_s4 + $0xf0] sm:$0xff] %vm876_vm1, %v842_v21  ;;  %939 = vst.msk [vmem:[%s2123_s4 + $0x1f0] sm:$0xff] %vm876_vm1, %v874_v22  ;;  %v585_v27 = vadd.f32 %v1605_v28, %v584_v23  ;;  %v745_v29 = vadd.f32 %v1605_v28, %v744_v25  ;;  %v586_v30 = vpop.f32.mrb[63].mxu0  ;;  %v746_v31 = vpop.f32.mrb[63].mxu1 }
 0x179   :  { %v843_v32 = vadd.f32 %v779_v24, %v585_v27  ;;  %v875_v33 = vadd.f32 %v811_v26, %v745_v29 }
 0x17b   :  { %908 = vst.msk [vmem:[%s2123_s4 + $0xf8] sm:$0xff] %vm876_vm1, %v843_v32  ;;  %940 = vst.msk [vmem:[%s2123_s4 + $0x1f8] sm:$0xff] %vm876_vm1, %v875_v33 }

</bundles_post_ra>
